<compile_context>
chip_gen: v5e
topology: v5e:2x2
jax: 0.10.0
libtpu: 0.0.40
codegen_flags: <defaults>
</compile_context>

<pallas_src>
import functools

import jax
import jax.numpy as jnp
from jax.experimental import pallas as pl
from jax.experimental.pallas import tpu as pltpu

C1, C2, HIDDEN, NCLASS = 64, 128, 512, 3


def _fused_forward_kernel(p1_ref, w1_ref, b1_ref, w2_ref, b2_ref,
                          w3_ref, b3_ref, w4_ref, b4_ref,
                          o_ref,
                          x2p_ref, ps1_ref, ps2_ref, h2s_ref,
                          *, N, H, W):
    H1, W1 = H // 2, W // 2
    H2, W2 = H1 // 2, W1 // 2
    n1 = N * H1 * W1          # rows after the first 2x2 pool (batch folded)
    n2 = N * H2 * W2          # rows after the second 2x2 pool

    # ---------------- conv1: single im2col matmul + bias ------------------
    # p1: (N*H*W, 27), w1: (27, C1)  ->  acc1: (N*H*W, C1), rows ordered (n,h,w)
    acc1 = jnp.dot(p1_ref[...], w1_ref[...],
                   preferred_element_type=jnp.float32) + b1_ref[...]

    # 2x2 max-pool + relu (relu commutes with max). Vertical pairs in-register,
    # horizontal pairs via a VMEM scratch + stride-2 sublane reads (layout-safe).
    a = acc1.reshape(N * H1, 2 * W, C1)
    v = jnp.maximum(a[:, :W, :], a[:, W:, :])                          # (N*H1, W, C1)
    ps1_ref[...] = v.reshape(N * H1 * W, C1)
    h1 = jnp.maximum(jnp.maximum(ps1_ref[pl.ds(0, n1, 2), :],
                                 ps1_ref[pl.ds(1, n1, 2), :]), 0.0)    # (n1, C1)

    # ---------------- conv2: zero-padded NHWC input assembled in VMEM -----
    x2p_ref[...] = jnp.zeros_like(x2p_ref)
    x2p_ref[:, 1:1 + H1, 1:1 + W1, :] = h1.reshape(N, H1, W1, C1)

    # TODO(synk): nn.Dropout2d on the conv2 output is identity in inference mode.
    acc2 = jnp.zeros((n1, C2), jnp.float32)
    for k in range(9):                                                 # 9 taps, K = C1
        dy, dx = divmod(k, 3)
        tap = x2p_ref[:, dy:dy + H1, dx:dx + W1, :].reshape(n1, C1)
        acc2 = acc2 + jnp.dot(tap.astype(jnp.bfloat16), w2_ref[k],
                              preferred_element_type=jnp.float32)
    acc2 = acc2 + b2_ref[...]

    a2 = acc2.reshape(N * H2, 2 * W1, C2)
    v2 = jnp.maximum(a2[:, :W1, :], a2[:, W1:, :])                     # (N*H2, W1, C2)
    ps2_ref[...] = v2.reshape(N * H2 * W1, C2)
    h2 = jnp.maximum(jnp.maximum(ps2_ref[pl.ds(0, n2, 2), :],
                                 ps2_ref[pl.ds(1, n2, 2), :]), 0.0)    # (n2, C2)
    h2s_ref[...] = h2.reshape(N, H2 * W2, C2)

    # ---------------- flatten (NHWC order; fc1_w rows pre-permuted) -------
    # 128-lane-aligned concat -> lane-dense (N, H2*W2*C2) activation.
    flat = jnp.concatenate([h2s_ref[:, p, :] for p in range(H2 * W2)], axis=1)

    # ---------------- MLP head: fc1 -> relu -> fc2 -> softmax -------------
    hfc = jnp.dot(flat.astype(jnp.bfloat16), w3_ref[...],
                  preferred_element_type=jnp.float32) + b3_ref[...]
    hfc = jnp.maximum(hfc, 0.0)
    # TODO(synk): F.dropout(x, training=self.training) is identity in inference mode.
    logits = jnp.dot(hfc, w4_ref[...],
                     preferred_element_type=jnp.float32) + b4_ref[...]
    m = jnp.max(logits, axis=1, keepdims=True)
    e = jnp.exp(logits - m)
    o_ref[...] = e / jnp.sum(e, axis=1, keepdims=True)                 # softmax(dim=1)


def _im2col_3x3(x_nhwc):
    """(N, H, W, Cin) -> (N*H*W, 9*Cin) patches for a 3x3, pad=1 convolution."""
    N, H, W, Cin = x_nhwc.shape
    xp = jnp.pad(x_nhwc, ((0, 0), (1, 1), (1, 1), (0, 0)))
    cols = [xp[:, dy:dy + H, dx:dx + W, :].reshape(N * H * W, Cin)
            for dy in range(3) for dx in range(3)]
    return jnp.concatenate(cols, axis=1)


@jax.jit
def image_classifier_forward(x_nchw, params):
    N, _, H, W = x_nchw.shape
    H1, W1 = H // 2, W // 2
    H2, W2 = H1 // 2, W1 // 2
    x = jnp.transpose(x_nchw, (0, 2, 3, 1))          # NCHW -> NHWC (channels on lanes)
    p1 = _im2col_3x3(x)                              # (N*H*W, 27)
    kernel = functools.partial(_fused_forward_kernel, N=N, H=H, W=W)
    return pl.pallas_call(
        kernel,
        out_shape=jax.ShapeDtypeStruct((N, NCLASS), jnp.float32),
        scratch_shapes=[
            pltpu.VMEM((N, H1 + 2, W1 + 2, C1), jnp.float32),  # padded conv2 input
            pltpu.VMEM((N * H1 * W, C1), jnp.float32),         # conv1 pool scratch
            pltpu.VMEM((N * H2 * W1, C2), jnp.float32),        # conv2 pool scratch
            pltpu.VMEM((N, H2 * W2, C2), jnp.float32),         # pooled conv2 output
        ],
        compiler_params=pltpu.CompilerParams(vmem_limit_bytes=32 * 1024 * 1024),
    )(p1,
      params["conv1_w"], params["conv1_b"],
      params["conv2_w"], params["conv2_b"],
      params["fc1_w"], params["fc1_b"],
      params["fc2_w"], params["fc2_b"])


def init_params(key, size):
    """Random parameters following the PyTorch module's shape conventions."""
    H2, W2 = size[0] // 4, size[1] // 4
    feat = C2 * H2 * W2
    ks = jax.random.split(key, 8)

    def nrm(k, shape, scale):
        return jax.random.normal(k, shape, jnp.float32) * scale

    return {
        "conv1_w": nrm(ks[0], (9, 3, C1), 0.10),     # 3x3 taps (dy-major), Cin, Cout
        "conv1_b": nrm(ks[1], (C1,), 0.10),
        "conv2_w": nrm(ks[2], (9, C1, C2), 0.05),
        "conv2_b": nrm(ks[3], (C2,), 0.05),
        "fc1_w": nrm(ks[4], (feat, HIDDEN), 0.02),   # rows in torch NCHW-flatten order
        "fc1_b": nrm(ks[5], (HIDDEN,), 0.02),
        "fc2_w": nrm(ks[6], (HIDDEN, NCLASS), 0.05),
        "fc2_b": nrm(ks[7], (NCLASS,), 0.05),
    }


def prepare_params(params, size):
    """One-time packing: flatten conv1 weights for im2col, permute fc1 rows from
    NCHW-flatten to NHWC-flatten order, cast the streamed weights to bf16."""
    H2, W2 = size[0] // 4, size[1] // 4
    P = H2 * W2
    hw = jnp.arange(P)
    c = jnp.arange(C2)
    # NHWC flat index j = (h*W2 + w)*C2 + c  <->  NCHW flat index c*P + (h*W2 + w)
    nchw_rows = (c[None, :] * P + hw[:, None]).reshape(-1)
    return {
        "conv1_w": params["conv1_w"].reshape(9 * 3, C1),                # (27, 64) f32
        "conv1_b": params["conv1_b"].reshape(1, C1),
        "conv2_w": params["conv2_w"].astype(jnp.bfloat16),              # (9, 64, 128)
        "conv2_b": params["conv2_b"].reshape(1, C2),
        "fc1_w": params["fc1_w"][nchw_rows, :].astype(jnp.bfloat16),    # (feat, 512)
        "fc1_b": params["fc1_b"].reshape(1, HIDDEN),
        "fc2_w": params["fc2_w"],                                       # (512, 3) f32
        "fc2_b": params["fc2_b"].reshape(1, NCLASS),
    }


if __name__ == "__main__":
    key = jax.random.PRNGKey(0)
    pkey, xkey = jax.random.split(key)
    size = (16, 16)                                  # fc1 input = 128 * 4 * 4 = 2048
    params = prepare_params(init_params(pkey, size), size)
    x = jax.random.normal(xkey, (2, 3, size[0], size[1]), jnp.float32)

    out = jax.block_until_ready(image_classifier_forward(x, params))

    assert out.shape == (2, NCLASS)
    assert bool(jnp.all(jnp.isfinite(out)))
    assert bool(jnp.allclose(jnp.sum(out, axis=1), 1.0, atol=1e-5))
    print("KERNEL_OK")
</pallas_src>

<mosaic_0001>
module attributes {stable_mosaic.version = 11 : i64} {
  func.func @_fused_forward_kernel(%arg0: memref<512x27xf32, #tpu.memory_space<vmem>>, %arg1: memref<27x64xf32, #tpu.memory_space<vmem>>, %arg2: memref<1x64xf32, #tpu.memory_space<vmem>>, %arg3: memref<9x64x128xbf16, #tpu.memory_space<vmem>>, %arg4: memref<1x128xf32, #tpu.memory_space<vmem>>, %arg5: memref<2048x512xbf16, #tpu.memory_space<vmem>>, %arg6: memref<1x512xf32, #tpu.memory_space<vmem>>, %arg7: memref<512x3xf32, #tpu.memory_space<vmem>>, %arg8: memref<1x3xf32, #tpu.memory_space<vmem>>, %arg9: memref<2x3xf32, #tpu.memory_space<vmem>>, %arg10: memref<2x10x10x64xf32, #tpu.memory_space<vmem>>, %arg11: memref<256x64xf32, #tpu.memory_space<vmem>>, %arg12: memref<64x128xf32, #tpu.memory_space<vmem>>, %arg13: memref<2x16x128xf32, #tpu.memory_space<vmem>>) attributes {dimension_semantics = [], scalar_prefetch = 0 : i64, scratch_operands = 4 : i64, tpu.core_type = #tpu.core_type<tc>} {
    %c0 = arith.constant 0 : index
    %c0_0 = arith.constant 0 : index
    %0 = vector.load %arg0[%c0, %c0_0] : memref<512x27xf32, #tpu.memory_space<vmem>>, vector<512x27xf32>
    %c0_1 = arith.constant 0 : index
    %c0_2 = arith.constant 0 : index
    %1 = vector.load %arg1[%c0_1, %c0_2] : memref<27x64xf32, #tpu.memory_space<vmem>>, vector<27x64xf32>
    %cst = arith.constant dense<0.000000e+00> : vector<512x64xf32>
    %2 = tpu.matmul %0, %1, %cst {dimension_numbers = #tpu.dot_dimension_numbers<[1], [0], [0], [1], [0, 0, 1, 1], [], []>} : vector<512x27xf32>, vector<27x64xf32>, vector<512x64xf32> -> vector<512x64xf32>
    %c0_3 = arith.constant 0 : index
    %c0_4 = arith.constant 0 : index
    %3 = vector.load %arg2[%c0_3, %c0_4] : memref<1x64xf32, #tpu.memory_space<vmem>>, vector<1x64xf32>
    %4 = vector.broadcast %3 : vector<1x64xf32> to vector<512x64xf32>
    %5 = arith.addf %2, %4 : vector<512x64xf32>
    %6 = vector.shape_cast %5 : vector<512x64xf32> to vector<16x32x64xf32>
    %7 = vector.extract_strided_slice %6 {offsets = [0, 0, 0], sizes = [16, 16, 64], strides = [1, 1, 1]} : vector<16x32x64xf32> to vector<16x16x64xf32>
    %8 = vector.extract_strided_slice %6 {offsets = [0, 16, 0], sizes = [16, 16, 64], strides = [1, 1, 1]} : vector<16x32x64xf32> to vector<16x16x64xf32>
    %9 = arith.maximumf %7, %8 : vector<16x16x64xf32>
    %10 = vector.shape_cast %9 : vector<16x16x64xf32> to vector<256x64xf32>
    %c0_5 = arith.constant 0 : index
    %c0_6 = arith.constant 0 : index
    %11 = vector.load %arg11[%c0_5, %c0_6] : memref<256x64xf32, #tpu.memory_space<vmem>>, vector<256x64xf32>
    tpu.vector_store %arg11[%c0_5, %c0_6], %10 {strides = array<i32>} : memref<256x64xf32, #tpu.memory_space<vmem>>, vector<256x64xf32>,
    %c0_7 = arith.constant 0 : index
    %c0_8 = arith.constant 0 : index
    %12 = tpu.strided_load %arg11[%c0_7, %c0_8] {strides = array<i32: 2, 1>} : memref<256x64xf32, #tpu.memory_space<vmem>>, vector<128x64xf32>
    %c1 = arith.constant 1 : index
    %c0_9 = arith.constant 0 : index
    %13 = tpu.strided_load %arg11[%c1, %c0_9] {strides = array<i32: 2, 1>} : memref<256x64xf32, #tpu.memory_space<vmem>>, vector<128x64xf32>
    %14 = arith.maximumf %12, %13 : vector<128x64xf32>
    %cst_10 = arith.constant 0.000000e+00 : f32
    %15 = vector.broadcast %cst_10 : f32 to vector<128x64xf32>
    %16 = arith.maximumf %14, %15 : vector<128x64xf32>
    %cst_11 = arith.constant 0.000000e+00 : f32
    %17 = vector.broadcast %cst_11 : f32 to vector<2x10x10x64xf32>
    %c0_12 = arith.constant 0 : index
    %c0_13 = arith.constant 0 : index
    %c0_14 = arith.constant 0 : index
    %c0_15 = arith.constant 0 : index
    %18 = vector.load %arg10[%c0_12, %c0_13, %c0_14, %c0_15] : memref<2x10x10x64xf32, #tpu.memory_space<vmem>>, vector<2x10x10x64xf32>
    tpu.vector_store %arg10[%c0_12, %c0_13, %c0_14, %c0_15], %17 {strides = array<i32>} : memref<2x10x10x64xf32, #tpu.memory_space<vmem>>, vector<2x10x10x64xf32>,
    %19 = vector.shape_cast %16 : vector<128x64xf32> to vector<2x8x8x64xf32>
    %c0_16 = arith.constant 0 : index
    %c1_17 = arith.constant 1 : index
    %c1_18 = arith.constant 1 : index
    %c0_19 = arith.constant 0 : index
    %20 = vector.load %arg10[%c0_16, %c1_17, %c1_18, %c0_19] : memref<2x10x10x64xf32, #tpu.memory_space<vmem>>, vector<2x8x8x64xf32>
    tpu.vector_store %arg10[%c0_16, %c1_17, %c1_18, %c0_19], %19 {strides = array<i32>} : memref<2x10x10x64xf32, #tpu.memory_space<vmem>>, vector<2x8x8x64xf32>,
    %cst_20 = arith.constant 0.000000e+00 : f32
    %21 = vector.broadcast %cst_20 : f32 to vector<128x128xf32>
    %c0_21 = arith.constant 0 : index
    %c0_22 = arith.constant 0 : index
    %c0_23 = arith.constant 0 : index
    %c0_24 = arith.constant 0 : index
    %22 = vector.load %arg10[%c0_21, %c0_22, %c0_23, %c0_24] : memref<2x10x10x64xf32, #tpu.memory_space<vmem>>, vector<2x8x8x64xf32>
    %23 = vector.shape_cast %22 : vector<2x8x8x64xf32> to vector<128x64xf32>
    %24 = arith.truncf %23 : vector<128x64xf32> to vector<128x64xbf16>
    %c0_25 = arith.constant 0 : index
    %c0_26 = arith.constant 0 : index
    %c0_27 = arith.constant 0 : index
    %25 = vector.load %arg3[%c0_25, %c0_26, %c0_27] : memref<9x64x128xbf16, #tpu.memory_space<vmem>>, vector<1x64x128xbf16>
    %26 = vector.shape_cast %25 : vector<1x64x128xbf16> to vector<64x128xbf16>
    %cst_28 = arith.constant dense<0.000000e+00> : vector<128x128xf32>
    %27 = tpu.matmul %24, %26, %cst_28 {dimension_numbers = #tpu.dot_dimension_numbers<[1], [0], [0], [1], [0, 0, 1, 1], [], []>} : vector<128x64xbf16>, vector<64x128xbf16>, vector<128x128xf32> -> vector<128x128xf32>
    %28 = arith.addf %21, %27 : vector<128x128xf32>
    %c0_29 = arith.constant 0 : index
    %c0_30 = arith.constant 0 : index
    %c1_31 = arith.constant 1 : index
    %c0_32 = arith.constant 0 : index
    %29 = vector.load %arg10[%c0_29, %c0_30, %c1_31, %c0_32] : memref<2x10x10x64xf32, #tpu.memory_space<vmem>>, vector<2x8x8x64xf32>
    %30 = vector.shape_cast %29 : vector<2x8x8x64xf32> to vector<128x64xf32>
    %31 = arith.truncf %30 : vector<128x64xf32> to vector<128x64xbf16>
    %c1_33 = arith.constant 1 : index
    %c0_34 = arith.constant 0 : index
    %c0_35 = arith.constant 0 : index
    %32 = vector.load %arg3[%c1_33, %c0_34, %c0_35] : memref<9x64x128xbf16, #tpu.memory_space<vmem>>, vector<1x64x128xbf16>
    %33 = vector.shape_cast %32 : vector<1x64x128xbf16> to vector<64x128xbf16>
    %cst_36 = arith.constant dense<0.000000e+00> : vector<128x128xf32>
    %34 = tpu.matmul %31, %33, %cst_36 {dimension_numbers = #tpu.dot_dimension_numbers<[1], [0], [0], [1], [0, 0, 1, 1], [], []>} : vector<128x64xbf16>, vector<64x128xbf16>, vector<128x128xf32> -> vector<128x128xf32>
    %35 = arith.addf %28, %34 : vector<128x128xf32>
    %c0_37 = arith.constant 0 : index
    %c0_38 = arith.constant 0 : index
    %c2 = arith.constant 2 : index
    %c0_39 = arith.constant 0 : index
    %36 = vector.load %arg10[%c0_37, %c0_38, %c2, %c0_39] : memref<2x10x10x64xf32, #tpu.memory_space<vmem>>, vector<2x8x8x64xf32>
    %37 = vector.shape_cast %36 : vector<2x8x8x64xf32> to vector<128x64xf32>
    %38 = arith.truncf %37 : vector<128x64xf32> to vector<128x64xbf16>
    %c2_40 = arith.constant 2 : index
    %c0_41 = arith.constant 0 : index
    %c0_42 = arith.constant 0 : index
    %39 = vector.load %arg3[%c2_40, %c0_41, %c0_42] : memref<9x64x128xbf16, #tpu.memory_space<vmem>>, vector<1x64x128xbf16>
    %40 = vector.shape_cast %39 : vector<1x64x128xbf16> to vector<64x128xbf16>
    %cst_43 = arith.constant dense<0.000000e+00> : vector<128x128xf32>
    %41 = tpu.matmul %38, %40, %cst_43 {dimension_numbers = #tpu.dot_dimension_numbers<[1], [0], [0], [1], [0, 0, 1, 1], [], []>} : vector<128x64xbf16>, vector<64x128xbf16>, vector<128x128xf32> -> vector<128x128xf32>
    %42 = arith.addf %35, %41 : vector<128x128xf32>
    %c0_44 = arith.constant 0 : index
    %c1_45 = arith.constant 1 : index
    %c0_46 = arith.constant 0 : index
    %c0_47 = arith.constant 0 : index
    %43 = vector.load %arg10[%c0_44, %c1_45, %c0_46, %c0_47] : memref<2x10x10x64xf32, #tpu.memory_space<vmem>>, vector<2x8x8x64xf32>
    %44 = vector.shape_cast %43 : vector<2x8x8x64xf32> to vector<128x64xf32>
    %45 = arith.truncf %44 : vector<128x64xf32> to vector<128x64xbf16>
    %c3 = arith.constant 3 : index
    %c0_48 = arith.constant 0 : index
    %c0_49 = arith.constant 0 : index
    %46 = vector.load %arg3[%c3, %c0_48, %c0_49] : memref<9x64x128xbf16, #tpu.memory_space<vmem>>, vector<1x64x128xbf16>
    %47 = vector.shape_cast %46 : vector<1x64x128xbf16> to vector<64x128xbf16>
    %cst_50 = arith.constant dense<0.000000e+00> : vector<128x128xf32>
    %48 = tpu.matmul %45, %47, %cst_50 {dimension_numbers = #tpu.dot_dimension_numbers<[1], [0], [0], [1], [0, 0, 1, 1], [], []>} : vector<128x64xbf16>, vector<64x128xbf16>, vector<128x128xf32> -> vector<128x128xf32>
    %49 = arith.addf %42, %48 : vector<128x128xf32>
    %c0_51 = arith.constant 0 : index
    %c1_52 = arith.constant 1 : index
    %c1_53 = arith.constant 1 : index
    %c0_54 = arith.constant 0 : index
    %50 = vector.load %arg10[%c0_51, %c1_52, %c1_53, %c0_54] : memref<2x10x10x64xf32, #tpu.memory_space<vmem>>, vector<2x8x8x64xf32>
    %51 = vector.shape_cast %50 : vector<2x8x8x64xf32> to vector<128x64xf32>
    %52 = arith.truncf %51 : vector<128x64xf32> to vector<128x64xbf16>
    %c4 = arith.constant 4 : index
    %c0_55 = arith.constant 0 : index
    %c0_56 = arith.constant 0 : index
    %53 = vector.load %arg3[%c4, %c0_55, %c0_56] : memref<9x64x128xbf16, #tpu.memory_space<vmem>>, vector<1x64x128xbf16>
    %54 = vector.shape_cast %53 : vector<1x64x128xbf16> to vector<64x128xbf16>
    %cst_57 = arith.constant dense<0.000000e+00> : vector<128x128xf32>
    %55 = tpu.matmul %52, %54, %cst_57 {dimension_numbers = #tpu.dot_dimension_numbers<[1], [0], [0], [1], [0, 0, 1, 1], [], []>} : vector<128x64xbf16>, vector<64x128xbf16>, vector<128x128xf32> -> vector<128x128xf32>
    %56 = arith.addf %49, %55 : vector<128x128xf32>
    %c0_58 = arith.constant 0 : index
    %c1_59 = arith.constant 1 : index
    %c2_60 = arith.constant 2 : index
    %c0_61 = arith.constant 0 : index
    %57 = vector.load %arg10[%c0_58, %c1_59, %c2_60, %c0_61] : memref<2x10x10x64xf32, #tpu.memory_space<vmem>>, vector<2x8x8x64xf32>
    %58 = vector.shape_cast %57 : vector<2x8x8x64xf32> to vector<128x64xf32>
    %59 = arith.truncf %58 : vector<128x64xf32> to vector<128x64xbf16>
    %c5 = arith.constant 5 : index
    %c0_62 = arith.constant 0 : index
    %c0_63 = arith.constant 0 : index
    %60 = vector.load %arg3[%c5, %c0_62, %c0_63] : memref<9x64x128xbf16, #tpu.memory_space<vmem>>, vector<1x64x128xbf16>
    %61 = vector.shape_cast %60 : vector<1x64x128xbf16> to vector<64x128xbf16>
    %cst_64 = arith.constant dense<0.000000e+00> : vector<128x128xf32>
    %62 = tpu.matmul %59, %61, %cst_64 {dimension_numbers = #tpu.dot_dimension_numbers<[1], [0], [0], [1], [0, 0, 1, 1], [], []>} : vector<128x64xbf16>, vector<64x128xbf16>, vector<128x128xf32> -> vector<128x128xf32>
    %63 = arith.addf %56, %62 : vector<128x128xf32>
    %c0_65 = arith.constant 0 : index
    %c2_66 = arith.constant 2 : index
    %c0_67 = arith.constant 0 : index
    %c0_68 = arith.constant 0 : index
    %64 = vector.load %arg10[%c0_65, %c2_66, %c0_67, %c0_68] : memref<2x10x10x64xf32, #tpu.memory_space<vmem>>, vector<2x8x8x64xf32>
    %65 = vector.shape_cast %64 : vector<2x8x8x64xf32> to vector<128x64xf32>
    %66 = arith.truncf %65 : vector<128x64xf32> to vector<128x64xbf16>
    %c6 = arith.constant 6 : index
    %c0_69 = arith.constant 0 : index
    %c0_70 = arith.constant 0 : index
    %67 = vector.load %arg3[%c6, %c0_69, %c0_70] : memref<9x64x128xbf16, #tpu.memory_space<vmem>>, vector<1x64x128xbf16>
    %68 = vector.shape_cast %67 : vector<1x64x128xbf16> to vector<64x128xbf16>
    %cst_71 = arith.constant dense<0.000000e+00> : vector<128x128xf32>
    %69 = tpu.matmul %66, %68, %cst_71 {dimension_numbers = #tpu.dot_dimension_numbers<[1], [0], [0], [1], [0, 0, 1, 1], [], []>} : vector<128x64xbf16>, vector<64x128xbf16>, vector<128x128xf32> -> vector<128x128xf32>
    %70 = arith.addf %63, %69 : vector<128x128xf32>
    %c0_72 = arith.constant 0 : index
    %c2_73 = arith.constant 2 : index
    %c1_74 = arith.constant 1 : index
    %c0_75 = arith.constant 0 : index
    %71 = vector.load %arg10[%c0_72, %c2_73, %c1_74, %c0_75] : memref<2x10x10x64xf32, #tpu.memory_space<vmem>>, vector<2x8x8x64xf32>
    %72 = vector.shape_cast %71 : vector<2x8x8x64xf32> to vector<128x64xf32>
    %73 = arith.truncf %72 : vector<128x64xf32> to vector<128x64xbf16>
    %c7 = arith.constant 7 : index
    %c0_76 = arith.constant 0 : index
    %c0_77 = arith.constant 0 : index
    %74 = vector.load %arg3[%c7, %c0_76, %c0_77] : memref<9x64x128xbf16, #tpu.memory_space<vmem>>, vector<1x64x128xbf16>
    %75 = vector.shape_cast %74 : vector<1x64x128xbf16> to vector<64x128xbf16>
    %cst_78 = arith.constant dense<0.000000e+00> : vector<128x128xf32>
    %76 = tpu.matmul %73, %75, %cst_78 {dimension_numbers = #tpu.dot_dimension_numbers<[1], [0], [0], [1], [0, 0, 1, 1], [], []>} : vector<128x64xbf16>, vector<64x128xbf16>, vector<128x128xf32> -> vector<128x128xf32>
    %77 = arith.addf %70, %76 : vector<128x128xf32>
    %c0_79 = arith.constant 0 : index
    %c2_80 = arith.constant 2 : index
    %c2_81 = arith.constant 2 : index
    %c0_82 = arith.constant 0 : index
    %78 = vector.load %arg10[%c0_79, %c2_80, %c2_81, %c0_82] : memref<2x10x10x64xf32, #tpu.memory_space<vmem>>, vector<2x8x8x64xf32>
    %79 = vector.shape_cast %78 : vector<2x8x8x64xf32> to vector<128x64xf32>
    %80 = arith.truncf %79 : vector<128x64xf32> to vector<128x64xbf16>
    %c8 = arith.constant 8 : index
    %c0_83 = arith.constant 0 : index
    %c0_84 = arith.constant 0 : index
    %81 = vector.load %arg3[%c8, %c0_83, %c0_84] : memref<9x64x128xbf16, #tpu.memory_space<vmem>>, vector<1x64x128xbf16>
    %82 = vector.shape_cast %81 : vector<1x64x128xbf16> to vector<64x128xbf16>
    %cst_85 = arith.constant dense<0.000000e+00> : vector<128x128xf32>
    %83 = tpu.matmul %80, %82, %cst_85 {dimension_numbers = #tpu.dot_dimension_numbers<[1], [0], [0], [1], [0, 0, 1, 1], [], []>} : vector<128x64xbf16>, vector<64x128xbf16>, vector<128x128xf32> -> vector<128x128xf32>
    %84 = arith.addf %77, %83 : vector<128x128xf32>
    %c0_86 = arith.constant 0 : index
    %c0_87 = arith.constant 0 : index
    %85 = vector.load %arg4[%c0_86, %c0_87] : memref<1x128xf32, #tpu.memory_space<vmem>>, vector<1x128xf32>
    %86 = vector.broadcast %85 : vector<1x128xf32> to vector<128x128xf32>
    %87 = arith.addf %84, %86 : vector<128x128xf32>
    %88 = vector.shape_cast %87 : vector<128x128xf32> to vector<8x16x128xf32>
    %89 = vector.extract_strided_slice %88 {offsets = [0, 0, 0], sizes = [8, 8, 128], strides = [1, 1, 1]} : vector<8x16x128xf32> to vector<8x8x128xf32>
    %90 = vector.extract_strided_slice %88 {offsets = [0, 8, 0], sizes = [8, 8, 128], strides = [1, 1, 1]} : vector<8x16x128xf32> to vector<8x8x128xf32>
    %91 = arith.maximumf %89, %90 : vector<8x8x128xf32>
    %92 = vector.shape_cast %91 : vector<8x8x128xf32> to vector<64x128xf32>
    %c0_88 = arith.constant 0 : index
    %c0_89 = arith.constant 0 : index
    %93 = vector.load %arg12[%c0_88, %c0_89] : memref<64x128xf32, #tpu.memory_space<vmem>>, vector<64x128xf32>
    tpu.vector_store %arg12[%c0_88, %c0_89], %92 {strides = array<i32>} : memref<64x128xf32, #tpu.memory_space<vmem>>, vector<64x128xf32>,
    %c0_90 = arith.constant 0 : index
    %c0_91 = arith.constant 0 : index
    %94 = tpu.strided_load %arg12[%c0_90, %c0_91] {strides = array<i32: 2, 1>} : memref<64x128xf32, #tpu.memory_space<vmem>>, vector<32x128xf32>
    %c1_92 = arith.constant 1 : index
    %c0_93 = arith.constant 0 : index
    %95 = tpu.strided_load %arg12[%c1_92, %c0_93] {strides = array<i32: 2, 1>} : memref<64x128xf32, #tpu.memory_space<vmem>>, vector<32x128xf32>
    %96 = arith.maximumf %94, %95 : vector<32x128xf32>
    %cst_94 = arith.constant 0.000000e+00 : f32
    %97 = vector.broadcast %cst_94 : f32 to vector<32x128xf32>
    %98 = arith.maximumf %96, %97 : vector<32x128xf32>
    %99 = vector.shape_cast %98 : vector<32x128xf32> to vector<2x16x128xf32>
    %c0_95 = arith.constant 0 : index
    %c0_96 = arith.constant 0 : index
    %c0_97 = arith.constant 0 : index
    %100 = vector.load %arg13[%c0_95, %c0_96, %c0_97] : memref<2x16x128xf32, #tpu.memory_space<vmem>>, vector<2x16x128xf32>
    tpu.vector_store %arg13[%c0_95, %c0_96, %c0_97], %99 {strides = array<i32>} : memref<2x16x128xf32, #tpu.memory_space<vmem>>, vector<2x16x128xf32>,
    %c0_98 = arith.constant 0 : index
    %c0_99 = arith.constant 0 : index
    %c0_100 = arith.constant 0 : index
    %101 = vector.load %arg13[%c0_98, %c0_99, %c0_100] : memref<2x16x128xf32, #tpu.memory_space<vmem>>, vector<2x1x128xf32>
    %102 = vector.shape_cast %101 : vector<2x1x128xf32> to vector<2x128xf32>
    %c0_101 = arith.constant 0 : index
    %c1_102 = arith.constant 1 : index
    %c0_103 = arith.constant 0 : index
    %103 = vector.load %arg13[%c0_101, %c1_102, %c0_103] : memref<2x16x128xf32, #tpu.memory_space<vmem>>, vector<2x1x128xf32>
    %104 = vector.shape_cast %103 : vector<2x1x128xf32> to vector<2x128xf32>
    %c0_104 = arith.constant 0 : index
    %c2_105 = arith.constant 2 : index
    %c0_106 = arith.constant 0 : index
    %105 = vector.load %arg13[%c0_104, %c2_105, %c0_106] : memref<2x16x128xf32, #tpu.memory_space<vmem>>, vector<2x1x128xf32>
    %106 = vector.shape_cast %105 : vector<2x1x128xf32> to vector<2x128xf32>
    %c0_107 = arith.constant 0 : index
    %c3_108 = arith.constant 3 : index
    %c0_109 = arith.constant 0 : index
    %107 = vector.load %arg13[%c0_107, %c3_108, %c0_109] : memref<2x16x128xf32, #tpu.memory_space<vmem>>, vector<2x1x128xf32>
    %108 = vector.shape_cast %107 : vector<2x1x128xf32> to vector<2x128xf32>
    %c0_110 = arith.constant 0 : index
    %c4_111 = arith.constant 4 : index
    %c0_112 = arith.constant 0 : index
    %109 = vector.load %arg13[%c0_110, %c4_111, %c0_112] : memref<2x16x128xf32, #tpu.memory_space<vmem>>, vector<2x1x128xf32>
    %110 = vector.shape_cast %109 : vector<2x1x128xf32> to vector<2x128xf32>
    %c0_113 = arith.constant 0 : index
    %c5_114 = arith.constant 5 : index
    %c0_115 = arith.constant 0 : index
    %111 = vector.load %arg13[%c0_113, %c5_114, %c0_115] : memref<2x16x128xf32, #tpu.memory_space<vmem>>, vector<2x1x128xf32>
    %112 = vector.shape_cast %111 : vector<2x1x128xf32> to vector<2x128xf32>
    %c0_116 = arith.constant 0 : index
    %c6_117 = arith.constant 6 : index
    %c0_118 = arith.constant 0 : index
    %113 = vector.load %arg13[%c0_116, %c6_117, %c0_118] : memref<2x16x128xf32, #tpu.memory_space<vmem>>, vector<2x1x128xf32>
    %114 = vector.shape_cast %113 : vector<2x1x128xf32> to vector<2x128xf32>
    %c0_119 = arith.constant 0 : index
    %c7_120 = arith.constant 7 : index
    %c0_121 = arith.constant 0 : index
    %115 = vector.load %arg13[%c0_119, %c7_120, %c0_121] : memref<2x16x128xf32, #tpu.memory_space<vmem>>, vector<2x1x128xf32>
    %116 = vector.shape_cast %115 : vector<2x1x128xf32> to vector<2x128xf32>
    %c0_122 = arith.constant 0 : index
    %c8_123 = arith.constant 8 : index
    %c0_124 = arith.constant 0 : index
    %117 = vector.load %arg13[%c0_122, %c8_123, %c0_124] : memref<2x16x128xf32, #tpu.memory_space<vmem>>, vector<2x1x128xf32>
    %118 = vector.shape_cast %117 : vector<2x1x128xf32> to vector<2x128xf32>
    %c0_125 = arith.constant 0 : index
    %c9 = arith.constant 9 : index
    %c0_126 = arith.constant 0 : index
    %119 = vector.load %arg13[%c0_125, %c9, %c0_126] : memref<2x16x128xf32, #tpu.memory_space<vmem>>, vector<2x1x128xf32>
    %120 = vector.shape_cast %119 : vector<2x1x128xf32> to vector<2x128xf32>
    %c0_127 = arith.constant 0 : index
    %c10 = arith.constant 10 : index
    %c0_128 = arith.constant 0 : index
    %121 = vector.load %arg13[%c0_127, %c10, %c0_128] : memref<2x16x128xf32, #tpu.memory_space<vmem>>, vector<2x1x128xf32>
    %122 = vector.shape_cast %121 : vector<2x1x128xf32> to vector<2x128xf32>
    %c0_129 = arith.constant 0 : index
    %c11 = arith.constant 11 : index
    %c0_130 = arith.constant 0 : index
    %123 = vector.load %arg13[%c0_129, %c11, %c0_130] : memref<2x16x128xf32, #tpu.memory_space<vmem>>, vector<2x1x128xf32>
    %124 = vector.shape_cast %123 : vector<2x1x128xf32> to vector<2x128xf32>
    %c0_131 = arith.constant 0 : index
    %c12 = arith.constant 12 : index
    %c0_132 = arith.constant 0 : index
    %125 = vector.load %arg13[%c0_131, %c12, %c0_132] : memref<2x16x128xf32, #tpu.memory_space<vmem>>, vector<2x1x128xf32>
    %126 = vector.shape_cast %125 : vector<2x1x128xf32> to vector<2x128xf32>
    %c0_133 = arith.constant 0 : index
    %c13 = arith.constant 13 : index
    %c0_134 = arith.constant 0 : index
    %127 = vector.load %arg13[%c0_133, %c13, %c0_134] : memref<2x16x128xf32, #tpu.memory_space<vmem>>, vector<2x1x128xf32>
    %128 = vector.shape_cast %127 : vector<2x1x128xf32> to vector<2x128xf32>
    %c0_135 = arith.constant 0 : index
    %c14 = arith.constant 14 : index
    %c0_136 = arith.constant 0 : index
    %129 = vector.load %arg13[%c0_135, %c14, %c0_136] : memref<2x16x128xf32, #tpu.memory_space<vmem>>, vector<2x1x128xf32>
    %130 = vector.shape_cast %129 : vector<2x1x128xf32> to vector<2x128xf32>
    %c0_137 = arith.constant 0 : index
    %c15 = arith.constant 15 : index
    %c0_138 = arith.constant 0 : index
    %131 = vector.load %arg13[%c0_137, %c15, %c0_138] : memref<2x16x128xf32, #tpu.memory_space<vmem>>, vector<2x1x128xf32>
    %132 = vector.shape_cast %131 : vector<2x1x128xf32> to vector<2x128xf32>
    %133 = tpu.concatenate %102, %104, %106, %108, %110, %112, %114, %116, %118, %120, %122, %124, %126, %128, %130, %132 in 1 : vector<2x128xf32>, vector<2x128xf32>, vector<2x128xf32>, vector<2x128xf32>, vector<2x128xf32>, vector<2x128xf32>, vector<2x128xf32>, vector<2x128xf32>, vector<2x128xf32>, vector<2x128xf32>, vector<2x128xf32>, vector<2x128xf32>, vector<2x128xf32>, vector<2x128xf32>, vector<2x128xf32>, vector<2x128xf32> -> vector<2x2048xf32>
    %134 = arith.truncf %133 : vector<2x2048xf32> to vector<2x2048xbf16>
    %c0_139 = arith.constant 0 : index
    %c0_140 = arith.constant 0 : index
    %135 = vector.load %arg5[%c0_139, %c0_140] : memref<2048x512xbf16, #tpu.memory_space<vmem>>, vector<2048x512xbf16>
    %cst_141 = arith.constant dense<0.000000e+00> : vector<2x512xf32>
    %136 = tpu.matmul %134, %135, %cst_141 {dimension_numbers = #tpu.dot_dimension_numbers<[1], [0], [0], [1], [0, 0, 1, 1], [], []>} : vector<2x2048xbf16>, vector<2048x512xbf16>, vector<2x512xf32> -> vector<2x512xf32>
    %c0_142 = arith.constant 0 : index
    %c0_143 = arith.constant 0 : index
    %137 = vector.load %arg6[%c0_142, %c0_143] : memref<1x512xf32, #tpu.memory_space<vmem>>, vector<1x512xf32>
    %138 = vector.broadcast %137 : vector<1x512xf32> to vector<2x512xf32>
    %139 = arith.addf %136, %138 : vector<2x512xf32>
    %cst_144 = arith.constant 0.000000e+00 : f32
    %140 = vector.broadcast %cst_144 : f32 to vector<2x512xf32>
    %141 = arith.maximumf %139, %140 : vector<2x512xf32>
    %c0_145 = arith.constant 0 : index
    %c0_146 = arith.constant 0 : index
    %142 = vector.load %arg7[%c0_145, %c0_146] : memref<512x3xf32, #tpu.memory_space<vmem>>, vector<512x3xf32>
    %cst_147 = arith.constant dense<0.000000e+00> : vector<2x3xf32>
    %143 = tpu.matmul %141, %142, %cst_147 {dimension_numbers = #tpu.dot_dimension_numbers<[1], [0], [0], [1], [0, 0, 1, 1], [], []>} : vector<2x512xf32>, vector<512x3xf32>, vector<2x3xf32> -> vector<2x3xf32>
    %c0_148 = arith.constant 0 : index
    %c0_149 = arith.constant 0 : index
    %144 = vector.load %arg8[%c0_148, %c0_149] : memref<1x3xf32, #tpu.memory_space<vmem>>, vector<1x3xf32>
    %145 = vector.broadcast %144 : vector<1x3xf32> to vector<2x3xf32>
    %146 = arith.addf %143, %145 : vector<2x3xf32>
    %cst_150 = arith.constant dense<0xFF800000> : vector<2xf32>
    %147 = vector.multi_reduction <maximumf>, %146, %cst_150 [1] : vector<2x3xf32> to vector<2xf32>
    %148 = vector.shape_cast %147 : vector<2xf32> to vector<2x1xf32>
    %149 = vector.broadcast %148 : vector<2x1xf32> to vector<2x3xf32>
    %150 = arith.subf %146, %149 : vector<2x3xf32>
    %151 = math.exp %150 : vector<2x3xf32>
    %cst_151 = arith.constant dense<0.000000e+00> : vector<2xf32>
    %152 = vector.multi_reduction <add>, %151, %cst_151 [1] : vector<2x3xf32> to vector<2xf32>
    %153 = vector.shape_cast %152 : vector<2xf32> to vector<2x1xf32>
    %154 = vector.broadcast %153 : vector<2x1xf32> to vector<2x3xf32>
    %155 = arith.divf %151, %154 : vector<2x3xf32>
    %c0_152 = arith.constant 0 : index
    %c0_153 = arith.constant 0 : index
    %156 = vector.load %arg9[%c0_152, %c0_153] : memref<2x3xf32, #tpu.memory_space<vmem>>, vector<2x3xf32>
    tpu.vector_store %arg9[%c0_152, %c0_153], %155 {strides = array<i32>} : memref<2x3xf32, #tpu.memory_space<vmem>>, vector<2x3xf32>,
    return
  }
}

</mosaic_0001>

<bundles_post_ra>
// kernel: image_classifier_forward.1
= control target key start
LH: loop header
LB: loop body
LE: loop exit
PB: predicated region body
PF: predicated region fallthrough
CT: control target
= control target key end

     0   :  { %vm299_vm0 = vcmask 1042432   ;;  %s13899_s0 = inlined_call_operand.vmem [shape: f32[512,27], index: 0, kind: input, shape index: {}]   ;;  %s13900_s1 = inlined_call_operand.vmem [shape: f32[27,64], index: 1, kind: input, shape index: {}]   ;;  %s13901_s2 = inlined_call_operand.vmem [shape: f32[1,64], index: 2, kind: input, shape index: {}]   ;;  %s13902_s3 = inlined_call_operand.vmem [shape: bf16[9,64,128], index: 3, kind: input, shape index: {}]   ;;  %s13903_s4 = inlined_call_operand.vmem [shape: f32[1,128], index: 4, kind: input, shape index: {}]   ;;  %s13904_s5 = inlined_call_operand.vmem [shape: bf16[2048,512], index: 5, kind: input, shape index: {}]   ;;  %s13905_s6 = inlined_call_operand.vmem [shape: f32[1,512], index: 6, kind: input, shape index: {}]   ;;  %s13906_s7 = inlined_call_operand.vmem [shape: f32[512,3], index: 7, kind: input, shape index: {}]   ;;  %s13907_s8 = inlined_call_operand.vmem [shape: f32[1,3], index: 8, kind: input, shape index: {}]   ;;  %s13908_s9 = inlined_call_operand.hbm [shape: f32[2,3], index: 9, kind: output, shape index: {}]  }
   0x1   :  { %v101_v0 = vld [vmem:[%s13900_s1 + $0x18] sm:$0x7]  ;;  %v100_v1 = vld [vmem:[%s13900_s1 + $0x10] sm:$0xff]  ;;  %v99_v2 = vld [vmem:[%s13900_s1 + $0x8] sm:$0xff] }
   0x2   :  { %6312 = vmatpush.msk.msra.mxu0 %vm299_vm0, %v101_v0  ;;  %v98_v3 = vld [vmem:[%s13900_s1] sm:$0xff] }
   0x4   :  { %316 = vmatpush.msra.mxu0 %v100_v1 }
   0x5   :  { %14 = vsyncpa [#allocation7], 0  ;;  %v34_v4 = vld [vmem:[%s13899_s0] sm:$0xff]  ;;  %vm106_vm1 = vcmask 220160   ;;  %v35_v5 = vld [vmem:[%s13899_s0 + $0x8] sm:$0xff]  ;;  %vm544_vm2 = vcmask 523264  }
   0x6   :  { %317 = vmatpush.msra.mxu0 %v99_v2  ;;  %v36_v6 = vld [vmem:[%s13899_s0 + $0x10] sm:$0xff]  ;;  %v37_v7 = vld [vmem:[%s13899_s0 + $0x18] sm:$0xff]  ;;  %v38_v8 = vld [vmem:[%s13899_s0 + $0x20] sm:$0xff]  ;;  %vm673_vm3 = vcmask 517120   ;;  %v9291_v30 = vmov 0.0   ;;  %vm2110_vm4 = vcmask 1041409  }
   0x7   :  { %v39_v9 = vld [vmem:[%s13899_s0 + $0x28] sm:$0xff]  ;;  %v40_v10 = vld [vmem:[%s13899_s0 + $0x30] sm:$0xff]  ;;  %v41_v11 = vld [vmem:[%s13899_s0 + $0x38] sm:$0xff]  ;;  %672 = vst.msk [vmem:[#allocation2] sm:$0xff] %vm544_vm2, %v9291_v30  ;;  %vm6270_vm5 = vcmask 17408  }
   0x8   :  { %318 = vmatpush.msra.mxu0 %v98_v3  ;;  %v42_v12 = vld [vmem:[%s13899_s0 + $0x40] sm:$0xff]  ;;  %v43_v13 = vld [vmem:[%s13899_s0 + $0x48] sm:$0xff]  ;;  %v44_v14 = vld [vmem:[%s13899_s0 + $0x50] sm:$0xff]  ;;  %674 = vst.msk [vmem:[#allocation2 + $0x8] sm:$0x3] %vm673_vm3, %v9291_v30 }
   0x9   :  { %6313 = vmatmul.msk.f32.vlgmr.msra.gmra.mxu0 %vm106_vm1, %v34_v4  ;;  %v45_v15 = vld [vmem:[%s13899_s0 + $0x58] sm:$0xff]  ;;  %v46_v16 = vld [vmem:[%s13899_s0 + $0x60] sm:$0xff]  ;;  %v47_v17 = vld [vmem:[%s13899_s0 + $0x68] sm:$0xff]  ;;  %675 = vst.msk [vmem:[#allocation2 + $0x10] sm:$0xff] %vm544_vm2, %v9291_v30 }
   0xa   :  { %v48_v18 = vld [vmem:[%s13899_s0 + $0x70] sm:$0xff]  ;;  %v49_v19 = vld [vmem:[%s13899_s0 + $0x78] sm:$0xff]  ;;  %v50_v21 = vld [vmem:[%s13899_s0 + $0x80] sm:$0xff]  ;;  %676 = vst.msk [vmem:[#allocation2 + $0x18] sm:$0x3] %vm673_vm3, %v9291_v30 }
   0xb   :  { %v8712_v22 = vld [vmem:[%s13902_s3 + $0x38] sm:$0xff]  ;;  %v8711_v25 = vld [vmem:[%s13902_s3 + $0x30] sm:$0xff]  ;;  %v51_v29 = vld [vmem:[%s13899_s0 + $0x88] sm:$0xff]  ;;  %677 = vst.msk [vmem:[#allocation2 + $0x20] sm:$0xff] %vm544_vm2, %v9291_v30 }
   0xc   :  { %v8708_v23 = vld [vmem:[%s13902_s3 + $0x18] sm:$0xff]  ;;  %847 = vmatpush.bf16.msra.mxu1 %v8712_v22  ;;  %v8707_v26 = vld [vmem:[%s13902_s3 + $0x10] sm:$0xff]  ;;  %v8710_v31 = vld [vmem:[%s13902_s3 + $0x28] sm:$0xff]  ;;  %678 = vst.msk [vmem:[#allocation2 + $0x28] sm:$0x3] %vm673_vm3, %v9291_v30 }
   0xd   :  { %v8716_v24 = vld [vmem:[%s13902_s3 + $0x58] sm:$0xff]  ;;  %944 = vmatpush.bf16.msra.mxu2 %v8708_v23  ;;  %v8715_v27 = vld [vmem:[%s13902_s3 + $0x50] sm:$0xff]  ;;  %v8706_v32 = vld [vmem:[%s13902_s3 + $0x8] sm:$0xff]  ;;  %679 = vst.msk [vmem:[#allocation2 + $0x30] sm:$0xff] %vm544_vm2, %v9291_v30 }
   0xe   :  { %1074 = vmatpush.bf16.msra.mxu3 %v8716_v24  ;;  %v8714_v33 = vld [vmem:[%s13902_s3 + $0x48] sm:$0xff]  ;;  %v9467_v34 = vld [vmem:[%s13901_s2] ss:$0 sm:$0xff]  ;;  %680 = vst.msk [vmem:[#allocation2 + $0x38] sm:$0x3] %vm673_vm3, %v9291_v30  ;;  %v52_v39 = vld [vmem:[%s13899_s0 + $0x90] sm:$0xff] }
   0xf   :  { %v8709_v35 = vld [vmem:[%s13902_s3 + $0x20] sm:$0xff]  ;;  %681 = vst.msk [vmem:[#allocation2 + $0x40] sm:$0xff] %vm544_vm2, %v9291_v30  ;;  %v53_v44 = vld [vmem:[%s13899_s0 + $0x98] sm:$0xff]  ;;  %v55_v55 = vld [vmem:[%s13899_s0 + $0xa8] sm:$0xff] }
  0x10   :  { %848 = vmatpush.bf16.msra.mxu1 %v8711_v25  ;;  %v8705_v36 = vld [vmem:[%s13902_s3] sm:$0xff]  ;;  %682 = vst.msk [vmem:[#allocation2 + $0x48] sm:$0x3] %vm673_vm3, %v9291_v30  ;;  %v56_v59 = vld [vmem:[%s13899_s0 + $0xb0] sm:$0xff]  ;;  %v61_v25 = vld [vmem:[%s13899_s0 + $0xd8] sm:$0xff] }
  0x11   :  { %6314 = vmatmul.msk.f32.gmra.mxu0 %vm106_vm1, %v35_v5  ;;  %945 = vmatpush.bf16.msra.mxu2 %v8707_v26  ;;  %v8713_v37 = vld [vmem:[%s13902_s3 + $0x40] sm:$0xff]  ;;  %683 = vst.msk [vmem:[#allocation2 + $0x50] sm:$0xff] %vm544_vm2, %v9291_v30 }
  0x12   :  { %1075 = vmatpush.bf16.msra.mxu3 %v8715_v27  ;;  %684 = vst.msk [vmem:[#allocation2 + $0x58] sm:$0x3] %vm673_vm3, %v9291_v30  ;;  %v54_v49 = vld [vmem:[%s13899_s0 + $0xa0] sm:$0xff] }
  0x13   :  { %685 = vst.msk [vmem:[#allocation2 + $0x60] sm:$0xff] %vm544_vm2, %v9291_v30  ;;  %v762_v56 = vld [vmem:[#allocation2 + $0x1] sm:$0xff] }
  0x14   :  { %849 = vmatpush.bf16.msra.mxu1 %v8710_v31  ;;  %686 = vst.msk [vmem:[#allocation2 + $0x68] sm:$0x3] %vm673_vm3, %v9291_v30  ;;  %v730_v57 = vld [vmem:[#allocation2] sm:$0xff] }
  0x15   :  { %946 = vmatpush.bf16.msra.mxu2 %v8706_v32  ;;  %687 = vst.msk [vmem:[#allocation2 + $0x70] sm:$0xff] %vm544_vm2, %v9291_v30  ;;  %v989_v58 = vld [vmem:[#allocation2 + $0x2] sm:$0xff] }
  0x16   :  { %1076 = vmatpush.bf16.msra.mxu3 %v8714_v33  ;;  %688 = vst.msk [vmem:[#allocation2 + $0x78] sm:$0x3] %vm673_vm3, %v9291_v30 }
  0x17   :  { %689 = vst.msk [vmem:[#allocation2 + $0x80] sm:$0xff] %vm544_vm2, %v9291_v30 }
  0x18   :  { %850 = vmatpush.bf16.msra.mxu1 %v8709_v35  ;;  %690 = vst.msk [vmem:[#allocation2 + $0x88] sm:$0x3] %vm673_vm3, %v9291_v30 }
  0x19   :  { %6315 = vmatmul.msk.f32.gmra.mxu0 %vm106_vm1, %v36_v6  ;;  %947 = vmatpush.bf16.msra.mxu2 %v8705_v36  ;;  %691 = vst.msk [vmem:[#allocation2 + $0x90] sm:$0xff] %vm544_vm2, %v9291_v30 }
  0x1a   :  { %1077 = vmatpush.bf16.msra.mxu3 %v8713_v37  ;;  %692 = vst.msk [vmem:[#allocation2 + $0x98] sm:$0x3] %vm673_vm3, %v9291_v30  ;;  %v63_v37 = vld [vmem:[%s13899_s0 + $0xe8] sm:$0xff] }
  0x1b   :  { %693 = vst.msk [vmem:[#allocation2 + $0xa0] sm:$0xff] %vm544_vm2, %v9291_v30 }
  0x1c   :  { %694 = vst.msk [vmem:[#allocation2 + $0xa8] sm:$0x3] %vm673_vm3, %v9291_v30 }
  0x1d   :  { %695 = vst.msk [vmem:[#allocation2 + $0xb0] sm:$0xff] %vm544_vm2, %v9291_v30 }
  0x1e   :  { %696 = vst.msk [vmem:[#allocation2 + $0xb8] sm:$0x3] %vm673_vm3, %v9291_v30 }
  0x1f   :  { %697 = vst.msk [vmem:[#allocation2 + $0xc0] sm:$0xff] %vm544_vm2, %v9291_v30 }
  0x20   :  { %698 = vst.msk [vmem:[#allocation2 + $0xc8] sm:$0x3] %vm673_vm3, %v9291_v30 }
  0x21   :  { %6316 = vmatmul.msk.f32.gmra.mxu0 %vm106_vm1, %v37_v7  ;;  %699 = vst.msk [vmem:[#allocation2 + $0xd0] sm:$0xff] %vm544_vm2, %v9291_v30  ;;  %v57_v7 = vld [vmem:[%s13899_s0 + $0xb8] sm:$0xff] }
  0x22   :  { %700 = vst.msk [vmem:[#allocation2 + $0xd8] sm:$0x3] %vm673_vm3, %v9291_v30 }
  0x23   :  { %701 = vst.msk [vmem:[#allocation2 + $0xe0] sm:$0xff] %vm544_vm2, %v9291_v30 }
  0x24   :  { %702 = vst.msk [vmem:[#allocation2 + $0xe8] sm:$0x3] %vm673_vm3, %v9291_v30 }
  0x25   :  { %703 = vst.msk [vmem:[#allocation2 + $0xf0] sm:$0xff] %vm544_vm2, %v9291_v30 }
  0x26   :  { %704 = vst.msk [vmem:[#allocation2 + $0xf8] sm:$0x3] %vm673_vm3, %v9291_v30 }
  0x27   :  { %705 = vst.msk [vmem:[#allocation2 + $0x100] sm:$0xff] %vm544_vm2, %v9291_v30 }
  0x28   :  { %706 = vst.msk [vmem:[#allocation2 + $0x108] sm:$0x3] %vm673_vm3, %v9291_v30 }
  0x29   :  { %6317 = vmatmul.msk.f32.gmra.mxu0 %vm106_vm1, %v38_v8  ;;  %707 = vst.msk [vmem:[#allocation2 + $0x110] sm:$0xff] %vm544_vm2, %v9291_v30 }
  0x2a   :  { %708 = vst.msk [vmem:[#allocation2 + $0x118] sm:$0x3] %vm673_vm3, %v9291_v30 }
  0x2b   :  { %709 = vst.msk [vmem:[#allocation2 + $0x120] sm:$0xff] %vm544_vm2, %v9291_v30 }
  0x2c   :  { %710 = vst.msk [vmem:[#allocation2 + $0x128] sm:$0x3] %vm673_vm3, %v9291_v30 }
  0x2d   :  { %711 = vst.msk [vmem:[#allocation2 + $0x130] sm:$0xff] %vm544_vm2, %v9291_v30 }
  0x2e   :  { %712 = vst.msk [vmem:[#allocation2 + $0x138] sm:$0x3] %vm673_vm3, %v9291_v30  ;;  %v62_v30 = vld [vmem:[%s13899_s0 + $0xe0] sm:$0xff] }
  0x31   :  { %6318 = vmatmul.msk.f32.gmra.mxu0 %vm106_vm1, %v39_v9 }
  0x39   :  { %6319 = vmatmul.msk.f32.gmra.mxu0 %vm106_vm1, %v40_v10 }
  0x41   :  { %6320 = vmatmul.msk.f32.gmra.mxu0 %vm106_vm1, %v41_v11 }
  0x49   :  { %6321 = vmatmul.msk.f32.gmra.mxu0 %vm106_vm1, %v42_v12  ;;  %v58_v12 = vld [vmem:[%s13899_s0 + $0xc0] sm:$0xff] }
  0x51   :  { %6322 = vmatmul.msk.f32.gmra.mxu0 %vm106_vm1, %v43_v13 }
  0x59   :  { %6323 = vmatmul.msk.f32.gmra.mxu0 %vm106_vm1, %v44_v14 }
  0x61   :  { %6324 = vmatmul.msk.f32.gmra.mxu0 %vm106_vm1, %v45_v15 }
  0x69   :  { %6325 = vmatmul.msk.f32.gmra.mxu0 %vm106_vm1, %v46_v16 }
  0x71   :  { %6326 = vmatmul.msk.f32.gmra.mxu0 %vm106_vm1, %v47_v17 }
  0x79   :  { %6327 = vmatmul.msk.f32.gmra.mxu0 %vm106_vm1, %v48_v18  ;;  %v59_v18 = vld [vmem:[%s13899_s0 + $0xc8] sm:$0xff] }
  0x81   :  { %6328 = vmatmul.msk.f32.gmra.mxu0 %vm106_vm1, %v49_v19 }
  0x86   :  { %v320_v20 = vpop.f32.mrf.mxu0 }
  0x87   :  { %v321_v40 = vadd.f32 %v9467_v34, %v320_v20  ;;  %v60_v20 = vld [vmem:[%s13899_s0 + $0xd0] sm:$0xff] }
  0x89   :  { %6329 = vmatmul.msk.f32.gmra.mxu0 %vm106_vm1, %v50_v21 }
  0x8e   :  { %v323_v28 = vpop.f32.mrf.mxu0 }
  0x8f   :  { %v324_v45 = vadd.f32 %v9467_v34, %v323_v28 }
  0x91   :  { %6330 = vmatmul.msk.f32.gmra.mxu0 %vm106_vm1, %v51_v29 }
  0x96   :  { %v326_v38 = vpop.f32.mrf.mxu0 }
  0x97   :  { %v327_v41 = vadd.f32 %v9467_v34, %v326_v38 }
  0x99   :  { %v512_v42 = vmax.f32 %v321_v40, %v327_v41  ;;  %6331 = vmatmul.msk.f32.gmra.mxu0 %vm106_vm1, %v52_v39  ;;  %v64_v39 = vld [vmem:[%s13899_s0 + $0xf0] sm:$0xff] }
  0x9b   :  { %545 = vst.msk [vmem:[#allocation3] sm:$0xff] %vm544_vm2, %v512_v42 }
  0x9e   :  { %v329_v43 = vpop.f32.mrf.mxu0 }
  0x9f   :  { %v330_v46 = vadd.f32 %v9467_v34, %v329_v43 }
  0xa1   :  { %v513_v47 = vmax.f32 %v324_v45, %v330_v46  ;;  %6332 = vmatmul.msk.f32.gmra.mxu0 %vm106_vm1, %v53_v44 }
  0xa3   :  { %546 = vst.msk [vmem:[#allocation3 + $0x8] sm:$0xff] %vm544_vm2, %v513_v47 }
  0xa6   :  { %v332_v48 = vpop.f32.mrf.mxu0 }
  0xa7   :  { %v333_v60 = vadd.f32 %v9467_v34, %v332_v48 }
  0xa9   :  { %6333 = vmatmul.msk.f32.gmra.mxu0 %vm106_vm1, %v54_v49 }
  0xaa   :  { %v577_v50 = vld [vmem:[#allocation3] ss:$2 sm:$0xff]  ;;  %v609_v51 = vld [vmem:[#allocation3 + $0x1] ss:$2 sm:$0xff] }
  0xab   :  { %v640_v52 = vmax.f32 %v577_v50, %v609_v51 }
  0xad   :  { %v656_v53 = vmax.f32 %v640_v52, 0.0 }
  0xae   :  { %v335_v54 = vpop.f32.mrf.mxu0 }
  0xaf   :  { %714 = vst.msk [vmem:[#allocation2 + $0x11] sm:$0xff] %vm544_vm2, %v656_v53  ;;  %v336_v8 = vadd.f32 %v9467_v34, %v335_v54  ;;  %v65_v53 = vld [vmem:[%s13899_s0 + $0xf8] sm:$0xff] }
  0xb1   :  { %6334 = vmatmul.msk.f32.gmra.mxu0 %vm106_vm1, %v55_v55 }
  0xb6   :  { %v338_v61 = vpop.f32.mrf.mxu0  ;;  %v763_v62 = vld [vmem:[#allocation2 + $0x11] sm:$0xff] }
  0xb7   :  { %v731_v63 = vld [vmem:[#allocation2 + $0x10] sm:$0xff]  ;;  %v339_v1 = vadd.f32 %v9467_v34, %v338_v61  ;;  %v778_v2 = vpack.c.bf16 %v763_v62, %v762_v56 }
  0xb8   :  { %v990_v0 = vld [vmem:[#allocation2 + $0x12] sm:$0xff]  ;;  %v746_v3 = vpack.c.bf16 %v731_v63, %v730_v57 }
  0xb9   :  { %v1005_v4 = vpack.c.bf16 %v990_v0, %v989_v58  ;;  %v514_v5 = vmax.f32 %v333_v60, %v339_v1  ;;  %6335 = vmatmul.msk.f32.gmra.mxu0 %vm106_vm1, %v56_v59  ;;  %6401 = vmatmul.msk.bf16.vlgmr.msra.gmra.mxu1 %vm544_vm2, %v778_v2  ;;  %v66_v58 = vld [vmem:[%s13899_s0 + $0x100] sm:$0xff]  ;;  %v67_v0 = vld [vmem:[%s13899_s0 + $0x108] sm:$0xff]  ;;  %v68_v1 = vld [vmem:[%s13899_s0 + $0x110] sm:$0xff] }
  0xba   :  { %6425 = vmatmul.msk.bf16.vlgmr.msra.gmra.mxu2 %vm544_vm2, %v746_v3 }
  0xbb   :  { %6457 = vmatmul.msk.bf16.vlgmr.msra.gmra.mxu3 %vm544_vm2, %v1005_v4  ;;  %547 = vst.msk [vmem:[#allocation3 + $0x10] sm:$0xff] %vm544_vm2, %v514_v5 }
  0xbe   :  { %v341_v6 = vpop.f32.mrf.mxu0 }
  0xbf   :  { %v342_v9 = vadd.f32 %v9467_v34, %v341_v6 }
  0xc1   :  { %v515_v10 = vmax.f32 %v336_v8, %v342_v9  ;;  %6336 = vmatmul.msk.f32.gmra.mxu0 %vm106_vm1, %v57_v7 }
  0xc3   :  { %548 = vst.msk [vmem:[#allocation3 + $0x18] sm:$0xff] %vm544_vm2, %v515_v10 }
  0xc6   :  { %v344_v11 = vpop.f32.mrf.mxu0 }
  0xc7   :  { %v345_v21 = vadd.f32 %v9467_v34, %v344_v11 }
  0xc9   :  { %6337 = vmatmul.msk.f32.gmra.mxu0 %vm106_vm1, %v58_v12 }
  0xca   :  { %v579_v13 = vld [vmem:[#allocation3 + $0x10] ss:$2 sm:$0xff]  ;;  %v611_v14 = vld [vmem:[#allocation3 + $0x11] ss:$2 sm:$0xff] }
  0xcb   :  { %v641_v15 = vmax.f32 %v579_v13, %v611_v14  ;;  %v69_v13 = vld [vmem:[%s13899_s0 + $0x118] sm:$0xff] }
  0xcd   :  { %v657_v16 = vmax.f32 %v641_v15, 0.0 }
  0xce   :  { %v347_v17 = vpop.f32.mrf.mxu0 }
  0xcf   :  { %715 = vst.msk [vmem:[#allocation2 + $0x21] sm:$0xff] %vm544_vm2, %v657_v16  ;;  %v348_v26 = vadd.f32 %v9467_v34, %v347_v17 }
  0xd1   :  { %6338 = vmatmul.msk.f32.gmra.mxu0 %vm106_vm1, %v59_v18  ;;  %v70_v18 = vld [vmem:[%s13899_s0 + $0x120] sm:$0xff] }
  0xd6   :  { %v350_v19 = vpop.f32.mrf.mxu0  ;;  %v9620_v38 = vld [vmem:[#allocation2 + $0x21] sm:$0xff] }
  0xd7   :  { %v351_v22 = vadd.f32 %v9467_v34, %v350_v19  ;;  %v9625_v40 = vld [vmem:[#allocation2 + $0x20] sm:$0xff] }
  0xd8   :  { %v9627_v41 = vld [vmem:[#allocation2 + $0x22] sm:$0xff] }
  0xd9   :  { %v516_v23 = vmax.f32 %v345_v21, %v351_v22  ;;  %6339 = vmatmul.msk.f32.gmra.mxu0 %vm106_vm1, %v60_v20 }
  0xdb   :  { %549 = vst.msk [vmem:[#allocation3 + $0x20] sm:$0xff] %vm544_vm2, %v516_v23 }
  0xde   :  { %v353_v24 = vpop.f32.mrf.mxu0 }
  0xdf   :  { %v354_v27 = vadd.f32 %v9467_v34, %v353_v24  ;;  %v71_v24 = vld [vmem:[%s13899_s0 + $0x128] sm:$0xff] }
  0xe1   :  { %v517_v28 = vmax.f32 %v348_v26, %v354_v27  ;;  %6340 = vmatmul.msk.f32.gmra.mxu0 %vm106_vm1, %v61_v25  ;;  %v72_v25 = vld [vmem:[%s13899_s0 + $0x130] sm:$0xff] }
  0xe3   :  { %550 = vst.msk [vmem:[#allocation3 + $0x28] sm:$0xff] %vm544_vm2, %v517_v28 }
  0xe6   :  { %v356_v29 = vpop.f32.mrf.mxu0 }
  0xe7   :  { %v357_v42 = vadd.f32 %v9467_v34, %v356_v29 }
  0xe9   :  { %6341 = vmatmul.msk.f32.gmra.mxu0 %vm106_vm1, %v62_v30 }
  0xea   :  { %v581_v31 = vld [vmem:[#allocation3 + $0x20] ss:$2 sm:$0xff]  ;;  %v613_v32 = vld [vmem:[#allocation3 + $0x21] ss:$2 sm:$0xff] }
  0xeb   :  { %v642_v33 = vmax.f32 %v581_v31, %v613_v32 }
  0xed   :  { %v658_v35 = vmax.f32 %v642_v33, 0.0 }
  0xee   :  { %v359_v36 = vpop.f32.mrf.mxu0 }
  0xef   :  { %716 = vst.msk [vmem:[#allocation2 + $0x31] sm:$0xff] %vm544_vm2, %v658_v35  ;;  %v360_v54 = vadd.f32 %v9467_v34, %v359_v36 }
  0xf1   :  { %6342 = vmatmul.msk.f32.gmra.mxu0 %vm106_vm1, %v63_v37 }
  0xf6   :  { %v362_v43 = vpop.f32.mrf.mxu0  ;;  %v9630_v44 = vld [vmem:[#allocation2 + $0x31] sm:$0xff] }
  0xf7   :  { %v9632_v45 = vld [vmem:[#allocation2 + $0x30] sm:$0xff]  ;;  %v363_v47 = vadd.f32 %v9467_v34, %v362_v43  ;;  %v779_v48 = vpack.c.bf16 %v9630_v44, %v9620_v38 }
  0xf8   :  { %v9634_v46 = vld [vmem:[#allocation2 + $0x32] sm:$0xff]  ;;  %v747_v49 = vpack.c.bf16 %v9632_v45, %v9625_v40 }
  0xf9   :  { %v1006_v50 = vpack.c.bf16 %v9634_v46, %v9627_v41  ;;  %v518_v51 = vmax.f32 %v357_v42, %v363_v47  ;;  %6343 = vmatmul.msk.f32.gmra.mxu0 %vm106_vm1, %v64_v39  ;;  %6402 = vmatmul.msk.bf16.gmra.mxu1 %vm544_vm2, %v779_v48  ;;  %v73_v47 = vld [vmem:[%s13899_s0 + $0x138] sm:$0xff] }
  0xfa   :  { %6426 = vmatmul.msk.bf16.gmra.mxu2 %vm544_vm2, %v747_v49 }
  0xfb   :  { %6458 = vmatmul.msk.bf16.gmra.mxu3 %vm544_vm2, %v1006_v50  ;;  %551 = vst.msk [vmem:[#allocation3 + $0x30] sm:$0xff] %vm544_vm2, %v518_v51 }
  0xfe   :  { %v365_v52 = vpop.f32.mrf.mxu0 }
  0xff   :  { %v366_v55 = vadd.f32 %v9467_v34, %v365_v52 }
 0x101   :  { %v519_v56 = vmax.f32 %v360_v54, %v366_v55  ;;  %6344 = vmatmul.msk.f32.gmra.mxu0 %vm106_vm1, %v65_v53  ;;  %v74_v54 = vld [vmem:[%s13899_s0 + $0x140] sm:$0xff] }
 0x103   :  { %552 = vst.msk [vmem:[#allocation3 + $0x38] sm:$0xff] %vm544_vm2, %v519_v56 }
 0x106   :  { %v368_v57 = vpop.f32.mrf.mxu0 }
 0x107   :  { %v369_v2 = vadd.f32 %v9467_v34, %v368_v57 }
 0x109   :  { %6345 = vmatmul.msk.f32.gmra.mxu0 %vm106_vm1, %v66_v58 }
 0x10a   :  { %v583_v59 = vld [vmem:[#allocation3 + $0x30] ss:$2 sm:$0xff]  ;;  %v615_v60 = vld [vmem:[#allocation3 + $0x31] ss:$2 sm:$0xff] }
 0x10b   :  { %v643_v61 = vmax.f32 %v583_v59, %v615_v60  ;;  %v75_v60 = vld [vmem:[%s13899_s0 + $0x148] sm:$0xff] }
 0x10d   :  { %v659_v62 = vmax.f32 %v643_v61, 0.0  ;;  %v76_v61 = vld [vmem:[%s13899_s0 + $0x150] sm:$0xff] }
 0x10e   :  { %v371_v63 = vpop.f32.mrf.mxu0 }
 0x10f   :  { %717 = vst.msk [vmem:[#allocation2 + $0x41] sm:$0xff] %vm544_vm2, %v659_v62  ;;  %v372_v14 = vadd.f32 %v9467_v34, %v371_v63 }
 0x111   :  { %6346 = vmatmul.msk.f32.gmra.mxu0 %vm106_vm1, %v67_v0 }
 0x116   :  { %v374_v3 = vpop.f32.mrf.mxu0  ;;  %v9668_v4 = vld [vmem:[#allocation2 + $0x41] sm:$0xff] }
 0x117   :  { %v9670_v5 = vld [vmem:[#allocation2 + $0x40] sm:$0xff]  ;;  %v375_v7 = vadd.f32 %v9467_v34, %v374_v3 }
 0x118   :  { %v9672_v6 = vld [vmem:[#allocation2 + $0x42] sm:$0xff] }
 0x119   :  { %v520_v11 = vmax.f32 %v369_v2, %v375_v7  ;;  %6347 = vmatmul.msk.f32.gmra.mxu0 %vm106_vm1, %v68_v1 }
 0x11b   :  { %553 = vst.msk [vmem:[#allocation3 + $0x40] sm:$0xff] %vm544_vm2, %v520_v11 }
 0x11e   :  { %v377_v12 = vpop.f32.mrf.mxu0 }
 0x11f   :  { %v378_v15 = vadd.f32 %v9467_v34, %v377_v12 }
 0x121   :  { %v521_v16 = vmax.f32 %v372_v14, %v378_v15  ;;  %6348 = vmatmul.msk.f32.gmra.mxu0 %vm106_vm1, %v69_v13  ;;  %v77_v15 = vld [vmem:[%s13899_s0 + $0x158] sm:$0xff] }
 0x123   :  { %554 = vst.msk [vmem:[#allocation3 + $0x48] sm:$0xff] %vm544_vm2, %v521_v16 }
 0x126   :  { %v380_v17 = vpop.f32.mrf.mxu0 }
 0x127   :  { %v381_v26 = vadd.f32 %v9467_v34, %v380_v17 }
 0x129   :  { %6349 = vmatmul.msk.f32.gmra.mxu0 %vm106_vm1, %v70_v18 }
 0x12a   :  { %v585_v19 = vld [vmem:[#allocation3 + $0x40] ss:$2 sm:$0xff]  ;;  %v617_v20 = vld [vmem:[#allocation3 + $0x41] ss:$2 sm:$0xff] }
 0x12b   :  { %v644_v21 = vmax.f32 %v585_v19, %v617_v20  ;;  %v78_v20 = vld [vmem:[%s13899_s0 + $0x160] sm:$0xff] }
 0x12d   :  { %v660_v22 = vmax.f32 %v644_v21, 0.0 }
 0x12e   :  { %v383_v23 = vpop.f32.mrf.mxu0 }
 0x12f   :  { %718 = vst.msk [vmem:[#allocation2 + $0x51] sm:$0xff] %vm544_vm2, %v660_v22  ;;  %v384_v48 = vadd.f32 %v9467_v34, %v383_v23 }
 0x131   :  { %6350 = vmatmul.msk.f32.gmra.mxu0 %vm106_vm1, %v71_v24 }
 0x136   :  { %v386_v27 = vpop.f32.mrf.mxu0  ;;  %v9703_v28 = vld [vmem:[#allocation2 + $0x51] sm:$0xff]  ;;  %v852_v37 = vpop.f32.mrf.mxu1 }
 0x137   :  { %v9705_v29 = vld [vmem:[#allocation2 + $0x50] sm:$0xff]  ;;  %v387_v31 = vadd.f32 %v9467_v34, %v386_v27  ;;  %v780_v32 = vpack.c.bf16 %v9703_v28, %v9668_v4 }
 0x138   :  { %v9707_v30 = vld [vmem:[#allocation2 + $0x52] sm:$0xff]  ;;  %v748_v33 = vpack.c.bf16 %v9705_v29, %v9670_v5 }
 0x139   :  { %v1007_v35 = vpack.c.bf16 %v9707_v30, %v9672_v6  ;;  %v522_v36 = vmax.f32 %v381_v26, %v387_v31  ;;  %6351 = vmatmul.msk.f32.gmra.mxu0 %vm106_vm1, %v72_v25  ;;  %6403 = vmatmul.msk.bf16.gmra.mxu1 %vm544_vm2, %v780_v32  ;;  %v79_v26 = vld [vmem:[%s13899_s0 + $0x168] sm:$0xff]  ;;  %v80_v32 = vld [vmem:[%s13899_s0 + $0x170] sm:$0xff] }
 0x13a   :  { %6427 = vmatmul.msk.bf16.gmra.mxu2 %vm544_vm2, %v748_v33 }
 0x13b   :  { %6459 = vmatmul.msk.bf16.gmra.mxu3 %vm544_vm2, %v1007_v35  ;;  %555 = vst.msk [vmem:[#allocation3 + $0x50] sm:$0xff] %vm544_vm2, %v522_v36 }
 0x13d   :  { %v949_v39 = vpop.f32.mrf.mxu2 }
 0x13e   :  { %v950_v42 = vadd.f32 %v949_v39, %v852_v37  ;;  %v389_v43 = vpop.f32.mrf.mxu0  ;;  %v1079_v49 = vpop.f32.mrf.mxu3 }
 0x13f   :  { %v390_v50 = vadd.f32 %v9467_v34, %v389_v43  ;;  %v9774_v27 = vpop.f32.mrf.mxu1 }
 0x140   :  { %v9726_v51 = vadd.f32 %v1079_v49, %v950_v42 }
 0x141   :  { %v523_v52 = vmax.f32 %v384_v48, %v390_v50  ;;  %6352 = vmatmul.msk.f32.gmra.mxu0 %vm106_vm1, %v73_v47 }
 0x143   :  { %556 = vst.msk [vmem:[#allocation3 + $0x58] sm:$0xff] %vm544_vm2, %v523_v52 }
 0x145   :  { %v9776_v31 = vpop.f32.mrf.mxu2 }
 0x146   :  { %v392_v53 = vpop.f32.mrf.mxu0  ;;  %v9788_v42 = vpop.f32.mrf.mxu3 }
 0x147   :  { %v393_v62 = vadd.f32 %v9467_v34, %v392_v53 }
 0x149   :  { %6353 = vmatmul.msk.f32.gmra.mxu0 %vm106_vm1, %v74_v54 }
 0x14a   :  { %v587_v55 = vld [vmem:[#allocation3 + $0x50] ss:$2 sm:$0xff]  ;;  %v619_v56 = vld [vmem:[#allocation3 + $0x51] ss:$2 sm:$0xff] }
 0x14b   :  { %v645_v57 = vmax.f32 %v587_v55, %v619_v56  ;;  %v81_v56 = vld [vmem:[%s13899_s0 + $0x178] sm:$0xff] }
 0x14d   :  { %v661_v58 = vmax.f32 %v645_v57, 0.0 }
 0x14e   :  { %v395_v59 = vpop.f32.mrf.mxu0 }
 0x14f   :  { %719 = vst.msk [vmem:[#allocation2 + $0x61] sm:$0xff] %vm544_vm2, %v661_v58  ;;  %v396_v16 = vadd.f32 %v9467_v34, %v395_v59 }
 0x151   :  { %6354 = vmatmul.msk.f32.gmra.mxu0 %vm106_vm1, %v75_v60 }
 0x156   :  { %v398_v63 = vpop.f32.mrf.mxu0  ;;  %v9743_v0 = vld [vmem:[#allocation2 + $0x61] sm:$0xff] }
 0x157   :  { %v9745_v1 = vld [vmem:[#allocation2 + $0x60] sm:$0xff]  ;;  %v399_v3 = vadd.f32 %v9467_v34, %v398_v63 }
 0x158   :  { %v9747_v2 = vld [vmem:[#allocation2 + $0x62] sm:$0xff] }
 0x159   :  { %v524_v13 = vmax.f32 %v393_v62, %v399_v3  ;;  %6355 = vmatmul.msk.f32.gmra.mxu0 %vm106_vm1, %v76_v61  ;;  %v82_v63 = vld [vmem:[%s13899_s0 + $0x180] sm:$0xff] }
 0x15b   :  { %557 = vst.msk [vmem:[#allocation3 + $0x60] sm:$0xff] %vm544_vm2, %v524_v13 }
 0x15e   :  { %v401_v14 = vpop.f32.mrf.mxu0 }
 0x15f   :  { %v402_v17 = vadd.f32 %v9467_v34, %v401_v14 }
 0x161   :  { %v525_v18 = vmax.f32 %v396_v16, %v402_v17  ;;  %6356 = vmatmul.msk.f32.gmra.mxu0 %vm106_vm1, %v77_v15  ;;  %v83_v17 = vld [vmem:[%s13899_s0 + $0x188] sm:$0xff] }
 0x163   :  { %558 = vst.msk [vmem:[#allocation3 + $0x68] sm:$0xff] %vm544_vm2, %v525_v18 }
 0x166   :  { %v404_v19 = vpop.f32.mrf.mxu0 }
 0x167   :  { %v405_v33 = vadd.f32 %v9467_v34, %v404_v19  ;;  %v84_v19 = vld [vmem:[%s13899_s0 + $0x190] sm:$0xff] }
 0x169   :  { %6357 = vmatmul.msk.f32.gmra.mxu0 %vm106_vm1, %v78_v20 }
 0x16a   :  { %v589_v21 = vld [vmem:[#allocation3 + $0x60] ss:$2 sm:$0xff]  ;;  %v621_v22 = vld [vmem:[#allocation3 + $0x61] ss:$2 sm:$0xff] }
 0x16b   :  { %v646_v23 = vmax.f32 %v589_v21, %v621_v22 }
 0x16d   :  { %v662_v24 = vmax.f32 %v646_v23, 0.0 }
 0x16e   :  { %v407_v25 = vpop.f32.mrf.mxu0 }
 0x16f   :  { %720 = vst.msk [vmem:[#allocation2 + $0x71] sm:$0xff] %vm544_vm2, %v662_v24  ;;  %v408_v57 = vadd.f32 %v9467_v34, %v407_v25  ;;  %v85_v24 = vld [vmem:[%s13899_s0 + $0x198] sm:$0xff] }
 0x171   :  { %6358 = vmatmul.msk.f32.gmra.mxu0 %vm106_vm1, %v79_v26 }
 0x176   :  { %v410_v35 = vpop.f32.mrf.mxu0  ;;  %v9782_v36 = vld [vmem:[#allocation2 + $0x71] sm:$0xff]  ;;  %v857_v52 = vpop.f32.mrf.mxu1 }
 0x177   :  { %v9784_v37 = vld [vmem:[#allocation2 + $0x70] sm:$0xff]  ;;  %v411_v43 = vadd.f32 %v9467_v34, %v410_v35  ;;  %v781_v47 = vpack.c.bf16 %v9782_v36, %v9743_v0  ;;  %v86_v35 = vld [vmem:[%s13899_s0 + $0x1a0] sm:$0xff] }
 0x178   :  { %v9786_v39 = vld [vmem:[#allocation2 + $0x72] sm:$0xff]  ;;  %v749_v48 = vpack.c.bf16 %v9784_v37, %v9745_v1 }
 0x179   :  { %v1008_v49 = vpack.c.bf16 %v9786_v39, %v9747_v2  ;;  %v526_v50 = vmax.f32 %v405_v33, %v411_v43  ;;  %6359 = vmatmul.msk.f32.gmra.mxu0 %vm106_vm1, %v80_v32  ;;  %6404 = vmatmul.msk.bf16.gmra.mxu1 %vm544_vm2, %v781_v47 }
 0x17a   :  { %6428 = vmatmul.msk.bf16.gmra.mxu2 %vm544_vm2, %v749_v48 }
 0x17b   :  { %6460 = vmatmul.msk.bf16.gmra.mxu3 %vm544_vm2, %v1008_v49  ;;  %559 = vst.msk [vmem:[#allocation3 + $0x70] sm:$0xff] %vm544_vm2, %v526_v50 }
 0x17d   :  { %v954_v53 = vpop.f32.mrf.mxu2 }
 0x17e   :  { %v955_v54 = vadd.f32 %v954_v53, %v857_v52  ;;  %v413_v55 = vpop.f32.mrf.mxu0  ;;  %v1084_v58 = vpop.f32.mrf.mxu3  ;;  %v87_v52 = vld [vmem:[%s13899_s0 + $0x1a8] sm:$0xff] }
 0x17f   :  { %v414_v59 = vadd.f32 %v9467_v34, %v413_v55  ;;  %v770_v53 = vld [vmem:[#allocation2 + $0xa1] sm:$0xff] }
 0x180   :  { %v9807_v60 = vadd.f32 %v1084_v58, %v955_v54  ;;  %v738_v54 = vld [vmem:[#allocation2 + $0xa0] sm:$0xff]  ;;  %v88_v58 = vld [vmem:[%s13899_s0 + $0x1b0] sm:$0xff] }
 0x181   :  { %v527_v61 = vmax.f32 %v408_v57, %v414_v59  ;;  %6360 = vmatmul.msk.f32.gmra.mxu0 %vm106_vm1, %v81_v56  ;;  %v997_v55 = vld [vmem:[#allocation2 + $0xa2] sm:$0xff]  ;;  %v9843_v56 = vpop.f32.mrf.mxu1 }
 0x183   :  { %560 = vst.msk [vmem:[#allocation3 + $0x78] sm:$0xff] %vm544_vm2, %v527_v61 }
 0x185   :  { %v9845_v57 = vpop.f32.mrf.mxu2 }
 0x186   :  { %v416_v62 = vpop.f32.mrf.mxu0 }
 0x187   :  { %v417_v20 = vadd.f32 %v9467_v34, %v416_v62 }
 0x189   :  { %6361 = vmatmul.msk.f32.gmra.mxu0 %vm106_vm1, %v82_v63 }
 0x18a   :  { %v591_v3 = vld [vmem:[#allocation3 + $0x70] ss:$2 sm:$0xff]  ;;  %v623_v13 = vld [vmem:[#allocation3 + $0x71] ss:$2 sm:$0xff] }
 0x18b   :  { %v647_v14 = vmax.f32 %v591_v3, %v623_v13  ;;  %v9857_v13 = vpop.f32.mrf.mxu3 }
 0x18d   :  { %v663_v15 = vmax.f32 %v647_v14, 0.0 }
 0x18e   :  { %v419_v16 = vpop.f32.mrf.mxu0 }
 0x18f   :  { %721 = vst.msk [vmem:[#allocation2 + $0x81] sm:$0xff] %vm544_vm2, %v663_v15  ;;  %v420_v25 = vadd.f32 %v9467_v34, %v419_v16 }
 0x191   :  { %6362 = vmatmul.msk.f32.gmra.mxu0 %vm106_vm1, %v83_v17 }
 0x196   :  { %v422_v18 = vpop.f32.mrf.mxu0 }
 0x197   :  { %v423_v21 = vadd.f32 %v9467_v34, %v422_v18 }
 0x199   :  { %v528_v22 = vmax.f32 %v417_v20, %v423_v21  ;;  %6363 = vmatmul.msk.f32.gmra.mxu0 %vm106_vm1, %v84_v19 }
 0x19b   :  { %561 = vst.msk [vmem:[#allocation3 + $0x80] sm:$0xff] %vm544_vm2, %v528_v22 }
 0x19e   :  { %v425_v23 = vpop.f32.mrf.mxu0 }
 0x19f   :  { %v426_v26 = vadd.f32 %v9467_v34, %v425_v23  ;;  %v89_v23 = vld [vmem:[%s13899_s0 + $0x1b8] sm:$0xff] }
 0x1a1   :  { %v529_v32 = vmax.f32 %v420_v25, %v426_v26  ;;  %6364 = vmatmul.msk.f32.gmra.mxu0 %vm106_vm1, %v85_v24 }
 0x1a3   :  { %562 = vst.msk [vmem:[#allocation3 + $0x88] sm:$0xff] %vm544_vm2, %v529_v32 }
 0x1a6   :  { %v428_v33 = vpop.f32.mrf.mxu0 }
 0x1a7   :  { %v429_v59 = vadd.f32 %v9467_v34, %v428_v33 }
 0x1a9   :  { %6365 = vmatmul.msk.f32.gmra.mxu0 %vm106_vm1, %v86_v35 }
 0x1aa   :  { %v593_v43 = vld [vmem:[#allocation3 + $0x80] ss:$2 sm:$0xff]  ;;  %v625_v47 = vld [vmem:[#allocation3 + $0x81] ss:$2 sm:$0xff] }
 0x1ab   :  { %v648_v48 = vmax.f32 %v593_v43, %v625_v47  ;;  %v90_v43 = vld [vmem:[%s13899_s0 + $0x1c0] sm:$0xff] }
 0x1ad   :  { %v664_v49 = vmax.f32 %v648_v48, 0.0 }
 0x1ae   :  { %v431_v50 = vpop.f32.mrf.mxu0 }
 0x1af   :  { %722 = vst.msk [vmem:[#allocation2 + $0xb1] sm:$0xff] %vm544_vm2, %v664_v49  ;;  %v432_v24 = vadd.f32 %v9467_v34, %v431_v50 }
 0x1b1   :  { %6366 = vmatmul.msk.f32.gmra.mxu0 %vm106_vm1, %v87_v52 }
 0x1b6   :  { %v434_v61 = vpop.f32.mrf.mxu0  ;;  %v9851_v62 = vld [vmem:[#allocation2 + $0xb1] sm:$0xff]  ;;  %v862_v19 = vpop.f32.mrf.mxu1 }
 0x1b7   :  { %v9853_v63 = vld [vmem:[#allocation2 + $0xb0] sm:$0xff]  ;;  %v435_v14 = vadd.f32 %v9467_v34, %v434_v61  ;;  %v782_v15 = vpack.c.bf16 %v9851_v62, %v770_v53  ;;  %v91_v53 = vld [vmem:[%s13899_s0 + $0x1c8] sm:$0xff] }
 0x1b8   :  { %v9855_v3 = vld [vmem:[#allocation2 + $0xb2] sm:$0xff]  ;;  %v750_v16 = vpack.c.bf16 %v9853_v63, %v738_v54 }
 0x1b9   :  { %v1009_v17 = vpack.c.bf16 %v9855_v3, %v997_v55  ;;  %v530_v18 = vmax.f32 %v429_v59, %v435_v14  ;;  %6367 = vmatmul.msk.f32.gmra.mxu0 %vm106_vm1, %v88_v58  ;;  %6405 = vmatmul.msk.bf16.gmra.mxu1 %vm544_vm2, %v782_v15  ;;  %v92_v54 = vld [vmem:[%s13899_s0 + $0x1d0] sm:$0xff] }
 0x1ba   :  { %6429 = vmatmul.msk.bf16.gmra.mxu2 %vm544_vm2, %v750_v16 }
 0x1bb   :  { %6461 = vmatmul.msk.bf16.gmra.mxu3 %vm544_vm2, %v1009_v17  ;;  %563 = vst.msk [vmem:[#allocation3 + $0x90] sm:$0xff] %vm544_vm2, %v530_v18 }
 0x1bd   :  { %v959_v20 = vpop.f32.mrf.mxu2 }
 0x1be   :  { %v960_v21 = vadd.f32 %v959_v20, %v862_v19  ;;  %v437_v22 = vpop.f32.mrf.mxu0  ;;  %v1089_v25 = vpop.f32.mrf.mxu3 }
 0x1bf   :  { %v438_v26 = vadd.f32 %v9467_v34, %v437_v22 }
 0x1c0   :  { %v9873_v32 = vadd.f32 %v1089_v25, %v960_v21  ;;  %v93_v21 = vld [vmem:[%s13899_s0 + $0x1d8] sm:$0xff] }
 0x1c1   :  { %v531_v33 = vmax.f32 %v432_v24, %v438_v26  ;;  %6368 = vmatmul.msk.f32.gmra.mxu0 %vm106_vm1, %v89_v23  ;;  %v94_v26 = vld [vmem:[%s13899_s0 + $0x1e0] sm:$0xff] }
 0x1c2   :  { %13918 = vst [vmem:[#allocation9_spill] sm:$0xff] %v9873_v32  ;;  %v1427_v32 = vld [vmem:[#allocation2 + $0x12] sm:$0xff] }
 0x1c3   :  { %564 = vst.msk [vmem:[#allocation3 + $0x98] sm:$0xff] %vm544_vm2, %v531_v33 }
 0x1c6   :  { %v440_v35 = vpop.f32.mrf.mxu0 }
 0x1c7   :  { %v441_v55 = vadd.f32 %v9467_v34, %v440_v35 }
 0x1c9   :  { %6369 = vmatmul.msk.f32.gmra.mxu0 %vm106_vm1, %v90_v43 }
 0x1ca   :  { %v595_v47 = vld [vmem:[#allocation3 + $0x90] ss:$2 sm:$0xff]  ;;  %v627_v48 = vld [vmem:[#allocation3 + $0x91] ss:$2 sm:$0xff] }
 0x1cb   :  { %v649_v49 = vmax.f32 %v595_v47, %v627_v48 }
 0x1cd   :  { %v665_v50 = vmax.f32 %v649_v49, 0.0  ;;  %v95_v49 = vld [vmem:[%s13899_s0 + $0x1e8] sm:$0xff] }
 0x1ce   :  { %v443_v52 = vpop.f32.mrf.mxu0 }
 0x1cf   :  { %723 = vst.msk [vmem:[#allocation2 + $0xc1] sm:$0xff] %vm544_vm2, %v665_v50  ;;  %v444_v22 = vadd.f32 %v9467_v34, %v443_v52  ;;  %v9921_v50 = vpop.f32.mrf.mxu1  ;;  %v9923_v52 = vpop.f32.mrf.mxu2 }
 0x1d0   :  { %13919 = vst [vmem:[#allocation10_spill] sm:$0xff] %v9921_v50 }
 0x1d1   :  { %6370 = vmatmul.msk.f32.gmra.mxu0 %vm106_vm1, %v91_v53  ;;  %13920 = vst [vmem:[#allocation11_spill] sm:$0xff] %v9923_v52  ;;  %v96_v53 = vld [vmem:[%s13899_s0 + $0x1f0] sm:$0xff] }
 0x1d6   :  { %v446_v58 = vpop.f32.mrf.mxu0  ;;  %v9890_v59 = vld [vmem:[#allocation2 + $0xc1] sm:$0xff] }
 0x1d7   :  { %v9892_v61 = vld [vmem:[#allocation2 + $0xc0] sm:$0xff]  ;;  %v447_v15 = vadd.f32 %v9467_v34, %v446_v58 }
 0x1d8   :  { %v9894_v14 = vld [vmem:[#allocation2 + $0xc2] sm:$0xff] }
 0x1d9   :  { %v532_v19 = vmax.f32 %v441_v55, %v447_v15  ;;  %6371 = vmatmul.msk.f32.gmra.mxu0 %vm106_vm1, %v92_v54 }
 0x1db   :  { %565 = vst.msk [vmem:[#allocation3 + $0xa0] sm:$0xff] %vm544_vm2, %v532_v19 }
 0x1de   :  { %v449_v20 = vpop.f32.mrf.mxu0 }
 0x1df   :  { %v450_v23 = vadd.f32 %v9467_v34, %v449_v20  ;;  %v9935_v20 = vpop.f32.mrf.mxu3 }
 0x1e0   :  { %13921 = vst [vmem:[#allocation12_spill] sm:$0xff] %v9935_v20 }
 0x1e1   :  { %v533_v24 = vmax.f32 %v444_v22, %v450_v23  ;;  %6372 = vmatmul.msk.f32.gmra.mxu0 %vm106_vm1, %v93_v21 }
 0x1e3   :  { %566 = vst.msk [vmem:[#allocation3 + $0xa8] sm:$0xff] %vm544_vm2, %v533_v24 }
 0x1e6   :  { %v452_v25 = vpop.f32.mrf.mxu0 }
 0x1e7   :  { %v453_v54 = vadd.f32 %v9467_v34, %v452_v25 }
 0x1e9   :  { %6373 = vmatmul.msk.f32.gmra.mxu0 %vm106_vm1, %v94_v26 }
 0x1ea   :  { %v597_v33 = vld [vmem:[#allocation3 + $0xa0] ss:$2 sm:$0xff]  ;;  %v629_v35 = vld [vmem:[#allocation3 + $0xa1] ss:$2 sm:$0xff] }
 0x1eb   :  { %v650_v43 = vmax.f32 %v597_v33, %v629_v35 }
 0x1ed   :  { %v666_v47 = vmax.f32 %v650_v43, 0.0 }
 0x1ee   :  { %v455_v48 = vpop.f32.mrf.mxu0 }
 0x1ef   :  { %724 = vst.msk [vmem:[#allocation2 + $0xd1] sm:$0xff] %vm544_vm2, %v666_v47  ;;  %v97_v47 = vld [vmem:[%s13899_s0 + $0x1f8] sm:$0xff]  ;;  %s6303_s0 = sshll.u32 %s13908_s9, 4  ;;  %s6304_s0 = int_to_ptr.hbm [resolvable:$true] %s6303_s0 }
 0x1f1   :  { %6374 = vmatmul.msk.f32.gmra.mxu0 %vm106_vm1, %v95_v49  ;;  %v456_v49 = vadd.f32 %v9467_v34, %v455_v48 }
 0x1f6   :  { %v458_v55 = vpop.f32.mrf.mxu0  ;;  %v9929_v58 = vld [vmem:[#allocation2 + $0xd1] sm:$0xff]  ;;  %v867_v26 = vpop.f32.mrf.mxu1 }
 0x1f7   :  { %v9931_v15 = vld [vmem:[#allocation2 + $0xd0] sm:$0xff]  ;;  %v459_v21 = vadd.f32 %v9467_v34, %v458_v55  ;;  %v9940_v22 = vpack.c.bf16 %v9929_v58, %v9890_v59 }
 0x1f8   :  { %v9933_v19 = vld [vmem:[#allocation2 + $0xd2] sm:$0xff]  ;;  %v9944_v23 = vpack.c.bf16 %v9931_v15, %v9892_v61 }
 0x1f9   :  { %13922 = vst [vmem:[#allocation13_spill] sm:$0xff] %v9940_v22  ;;  %v9948_v24 = vpack.c.bf16 %v9933_v19, %v9894_v14  ;;  %v534_v25 = vmax.f32 %v453_v54, %v459_v21  ;;  %6375 = vmatmul.msk.f32.gmra.mxu0 %vm106_vm1, %v96_v53  ;;  %6406 = vmatmul.msk.bf16.gmra.mxu1 %vm544_vm2, %v9940_v22 }
 0x1fa   :  { %13923 = vst [vmem:[#allocation14_spill] sm:$0xff] %v9944_v23  ;;  %6430 = vmatmul.msk.bf16.gmra.mxu2 %vm544_vm2, %v9944_v23 }
 0x1fb   :  { %13924 = vst [vmem:[#allocation15_spill] sm:$0xff] %v9948_v24  ;;  %6462 = vmatmul.msk.bf16.gmra.mxu3 %vm544_vm2, %v9948_v24 }
 0x1fc   :  { %567 = vst.msk [vmem:[#allocation3 + $0xb0] sm:$0xff] %vm544_vm2, %v534_v25 }
 0x1fd   :  { %v964_v33 = vpop.f32.mrf.mxu2 }
 0x1fe   :  { %v965_v35 = vadd.f32 %v964_v33, %v867_v26  ;;  %v461_v43 = vpop.f32.mrf.mxu0  ;;  %v1094_v53 = vpop.f32.mrf.mxu3 }
 0x1ff   :  { %v462_v54 = vadd.f32 %v9467_v34, %v461_v43 }
 0x200   :  { %v9963_v55 = vadd.f32 %v1094_v53, %v965_v35 }
 0x201   :  { %v535_v21 = vmax.f32 %v456_v49, %v462_v54  ;;  %6376 = vmatmul.msk.f32.gmra.mxu0 %vm106_vm1, %v97_v47 }
 0x202   :  { %13925 = vst [vmem:[#allocation16_spill] sm:$0xff] %v9963_v55 }
 0x203   :  { %568 = vst.msk [vmem:[#allocation3 + $0xb8] sm:$0xff] %vm544_vm2, %v535_v21 }
 0x206   :  { %v464_v25 = vpop.f32.mrf.mxu0 }
 0x207   :  { %v465_v48 = vadd.f32 %v9467_v34, %v464_v25 }
 0x20a   :  { %v599_v18 = vld [vmem:[#allocation3 + $0xb0] ss:$2 sm:$0xff]  ;;  %v631_v26 = vld [vmem:[#allocation3 + $0xb1] ss:$2 sm:$0xff] }
 0x20b   :  { %v651_v33 = vmax.f32 %v599_v18, %v631_v26 }
 0x20d   :  { %v667_v17 = vmax.f32 %v651_v33, 0.0 }
 0x20e   :  { %v467_v16 = vpop.f32.mrf.mxu0 }
 0x20f   :  { %725 = vst.msk [vmem:[#allocation2 + $0xe1] sm:$0xff] %vm544_vm2, %v667_v17  ;;  %v468_v21 = vadd.f32 %v9467_v34, %v467_v16  ;;  %v9987_v17 = vpop.f32.mrf.mxu1 }
 0x210   :  { %13926 = vst [vmem:[#allocation17_spill] sm:$0xff] %v9987_v17 }
 0x216   :  { %v470_v12 = vpop.f32.mrf.mxu0  ;;  %v9969_v11 = vld [vmem:[#allocation2 + $0xe1] sm:$0xff] }
 0x217   :  { %v9971_v35 = vld [vmem:[#allocation2 + $0xe0] sm:$0xff]  ;;  %v471_v47 = vadd.f32 %v9467_v34, %v470_v12 }
 0x218   :  { %v9973_v43 = vld [vmem:[#allocation2 + $0xe2] sm:$0xff] }
 0x219   :  { %v536_v53 = vmax.f32 %v465_v48, %v471_v47  ;;  %v9989_v48 = vpop.f32.mrf.mxu2 }
 0x21a   :  { %13927 = vst [vmem:[#allocation18_spill] sm:$0xff] %v9989_v48 }
 0x21b   :  { %569 = vst.msk [vmem:[#allocation3 + $0xc0] sm:$0xff] %vm544_vm2, %v536_v53 }
 0x21e   :  { %v473_v54 = vpop.f32.mrf.mxu0 }
 0x21f   :  { %v474_v25 = vadd.f32 %v9467_v34, %v473_v54 }
 0x221   :  { %v537_v26 = vmax.f32 %v468_v21, %v474_v25  ;;  %v9998_v25 = vpop.f32.mrf.mxu3 }
 0x222   :  { %13928 = vst [vmem:[#allocation19_spill] sm:$0xff] %v9998_v25 }
 0x223   :  { %570 = vst.msk [vmem:[#allocation3 + $0xc8] sm:$0xff] %vm544_vm2, %v537_v26 }
 0x226   :  { %v476_v12 = vpop.f32.mrf.mxu0 }
 0x227   :  { %v477_v47 = vadd.f32 %v9467_v34, %v476_v12 }
 0x22a   :  { %v601_v33 = vld [vmem:[#allocation3 + $0xc0] ss:$2 sm:$0xff]  ;;  %v633_v49 = vld [vmem:[#allocation3 + $0xc1] ss:$2 sm:$0xff] }
 0x22b   :  { %v652_v7 = vmax.f32 %v601_v33, %v633_v49 }
 0x22d   :  { %v668_v10 = vmax.f32 %v652_v7, 0.0 }
 0x22e   :  { %v479_v18 = vpop.f32.mrf.mxu0 }
 0x22f   :  { %726 = vst.msk [vmem:[#allocation2 + $0xf1] sm:$0xff] %vm544_vm2, %v668_v10  ;;  %v480_v24 = vadd.f32 %v9467_v34, %v479_v18 }
 0x236   :  { %v482_v16 = vpop.f32.mrf.mxu0  ;;  %v9992_v53 = vld [vmem:[#allocation2 + $0xf1] sm:$0xff]  ;;  %v872_v33 = vpop.f32.mrf.mxu1 }
 0x237   :  { %v9994_v54 = vld [vmem:[#allocation2 + $0xf0] sm:$0xff]  ;;  %v483_v7 = vadd.f32 %v9467_v34, %v482_v16  ;;  %v10003_v10 = vpack.c.bf16 %v9992_v53, %v9969_v11 }
 0x238   :  { %v9996_v21 = vld [vmem:[#allocation2 + $0xf2] sm:$0xff]  ;;  %v10007_v49 = vpack.c.bf16 %v9994_v54, %v9971_v35 }
 0x239   :  { %13929 = vst [vmem:[#allocation20_spill] sm:$0xff] %v10003_v10  ;;  %v10011_v26 = vpack.c.bf16 %v9996_v21, %v9973_v43  ;;  %v538_v12 = vmax.f32 %v477_v47, %v483_v7  ;;  %6407 = vmatmul.msk.bf16.gmra.mxu1 %vm544_vm2, %v10003_v10 }
 0x23a   :  { %13930 = vst [vmem:[#allocation21_spill] sm:$0xff] %v10007_v49  ;;  %6431 = vmatmul.msk.bf16.gmra.mxu2 %vm544_vm2, %v10007_v49 }
 0x23b   :  { %13931 = vst [vmem:[#allocation22_spill] sm:$0xff] %v10011_v26  ;;  %6463 = vmatmul.msk.bf16.gmra.mxu3 %vm544_vm2, %v10011_v26 }
 0x23c   :  { %571 = vst.msk [vmem:[#allocation3 + $0xd0] sm:$0xff] %vm544_vm2, %v538_v12 }
 0x23d   :  { %v969_v16 = vpop.f32.mrf.mxu2 }
 0x23e   :  { %v970_v9 = vadd.f32 %v969_v16, %v872_v33  ;;  %v485_v8 = vpop.f32.mrf.mxu0  ;;  %v1099_v22 = vpop.f32.mrf.mxu3 }
 0x23f   :  { %v486_v47 = vadd.f32 %v9467_v34, %v485_v8 }
 0x240   :  { %v10022_v7 = vadd.f32 %v1099_v22, %v970_v9 }
 0x241   :  { %v539_v10 = vmax.f32 %v480_v24, %v486_v47  ;;  %v8727_v47 = vld [vmem:[%s13902_s3 + $0xb0] sm:$0xff]  ;;  %v8726_v24 = vld [vmem:[%s13902_s3 + $0xa8] sm:$0xff] }
 0x242   :  { %13932 = vst [vmem:[#allocation23_spill] sm:$0xff] %v10022_v7 }
 0x243   :  { %572 = vst.msk [vmem:[#allocation3 + $0xd8] sm:$0xff] %vm544_vm2, %v539_v10  ;;  %v8724_v10 = vld [vmem:[%s13902_s3 + $0x98] sm:$0xff] }
 0x244   :  { %1366 = vmatpush.bf16.msrb.mxu2 %v8724_v10  ;;  %v8718_v10 = vld [vmem:[%s13902_s3 + $0x68] sm:$0xff] }
 0x246   :  { %v488_v49 = vpop.f32.mrf.mxu0 }
 0x247   :  { %v489_v33 = vadd.f32 %v9467_v34, %v488_v49  ;;  %v8719_v49 = vld [vmem:[%s13902_s3 + $0x70] sm:$0xff] }
 0x24a   :  { %v603_v23 = vld [vmem:[#allocation3 + $0xd0] ss:$2 sm:$0xff]  ;;  %v635_v25 = vld [vmem:[#allocation3 + $0xd1] ss:$2 sm:$0xff] }
 0x24b   :  { %v653_v26 = vmax.f32 %v603_v23, %v635_v25  ;;  %v8720_v25 = vld [vmem:[%s13902_s3 + $0x78] sm:$0xff] }
 0x24c   :  { %1220 = vmatpush.bf16.msrb.mxu1 %v8720_v25 }
 0x24d   :  { %v669_v48 = vmax.f32 %v653_v26, 0.0  ;;  %v8723_v26 = vld [vmem:[%s13902_s3 + $0x90] sm:$0xff] }
 0x24e   :  { %v491_v12 = vpop.f32.mrf.mxu0  ;;  %1367 = vmatpush.bf16.msrb.mxu2 %v8723_v26  ;;  %v8725_v26 = vld [vmem:[%s13902_s3 + $0xa0] sm:$0xff] }
 0x24f   :  { %727 = vst.msk [vmem:[#allocation2 + $0x101] sm:$0xff] %vm544_vm2, %v669_v48 }
 0x250   :  { %1221 = vmatpush.bf16.msrb.mxu1 %v8719_v49  ;;  %v8721_v49 = vld [vmem:[%s13902_s3 + $0x80] sm:$0xff] }
 0x254   :  { %1222 = vmatpush.bf16.msrb.mxu1 %v8718_v10  ;;  %v10082_v10 = vpop.f32.mrf.mxu1 }
 0x255   :  { %13933 = vst [vmem:[#allocation24_spill] sm:$0xff] %v10082_v10 }
 0x256   :  { %v494_v16 = vpop.f32.mrf.mxu0  ;;  %v10027_v18 = vld [vmem:[#allocation2 + $0x101] sm:$0xff] }
 0x257   :  { %v10029_v17 = vld [vmem:[#allocation2 + $0x100] sm:$0xff]  ;;  %v495_v9 = vadd.f32 %v9467_v34, %v494_v16  ;;  %v8728_v34 = vld [vmem:[%s13902_s3 + $0xb8] sm:$0xff] }
 0x258   :  { %v10031_v8 = vld [vmem:[#allocation2 + $0x102] sm:$0xff]  ;;  %1512 = vmatpush.bf16.msrb.mxu3 %v8728_v34  ;;  %v9262_v16 = vld [vmem:[%s13901_s2] ss:$0 sm:$0xff] }
 0x259   :  { %v540_v48 = vmax.f32 %v489_v33, %v495_v9  ;;  %v492_v9 = vadd.f32 %v9262_v16, %v491_v12  ;;  %v8722_v34 = vld [vmem:[%s13902_s3 + $0x88] sm:$0xff]  ;;  %v8717_v12 = vld [vmem:[%s13902_s3 + $0x60] sm:$0xff] }
 0x25a   :  { %1368 = vmatpush.bf16.msrb.mxu2 %v8722_v34  ;;  %1223 = vmatpush.bf16.msrb.mxu1 %v8717_v12  ;;  %v10084_v34 = vpop.f32.mrf.mxu2 }
 0x25b   :  { %573 = vst.msk [vmem:[#allocation3 + $0xe0] sm:$0xff] %vm544_vm2, %v540_v48 }
 0x25c   :  { %1513 = vmatpush.bf16.msrb.mxu3 %v8727_v47  ;;  %13934 = vst [vmem:[#allocation25_spill] sm:$0xff] %v10084_v34 }
 0x25e   :  { %v497_v33 = vpop.f32.mrf.mxu0  ;;  %1369 = vmatpush.bf16.msrb.mxu2 %v8721_v49  ;;  %v10092_v49 = vpop.f32.mrf.mxu3 }
 0x25f   :  { %v498_v48 = vadd.f32 %v9262_v16, %v497_v33  ;;  %13935 = vst [vmem:[#allocation26_spill] sm:$0xff] %v10092_v49 }
 0x260   :  { %1514 = vmatpush.bf16.msrb.mxu3 %v8726_v24 }
 0x261   :  { %v541_v25 = vmax.f32 %v492_v9, %v498_v48 }
 0x263   :  { %574 = vst.msk [vmem:[#allocation3 + $0xe8] sm:$0xff] %vm544_vm2, %v541_v25 }
 0x264   :  { %1515 = vmatpush.bf16.msrb.mxu3 %v8725_v26 }
 0x266   :  { %v500_v47 = vpop.f32.mrf.mxu0 }
 0x267   :  { %v501_v23 = vadd.f32 %v9262_v16, %v500_v47 }
 0x26a   :  { %v605_v33 = vld [vmem:[#allocation3 + $0xe0] ss:$2 sm:$0xff]  ;;  %v637_v9 = vld [vmem:[#allocation3 + $0xe1] ss:$2 sm:$0xff] }
 0x26b   :  { %v654_v48 = vmax.f32 %v605_v33, %v637_v9 }
 0x26d   :  { %v670_v24 = vmax.f32 %v654_v48, 0.0 }
 0x26e   :  { %v503_v25 = vpop.f32.mrf.mxu0 }
 0x26f   :  { %728 = vst.msk [vmem:[#allocation2 + $0x111] sm:$0xff] %vm544_vm2, %v670_v24 }
 0x276   :  { %v506_v22 = vpop.f32.mrf.mxu0  ;;  %v10086_v7 = vld [vmem:[#allocation2 + $0x111] sm:$0xff]  ;;  %v877_v24 = vpop.f32.mrf.mxu1 }
 0x277   :  { %v10088_v55 = vld [vmem:[#allocation2 + $0x110] sm:$0xff]  ;;  %v507_v26 = vadd.f32 %v9262_v16, %v506_v22  ;;  %v10096_v33 = vpack.c.bf16 %v10086_v7, %v10027_v18  ;;  %v504_v22 = vadd.f32 %v9262_v16, %v503_v25  ;;  %v1443_v25 = vpack.c.bf16 %v9627_v41, %v1427_v32 }
 0x278   :  { %v10090_v12 = vld [vmem:[#allocation2 + $0x112] sm:$0xff]  ;;  %v10100_v9 = vpack.c.bf16 %v10088_v55, %v10029_v17  ;;  %v13941_v41 = vpack.c.bf16 %v9672_v6, %v9634_v46  ;;  %v13942_v32 = vpack.c.bf16 %v9745_v1, %v9705_v29  ;;  %v10153_v6 = vld [vmem:[#allocation2 + $0x81] sm:$0xff] }
 0x279   :  { %13936 = vst [vmem:[#allocation27_spill] sm:$0xff] %v10096_v33  ;;  %v10104_v47 = vpack.c.bf16 %v10090_v12, %v10031_v8  ;;  %v542_v48 = vmax.f32 %v501_v23, %v507_v26  ;;  %6408 = vmatmul.msk.bf16.gmra.mxu1 %vm544_vm2, %v10096_v33  ;;  %v1135_v26 = vld [vmem:[#allocation2 + $0x10] sm:$0xff]  ;;  %v10155_v29 = vld [vmem:[#allocation2 + $0x82] sm:$0xff] }
 0x27a   :  { %13937 = vst [vmem:[#allocation28_spill] sm:$0xff] %v10100_v9  ;;  %6432 = vmatmul.msk.bf16.gmra.mxu2 %vm544_vm2, %v10100_v9  ;;  %v1281_v33 = vld [vmem:[#allocation2 + $0x11] sm:$0xff]  ;;  %v1151_v9 = vpack.c.bf16 %v9625_v40, %v1135_v26  ;;  %v13939_v40 = vpack.c.bf16 %v9670_v5, %v9632_v45  ;;  %v13943_v45 = vpack.c.bf16 %v9743_v0, %v9703_v28  ;;  %v10151_v5 = vld [vmem:[#allocation2 + $0x80] sm:$0xff] }
 0x27b   :  { %13938 = vst [vmem:[#allocation29_spill] sm:$0xff] %v10104_v47  ;;  %6464 = vmatmul.msk.bf16.gmra.mxu3 %vm544_vm2, %v10104_v47  ;;  %v1297_v47 = vpack.c.bf16 %v9620_v38, %v1281_v33  ;;  %v13940_v38 = vpack.c.bf16 %v9668_v4, %v9630_v44  ;;  %v13944_v44 = vpack.c.bf16 %v9747_v2, %v9707_v30  ;;  %v8737_v26 = vld [vmem:[%s13902_s3 + $0x100] sm:$0xff] }
 0x27c   :  { %575 = vst.msk [vmem:[#allocation3 + $0xf0] sm:$0xff] %vm544_vm2, %v542_v48  ;;  %v1154_v28 = vpack.c.bf16 %v10151_v5, %v9784_v37  ;;  %v1300_v30 = vpack.c.bf16 %v10153_v6, %v9782_v36  ;;  %v1446_v0 = vpack.c.bf16 %v10155_v29, %v9786_v39  ;;  %v13945_v37 = vpack.c.bf16 %v9892_v61, %v9853_v63  ;;  %v8734_v48 = vld [vmem:[%s13902_s3 + $0xe8] sm:$0xff] }
 0x27d   :  { %v974_v49 = vpop.f32.mrf.mxu2  ;;  %v13946_v36 = vpack.c.bf16 %v9890_v59, %v9851_v62  ;;  %v13947_v39 = vpack.c.bf16 %v9894_v14, %v9855_v3  ;;  %v13949_v63 = vpack.c.bf16 %v9969_v11, %v9929_v58  ;;  %v8732_v62 = vld [vmem:[%s13902_s3 + $0xd8] sm:$0xff]  ;;  %v13950_v61 = vpack.c.bf16 %v9973_v43, %v9933_v19  ;;  %v8731_v11 = vld [vmem:[%s13902_s3 + $0xd0] sm:$0xff] }
 0x27e   :  { %v975_v34 = vadd.f32 %v974_v49, %v877_v24  ;;  %v509_v10 = vpop.f32.mrf.mxu0  ;;  %v1104_v20 = vpop.f32.mrf.mxu3  ;;  %v8736_v3 = vld [vmem:[%s13902_s3 + $0xf8] sm:$0xff]  ;;  %1659 = vmatpush.bf16.msra.mxu1 %v8732_v62  ;;  %v8735_v14 = vld [vmem:[%s13902_s3 + $0xf0] sm:$0xff]  ;;  %v8729_v24 = vld [vmem:[%s13902_s3 + $0xc0] sm:$0xff] }
 0x27f   :  { %v510_v52 = vadd.f32 %v9262_v16, %v509_v10  ;;  %v10147_v4 = vpop.f32.mrf.mxu1  ;;  %v8740_v59 = vld [vmem:[%s13902_s3 + $0x118] sm:$0xff]  ;;  %1805 = vmatpush.bf16.msra.mxu2 %v8736_v3  ;;  %v8739_v58 = vld [vmem:[%s13902_s3 + $0x110] sm:$0xff] }
 0x280   :  { %v10113_v50 = vadd.f32 %v1104_v20, %v975_v34  ;;  %1951 = vmatpush.bf16.msra.mxu3 %v8740_v59  ;;  %v9155_v19 = vld [vmem:[%s13904_s5 + $0xcec] sm:$0xf0]  ;;  %v952_v59 = vadd.f32 %v9776_v31, %v9774_v27 }
 0x281   :  { %v543_v23 = vmax.f32 %v504_v22, %v510_v52  ;;  %v8738_v22 = vld [vmem:[%s13902_s3 + $0x108] sm:$0xff] }
 0x282   :  { %1660 = vmatpush.bf16.msra.mxu1 %v8731_v11 }
 0x283   :  { %576 = vst.msk [vmem:[#allocation3 + $0xf8] sm:$0xff] %vm544_vm2, %v543_v23  ;;  %1806 = vmatpush.bf16.msra.mxu2 %v8735_v14  ;;  %v8733_v23 = vld [vmem:[%s13902_s3 + $0xe0] sm:$0xff] }
 0x284   :  { %1952 = vmatpush.bf16.msra.mxu3 %v8739_v58 }
 0x285   :  { %v10149_v46 = vpop.f32.mrf.mxu2 }
 0x286   :  { %v10157_v1 = vpop.f32.mrf.mxu3 }
 0x287   :  { %1807 = vmatpush.bf16.msra.mxu2 %v8734_v48 }
 0x288   :  { %1953 = vmatpush.bf16.msra.mxu3 %v8738_v22 }
 0x289   :  { %6489 = vmatmul.msk.bf16.vlgmr.msrb.gmra.mxu1 %vm544_vm2, %v1151_v9 }
 0x28a   :  { %6521 = vmatmul.msk.bf16.vlgmr.msrb.gmra.mxu2 %vm544_vm2, %v1297_v47  ;;  %v607_v49 = vld [vmem:[#allocation3 + $0xf0] ss:$2 sm:$0xff]  ;;  %v639_v16 = vld [vmem:[#allocation3 + $0xf1] ss:$2 sm:$0xff]  ;;  %v13948_v47 = vpack.c.bf16 %v9971_v35, %v9931_v15  ;;  %v8307_v15 = vld [vmem:[%s13904_s5 + $0xce0] sm:$0xf] }
 0x28b   :  { %6553 = vmatmul.msk.bf16.vlgmr.msrb.gmra.mxu3 %vm544_vm2, %v1443_v25  ;;  %v655_v52 = vmax.f32 %v607_v49, %v639_v16  ;;  %v8730_v35 = vld [vmem:[%s13902_s3 + $0xc8] sm:$0xff]  ;;  %v8308_v43 = vor.u32 %v9155_v19, %v8307_v15  ;;  %1808 = vmatpush.bf16.msra.mxu2 %v8733_v23  ;;  %v13951_v25 = vpack.c.bf16 %v10029_v17, %v9994_v54 }
 0x28c   :  { %1661 = vmatpush.bf16.msra.mxu1 %v8730_v35  ;;  %1954 = vmatpush.bf16.msra.mxu3 %v8737_v26  ;;  %v13952_v49 = vpack.c.bf16 %v10027_v18, %v9992_v53  ;;  %v13953_v16 = vpack.c.bf16 %v10031_v8, %v9996_v21  ;;  %v1577_v35 = vld [vmem:[#allocation2 + $0x50] sm:$0xff]  ;;  %v1576_v26 = vld [vmem:[#allocation2 + $0x40] sm:$0xff] }
 0x28d   :  { %v671_v20 = vmax.f32 %v655_v52, 0.0  ;;  %5442 = vmatpush.bf16.msrb.mxu0 %v8308_v43  ;;  %v1723_v43 = vld [vmem:[#allocation2 + $0x51] sm:$0xff]  ;;  %v1591_v31 = vpack.c.bf16 %v1577_v35, %v1576_v26 }
 0x28e   :  { %v1581_v26 = vld [vmem:[#allocation2 + $0x90] sm:$0xff] }
 0x28f   :  { %729 = vst.msk [vmem:[#allocation2 + $0x121] sm:$0xff] %vm544_vm2, %v671_v20 }
 0x290   :  { %1662 = vmatpush.bf16.msra.mxu1 %v8729_v24  ;;  %v1869_v24 = vld [vmem:[#allocation2 + $0x52] sm:$0xff] }
 0x296   :  { %v10258_v54 = vld [vmem:[#allocation2 + $0x122] sm:$0xff] }
 0x297   :  { %v1450_v8 = vpack.c.bf16 %v10258_v54, %v10090_v12  ;;  %v1574_v12 = vld [vmem:[#allocation2 + $0x20] sm:$0xff] }
 0x299   :  { %6490 = vmatmul.msk.bf16.gmra.mxu1 %vm544_vm2, %v13939_v40  ;;  %v10252_v40 = vld [vmem:[#allocation2 + $0x120] sm:$0xff] }
 0x29a   :  { %6522 = vmatmul.msk.bf16.gmra.mxu2 %vm544_vm2, %v13940_v38  ;;  %v10254_v38 = vld [vmem:[#allocation2 + $0x121] sm:$0xff]  ;;  %v1158_v18 = vpack.c.bf16 %v10252_v40, %v10088_v55  ;;  %v1575_v55 = vld [vmem:[#allocation2 + $0x30] sm:$0xff] }
 0x29b   :  { %6554 = vmatmul.msk.bf16.gmra.mxu3 %vm544_vm2, %v13941_v41  ;;  %v1304_v21 = vpack.c.bf16 %v10254_v38, %v10086_v7 }
 0x2a9   :  { %6491 = vmatmul.msk.bf16.gmra.mxu1 %vm544_vm2, %v13942_v32 }
 0x2aa   :  { %6523 = vmatmul.msk.bf16.gmra.mxu2 %vm544_vm2, %v13943_v45 }
 0x2ab   :  { %6555 = vmatmul.msk.bf16.gmra.mxu3 %vm544_vm2, %v13944_v44 }
 0x2b6   :  { %v882_v2 = vpop.f32.mrf.mxu1 }
 0x2b9   :  { %6492 = vmatmul.msk.bf16.gmra.mxu1 %vm544_vm2, %v1154_v28 }
 0x2ba   :  { %6524 = vmatmul.msk.bf16.gmra.mxu2 %vm544_vm2, %v1300_v30 }
 0x2bb   :  { %6556 = vmatmul.msk.bf16.gmra.mxu3 %vm544_vm2, %v1446_v0  ;;  %v1721_v0 = vld [vmem:[#allocation2 + $0x31] sm:$0xff] }
 0x2bd   :  { %v979_v10 = vpop.f32.mrf.mxu2 }
 0x2be   :  { %v980_v34 = vadd.f32 %v979_v10, %v882_v2  ;;  %v1109_v33 = vpop.f32.mrf.mxu3  ;;  %v10248_v52 = vpop.f32.mrf.mxu1  ;;  %v1867_v10 = vld [vmem:[#allocation2 + $0x32] sm:$0xff] }
 0x2c0   :  { %v10168_v9 = vadd.f32 %v1109_v33, %v980_v34  ;;  %v1720_v33 = vld [vmem:[#allocation2 + $0x21] sm:$0xff] }
 0x2c5   :  { %v10250_v20 = vpop.f32.mrf.mxu2 }
 0x2c6   :  { %v10256_v17 = vpop.f32.mrf.mxu3 }
 0x2c9   :  { %6493 = vmatmul.msk.bf16.gmra.mxu1 %vm544_vm2, %v13945_v37 }
 0x2ca   :  { %6525 = vmatmul.msk.bf16.gmra.mxu2 %vm544_vm2, %v13946_v36 }
 0x2cb   :  { %6557 = vmatmul.msk.bf16.gmra.mxu3 %vm544_vm2, %v13947_v39  ;;  %v1590_v39 = vpack.c.bf16 %v1575_v55, %v1574_v12 }
 0x2d9   :  { %6494 = vmatmul.msk.bf16.gmra.mxu1 %vm544_vm2, %v13948_v47  ;;  %v1736_v47 = vpack.c.bf16 %v1721_v0, %v1720_v33  ;;  %v1578_v33 = vld [vmem:[#allocation2 + $0x60] sm:$0xff] }
 0x2da   :  { %6526 = vmatmul.msk.bf16.gmra.mxu2 %vm544_vm2, %v13949_v63  ;;  %v1866_v63 = vld [vmem:[#allocation2 + $0x22] sm:$0xff] }
 0x2db   :  { %6558 = vmatmul.msk.bf16.gmra.mxu3 %vm544_vm2, %v13950_v61  ;;  %v1882_v62 = vpack.c.bf16 %v1867_v10, %v1866_v63 }
 0x2e9   :  { %6495 = vmatmul.msk.bf16.gmra.mxu1 %vm544_vm2, %v13951_v25  ;;  %v1722_v25 = vld [vmem:[#allocation2 + $0x41] sm:$0xff] }
 0x2ea   :  { %6527 = vmatmul.msk.bf16.gmra.mxu2 %vm544_vm2, %v13952_v49 }
 0x2eb   :  { %6559 = vmatmul.msk.bf16.gmra.mxu3 %vm544_vm2, %v13953_v16  ;;  %v1737_v16 = vpack.c.bf16 %v1723_v43, %v1722_v25  ;;  %v1727_v25 = vld [vmem:[#allocation2 + $0x91] sm:$0xff] }
 0x2f6   :  { %v887_v53 = vpop.f32.mrf.mxu1 }
 0x2f9   :  { %6496 = vmatmul.msk.bf16.gmra.mxu1 %vm544_vm2, %v1158_v18 }
 0x2fa   :  { %6528 = vmatmul.msk.bf16.gmra.mxu2 %vm544_vm2, %v1304_v21  ;;  %v957_v21 = vadd.f32 %v9845_v57, %v9843_v56  ;;  %v1579_v56 = vld [vmem:[#allocation2 + $0x70] sm:$0xff] }
 0x2fb   :  { %6560 = vmatmul.msk.bf16.gmra.mxu3 %vm544_vm2, %v1450_v8  ;;  %v1725_v57 = vld [vmem:[#allocation2 + $0x71] sm:$0xff] }
 0x2fc   :  { %v1122_v55 = vadd.f32 %v9857_v13, %v957_v21 }
 0x2fd   :  { %v984_v41 = vpop.f32.mrf.mxu2 }
 0x2fe   :  { %v985_v32 = vadd.f32 %v984_v41, %v887_v53  ;;  %v1114_v45 = vpop.f32.mrf.mxu3  ;;  %v889_v44 = vpop.f32.mrf.mxu1  ;;  %v1868_v53 = vld [vmem:[#allocation2 + $0x42] sm:$0xff] }
 0x2ff   :  { %v1883_v18 = vpack.c.bf16 %v1869_v24, %v1868_v53 }
 0x300   :  { %v10269_v28 = vadd.f32 %v1114_v45, %v985_v32 }
 0x305   :  { %v986_v30 = vpop.f32.mrf.mxu2 }
 0x306   :  { %v987_v2 = vadd.f32 %v986_v30, %v889_v44  ;;  %v1116_v7 = vpop.f32.mrf.mxu3  ;;  %v1225_v34 = vpop.f32.mrf.mxu1  ;;  %v9151_v44 = vld [vmem:[%s13904_s5 + $0xccc] sm:$0xf0] }
 0x307   :  { %v1265_v36 = vadd.f32 %v1225_v34, %v9726_v51  ;;  %v1120_v51 = vadd.f32 %v9788_v42, %v952_v59  ;;  %v1871_v34 = vld [vmem:[#allocation2 + $0x72] sm:$0xff]  ;;  %v1870_v59 = vld [vmem:[#allocation2 + $0x62] sm:$0xff] }
 0x308   :  { %v10271_v37 = vadd.f32 %v1116_v7, %v987_v2 }
 0x309   :  { %6585 = vmatmul.msk.bf16.vlgmr.msra.gmra.mxu1 %vm544_vm2, %v1590_v39 }
 0x30a   :  { %6617 = vmatmul.msk.bf16.vlgmr.msra.gmra.mxu2 %vm544_vm2, %v1736_v47  ;;  %v13954_v47 = vld [vmem:[#allocation9_spill] sm:$0xff] }
 0x30b   :  { %6649 = vmatmul.msk.bf16.vlgmr.msra.gmra.mxu3 %vm544_vm2, %v1882_v62  ;;  %v1592_v62 = vpack.c.bf16 %v1579_v56, %v1578_v33 }
 0x30d   :  { %v1371_v3 = vpop.f32.mrf.mxu2 }
 0x30e   :  { %v1411_v61 = vadd.f32 %v1371_v3, %v1265_v36  ;;  %v1517_v11 = vpop.f32.mrf.mxu3  ;;  %v1227_v14 = vpop.f32.mrf.mxu1  ;;  %v1724_v36 = vld [vmem:[#allocation2 + $0x61] sm:$0xff] }
 0x30f   :  { %v1266_v15 = vadd.f32 %v1227_v14, %v1120_v51  ;;  %v1738_v3 = vpack.c.bf16 %v1725_v57, %v1724_v36  ;;  %v13956_v14 = vld [vmem:[#allocation11_spill] sm:$0xff] }
 0x310   :  { %v10279_v58 = vadd.f32 %v1517_v11, %v1411_v61  ;;  %v1884_v61 = vpack.c.bf16 %v1871_v34, %v1870_v59  ;;  %v13955_v11 = vld [vmem:[#allocation10_spill] sm:$0xff]  ;;  %v13962_v36 = vld [vmem:[#allocation23_spill] sm:$0xff] }
 0x311   :  { %v962_v51 = vadd.f32 %v13956_v14, %v13955_v11 }
 0x315   :  { %v1373_v19 = vpop.f32.mrf.mxu2 }
 0x316   :  { %v1412_v48 = vadd.f32 %v1373_v19, %v1266_v15  ;;  %v1519_v22 = vpop.f32.mrf.mxu3  ;;  %v1230_v23 = vpop.f32.mrf.mxu1 }
 0x317   :  { %v1267_v27 = vadd.f32 %v1230_v23, %v9807_v60  ;;  %v8291_v60 = vld [vmem:[%s13904_s5 + $0xcc0] sm:$0xf] }
 0x318   :  { %v10282_v49 = vadd.f32 %v1519_v22, %v1412_v48  ;;  %v8292_v30 = vor.u32 %v9151_v44, %v8291_v60  ;;  %v13957_v48 = vld [vmem:[#allocation12_spill] sm:$0xff]  ;;  %v13959_v44 = vld [vmem:[#allocation17_spill] sm:$0xff] }
 0x319   :  { %6586 = vmatmul.msk.bf16.gmra.mxu1 %vm544_vm2, %v1591_v31  ;;  %v1124_v22 = vadd.f32 %v13957_v48, %v962_v51  ;;  %v13966_v48 = vld [vmem:[#allocation21_spill] sm:$0xff] }
 0x31a   :  { %6618 = vmatmul.msk.bf16.gmra.mxu2 %vm544_vm2, %v1737_v16  ;;  %5443 = vmatpush.bf16.msrb.mxu0 %v8292_v30  ;;  %v1873_v16 = vld [vmem:[#allocation2 + $0x92] sm:$0xff]  ;;  %v13960_v30 = vld [vmem:[#allocation18_spill] sm:$0xff] }
 0x31b   :  { %6650 = vmatmul.msk.bf16.gmra.mxu3 %vm544_vm2, %v1883_v18 }
 0x31d   :  { %v1376_v42 = vpop.f32.mrf.mxu2 }
 0x31e   :  { %v1413_v8 = vadd.f32 %v1376_v42, %v1267_v27  ;;  %v1522_v41 = vpop.f32.mrf.mxu3  ;;  %v1232_v32 = vpop.f32.mrf.mxu1  ;;  %v13958_v42 = vld [vmem:[#allocation16_spill] sm:$0xff] }
 0x31f   :  { %v1268_v0 = vadd.f32 %v1232_v32, %v1122_v55  ;;  %v1885_v32 = vpack.c.bf16 %v1873_v16, %v10155_v29  ;;  %v967_v55 = vadd.f32 %v13960_v30, %v13959_v44  ;;  %v9147_v16 = vld [vmem:[%s13904_s5 + $0xcac] sm:$0xf0]  ;;  %v13971_v44 = vld [vmem:[#allocation29_spill] sm:$0xff] }
 0x320   :  { %v10290_v45 = vadd.f32 %v1522_v41, %v1413_v8  ;;  %v1593_v8 = vpack.c.bf16 %v1581_v26, %v10151_v5  ;;  %v1739_v41 = vpack.c.bf16 %v1727_v25, %v10153_v6  ;;  %v13961_v5 = vld [vmem:[#allocation19_spill] sm:$0xff] }
 0x325   :  { %v1378_v2 = vpop.f32.mrf.mxu2 }
 0x326   :  { %v1414_v7 = vadd.f32 %v1378_v2, %v1268_v0  ;;  %v1524_v10 = vpop.f32.mrf.mxu3  ;;  %v1235_v12 = vpop.f32.mrf.mxu1 }
 0x327   :  { %v1269_v63 = vadd.f32 %v1235_v12, %v13954_v47 }
 0x328   :  { %v10299_v39 = vadd.f32 %v1524_v10, %v1414_v7  ;;  %v1126_v7 = vadd.f32 %v13961_v5, %v967_v55 }
 0x329   :  { %6587 = vmatmul.msk.bf16.gmra.mxu1 %vm544_vm2, %v1592_v62  ;;  %v13964_v62 = vld [vmem:[#allocation13_spill] sm:$0xff] }
 0x32a   :  { %6619 = vmatmul.msk.bf16.gmra.mxu2 %vm544_vm2, %v1738_v3  ;;  %v13965_v3 = vld [vmem:[#allocation15_spill] sm:$0xff] }
 0x32b   :  { %6651 = vmatmul.msk.bf16.gmra.mxu3 %vm544_vm2, %v1884_v61 }
 0x32d   :  { %v1381_v13 = vpop.f32.mrf.mxu2 }
 0x32e   :  { %v1415_v15 = vadd.f32 %v1381_v13, %v1269_v63  ;;  %v1527_v19 = vpop.f32.mrf.mxu3  ;;  %v1237_v35 = vpop.f32.mrf.mxu1  ;;  %v13963_v63 = vld [vmem:[#allocation14_spill] sm:$0xff] }
 0x32f   :  { %v1270_v24 = vadd.f32 %v1237_v35, %v1124_v22  ;;  %v13967_v22 = vld [vmem:[#allocation20_spill] sm:$0xff] }
 0x330   :  { %v10307_v43 = vadd.f32 %v1527_v19, %v1415_v15 }
 0x335   :  { %v1383_v23 = vpop.f32.mrf.mxu2 }
 0x336   :  { %v1416_v27 = vadd.f32 %v1383_v23, %v1270_v24  ;;  %v1529_v31 = vpop.f32.mrf.mxu3  ;;  %v1240_v53 = vpop.f32.mrf.mxu1  ;;  %v13968_v24 = vld [vmem:[#allocation22_spill] sm:$0xff] }
 0x337   :  { %v1271_v21 = vadd.f32 %v1240_v53, %v13958_v42 }
 0x338   :  { %v10310_v18 = vadd.f32 %v1529_v31, %v1416_v27 }
 0x339   :  { %6588 = vmatmul.msk.bf16.gmra.mxu1 %vm544_vm2, %v1593_v8 }
 0x33a   :  { %6620 = vmatmul.msk.bf16.gmra.mxu2 %vm544_vm2, %v1739_v41 }
 0x33b   :  { %6652 = vmatmul.msk.bf16.gmra.mxu3 %vm544_vm2, %v1885_v32  ;;  %v13969_v32 = vld [vmem:[#allocation28_spill] sm:$0xff] }
 0x33d   :  { %v1386_v60 = vpop.f32.mrf.mxu2 }
 0x33e   :  { %v1417_v0 = vadd.f32 %v1386_v60, %v1271_v21  ;;  %v1532_v2 = vpop.f32.mrf.mxu3  ;;  %v1242_v56 = vpop.f32.mrf.mxu1  ;;  %v13970_v60 = vld [vmem:[#allocation27_spill] sm:$0xff] }
 0x33f   :  { %v1272_v6 = vadd.f32 %v1242_v56, %v1126_v7  ;;  %v1589_v7 = vld [vmem:[#allocation2 + $0x130] sm:$0xff] }
 0x340   :  { %v10321_v57 = vadd.f32 %v1532_v2, %v1417_v0 }
 0x345   :  { %v1388_v10 = vpop.f32.mrf.mxu2 }
 0x346   :  { %v1418_v29 = vadd.f32 %v1388_v10, %v1272_v6  ;;  %v1534_v34 = vpop.f32.mrf.mxu3  ;;  %v1245_v12 = vpop.f32.mrf.mxu1  ;;  %v1881_v10 = vld [vmem:[#allocation2 + $0x132] sm:$0xff] }
 0x347   :  { %v1273_v47 = vadd.f32 %v1245_v12, %v13962_v36  ;;  %v1597_v12 = vpack.c.bf16 %v1589_v7, %v10252_v40 }
 0x348   :  { %v10324_v33 = vadd.f32 %v1534_v34, %v1418_v29 }
 0x349   :  { %6589 = vmatmul.msk.bf16.gmra.mxu1 %vm544_vm2, %v13963_v63 }
 0x34a   :  { %6621 = vmatmul.msk.bf16.gmra.mxu2 %vm544_vm2, %v13964_v62 }
 0x34b   :  { %6653 = vmatmul.msk.bf16.gmra.mxu3 %vm544_vm2, %v13965_v3 }
 0x34d   :  { %v1391_v59 = vpop.f32.mrf.mxu2 }
 0x34e   :  { %v1419_v61 = vadd.f32 %v1391_v59, %v1273_v47  ;;  %v1537_v13 = vpop.f32.mrf.mxu3  ;;  %v10333_v11 = vpop.f32.mrf.mxu1  ;;  %v1889_v47 = vpack.c.bf16 %v1881_v10, %v10258_v54 }
 0x350   :  { %v10335_v14 = vadd.f32 %v1537_v13, %v1419_v61 }
 0x355   :  { %v10337_v51 = vpop.f32.mrf.mxu2 }
 0x356   :  { %v10339_v15 = vpop.f32.mrf.mxu3  ;;  %v1250_v19 = vpop.f32.mrf.mxu1 }
 0x357   :  { %v1275_v35 = vadd.f32 %v1250_v19, %v10113_v50  ;;  %v8275_v50 = vld [vmem:[%s13904_s5 + $0xca0] sm:$0xf] }
 0x358   :  { %v8276_v53 = vor.u32 %v9147_v16, %v8275_v50 }
 0x359   :  { %6590 = vmatmul.msk.bf16.gmra.mxu1 %vm544_vm2, %v13966_v48 }
 0x35a   :  { %6622 = vmatmul.msk.bf16.gmra.mxu2 %vm544_vm2, %v13967_v22  ;;  %5444 = vmatpush.bf16.msrb.mxu0 %v8276_v53 }
 0x35b   :  { %6654 = vmatmul.msk.bf16.gmra.mxu3 %vm544_vm2, %v13968_v24 }
 0x35d   :  { %v1396_v23 = vpop.f32.mrf.mxu2 }
 0x35e   :  { %v1421_v26 = vadd.f32 %v1396_v23, %v1275_v35  ;;  %v1542_v25 = vpop.f32.mrf.mxu3  ;;  %v10348_v27 = vpop.f32.mrf.mxu1 }
 0x360   :  { %v10350_v31 = vadd.f32 %v1542_v25, %v1421_v26  ;;  %v10397_v26 = vld [vmem:[%s13903_s4] ss:$0 sm:$0xff] }
 0x365   :  { %v10358_v42 = vpop.f32.mrf.mxu2 }
 0x366   :  { %v10360_v21 = vpop.f32.mrf.mxu3  ;;  %v1255_v8 = vpop.f32.mrf.mxu1 }
 0x367   :  { %v1277_v41 = vadd.f32 %v1255_v8, %v10168_v9  ;;  %v1735_v9 = vld [vmem:[#allocation2 + $0x131] sm:$0xff] }
 0x368   :  { %v1743_v36 = vpack.c.bf16 %v1735_v9, %v10254_v38 }
 0x369   :  { %6591 = vmatmul.msk.bf16.gmra.mxu1 %vm544_vm2, %v13969_v32 }
 0x36a   :  { %6623 = vmatmul.msk.bf16.gmra.mxu2 %vm544_vm2, %v13970_v60 }
 0x36b   :  { %6655 = vmatmul.msk.bf16.gmra.mxu3 %vm544_vm2, %v13971_v44 }
 0x36d   :  { %v1401_v30 = vpop.f32.mrf.mxu2 }
 0x36e   :  { %v1423_v55 = vadd.f32 %v1401_v30, %v1277_v41  ;;  %v1547_v0 = vpop.f32.mrf.mxu3  ;;  %v10369_v2 = vpop.f32.mrf.mxu1 }
 0x370   :  { %v10371_v56 = vadd.f32 %v1547_v0, %v1423_v55  ;;  %v8259_v55 = vld [vmem:[%s13904_s5 + $0xc80] sm:$0xf]  ;;  %v9143_v0 = vld [vmem:[%s13904_s5 + $0xc8c] sm:$0xf0] }
 0x371   :  { %v8260_v7 = vor.u32 %v9143_v0, %v8259_v55  ;;  %v8763_v55 = vld [vmem:[%s13904_s5 + $0xac] sm:$0xf0]  ;;  %v6867_v0 = vld [vmem:[%s13904_s5 + $0x1a0] sm:$0xf] }
 0x373   :  { %5445 = vmatpush.bf16.msrb.mxu0 %v8260_v7 }
 0x375   :  { %v10373_v5 = vpop.f32.mrf.mxu2 }
 0x376   :  { %v10375_v6 = vpop.f32.mrf.mxu3  ;;  %v1260_v29 = vpop.f32.mrf.mxu1 }
 0x377   :  { %v1279_v34 = vadd.f32 %v1260_v29, %v10269_v28 }
 0x379   :  { %6592 = vmatmul.msk.bf16.gmra.mxu1 %vm544_vm2, %v1597_v12 }
 0x37a   :  { %6624 = vmatmul.msk.bf16.gmra.mxu2 %vm544_vm2, %v1743_v36 }
 0x37b   :  { %6656 = vmatmul.msk.bf16.gmra.mxu3 %vm544_vm2, %v1889_v47 }
 0x37d   :  { %v1406_v63 = vpop.f32.mrf.mxu2 }
 0x37e   :  { %v1425_v62 = vadd.f32 %v1406_v63, %v1279_v34  ;;  %v1552_v3 = vpop.f32.mrf.mxu3  ;;  %v10384_v59 = vpop.f32.mrf.mxu1 }
 0x380   :  { %v10386_v61 = vadd.f32 %v1552_v3, %v1425_v62  ;;  %v6771_v62 = vld [vmem:[%s13904_s5 + $0xe0] sm:$0xf]  ;;  %v8771_v3 = vld [vmem:[%s13904_s5 + $0xec] sm:$0xf0] }
 0x385   :  { %v10388_v28 = vpop.f32.mrf.mxu2 }
 0x386   :  { %v10390_v40 = vpop.f32.mrf.mxu3  ;;  %v1664_v38 = vpop.f32.mrf.mxu1 }
 0x387   :  { %v1704_v35 = vadd.f32 %v1664_v38, %v10279_v58 }
 0x38d   :  { %v1810_v13 = vpop.f32.mrf.mxu2 }
 0x38e   :  { %v1956_v54 = vpop.f32.mrf.mxu3  ;;  %v1666_v19 = vpop.f32.mrf.mxu1  ;;  %v1850_v48 = vadd.f32 %v1810_v13, %v1704_v35  ;;  %v6772_v13 = vor.u32 %v8771_v3, %v6771_v62  ;;  %v8835_v35 = vld [vmem:[%s13904_s5 + $0x2ec] sm:$0xf0] }
 0x38f   :  { %v1705_v22 = vadd.f32 %v1666_v19, %v10282_v49  ;;  %v7027_v19 = vld [vmem:[%s13904_s5 + $0x2e0] sm:$0xf] }
 0x390   :  { %v1996_v23 = vadd.f32 %v1956_v54, %v1850_v48  ;;  %v8803_v54 = vld [vmem:[%s13904_s5 + $0x1ec] sm:$0xf0]  ;;  %5286 = vmatpush.bf16.msrb.mxu1 %v6772_v13  ;;  %v6723_v13 = vld [vmem:[%s13904_s5 + $0x80] sm:$0xf] }
 0x392   :  { %v2016_v8 = vadd.f32 %v10397_v26, %v1996_v23 }
 0x395   :  { %v1812_v24 = vpop.f32.mrf.mxu2 }
 0x396   :  { %v1851_v25 = vadd.f32 %v1812_v24, %v1705_v22  ;;  %v1958_v50 = vpop.f32.mrf.mxu3  ;;  %v1669_v16 = vpop.f32.mrf.mxu1  ;;  %v7028_v24 = vor.u32 %v8835_v35, %v7027_v19  ;;  %v6851_v19 = vld [vmem:[%s13904_s5 + $0x180] sm:$0xf] }
 0x397   :  { %v1706_v44 = vadd.f32 %v1669_v16, %v10290_v45  ;;  %v8767_v16 = vld [vmem:[%s13904_s5 + $0xcc] sm:$0xf0] }
 0x398   :  { %v1997_v53 = vadd.f32 %v1958_v50, %v1851_v25  ;;  %5312 = vmatpush.bf16.msrb.mxu3 %v7028_v24  ;;  %v6755_v50 = vld [vmem:[%s13904_s5 + $0xc0] sm:$0xf]  ;;  %v8791_v24 = vld [vmem:[%s13904_s5 + $0x18c] sm:$0xf0] }
 0x39a   :  { %v2017_v41 = vadd.f32 %v10397_v26, %v1997_v53  ;;  %v6883_v53 = vld [vmem:[%s13904_s5 + $0x1c0] sm:$0xf] }
 0x39c   :  { %v2032_v32 = vmax.f32 %v2016_v8, %v2017_v41  ;;  %v6756_v41 = vor.u32 %v8767_v16, %v6755_v50  ;;  %v8823_v50 = vld [vmem:[%s13904_s5 + $0x28c] sm:$0xf0] }
 0x39d   :  { %v1815_v58 = vpop.f32.mrf.mxu2 }
 0x39e   :  { %2040 = vst [vmem:[#allocation4] sm:$0xff] %v2032_v32  ;;  %v1961_v60 = vpop.f32.mrf.mxu3  ;;  %v1671_v49 = vpop.f32.mrf.mxu1  ;;  %v1852_v30 = vadd.f32 %v1815_v58, %v1706_v44  ;;  %v8799_v32 = vld [vmem:[%s13904_s5 + $0x1cc] sm:$0xf0]  ;;  %v7011_v58 = vld [vmem:[%s13904_s5 + $0x2c0] sm:$0xf]  ;;  %5287 = vmatpush.bf16.msrb.mxu1 %v6756_v41 }
 0x39f   :  { %v1707_v9 = vadd.f32 %v1671_v49, %v10299_v39  ;;  %v6899_v39 = vld [vmem:[%s13904_s5 + $0x1e0] sm:$0xf]  ;;  %v6884_v49 = vor.u32 %v8799_v32, %v6883_v53  ;;  %v8755_v32 = vld [vmem:[%s13904_s5 + $0x6c] sm:$0xf0] }
 0x3a0   :  { %v1998_v29 = vadd.f32 %v1961_v60, %v1852_v30  ;;  %v6900_v22 = vor.u32 %v8803_v54, %v6899_v39  ;;  %v8831_v60 = vld [vmem:[%s13904_s5 + $0x2cc] sm:$0xf0]  ;;  %v6707_v41 = vld [vmem:[%s13904_s5 + $0x60] sm:$0xf] }
 0x3a1   :  { %v7012_v44 = vor.u32 %v8831_v60, %v7011_v58  ;;  %v8759_v54 = vld [vmem:[%s13904_s5 + $0x8c] sm:$0xf0]  ;;  %v6835_v58 = vld [vmem:[%s13904_s5 + $0x160] sm:$0xf] }
 0x3a2   :  { %v2018_v45 = vadd.f32 %v10397_v26, %v1998_v29  ;;  %5299 = vmatpush.bf16.msrb.mxu2 %v6900_v22  ;;  %v6995_v29 = vld [vmem:[%s13904_s5 + $0x2a0] sm:$0xf]  ;;  %v6724_v22 = vor.u32 %v8759_v54, %v6723_v13 }
 0x3a3   :  { %5313 = vmatpush.bf16.msrb.mxu3 %v7012_v44  ;;  %v8787_v44 = vld [vmem:[%s13904_s5 + $0x16c] sm:$0xf0]  ;;  %v6803_v13 = vld [vmem:[%s13904_s5 + $0x120] sm:$0xf] }
 0x3a5   :  { %v1817_v10 = vpop.f32.mrf.mxu2 }
 0x3a6   :  { %v1853_v34 = vadd.f32 %v1817_v10, %v1707_v9  ;;  %v1963_v12 = vpop.f32.mrf.mxu3  ;;  %v1674_v36 = vpop.f32.mrf.mxu1  ;;  %5300 = vmatpush.bf16.msrb.mxu2 %v6884_v49  ;;  %v8795_v10 = vld [vmem:[%s13904_s5 + $0x1ac] sm:$0xf0]  ;;  %v6708_v49 = vor.u32 %v8755_v32, %v6707_v41 }
 0x3a7   :  { %v1708_v8 = vadd.f32 %v1674_v36, %v10307_v43  ;;  %v6739_v43 = vld [vmem:[%s13904_s5 + $0xa0] sm:$0xf] }
 0x3a8   :  { %v1999_v47 = vadd.f32 %v1963_v12, %v1853_v34  ;;  %v6740_v9 = vor.u32 %v8763_v55, %v6739_v43  ;;  %v8827_v34 = vld [vmem:[%s13904_s5 + $0x2ac] sm:$0xf0] }
 0x3a9   :  { %v8819_v43 = vld [vmem:[%s13904_s5 + $0x26c] sm:$0xf0] }
 0x3aa   :  { %v2019_v63 = vadd.f32 %v10397_v26, %v1999_v47  ;;  %5288 = vmatpush.bf16.msrb.mxu1 %v6740_v9 }
 0x3ac   :  { %v2033_v38 = vmax.f32 %v2018_v45, %v2019_v63  ;;  %v6868_v45 = vor.u32 %v8795_v10, %v6867_v0  ;;  %v6996_v63 = vor.u32 %v8827_v34, %v6995_v29  ;;  %v6836_v0 = vor.u32 %v8787_v44, %v6835_v58  ;;  %v6691_v29 = vld [vmem:[%s13904_s5 + $0x40] sm:$0xf]  ;;  %v8751_v34 = vld [vmem:[%s13904_s5 + $0x4c] sm:$0xf0] }
 0x3ad   :  { %v1820_v48 = vpop.f32.mrf.mxu2  ;;  %v6659_v58 = vld [vmem:[%s13904_s5] sm:$0xf] }
 0x3ae   :  { %2041 = vst [vmem:[#allocation4 + $0x8] sm:$0xff] %v2033_v38  ;;  %v1966_v23 = vpop.f32.mrf.mxu3  ;;  %v1676_v25 = vpop.f32.mrf.mxu1  ;;  %v1854_v30 = vadd.f32 %v1820_v48, %v1708_v8  ;;  %5301 = vmatpush.bf16.msrb.mxu2 %v6868_v45  ;;  %5314 = vmatpush.bf16.msrb.mxu3 %v6996_v63  ;;  %v8783_v45 = vld [vmem:[%s13904_s5 + $0x14c] sm:$0xf0]  ;;  %v6947_v63 = vld [vmem:[%s13904_s5 + $0x240] sm:$0xf] }
 0x3af   :  { %v1709_v7 = vadd.f32 %v1676_v25, %v10310_v18  ;;  %v6852_v25 = vor.u32 %v8791_v24, %v6851_v19  ;;  %5289 = vmatpush.bf16.msrb.mxu1 %v6724_v22  ;;  %v8811_v22 = vld [vmem:[%s13904_s5 + $0x22c] sm:$0xf0] }
 0x3b0   :  { %v2000_v18 = vadd.f32 %v1966_v23, %v1854_v30  ;;  %v6979_v23 = vld [vmem:[%s13904_s5 + $0x280] sm:$0xf] }
 0x3b1   :  { %v6980_v8 = vor.u32 %v8823_v50, %v6979_v23  ;;  %v6963_v30 = vld [vmem:[%s13904_s5 + $0x260] sm:$0xf] }
 0x3b2   :  { %v2020_v16 = vadd.f32 %v10397_v26, %v2000_v18  ;;  %5302 = vmatpush.bf16.msrb.mxu2 %v6852_v25  ;;  %v13972_v50 = vld [vmem:[#allocation24_spill] sm:$0xff] }
 0x3b3   :  { %5315 = vmatpush.bf16.msrb.mxu3 %v6980_v8  ;;  %5290 = vmatpush.bf16.msrb.mxu1 %v6708_v49  ;;  %v6787_v49 = vld [vmem:[%s13904_s5 + $0x100] sm:$0xf] }
 0x3b5   :  { %v2048_v12 = vld [vmem:[#allocation4] ss:$2 sm:$0xff]  ;;  %v2056_v36 = vld [vmem:[#allocation4 + $0x1] ss:$2 sm:$0xff]  ;;  %v1822_v47 = vpop.f32.mrf.mxu2 }
 0x3b6   :  { %v2063_v62 = vmax.f32 %v2048_v12, %v2056_v36  ;;  %v1855_v3 = vadd.f32 %v1822_v47, %v1709_v7  ;;  %v1968_v39 = vpop.f32.mrf.mxu3  ;;  %v1679_v38 = vpop.f32.mrf.mxu1  ;;  %v6964_v7 = vor.u32 %v8819_v43, %v6963_v30  ;;  %5303 = vmatpush.bf16.msrb.mxu2 %v6836_v0  ;;  %v6819_v12 = vld [vmem:[%s13904_s5 + $0x140] sm:$0xf]  ;;  %v6692_v47 = vor.u32 %v8751_v34, %v6691_v29  ;;  %v8775_v43 = vld [vmem:[%s13904_s5 + $0x10c] sm:$0xf0] }
 0x3b7   :  { %v1710_v36 = vadd.f32 %v1679_v38, %v10321_v57  ;;  %v6820_v18 = vor.u32 %v8783_v45, %v6819_v12  ;;  %v6675_v57 = vld [vmem:[%s13904_s5 + $0x20] sm:$0xf]  ;;  %v8747_v38 = vld [vmem:[%s13904_s5 + $0x2c] sm:$0xf0] }
 0x3b8   :  { %v2067_v35 = vmax.f32 %v2063_v62, 0.0  ;;  %v2001_v48 = vadd.f32 %v1968_v39, %v1855_v3  ;;  %5316 = vmatpush.bf16.msrb.mxu3 %v6964_v7  ;;  %v8815_v62 = vld [vmem:[%s13904_s5 + $0x24c] sm:$0xf0]  ;;  %5291 = vmatpush.bf16.msrb.mxu1 %v6692_v47  ;;  %v6676_v19 = vor.u32 %v8747_v38, %v6675_v57  ;;  %v6788_v7 = vor.u32 %v8775_v43, %v6787_v49  ;;  %v7283_v34 = vld [vmem:[%s13904_s5 + $0x4e0] sm:$0xf] }
 0x3b9   :  { %v6948_v3 = vor.u32 %v8815_v62, %v6947_v63  ;;  %v8807_v0 = vld [vmem:[%s13904_s5 + $0x20c] sm:$0xf0] }
 0x3ba   :  { %2071 = vst [vmem:[#allocation5] sm:$0xff] %v2067_v35  ;;  %v2021_v53 = vadd.f32 %v10397_v26, %v2001_v48  ;;  %5304 = vmatpush.bf16.msrb.mxu2 %v6820_v18  ;;  %v8779_v35 = vld [vmem:[%s13904_s5 + $0x12c] sm:$0xf0]  ;;  %v6931_v48 = vld [vmem:[%s13904_s5 + $0x220] sm:$0xf] }
 0x3bb   :  { %v6804_v23 = vor.u32 %v8779_v35, %v6803_v13  ;;  %v6932_v25 = vor.u32 %v8811_v22, %v6931_v48  ;;  %v8867_v29 = vld [vmem:[%s13904_s5 + $0x3ec] sm:$0xf0]  ;;  %v7411_v18 = vld [vmem:[%s13904_s5 + $0x5e0] sm:$0xf] }
 0x3bc   :  { %v2034_v60 = vmax.f32 %v2020_v16, %v2021_v53  ;;  %5317 = vmatpush.bf16.msrb.mxu3 %v6948_v3  ;;  %v13973_v16 = vld [vmem:[#allocation25_spill] sm:$0xff]  ;;  %5292 = vmatpush.bf16.msrb.mxu1 %v6676_v19  ;;  %v13974_v12 = vld [vmem:[#allocation26_spill] sm:$0xff] }
 0x3bd   :  { %v1825_v55 = vpop.f32.mrf.mxu2  ;;  %v8899_v62 = vld [vmem:[%s13904_s5 + $0x4ec] sm:$0xf0]  ;;  %v7267_v35 = vld [vmem:[%s13904_s5 + $0x4c0] sm:$0xf] }
 0x3be   :  { %2042 = vst [vmem:[#allocation4 + $0x10] sm:$0xff] %v2034_v60  ;;  %v1971_v9 = vpop.f32.mrf.mxu3  ;;  %v1681_v10 = vpop.f32.mrf.mxu1  ;;  %v1856_v39 = vadd.f32 %v1825_v55, %v1710_v36  ;;  %5305 = vmatpush.bf16.msrb.mxu2 %v6804_v23  ;;  %v8743_v60 = vld [vmem:[%s13904_s5 + $0xc] sm:$0xf0]  ;;  %v6915_v55 = vld [vmem:[%s13904_s5 + $0x200] sm:$0xf] }
 0x3bf   :  { %v1711_v54 = vadd.f32 %v1681_v10, %v10324_v33  ;;  %v972_v33 = vadd.f32 %v13973_v16, %v13972_v50  ;;  %v6660_v30 = vor.u32 %v8743_v60, %v6659_v58  ;;  %v7155_v10 = vld [vmem:[%s13904_s5 + $0x3e0] sm:$0xf]  ;;  %v8931_v3 = vld [vmem:[%s13904_s5 + $0x5ec] sm:$0xf0] }
 0x3c0   :  { %v2002_v53 = vadd.f32 %v1971_v9, %v1856_v39  ;;  %5318 = vmatpush.bf16.msrb.mxu3 %v6932_v25  ;;  %v6916_v9 = vor.u32 %v8807_v0, %v6915_v55  ;;  %v7156_v63 = vor.u32 %v8867_v29, %v7155_v10  ;;  %v7284_v39 = vor.u32 %v8899_v62, %v7283_v34  ;;  %v8863_v19 = vld [vmem:[%s13904_s5 + $0x3cc] sm:$0xf0]  ;;  %v7235_v10 = vld [vmem:[%s13904_s5 + $0x480] sm:$0xf] }
 0x3c1   :  { %v1128_v36 = vadd.f32 %v13974_v12, %v972_v33  ;;  %5293 = vmatpush.bf16.msrb.mxu1 %v6660_v30  ;;  %v7412_v57 = vor.u32 %v8931_v3, %v7411_v18  ;;  %v8927_v23 = vld [vmem:[%s13904_s5 + $0x5cc] sm:$0xf0] }
 0x3c2   :  { %v2022_v47 = vadd.f32 %v10397_v26, %v2002_v53  ;;  %5306 = vmatpush.bf16.msrb.mxu2 %v6788_v7  ;;  %v8859_v58 = vld [vmem:[%s13904_s5 + $0x3ac] sm:$0xf0]  ;;  %v7107_v7 = vld [vmem:[%s13904_s5 + $0x380] sm:$0xf] }
 0x3c3   :  { %v1274_v38 = vadd.f32 %v10333_v11, %v1128_v36  ;;  %v8895_v11 = vld [vmem:[%s13904_s5 + $0x4cc] sm:$0xf0] }
 0x3c4   :  { %5319 = vmatpush.bf16.msrb.mxu3 %v6916_v9  ;;  %v7268_v16 = vor.u32 %v8895_v11, %v7267_v35  ;;  %v8923_v49 = vld [vmem:[%s13904_s5 + $0x5ac] sm:$0xf0]  ;;  %v7347_v11 = vld [vmem:[%s13904_s5 + $0x560] sm:$0xf] }
 0x3c5   :  { %v1827_v24 = vpop.f32.mrf.mxu2  ;;  %5325 = vmatpush.bf16.msra.mxu1 %v7156_v63  ;;  %v1420_v25 = vadd.f32 %v10337_v51, %v1274_v38  ;;  %v7251_v51 = vld [vmem:[%s13904_s5 + $0x4a0] sm:$0xf]  ;;  %v8855_v9 = vld [vmem:[%s13904_s5 + $0x38c] sm:$0xf0] }
 0x3c6   :  { %v1857_v8 = vadd.f32 %v1827_v24, %v1711_v54  ;;  %v1973_v41 = vpop.f32.mrf.mxu3  ;;  %v1684_v32 = vpop.f32.mrf.mxu1  ;;  %v7139_v54 = vld [vmem:[%s13904_s5 + $0x3c0] sm:$0xf]  ;;  %5338 = vmatpush.bf16.msra.mxu2 %v7284_v39  ;;  %v7108_v36 = vor.u32 %v8855_v9, %v7107_v7 }
 0x3c7   :  { %v7140_v22 = vor.u32 %v8863_v19, %v7139_v54  ;;  %v7395_v24 = vld [vmem:[%s13904_s5 + $0x5c0] sm:$0xf]  ;;  %v8851_v19 = vld [vmem:[%s13904_s5 + $0x36c] sm:$0xf0] }
 0x3c8   :  { %v2003_v44 = vadd.f32 %v1973_v41, %v1857_v8  ;;  %5351 = vmatpush.bf16.msra.mxu3 %v7412_v57  ;;  %v7396_v33 = vor.u32 %v8927_v23, %v7395_v24  ;;  %v1712_v8 = vadd.f32 %v1684_v32, %v10335_v14  ;;  %v7123_v41 = vld [vmem:[%s13904_s5 + $0x3a0] sm:$0xf]  ;;  %v8891_v14 = vld [vmem:[%s13904_s5 + $0x4ac] sm:$0xf0] }
 0x3c9   :  { %5326 = vmatpush.bf16.msra.mxu1 %v7140_v22  ;;  %v7124_v60 = vor.u32 %v8859_v58, %v7123_v41  ;;  %v7379_v32 = vld [vmem:[%s13904_s5 + $0x5a0] sm:$0xf]  ;;  %v7252_v43 = vor.u32 %v8891_v14, %v7251_v51  ;;  %v8883_v22 = vld [vmem:[%s13904_s5 + $0x46c] sm:$0xf0] }
 0x3ca   :  { %v2023_v45 = vadd.f32 %v10397_v26, %v2003_v44  ;;  %5339 = vmatpush.bf16.msra.mxu2 %v7268_v16  ;;  %v1566_v44 = vadd.f32 %v10339_v15, %v1420_v25  ;;  %v7380_v55 = vor.u32 %v8923_v49, %v7379_v32  ;;  %v977_v15 = vadd.f32 %v10149_v46, %v10147_v4  ;;  %v7363_v39 = vld [vmem:[%s13904_s5 + $0x580] sm:$0xf]  ;;  %v8919_v4 = vld [vmem:[%s13904_s5 + $0x58c] sm:$0xf0] }
 0x3cb   :  { %v7364_v57 = vor.u32 %v8919_v4, %v7363_v39  ;;  %v7091_v54 = vld [vmem:[%s13904_s5 + $0x360] sm:$0xf]  ;;  %v8915_v16 = vld [vmem:[%s13904_s5 + $0x56c] sm:$0xf0] }
 0x3cc   :  { %v2035_v13 = vmax.f32 %v2022_v47, %v2023_v45  ;;  %5352 = vmatpush.bf16.msra.mxu3 %v7396_v33  ;;  %v8887_v47 = vld [vmem:[%s13904_s5 + $0x48c] sm:$0xf0]  ;;  %v7092_v35 = vor.u32 %v8851_v19, %v7091_v54  ;;  %v1130_v24 = vadd.f32 %v10157_v1, %v977_v15  ;;  %v7348_v33 = vor.u32 %v8915_v16, %v7347_v11  ;;  %v7075_v51 = vld [vmem:[%s13904_s5 + $0x340] sm:$0xf] }
 0x3cd   :  { %v1830_v48 = vpop.f32.mrf.mxu2  ;;  %5327 = vmatpush.bf16.msra.mxu1 %v7124_v60  ;;  %v7236_v3 = vor.u32 %v8887_v47, %v7235_v10  ;;  %v8847_v60 = vld [vmem:[%s13904_s5 + $0x34c] sm:$0xf0]  ;;  %v7203_v14 = vld [vmem:[%s13904_s5 + $0x440] sm:$0xf]  ;;  %v982_v19 = vadd.f32 %v10250_v20, %v10248_v52 }
 0x3ce   :  { %2043 = vst [vmem:[#allocation4 + $0x18] sm:$0xff] %v2035_v13  ;;  %v1976_v50 = vpop.f32.mrf.mxu3  ;;  %v1686_v53 = vpop.f32.mrf.mxu1  ;;  %v1858_v30 = vadd.f32 %v1830_v48, %v1712_v8  ;;  %5340 = vmatpush.bf16.msra.mxu2 %v7252_v43  ;;  %v7219_v48 = vld [vmem:[%s13904_s5 + $0x460] sm:$0xf]  ;;  %v9139_v8 = vld [vmem:[%s13904_s5 + $0xc6c] sm:$0xf0]  ;;  %v1276_v1 = vadd.f32 %v10348_v27, %v1130_v24  ;;  %v7076_v49 = vor.u32 %v8847_v60, %v7075_v51 }
 0x3cf   :  { %v1713_v0 = vadd.f32 %v1686_v53, %v1566_v44  ;;  %v8243_v53 = vld [vmem:[%s13904_s5 + $0xc60] sm:$0xf]  ;;  %v8879_v27 = vld [vmem:[%s13904_s5 + $0x44c] sm:$0xf0]  ;;  %v1132_v51 = vadd.f32 %v10256_v17, %v982_v19 }
 0x3d0   :  { %5353 = vmatpush.bf16.msra.mxu3 %v7380_v55  ;;  %v2004_v63 = vadd.f32 %v1976_v50, %v1858_v30  ;;  %v7220_v50 = vor.u32 %v8883_v22, %v7219_v48  ;;  %v8244_v58 = vor.u32 %v9139_v8, %v8243_v53  ;;  %v7331_v44 = vld [vmem:[%s13904_s5 + $0x540] sm:$0xf]  ;;  %v8911_v30 = vld [vmem:[%s13904_s5 + $0x54c] sm:$0xf0]  ;;  %v1422_v43 = vadd.f32 %v10358_v42, %v1276_v1 }
 0x3d1   :  { %5328 = vmatpush.bf16.msra.mxu1 %v7108_v36  ;;  %v7332_v7 = vor.u32 %v8911_v30, %v7331_v44  ;;  %v8227_v10 = vld [vmem:[%s13904_s5 + $0xc40] sm:$0xf]  ;;  %v9135_v15 = vld [vmem:[%s13904_s5 + $0xc4c] sm:$0xf0]  ;;  %v8765_v30 = vld [vmem:[%s13904_s5 + $0xc4] sm:$0xf] }
 0x3d2   :  { %5341 = vmatpush.bf16.msra.mxu2 %v7236_v3  ;;  %v2024_v23 = vadd.f32 %v10397_v26, %v2004_v63  ;;  %5446 = vmatpush.bf16.msrb.mxu0 %v8244_v58  ;;  %v7059_v42 = vld [vmem:[%s13904_s5 + $0x320] sm:$0xf]  ;;  %v8907_v63 = vld [vmem:[%s13904_s5 + $0x52c] sm:$0xf0]  ;;  %v6773_v58 = vld [vmem:[%s13904_s5 + $0xf0] sm:$0xf0] }
 0x3d3   :  { %v7187_v36 = vld [vmem:[%s13904_s5 + $0x420] sm:$0xf]  ;;  %v8871_v22 = vld [vmem:[%s13904_s5 + $0x40c] sm:$0xf0] }
 0x3d4   :  { %5354 = vmatpush.bf16.msra.mxu3 %v7364_v57  ;;  %v8211_v4 = vld [vmem:[%s13904_s5 + $0xc20] sm:$0xf]  ;;  %v8903_v24 = vld [vmem:[%s13904_s5 + $0x50c] sm:$0xf0] }
 0x3d5   :  { %v2050_v29 = vld [vmem:[#allocation4 + $0x10] ss:$2 sm:$0xff]  ;;  %v2058_v34 = vld [vmem:[#allocation4 + $0x11] ss:$2 sm:$0xff]  ;;  %v1832_v12 = vpop.f32.mrf.mxu2  ;;  %5329 = vmatpush.bf16.msra.mxu1 %v7092_v35  ;;  %v7171_v54 = vld [vmem:[%s13904_s5 + $0x400] sm:$0xf] }
 0x3d6   :  { %v2064_v45 = vmax.f32 %v2050_v29, %v2058_v34  ;;  %v1859_v62 = vadd.f32 %v1832_v12, %v1713_v0  ;;  %v1978_v18 = vpop.f32.mrf.mxu3  ;;  %v1689_v46 = vpop.f32.mrf.mxu1  ;;  %5342 = vmatpush.bf16.msra.mxu2 %v7220_v50  ;;  %v7204_v0 = vor.u32 %v8879_v27, %v7203_v14  ;;  %v8228_v34 = vor.u32 %v9135_v15, %v8227_v10  ;;  %v8843_v12 = vld [vmem:[%s13904_s5 + $0x32c] sm:$0xf0]  ;;  %v7299_v11 = vld [vmem:[%s13904_s5 + $0x500] sm:$0xf]  ;;  %v6741_v10 = vld [vmem:[%s13904_s5 + $0xb0] sm:$0xf0] }
 0x3d7   :  { %v1714_v29 = vadd.f32 %v1689_v46, %v10350_v31  ;;  %v7060_v47 = vor.u32 %v8843_v12, %v7059_v42  ;;  %v8875_v31 = vld [vmem:[%s13904_s5 + $0x42c] sm:$0xf0]  ;;  %v7172_v52 = vor.u32 %v8871_v22, %v7171_v54  ;;  %v7300_v20 = vor.u32 %v8903_v24, %v7299_v11  ;;  %v8195_v53 = vld [vmem:[%s13904_s5 + $0xc00] sm:$0xf]  ;;  %v6693_v22 = vld [vmem:[%s13904_s5 + $0x50] sm:$0xf0] }
 0x3d8   :  { %v2068_v38 = vmax.f32 %v2064_v45, 0.0  ;;  %v2005_v13 = vadd.f32 %v1978_v18, %v1859_v62  ;;  %5355 = vmatpush.bf16.msra.mxu3 %v7348_v33  ;;  %v7315_v45 = vld [vmem:[%s13904_s5 + $0x520] sm:$0xf]  ;;  %v1568_v62 = vadd.f32 %v10360_v21, %v1422_v43  ;;  %5447 = vmatpush.bf16.msrb.mxu0 %v8228_v34  ;;  %v7188_v3 = vor.u32 %v8875_v31, %v7187_v36  ;;  %v9131_v46 = vld [vmem:[%s13904_s5 + $0xc2c] sm:$0xf0] }
 0x3d9   :  { %5330 = vmatpush.bf16.msra.mxu1 %v7076_v49  ;;  %v7316_v39 = vor.u32 %v8907_v63, %v7315_v45  ;;  %v8839_v21 = vld [vmem:[%s13904_s5 + $0x30c] sm:$0xf0]  ;;  %v1278_v49 = vadd.f32 %v10369_v2, %v1132_v51  ;;  %v6757_v43 = vld [vmem:[%s13904_s5 + $0xd0] sm:$0xf0]  ;;  %v8761_v2 = vld [vmem:[%s13904_s5 + $0xa4] sm:$0xf] }
 0x3da   :  { %2072 = vst [vmem:[#allocation5 + $0x8] sm:$0xff] %v2068_v38  ;;  %v2025_v25 = vadd.f32 %v10397_v26, %v2005_v13  ;;  %5343 = vmatpush.bf16.msra.mxu2 %v7204_v0  ;;  %v8212_v38 = vor.u32 %v9131_v46, %v8211_v4  ;;  %v7043_v13 = vld [vmem:[%s13904_s5 + $0x300] sm:$0xf]  ;;  %v9127_v8 = vld [vmem:[%s13904_s5 + $0xc0c] sm:$0xf0]  ;;  %v6760_v0 = vor.u32 %v8765_v30, %v6757_v43 }
 0x3db   :  { %v7044_v48 = vor.u32 %v8839_v21, %v7043_v13  ;;  %v8196_v1 = vor.u32 %v9127_v8, %v8195_v53  ;;  %v1424_v17 = vadd.f32 %v10373_v5, %v1278_v49  ;;  %v6744_v34 = vor.u32 %v8761_v2, %v6741_v10  ;;  %v6709_v13 = vld [vmem:[%s13904_s5 + $0x70] sm:$0xf0]  ;;  %v2075_v51 = vld [vmem:[#allocation5] sm:$0x1]  ;;  %v8959_v10 = vld [vmem:[%s13904_s5 + $0x6cc] sm:$0xf0] }
 0x3dc   :  { %v2036_v41 = vmax.f32 %v2024_v23, %v2025_v25  ;;  %5356 = vmatpush.bf16.msra.mxu3 %v7332_v7  ;;  %5448 = vmatpush.bf16.msrb.mxu0 %v8212_v38  ;;  %v1280_v38 = vadd.f32 %v10384_v59, %v10271_v37  ;;  %v7539_v59 = vld [vmem:[%s13904_s5 + $0x6e0] sm:$0xf] }
 0x3dd   :  { %v1835_v32 = vpop.f32.mrf.mxu2  ;;  %5331 = vmatpush.bf16.msra.mxu1 %v7060_v47  ;;  %v1570_v15 = vadd.f32 %v10375_v6, %v1424_v17  ;;  %v7523_v43 = vld [vmem:[%s13904_s5 + $0x6c0] sm:$0xf]  ;;  %v8745_v17 = vld [vmem:[%s13904_s5 + $0x24] sm:$0xf] }
 0x3de   :  { %2044 = vst [vmem:[#allocation4 + $0x20] sm:$0xff] %v2036_v41  ;;  %v1981_v55 = vpop.f32.mrf.mxu3  ;;  %v1691_v9 = vpop.f32.mrf.mxu1  ;;  %v1860_v18 = vadd.f32 %v1835_v32, %v1714_v29  ;;  %5344 = vmatpush.bf16.msra.mxu2 %v7188_v3  ;;  %v8769_v41 = vld [vmem:[%s13904_s5 + $0xe4] sm:$0xf]  ;;  %v1426_v19 = vadd.f32 %v10388_v28, %v1280_v38  ;;  %v8963_v28 = vld [vmem:[%s13904_s5 + $0x6ec] sm:$0xf0] }
 0x3df   :  { %v1715_v57 = vadd.f32 %v1691_v9, %v1568_v62  ;;  %v6776_v32 = vor.u32 %v8769_v41, %v6773_v58  ;;  %v6725_v62 = vld [vmem:[%s13904_s5 + $0x90] sm:$0xf0]  ;;  %v9027_v58 = vld [vmem:[%s13904_s5 + $0x8ec] sm:$0xf0]  ;;  %v7763_v38 = vld [vmem:[%s13904_s5 + $0x8a0] sm:$0xf] }
 0x3e0   :  { %5357 = vmatpush.bf16.msra.mxu3 %v7316_v39  ;;  %v2006_v23 = vadd.f32 %v1981_v55, %v1860_v18  ;;  %5449 = vmatpush.bf16.msrb.mxu0 %v8196_v1 }
 0x3e1   :  { %5332 = vmatpush.bf16.msra.mxu1 %v7044_v48  ;;  %v8749_v48 = vld [vmem:[%s13904_s5 + $0x44] sm:$0xf] }
 0x3e2   :  { %5345 = vmatpush.bf16.msra.mxu2 %v7172_v52  ;;  %v2026_v60 = vadd.f32 %v10397_v26, %v2006_v23  ;;  %v6696_v37 = vor.u32 %v8749_v48, %v6693_v22  ;;  %v7667_v23 = vld [vmem:[%s13904_s5 + $0x7e0] sm:$0xf]  ;;  %v1572_v52 = vadd.f32 %v10390_v40, %v1426_v19 }
 0x3e4   :  { %5358 = vmatpush.bf16.msra.mxu3 %v7300_v20  ;;  %5494 = vmatpush.bf16.msra.mxu0 %v6776_v32  ;;  %v7540_v32 = vor.u32 %v8963_v28, %v7539_v59 }
 0x3e5   :  { %v1837_v35 = vpop.f32.mrf.mxu2 }
 0x3e6   :  { %v1861_v25 = vadd.f32 %v1837_v35, %v1715_v57  ;;  %v1983_v50 = vpop.f32.mrf.mxu3  ;;  %v1694_v16 = vpop.f32.mrf.mxu1  ;;  %v8753_v57 = vld [vmem:[%s13904_s5 + $0x64] sm:$0xf] }
 0x3e7   :  { %v1716_v9 = vadd.f32 %v1694_v16, %v10371_v56  ;;  %v8757_v56 = vld [vmem:[%s13904_s5 + $0x84] sm:$0xf]  ;;  %v6712_v54 = vor.u32 %v8753_v57, %v6709_v13  ;;  %v9019_v13 = vld [vmem:[%s13904_s5 + $0x8ac] sm:$0xf0] }
 0x3e8   :  { %v2007_v33 = vadd.f32 %v1983_v50, %v1861_v25  ;;  %5495 = vmatpush.bf16.msra.mxu0 %v6760_v0  ;;  %v6728_v18 = vor.u32 %v8757_v56, %v6725_v62  ;;  %v8995_v25 = vld [vmem:[%s13904_s5 + $0x7ec] sm:$0xf0]  ;;  %v7795_v50 = vld [vmem:[%s13904_s5 + $0x8e0] sm:$0xf]  ;;  %v7764_v28 = vor.u32 %v9019_v13, %v7763_v38 }
 0x3e9   :  { %v7668_v49 = vor.u32 %v8995_v25, %v7667_v23  ;;  %v7796_v2 = vor.u32 %v9027_v58, %v7795_v50  ;;  %v8955_v62 = vld [vmem:[%s13904_s5 + $0x6ac] sm:$0xf0]  ;;  %v7747_v25 = vld [vmem:[%s13904_s5 + $0x880] sm:$0xf] }
 0x3ea   :  { %v2027_v14 = vadd.f32 %v10397_v26, %v2007_v33  ;;  %v8983_v23 = vld [vmem:[%s13904_s5 + $0x78c] sm:$0xf0] }
 0x3eb   :  { %v9015_v50 = vld [vmem:[%s13904_s5 + $0x88c] sm:$0xf0] }
 0x3ec   :  { %v2037_v27 = vmax.f32 %v2026_v60, %v2027_v14  ;;  %5496 = vmatpush.bf16.msra.mxu0 %v6744_v34  ;;  %v2077_v60 = vld [vmem:[#allocation5 + $0x1] sm:$0x1]  ;;  %v2079_v14 = vld [vmem:[#allocation5 + $0x2] sm:$0x1]  ;;  %v8947_v58 = vld [vmem:[%s13904_s5 + $0x66c] sm:$0xf0] }
 0x3ed   :  { %v1840_v44 = vpop.f32.mrf.mxu2 }
 0x3ee   :  { %2045 = vst [vmem:[#allocation4 + $0x28] sm:$0xff] %v2037_v27  ;;  %v1986_v55 = vpop.f32.mrf.mxu3  ;;  %v1696_v7 = vpop.f32.mrf.mxu1  ;;  %v1862_v29 = vadd.f32 %v1840_v44, %v1716_v9 }
 0x3ef   :  { %v1717_v5 = vadd.f32 %v1696_v7, %v1570_v15  ;;  %v7651_v15 = vld [vmem:[%s13904_s5 + $0x7c0] sm:$0xf] }
 0x3f0   :  { %v2008_v31 = vadd.f32 %v1986_v55, %v1862_v29  ;;  %5497 = vmatpush.bf16.msra.mxu0 %v6728_v18  ;;  %v6677_v29 = vld [vmem:[%s13904_s5 + $0x30] sm:$0xf0] }
 0x3f2   :  { %v2028_v4 = vadd.f32 %v10397_v26, %v2008_v31 }
 0x3f4   :  { %5498 = vmatpush.bf16.msra.mxu0 %v6712_v54 }
 0x3f5   :  { %v2052_v42 = vld [vmem:[#allocation4 + $0x20] ss:$2 sm:$0xff]  ;;  %v2060_v12 = vld [vmem:[#allocation4 + $0x21] ss:$2 sm:$0xff]  ;;  %v1842_v36 = vpop.f32.mrf.mxu2 }
 0x3f6   :  { %v2065_v47 = vmax.f32 %v2052_v42, %v2060_v12  ;;  %v1863_v45 = vadd.f32 %v1842_v36, %v1717_v5  ;;  %v1988_v63 = vpop.f32.mrf.mxu3  ;;  %v1699_v6 = vpop.f32.mrf.mxu1  ;;  %v8991_v42 = vld [vmem:[%s13904_s5 + $0x7cc] sm:$0xf0]  ;;  %v7779_v12 = vld [vmem:[%s13904_s5 + $0x8c0] sm:$0xf] }
 0x3f7   :  { %v1718_v24 = vadd.f32 %v1699_v6, %v10386_v61  ;;  %v9023_v36 = vld [vmem:[%s13904_s5 + $0x8cc] sm:$0xf0]  ;;  %v7652_v6 = vor.u32 %v8991_v42, %v7651_v15 }
 0x3f8   :  { %v2069_v3 = vmax.f32 %v2065_v47, 0.0  ;;  %v2009_v39 = vadd.f32 %v1988_v63, %v1863_v45  ;;  %5499 = vmatpush.bf16.msra.mxu0 %v6696_v37  ;;  %v6680_v47 = vor.u32 %v8745_v17, %v6677_v29  ;;  %v7524_v45 = vor.u32 %v8959_v10, %v7523_v43  ;;  %v7507_v63 = vld [vmem:[%s13904_s5 + $0x6a0] sm:$0xf] }
 0x3f9   :  { %v7780_v18 = vor.u32 %v9023_v36, %v7779_v12  ;;  %v7508_v22 = vor.u32 %v8955_v62, %v7507_v63  ;;  %v7459_v17 = vld [vmem:[%s13904_s5 + $0x640] sm:$0xf]  ;;  %v8975_v36 = vld [vmem:[%s13904_s5 + $0x74c] sm:$0xf0] }
 0x3fa   :  { %2073 = vst [vmem:[#allocation5 + $0x10] sm:$0xff] %v2069_v3  ;;  %v2029_v46 = vadd.f32 %v10397_v26, %v2009_v39  ;;  %v7635_v3 = vld [vmem:[%s13904_s5 + $0x7a0] sm:$0xf]  ;;  %v8987_v39 = vld [vmem:[%s13904_s5 + $0x7ac] sm:$0xf0] }
 0x3fb   :  { %v7636_v59 = vor.u32 %v8987_v39, %v7635_v3  ;;  %v7443_v63 = vld [vmem:[%s13904_s5 + $0x620] sm:$0xf]  ;;  %v8971_v39 = vld [vmem:[%s13904_s5 + $0x72c] sm:$0xf0] }
 0x3fc   :  { %v2038_v21 = vmax.f32 %v2028_v4, %v2029_v46  ;;  %v8741_v4 = vld [vmem:[%s13904_s5 + $0x4] sm:$0xf]  ;;  %5500 = vmatpush.bf16.msra.mxu0 %v6680_v47  ;;  %v9007_v47 = vld [vmem:[%s13904_s5 + $0x84c] sm:$0xf0]  ;;  %v7571_v3 = vld [vmem:[%s13904_s5 + $0x720] sm:$0xf] }
 0x3fd   :  { %v1845_v35 = vpop.f32.mrf.mxu2 }
 0x3fe   :  { %2046 = vst [vmem:[#allocation4 + $0x30] sm:$0xff] %v2038_v21  ;;  %v1991_v11 = vpop.f32.mrf.mxu3  ;;  %v1701_v20 = vpop.f32.mrf.mxu1  ;;  %v1864_v8 = vadd.f32 %v1845_v35, %v1718_v24  ;;  %v6661_v21 = vld [vmem:[%s13904_s5 + $0x10] sm:$0xf0]  ;;  %v7619_v24 = vld [vmem:[%s13904_s5 + $0x780] sm:$0xf] }
 0x3ff   :  { %v1719_v27 = vadd.f32 %v1701_v20, %v1572_v52  ;;  %v6664_v35 = vor.u32 %v8741_v4, %v6661_v21  ;;  %v7699_v4 = vld [vmem:[%s13904_s5 + $0x820] sm:$0xf]  ;;  %v8935_v21 = vld [vmem:[%s13904_s5 + $0x60c] sm:$0xf0] }
 0x400   :  { %v2010_v34 = vadd.f32 %v1991_v11, %v1864_v8  ;;  %v8951_v11 = vld [vmem:[%s13904_s5 + $0x68c] sm:$0xf0]  ;;  %v2083_v8 = vld [vmem:[#allocation5 + $0x4] sm:$0x1] }
 0x401   :  { %v2076_v16 = vld [vmem:[#allocation5 + $0x10] sm:$0x1]  ;;  %v2078_v33 = vld [vmem:[#allocation5 + $0x11] sm:$0x1]  ;;  %v2080_v53 = vld [vmem:[#allocation5 + $0x12] sm:$0x1]  ;;  %5501 = vmatpush.bf16.msra.mxu0 %v6664_v35  ;;  %v7572_v35 = vor.u32 %v8971_v39, %v7571_v3 }
 0x402   :  { %v2109_v61 = vrot.slane %v2076_v16, 7  ;;  %v2115_v1 = vrot.slane %v2078_v33, 7  ;;  %v2120_v41 = vrot.slane %v2080_v53, 7  ;;  %v2030_v46 = vadd.f32 %v10397_v26, %v2010_v34  ;;  %v2082_v54 = vld [vmem:[#allocation5 + $0x13] sm:$0x1] }
 0x403   :  { %v2084_v19 = vld [vmem:[#allocation5 + $0x14] sm:$0x1]  ;;  %v2086_v37 = vld [vmem:[#allocation5 + $0x15] sm:$0x1]  ;;  %v2125_v52 = vrot.slane %v2082_v54, 7 }
 0x404   :  { %v2111_v40 = vsel %vm2110_vm4, %v2109_v61, %v2075_v51  ;;  %v2116_v44 = vsel %vm2110_vm4, %v2115_v1, %v2077_v60  ;;  %v2121_v30 = vsel %vm2110_vm4, %v2120_v41, %v2079_v14  ;;  %v2130_v20 = vrot.slane %v2084_v19, 7  ;;  %v2081_v53 = vld [vmem:[#allocation5 + $0x3] sm:$0x1]  ;;  %v8979_v60 = vld [vmem:[%s13904_s5 + $0x76c] sm:$0xf0] }
 0x405   :  { %v1847_v55 = vpop.f32.mrf.mxu2  ;;  %v10826_v0 = vpack.c.bf16 %v2111_v40, %v2111_v40  ;;  %v10828_v7 = vpack.c.bf16 %v2116_v44, %v2116_v44  ;;  %v10830_v9 = vpack.c.bf16 %v2121_v30, %v2121_v30  ;;  %v2135_v16 = vrot.slane %v2086_v37, 7  ;;  %v7475_v61 = vld [vmem:[%s13904_s5 + $0x660] sm:$0xf]  ;;  %v9011_v40 = vld [vmem:[%s13904_s5 + $0x86c] sm:$0xf0] }
 0x406   :  { %v1865_v5 = vadd.f32 %v1847_v55, %v1719_v27  ;;  %v1993_v56 = vpop.f32.mrf.mxu3  ;;  %v7620_v1 = vor.u32 %v8983_v23, %v7619_v24  ;;  %v7748_v41 = vor.u32 %v9015_v50, %v7747_v25  ;;  %v7603_v51 = vld [vmem:[%s13904_s5 + $0x760] sm:$0xf]  ;;  %v2126_v14 = vsel %vm2110_vm4, %v2125_v52, %v2081_v53  ;;  %v8943_v55 = vld [vmem:[%s13904_s5 + $0x64c] sm:$0xf0]  ;;  %v2088_v38 = vld [vmem:[#allocation5 + $0x16] sm:$0x1] }
 0x407   :  { %5294 = vmatmul.bf16.vlgmr.msrb.gmra.mxu1 %v10826_v0  ;;  %5307 = vmatmul.bf16.vlgmr.msrb.gmra.mxu2 %v10828_v7  ;;  %v7731_v27 = vld [vmem:[%s13904_s5 + $0x860] sm:$0xf]  ;;  %v7476_v30 = vor.u32 %v8947_v58, %v7475_v61  ;;  %v7604_v43 = vor.u32 %v8979_v60, %v7603_v51  ;;  %v10924_v15 = vpack.c.bf16 %v2126_v14, %v2126_v14  ;;  %v2090_v19 = vld [vmem:[#allocation5 + $0x17] sm:$0x1]  ;;  %v9091_v23 = vld [vmem:[%s13904_s5 + $0xaec] sm:$0xf0] }
 0x408   :  { %v2011_v31 = vadd.f32 %v1993_v56, %v1865_v5  ;;  %5320 = vmatmul.bf16.vlgmr.msrb.gmra.mxu3 %v10830_v9  ;;  %5364 = vmatpush.bf16.msrb.mxu1 %v7540_v32  ;;  %v2131_v32 = vsel %vm2110_vm4, %v2130_v20, %v2083_v8  ;;  %v7732_v34 = vor.u32 %v9011_v40, %v7731_v27  ;;  %v7587_v5 = vld [vmem:[%s13904_s5 + $0x740] sm:$0xf]  ;;  %v2087_v25 = vld [vmem:[#allocation5 + $0x6] sm:$0x1]  ;;  %v2145_v50 = vrot.slane %v2090_v19, 7 }
 0x409   :  { %5377 = vmatpush.bf16.msrb.mxu2 %v7668_v49  ;;  %5390 = vmatpush.bf16.msrb.mxu3 %v7796_v2  ;;  %v2085_v49 = vld [vmem:[#allocation5 + $0x5] sm:$0x1]  ;;  %v10926_v29 = vpack.c.bf16 %v2131_v32, %v2131_v32  ;;  %v7715_v56 = vld [vmem:[%s13904_s5 + $0x840] sm:$0xf]  ;;  %v7588_v62 = vor.u32 %v8975_v36, %v7587_v5  ;;  %v2099_v58 = vld [vmem:[#allocation5 + $0xc] sm:$0x1] }
 0x40a   :  { %v2031_v57 = vadd.f32 %v10397_v26, %v2011_v31  ;;  %v7491_v26 = vld [vmem:[%s13904_s5 + $0x680] sm:$0xf]  ;;  %v2136_v44 = vsel %vm2110_vm4, %v2135_v16, %v2085_v49  ;;  %v9123_v16 = vld [vmem:[%s13904_s5 + $0xbec] sm:$0xf0]  ;;  %v8897_v27 = vld [vmem:[%s13904_s5 + $0x4e4] sm:$0xf] }
 0x40b   :  { %v7492_v33 = vor.u32 %v8951_v11, %v7491_v26  ;;  %v10931_v12 = vpack.c.bf16 %v2136_v44, %v2136_v44  ;;  %v7555_v54 = vld [vmem:[%s13904_s5 + $0x700] sm:$0xf]  ;;  %v8999_v11 = vld [vmem:[%s13904_s5 + $0x80c] sm:$0xf0]  ;;  %v7285_v40 = vld [vmem:[%s13904_s5 + $0x4f0] sm:$0xf0] }
 0x40c   :  { %v2039_v48 = vmax.f32 %v2030_v46, %v2031_v57  ;;  %5365 = vmatpush.bf16.msrb.mxu1 %v7524_v45  ;;  %v7460_v45 = vor.u32 %v8943_v55, %v7459_v17  ;;  %v9003_v46 = vld [vmem:[%s13904_s5 + $0x82c] sm:$0xf0]  ;;  %v7427_v57 = vld [vmem:[%s13904_s5 + $0x600] sm:$0xf]  ;;  %v8889_v19 = vld [vmem:[%s13904_s5 + $0x4a4] sm:$0xf] }
 0x40d   :  { %5378 = vmatpush.bf16.msrb.mxu2 %v7652_v6  ;;  %5391 = vmatpush.bf16.msrb.mxu3 %v7780_v18  ;;  %v7716_v6 = vor.u32 %v9007_v47, %v7715_v56  ;;  %v8939_v18 = vld [vmem:[%s13904_s5 + $0x62c] sm:$0xf0]  ;;  %v7683_v26 = vld [vmem:[%s13904_s5 + $0x800] sm:$0xf]  ;;  %v7428_v52 = vor.u32 %v8935_v21, %v7427_v57 }
 0x40e   :  { %2047 = vst [vmem:[#allocation4 + $0x38] sm:$0xff] %v2039_v48  ;;  %v7444_v13 = vor.u32 %v8939_v18, %v7443_v63  ;;  %v7700_v48 = vor.u32 %v9003_v46, %v7699_v4  ;;  %v7923_v37 = vld [vmem:[%s13904_s5 + $0x9e0] sm:$0xf]  ;;  %v7684_v8 = vor.u32 %v8999_v11, %v7683_v26  ;;  %v9055_v17 = vld [vmem:[%s13904_s5 + $0x9cc] sm:$0xf0] }
 0x40f   :  { %v8051_v24 = vld [vmem:[%s13904_s5 + $0xae0] sm:$0xf]  ;;  %v9051_v4 = vld [vmem:[%s13904_s5 + $0x9ac] sm:$0xf0] }
 0x410   :  { %5366 = vmatpush.bf16.msrb.mxu1 %v7508_v22  ;;  %v8967_v22 = vld [vmem:[%s13904_s5 + $0x70c] sm:$0xf0]  ;;  %v8179_v20 = vld [vmem:[%s13904_s5 + $0xbe0] sm:$0xf]  ;;  %v8052_v60 = vor.u32 %v9091_v23, %v8051_v24 }
 0x411   :  { %5379 = vmatpush.bf16.msrb.mxu2 %v7636_v59  ;;  %5392 = vmatpush.bf16.msrb.mxu3 %v7764_v28  ;;  %v9059_v59 = vld [vmem:[%s13904_s5 + $0x9ec] sm:$0xf0]  ;;  %v2140_v28 = vrot.slane %v2088_v38, 7  ;;  %v7556_v53 = vor.u32 %v8967_v22, %v7555_v54  ;;  %v8180_v44 = vor.u32 %v9123_v16, %v8179_v20  ;;  %v8035_v55 = vld [vmem:[%s13904_s5 + $0xac0] sm:$0xf] }
 0x412   :  { %v7924_v61 = vor.u32 %v9059_v59, %v7923_v37  ;;  %v8163_v5 = vld [vmem:[%s13904_s5 + $0xbc0] sm:$0xf]  ;;  %v9083_v57 = vld [vmem:[%s13904_s5 + $0xaac] sm:$0xf0] }
 0x413   :  { %v2141_v14 = vsel %vm2110_vm4, %v2140_v28, %v2087_v25  ;;  %v7891_v39 = vld [vmem:[%s13904_s5 + $0x9a0] sm:$0xf]  ;;  %v9047_v11 = vld [vmem:[%s13904_s5 + $0x98c] sm:$0xf0] }
 0x414   :  { %5367 = vmatpush.bf16.msrb.mxu1 %v7492_v33  ;;  %v2089_v33 = vld [vmem:[#allocation5 + $0x7] sm:$0x1]  ;;  %v11027_v36 = vpack.c.bf16 %v2141_v14, %v2141_v14  ;;  %v8019_v46 = vld [vmem:[%s13904_s5 + $0xaa0] sm:$0xf]  ;;  %v7892_v54 = vor.u32 %v9051_v4, %v7891_v39  ;;  %v9079_v59 = vld [vmem:[%s13904_s5 + $0xa8c] sm:$0xf0] }
 0x415   :  { %v2054_v2 = vld [vmem:[#allocation4 + $0x30] ss:$2 sm:$0xff]  ;;  %v2062_v10 = vld [vmem:[#allocation4 + $0x31] ss:$2 sm:$0xff]  ;;  %5380 = vmatpush.bf16.msrb.mxu2 %v7620_v1  ;;  %5393 = vmatpush.bf16.msrb.mxu3 %v7748_v41  ;;  %v2091_v1 = vld [vmem:[#allocation5 + $0x8] sm:$0x1] }
 0x416   :  { %v2066_v42 = vmax.f32 %v2054_v2, %v2062_v10  ;;  %v8147_v38 = vld [vmem:[%s13904_s5 + $0xba0] sm:$0xf]  ;;  %v9111_v24 = vld [vmem:[%s13904_s5 + $0xb8c] sm:$0xf0]  ;;  %v7221_v14 = vld [vmem:[%s13904_s5 + $0x470] sm:$0xf0] }
 0x417   :  { %5333 = vmatmul.bf16.vlgmr.msra.gmra.mxu1 %v10924_v15  ;;  %5346 = vmatmul.bf16.vlgmr.msra.gmra.mxu2 %v10926_v29  ;;  %v7875_v26 = vld [vmem:[%s13904_s5 + $0x980] sm:$0xf]  ;;  %v8873_v39 = vld [vmem:[%s13904_s5 + $0x424] sm:$0xf]  ;;  %v7189_v4 = vld [vmem:[%s13904_s5 + $0x430] sm:$0xf0] }
 0x418   :  { %v2070_v31 = vmax.f32 %v2066_v42, 0.0  ;;  %5359 = vmatmul.bf16.vlgmr.msra.gmra.mxu3 %v10931_v12  ;;  %5368 = vmatpush.bf16.msrb.mxu1 %v7476_v30  ;;  %v2146_v30 = vsel %vm2110_vm4, %v2145_v50, %v2089_v33  ;;  %v9119_v42 = vld [vmem:[%s13904_s5 + $0xbcc] sm:$0xf0]  ;;  %v8003_v37 = vld [vmem:[%s13904_s5 + $0xa80] sm:$0xf]  ;;  %v7876_v25 = vor.u32 %v9047_v11, %v7875_v26 }
 0x419   :  { %5381 = vmatpush.bf16.msrb.mxu2 %v7604_v43  ;;  %5394 = vmatpush.bf16.msrb.mxu3 %v7732_v34  ;;  %v7907_v43 = vld [vmem:[%s13904_s5 + $0x9c0] sm:$0xf]  ;;  %v9087_v34 = vld [vmem:[%s13904_s5 + $0xacc] sm:$0xf0]  ;;  %v8164_v3 = vor.u32 %v9119_v42, %v8163_v5  ;;  %v8885_v50 = vld [vmem:[%s13904_s5 + $0x484] sm:$0xf]  ;;  %v8004_v20 = vor.u32 %v9079_v59, %v8003_v37 }
 0x41a   :  { %2074 = vst [vmem:[#allocation5 + $0x18] sm:$0xff] %v2070_v31  ;;  %v11033_v31 = vpack.c.bf16 %v2146_v30, %v2146_v30  ;;  %v7908_v63 = vor.u32 %v9055_v17, %v7907_v43  ;;  %v8036_v18 = vor.u32 %v9087_v34, %v8035_v55  ;;  %v8131_v28 = vld [vmem:[%s13904_s5 + $0xb80] sm:$0xf]  ;;  %v9071_v30 = vld [vmem:[%s13904_s5 + $0xa4c] sm:$0xf0] }
 0x41b   :  { %v8132_v16 = vor.u32 %v9111_v24, %v8131_v28  ;;  %v7859_v33 = vld [vmem:[%s13904_s5 + $0x960] sm:$0xf]  ;;  %v9103_v17 = vld [vmem:[%s13904_s5 + $0xb4c] sm:$0xf0]  ;;  %v7205_v34 = vld [vmem:[%s13904_s5 + $0x450] sm:$0xf0] }
 0x41c   :  { %5369 = vmatpush.bf16.msrb.mxu1 %v7460_v45  ;;  %v7288_v45 = vor.u32 %v8897_v27, %v7285_v40  ;;  %v7843_v27 = vld [vmem:[%s13904_s5 + $0x940] sm:$0xf]  ;;  %v9039_v40 = vld [vmem:[%s13904_s5 + $0x94c] sm:$0xf0] }
 0x41d   :  { %5382 = vmatpush.bf16.msrb.mxu2 %v7588_v62  ;;  %5395 = vmatpush.bf16.msrb.mxu3 %v7716_v6  ;;  %v8893_v62 = vld [vmem:[%s13904_s5 + $0x4c4] sm:$0xf]  ;;  %v7269_v6 = vld [vmem:[%s13904_s5 + $0x4d0] sm:$0xf0]  ;;  %v8099_v43 = vld [vmem:[%s13904_s5 + $0xb40] sm:$0xf] }
 0x41e   :  { %v7272_v21 = vor.u32 %v8893_v62, %v7269_v6  ;;  %v8100_v42 = vor.u32 %v9103_v17, %v8099_v43  ;;  %v7955_v62 = vld [vmem:[%s13904_s5 + $0xa20] sm:$0xf]  ;;  %v9067_v6 = vld [vmem:[%s13904_s5 + $0xa2c] sm:$0xf0] }
 0x41f   :  { %v9063_v26 = vld [vmem:[%s13904_s5 + $0xa0c] sm:$0xf0]  ;;  %v8067_v11 = vld [vmem:[%s13904_s5 + $0xb00] sm:$0xf] }
 0x420   :  { %5370 = vmatpush.bf16.msrb.mxu1 %v7444_v13  ;;  %v9115_v13 = vld [vmem:[%s13904_s5 + $0xbac] sm:$0xf0]  ;;  %v8435_v59 = vld [vmem:[%s13904_s5 + $0xde0] sm:$0xf] }
 0x421   :  { %5383 = vmatpush.bf16.msrb.mxu2 %v7572_v35  ;;  %5396 = vmatpush.bf16.msrb.mxu3 %v7700_v48  ;;  %v2092_v41 = vld [vmem:[#allocation5 + $0x18] sm:$0x1]  ;;  %v2100_v51 = vld [vmem:[#allocation5 + $0x1c] sm:$0x1]  ;;  %v7253_v35 = vld [vmem:[%s13904_s5 + $0x4b0] sm:$0xf0]  ;;  %v8020_v48 = vor.u32 %v9083_v57, %v8019_v46  ;;  %v8148_v22 = vor.u32 %v9115_v13, %v8147_v38 }
 0x422   :  { %v2150_v32 = vrot.slane %v2092_v41, 7  ;;  %v2170_v49 = vrot.slane %v2100_v51, 7  ;;  %v7256_v23 = vor.u32 %v8889_v19, %v7253_v35  ;;  %v9107_v41 = vld [vmem:[%s13904_s5 + $0xb6c] sm:$0xf0]  ;;  %v7811_v46 = vld [vmem:[%s13904_s5 + $0x900] sm:$0xf] }
 0x423   :  { %v2094_v57 = vld [vmem:[#allocation5 + $0x19] sm:$0x1]  ;;  %v2096_v38 = vld [vmem:[#allocation5 + $0x1a] sm:$0x1]  ;;  %v7939_v19 = vld [vmem:[%s13904_s5 + $0xa00] sm:$0xf] }
 0x424   :  { %5371 = vmatpush.bf16.msrb.mxu1 %v7428_v52  ;;  %v2151_v2 = vsel %vm2110_vm4, %v2150_v32, %v2091_v1  ;;  %v2171_v10 = vsel %vm2110_vm4, %v2170_v49, %v2099_v58  ;;  %v7237_v52 = vld [vmem:[%s13904_s5 + $0x490] sm:$0xf0]  ;;  %v8115_v1 = vld [vmem:[%s13904_s5 + $0xb60] sm:$0xf]  ;;  %v2098_v35 = vld [vmem:[#allocation5 + $0x1b] sm:$0x1] }
 0x425   :  { %5384 = vmatpush.bf16.msrb.mxu2 %v7556_v53  ;;  %5397 = vmatpush.bf16.msrb.mxu3 %v7684_v8  ;;  %v11029_v56 = vpack.c.bf16 %v2151_v2, %v2151_v2  ;;  %v11031_v47 = vpack.c.bf16 %v2171_v10, %v2171_v10  ;;  %v9043_v53 = vld [vmem:[%s13904_s5 + $0x96c] sm:$0xf0]  ;;  %v7987_v8 = vld [vmem:[%s13904_s5 + $0xa60] sm:$0xf]  ;;  %v7240_v58 = vor.u32 %v8885_v50, %v7237_v52  ;;  %v8877_v10 = vld [vmem:[%s13904_s5 + $0x444] sm:$0xf] }
 0x426   :  { %v7860_v51 = vor.u32 %v9043_v53, %v7859_v33  ;;  %v8116_v49 = vor.u32 %v9107_v41, %v8115_v1  ;;  %v7844_v2 = vor.u32 %v9039_v40, %v7843_v27  ;;  %v7208_v13 = vor.u32 %v8877_v10, %v7205_v34  ;;  %v9095_v37 = vld [vmem:[%s13904_s5 + $0xb0c] sm:$0xf0]  ;;  %v8691_v33 = vld [vmem:[%s13904_s5 + $0xfe0] sm:$0xf]  ;;  %v2095_v41 = vld [vmem:[#allocation5 + $0xa] sm:$0x1] }
 0x427   :  { %5372 = vmatmul.bf16.vlgmr.msrb.gmra.mxu1 %v11027_v36  ;;  %5450 = vmatmul.bf16.vlgmr.msrb.gmra.mxu0 %v11031_v47  ;;  %v9187_v28 = vld [vmem:[%s13904_s5 + $0xdec] sm:$0xf0]  ;;  %v2155_v24 = vrot.slane %v2094_v57, 7  ;;  %v2165_v52 = vrot.slane %v2098_v35, 7  ;;  %v8068_v1 = vor.u32 %v9095_v37, %v8067_v11  ;;  %v7173_v27 = vld [vmem:[%s13904_s5 + $0x410] sm:$0xf0] }
 0x428   :  { %5403 = vmatpush.bf16.msra.mxu1 %v7924_v61  ;;  %5385 = vmatmul.bf16.vlgmr.msrb.gmra.mxu2 %v11033_v31  ;;  %v9075_v61 = vld [vmem:[%s13904_s5 + $0xa6c] sm:$0xf0]  ;;  %v9025_v40 = vld [vmem:[%s13904_s5 + $0x8e4] sm:$0xf]  ;;  %v8419_v17 = vld [vmem:[%s13904_s5 + $0xdc0] sm:$0xf] }
 0x429   :  { %5416 = vmatpush.bf16.msra.mxu2 %v8052_v60  ;;  %5429 = vmatpush.bf16.msra.mxu3 %v8180_v44  ;;  %v8881_v60 = vld [vmem:[%s13904_s5 + $0x464] sm:$0xf]  ;;  %v7988_v32 = vor.u32 %v9075_v61, %v7987_v8  ;;  %v7971_v44 = vld [vmem:[%s13904_s5 + $0xa40] sm:$0xf]  ;;  %v9219_v50 = vld [vmem:[%s13904_s5 + $0xeec] sm:$0xf0]  ;;  %v7940_v61 = vor.u32 %v9063_v26, %v7939_v19 }
 0x42a   :  { %5398 = vmatmul.bf16.vlgmr.msrb.gmra.mxu3 %v11029_v56  ;;  %5546 = vmatpush.bf16.msrb.mxu0 %v7288_v45  ;;  %v7224_v55 = vor.u32 %v8881_v60, %v7221_v14  ;;  %v7972_v5 = vor.u32 %v9071_v30, %v7971_v44  ;;  %v7827_v45 = vld [vmem:[%s13904_s5 + $0x920] sm:$0xf]  ;;  %v9251_v53 = vld [vmem:[%s13904_s5 + $0xfec] sm:$0xf0]  ;;  %v2093_v8 = vld [vmem:[#allocation5 + $0x9] sm:$0x1]  ;;  %v8436_v60 = vor.u32 %v9187_v28, %v8435_v59 }
 0x42b   :  { %v7797_v44 = vld [vmem:[%s13904_s5 + $0x8f0] sm:$0xf0]  ;;  %v8692_v30 = vor.u32 %v9251_v53, %v8691_v33  ;;  %v9215_v10 = vld [vmem:[%s13904_s5 + $0xecc] sm:$0xf0]  ;;  %v8675_v34 = vld [vmem:[%s13904_s5 + $0xfc0] sm:$0xf] }
 0x42c   :  { %5404 = vmatpush.bf16.msra.mxu1 %v7908_v63  ;;  %v9035_v63 = vld [vmem:[%s13904_s5 + $0x92c] sm:$0xf0]  ;;  %v8403_v57 = vld [vmem:[%s13904_s5 + $0xda0] sm:$0xf]  ;;  %v7765_v26 = vld [vmem:[%s13904_s5 + $0x8b0] sm:$0xf0] }
 0x42d   :  { %5417 = vmatpush.bf16.msra.mxu2 %v8036_v18  ;;  %5430 = vmatpush.bf16.msra.mxu3 %v8164_v3  ;;  %v8083_v18 = vld [vmem:[%s13904_s5 + $0xb20] sm:$0xf]  ;;  %v9099_v3 = vld [vmem:[%s13904_s5 + $0xb2c] sm:$0xf0]  ;;  %v7749_v33 = vld [vmem:[%s13904_s5 + $0x890] sm:$0xf0] }
 0x42e   :  { %5547 = vmatpush.bf16.msrb.mxu0 %v7272_v21  ;;  %v7828_v21 = vor.u32 %v9035_v63, %v7827_v45  ;;  %v9243_v19 = vld [vmem:[%s13904_s5 + $0xfac] sm:$0xf0]  ;;  %v8387_v59 = vld [vmem:[%s13904_s5 + $0xd80] sm:$0xf] }
 0x42f   :  { %v9175_v28 = vld [vmem:[%s13904_s5 + $0xd8c] sm:$0xf0] }
 0x430   :  { %5405 = vmatpush.bf16.msra.mxu1 %v7892_v54  ;;  %v9031_v54 = vld [vmem:[%s13904_s5 + $0x90c] sm:$0xf0] }
 0x431   :  { %5418 = vmatpush.bf16.msra.mxu2 %v8020_v48  ;;  %5431 = vmatpush.bf16.msra.mxu3 %v8148_v22  ;;  %v7956_v48 = vor.u32 %v9067_v6, %v7955_v62  ;;  %v8084_v22 = vor.u32 %v9099_v3, %v8083_v18  ;;  %v7800_v6 = vor.u32 %v9025_v40, %v7797_v44  ;;  %v9021_v3 = vld [vmem:[%s13904_s5 + $0x8c4] sm:$0xf] }
 0x432   :  { %5548 = vmatpush.bf16.msrb.mxu0 %v7256_v23  ;;  %v2160_v23 = vrot.slane %v2096_v38, 7  ;;  %v9179_v38 = vld [vmem:[%s13904_s5 + $0xdac] sm:$0xf0] }
 0x434   :  { %5406 = vmatpush.bf16.msra.mxu1 %v7876_v25  ;;  %v8563_v25 = vld [vmem:[%s13904_s5 + $0xee0] sm:$0xf] }
 0x435   :  { %5419 = vmatpush.bf16.msra.mxu2 %v8004_v20  ;;  %5432 = vmatpush.bf16.msra.mxu3 %v8132_v16  ;;  %v7192_v20 = vor.u32 %v8873_v39, %v7189_v4  ;;  %v7812_v16 = vor.u32 %v9031_v54, %v7811_v46  ;;  %v8564_v14 = vor.u32 %v9219_v50, %v8563_v25  ;;  %v7781_v39 = vld [vmem:[%s13904_s5 + $0x8d0] sm:$0xf0]  ;;  %v8659_v54 = vld [vmem:[%s13904_s5 + $0xfa0] sm:$0xf]  ;;  %v9239_v50 = vld [vmem:[%s13904_s5 + $0xf8c] sm:$0xf0] }
 0x436   :  { %5549 = vmatpush.bf16.msrb.mxu0 %v7240_v58  ;;  %v2097_v58 = vld [vmem:[#allocation5 + $0xb] sm:$0x1]  ;;  %v7784_v35 = vor.u32 %v9021_v3, %v7781_v39  ;;  %v8660_v37 = vor.u32 %v9243_v19, %v8659_v54  ;;  %v8643_v25 = vld [vmem:[%s13904_s5 + $0xf80] sm:$0xf]  ;;  %v7717_v3 = vld [vmem:[%s13904_s5 + $0x850] sm:$0xf0] }
 0x437   :  { %5502 = vmatmul.bf16.vlgmr.msra.gmra.mxu0 %v10826_v0  ;;  %v2166_v43 = vsel %vm2110_vm4, %v2165_v52, %v2097_v58  ;;  %v9203_v58 = vld [vmem:[%s13904_s5 + $0xe6c] sm:$0xf0]  ;;  %v2106_v39 = vld [vmem:[#allocation5 + $0x1f] sm:$0x1]  ;;  %v8595_v54 = vld [vmem:[%s13904_s5 + $0xf20] sm:$0xf] }
 0x438   :  { %5407 = vmatpush.bf16.msra.mxu1 %v7860_v51  ;;  %v8869_v51 = vld [vmem:[%s13904_s5 + $0x404] sm:$0xf]  ;;  %v11239_v62 = vpack.c.bf16 %v2166_v43, %v2166_v43  ;;  %v9167_v43 = vld [vmem:[%s13904_s5 + $0xd4c] sm:$0xf0] }
 0x439   :  { %5420 = vmatpush.bf16.msra.mxu2 %v7988_v32  ;;  %5433 = vmatpush.bf16.msra.mxu3 %v8116_v49  ;;  %v2156_v32 = vsel %vm2110_vm4, %v2155_v24, %v2093_v8  ;;  %v2161_v49 = vsel %vm2110_vm4, %v2160_v23, %v2095_v41  ;;  %v7176_v63 = vor.u32 %v8869_v51, %v7173_v27  ;;  %v8515_v24 = vld [vmem:[%s13904_s5 + $0xe80] sm:$0xf]  ;;  %v9207_v23 = vld [vmem:[%s13904_s5 + $0xe8c] sm:$0xf0]  ;;  %v7733_v27 = vld [vmem:[%s13904_s5 + $0x870] sm:$0xf0] }
 0x43a   :  { %5550 = vmatpush.bf16.msrb.mxu0 %v7224_v55  ;;  %v9183_v55 = vld [vmem:[%s13904_s5 + $0xdcc] sm:$0xf0]  ;;  %v11237_v45 = vpack.c.bf16 %v2161_v49, %v2161_v49  ;;  %v8516_v53 = vor.u32 %v9207_v23, %v8515_v24  ;;  %v8644_v8 = vor.u32 %v9239_v50, %v8643_v25  ;;  %v8499_v41 = vld [vmem:[%s13904_s5 + $0xe60] sm:$0xf]  ;;  %v9009_v49 = vld [vmem:[%s13904_s5 + $0x864] sm:$0xf] }
 0x43b   :  { %v8420_v18 = vor.u32 %v9183_v55, %v8419_v17  ;;  %v8627_v51 = vld [vmem:[%s13904_s5 + $0xf60] sm:$0xf]  ;;  %v8500_v40 = vor.u32 %v9203_v58, %v8499_v41  ;;  %v9199_v55 = vld [vmem:[%s13904_s5 + $0xe4c] sm:$0xf0]  ;;  %v8865_v58 = vld [vmem:[%s13904_s5 + $0x3e4] sm:$0xf] }
 0x43c   :  { %5408 = vmatpush.bf16.msra.mxu1 %v7844_v2  ;;  %v8547_v2 = vld [vmem:[%s13904_s5 + $0xec0] sm:$0xf]  ;;  %v9227_v19 = vld [vmem:[%s13904_s5 + $0xf2c] sm:$0xf0] }
 0x43d   :  { %5421 = vmatpush.bf16.msra.mxu2 %v7972_v5  ;;  %5434 = vmatpush.bf16.msra.mxu3 %v8100_v42  ;;  %v9247_v5 = vld [vmem:[%s13904_s5 + $0xfcc] sm:$0xf0]  ;;  %v11235_v42 = vpack.c.bf16 %v2156_v32, %v2156_v32  ;;  %v8548_v4 = vor.u32 %v9215_v10, %v8547_v2  ;;  %v8483_v17 = vld [vmem:[%s13904_s5 + $0xe40] sm:$0xf]  ;;  %v8596_v23 = vor.u32 %v9227_v19, %v8595_v54  ;;  %v9149_v19 = vld [vmem:[%s13904_s5 + $0xcc4] sm:$0xf] }
 0x43e   :  { %5551 = vmatpush.bf16.msrb.mxu0 %v7208_v13  ;;  %v8676_v46 = vor.u32 %v9247_v5, %v8675_v34  ;;  %v8531_v13 = vld [vmem:[%s13904_s5 + $0xea0] sm:$0xf]  ;;  %v9231_v10 = vld [vmem:[%s13904_s5 + $0xf4c] sm:$0xf0]  ;;  %v2102_v34 = vld [vmem:[#allocation5 + $0x1d] sm:$0x1] }
 0x43f   :  { %v8611_v2 = vld [vmem:[%s13904_s5 + $0xf40] sm:$0xf]  ;;  %v2104_v5 = vld [vmem:[#allocation5 + $0x1e] sm:$0x1]  ;;  %v9159_v25 = vld [vmem:[%s13904_s5 + $0xd0c] sm:$0xf0] }
 0x440   :  { %5409 = vmatpush.bf16.msra.mxu1 %v7828_v21  ;;  %v9211_v21 = vld [vmem:[%s13904_s5 + $0xeac] sm:$0xf0]  ;;  %v8451_v50 = vld [vmem:[%s13904_s5 + $0xe00] sm:$0xf] }
 0x441   :  { %5422 = vmatpush.bf16.msra.mxu2 %v7956_v48  ;;  %5435 = vmatpush.bf16.msra.mxu3 %v8084_v22  ;;  %v8404_v48 = vor.u32 %v9179_v38, %v8403_v57  ;;  %v9017_v22 = vld [vmem:[%s13904_s5 + $0x8a4] sm:$0xf]  ;;  %v8532_v11 = vor.u32 %v9211_v21, %v8531_v13  ;;  %v8339_v57 = vld [vmem:[%s13904_s5 + $0xd20] sm:$0xf]  ;;  %v9163_v38 = vld [vmem:[%s13904_s5 + $0xd2c] sm:$0xf0] }
 0x442   :  { %5552 = vmatpush.bf16.msrb.mxu0 %v7192_v20  ;;  %v7768_v52 = vor.u32 %v9017_v22, %v7765_v26  ;;  %v8388_v20 = vor.u32 %v9175_v28, %v8387_v59  ;;  %v8467_v13 = vld [vmem:[%s13904_s5 + $0xe20] sm:$0xf]  ;;  %v9195_v21 = vld [vmem:[%s13904_s5 + $0xe2c] sm:$0xf0]  ;;  %v2185_v22 = vrot.slane %v2106_v39, 7 }
 0x443   :  { %v7701_v59 = vld [vmem:[%s13904_s5 + $0x830] sm:$0xf0]  ;;  %v8323_v28 = vld [vmem:[%s13904_s5 + $0xd00] sm:$0xf]  ;;  %v8468_v24 = vor.u32 %v9195_v21, %v8467_v13  ;;  %v8861_v39 = vld [vmem:[%s13904_s5 + $0x3c4] sm:$0xf] }
 0x444   :  { %5410 = vmatpush.bf16.msra.mxu1 %v7812_v16  ;;  %v9013_v16 = vld [vmem:[%s13904_s5 + $0x884] sm:$0xf]  ;;  %v8324_v41 = vor.u32 %v9159_v25, %v8323_v28 }
 0x445   :  { %5423 = vmatpush.bf16.msra.mxu2 %v7940_v61  ;;  %5436 = vmatpush.bf16.msra.mxu3 %v8068_v1  ;;  %v8371_v61 = vld [vmem:[%s13904_s5 + $0xd60] sm:$0xf]  ;;  %v9171_v1 = vld [vmem:[%s13904_s5 + $0xd6c] sm:$0xf0]  ;;  %v8857_v28 = vld [vmem:[%s13904_s5 + $0x3a4] sm:$0xf] }
 0x446   :  { %5553 = vmatpush.bf16.msrb.mxu0 %v7176_v63  ;;  %v8372_v32 = vor.u32 %v9171_v1, %v8371_v61  ;;  %v7736_v63 = vor.u32 %v9009_v49, %v7733_v27  ;;  %v7029_v61 = vld [vmem:[%s13904_s5 + $0x2f0] sm:$0xf0]  ;;  %v2103_v49 = vld [vmem:[#allocation5 + $0xe] sm:$0x1]  ;;  %v2105_v27 = vld [vmem:[#allocation5 + $0xf] sm:$0x1] }
 0x447   :  { %5411 = vmatmul.bf16.vlgmr.msra.gmra.mxu1 %v11235_v42 }
 0x448   :  { %5455 = vmatpush.bf16.msrb.mxu1 %v8436_v60  ;;  %5424 = vmatmul.bf16.vlgmr.msra.gmra.mxu2 %v11237_v45  ;;  %v9235_v60 = vld [vmem:[%s13904_s5 + $0xf6c] sm:$0xf0] }
 0x449   :  { %5468 = vmatpush.bf16.msrb.mxu2 %v8564_v14  ;;  %5481 = vmatpush.bf16.msrb.mxu3 %v8692_v30  ;;  %v7752_v14 = vor.u32 %v9013_v16, %v7749_v33  ;;  %v8628_v44 = vor.u32 %v9235_v60, %v8627_v51  ;;  %v8355_v30 = vld [vmem:[%s13904_s5 + $0xd40] sm:$0xf]  ;;  %v9223_v16 = vld [vmem:[%s13904_s5 + $0xf0c] sm:$0xf0]  ;;  %v8801_v33 = vld [vmem:[%s13904_s5 + $0x1e4] sm:$0xf] }
 0x44a   :  { %5437 = vmatmul.bf16.vlgmr.msra.gmra.mxu3 %v11239_v62  ;;  %5598 = vmatpush.bf16.msra.mxu0 %v7800_v6  ;;  %v8356_v6 = vor.u32 %v9167_v43, %v8355_v30  ;;  %v7157_v51 = vld [vmem:[%s13904_s5 + $0x3f0] sm:$0xf0]  ;;  %v2101_v60 = vld [vmem:[#allocation5 + $0xd] sm:$0x1] }
 0x44b   :  { %5554 = vmatmul.bf16.vlgmr.msrb.gmra.mxu0 %v10926_v29 }
 0x44c   :  { %5456 = vmatpush.bf16.msrb.mxu1 %v8420_v18  ;;  %v9005_v18 = vld [vmem:[%s13904_s5 + $0x844] sm:$0xf] }
 0x44d   :  { %5469 = vmatpush.bf16.msrb.mxu2 %v8548_v4  ;;  %5482 = vmatpush.bf16.msrb.mxu3 %v8676_v46  ;;  %v8484_v4 = vor.u32 %v9199_v55, %v8483_v17  ;;  %v8612_v46 = vor.u32 %v9231_v10, %v8611_v2  ;;  %v7720_v26 = vor.u32 %v9005_v18, %v7717_v3  ;;  %v7685_v55 = vld [vmem:[%s13904_s5 + $0x810] sm:$0xf0]  ;;  %v9153_v2 = vld [vmem:[%s13904_s5 + $0xce4] sm:$0xf] }
 0x44e   :  { %5599 = vmatpush.bf16.msra.mxu0 %v7784_v35  ;;  %v2175_v35 = vrot.slane %v2102_v34, 7  ;;  %v8309_v10 = vld [vmem:[%s13904_s5 + $0xcf0] sm:$0xf0]  ;;  %v7160_v34 = vor.u32 %v8865_v58, %v7157_v51  ;;  %v8829_v18 = vld [vmem:[%s13904_s5 + $0x2c4] sm:$0xf] }
 0x44f   :  { %v7013_v3 = vld [vmem:[%s13904_s5 + $0x2d0] sm:$0xf0]  ;;  %v8312_v21 = vor.u32 %v9153_v2, %v8309_v10  ;;  %v9137_v10 = vld [vmem:[%s13904_s5 + $0xc64] sm:$0xf] }
 0x450   :  { %5457 = vmatpush.bf16.msrb.mxu1 %v8404_v48  ;;  %v2180_v48 = vrot.slane %v2104_v5, 7  ;;  %v2176_v43 = vsel %vm2110_vm4, %v2175_v35, %v2101_v60  ;;  %v2186_v5 = vsel %vm2110_vm4, %v2185_v22, %v2105_v27  ;;  %v8293_v35 = vld [vmem:[%s13904_s5 + $0xcd0] sm:$0xf0]  ;;  %v9141_v60 = vld [vmem:[%s13904_s5 + $0xc84] sm:$0xf] }
 0x451   :  { %5470 = vmatpush.bf16.msrb.mxu2 %v8532_v11  ;;  %5483 = vmatpush.bf16.msrb.mxu3 %v8660_v37  ;;  %v8340_v11 = vor.u32 %v9163_v38, %v8339_v57  ;;  %v9001_v37 = vld [vmem:[%s13904_s5 + $0x824] sm:$0xf]  ;;  %v11444_v13 = vpack.c.bf16 %v2186_v5, %v2186_v5 }
 0x452   :  { %5600 = vmatpush.bf16.msra.mxu0 %v7768_v52  ;;  %v9191_v52 = vld [vmem:[%s13904_s5 + $0xe0c] sm:$0xf0]  ;;  %v7704_v1 = vor.u32 %v9001_v37, %v7701_v59  ;;  %v2181_v17 = vsel %vm2110_vm4, %v2180_v48, %v2103_v49  ;;  %v7016_v48 = vor.u32 %v8829_v18, %v7013_v3  ;;  %v8825_v37 = vld [vmem:[%s13904_s5 + $0x2a4] sm:$0xf]  ;;  %v6997_v59 = vld [vmem:[%s13904_s5 + $0x2b0] sm:$0xf0] }
 0x453   :  { %v11442_v57 = vpack.c.bf16 %v2181_v17, %v2181_v17  ;;  %v8785_v27 = vld [vmem:[%s13904_s5 + $0x164] sm:$0xf]  ;;  %v7093_v17 = vld [vmem:[%s13904_s5 + $0x370] sm:$0xf0] }
 0x454   :  { %5458 = vmatpush.bf16.msrb.mxu1 %v8388_v20  ;;  %v8579_v20 = vld [vmem:[%s13904_s5 + $0xf00] sm:$0xf]  ;;  %v6821_v18 = vld [vmem:[%s13904_s5 + $0x150] sm:$0xf0]  ;;  %v8813_v3 = vld [vmem:[%s13904_s5 + $0x244] sm:$0xf] }
 0x455   :  { %5471 = vmatpush.bf16.msrb.mxu2 %v8516_v53  ;;  %5484 = vmatpush.bf16.msrb.mxu3 %v8644_v8  ;;  %v6901_v53 = vld [vmem:[%s13904_s5 + $0x1f0] sm:$0xf0]  ;;  %v8833_v8 = vld [vmem:[%s13904_s5 + $0x2e4] sm:$0xf] }
 0x456   :  { %5601 = vmatpush.bf16.msra.mxu0 %v7752_v14  ;;  %v8452_v14 = vor.u32 %v9191_v52, %v8451_v50  ;;  %v7032_v30 = vor.u32 %v8833_v8, %v7029_v61  ;;  %v9145_v50 = vld [vmem:[%s13904_s5 + $0xca4] sm:$0xf]  ;;  %v8277_v52 = vld [vmem:[%s13904_s5 + $0xcb0] sm:$0xf0] }
 0x457   :  { %v8821_v8 = vld [vmem:[%s13904_s5 + $0x284] sm:$0xf]  ;;  %v6981_v61 = vld [vmem:[%s13904_s5 + $0x290] sm:$0xf0]  ;;  %v8280_v58 = vor.u32 %v9145_v50, %v8277_v52 }
 0x458   :  { %5459 = vmatpush.bf16.msrb.mxu1 %v8372_v32  ;;  %v8580_v32 = vor.u32 %v9223_v16, %v8579_v20  ;;  %v7000_v20 = vor.u32 %v8825_v37, %v6997_v59  ;;  %v8809_v37 = vld [vmem:[%s13904_s5 + $0x224] sm:$0xf]  ;;  %v6933_v59 = vld [vmem:[%s13904_s5 + $0x230] sm:$0xf0] }
 0x459   :  { %5472 = vmatpush.bf16.msrb.mxu2 %v8500_v40  ;;  %5485 = vmatpush.bf16.msrb.mxu3 %v8628_v44  ;;  %v8997_v40 = vld [vmem:[%s13904_s5 + $0x804] sm:$0xf]  ;;  %v6904_v44 = vor.u32 %v8801_v33, %v6901_v53  ;;  %v6853_v53 = vld [vmem:[%s13904_s5 + $0x190] sm:$0xf0] }
 0x45a   :  { %5602 = vmatpush.bf16.msra.mxu0 %v7736_v63  ;;  %v8797_v63 = vld [vmem:[%s13904_s5 + $0x1c4] sm:$0xf]  ;;  %v7688_v38 = vor.u32 %v8997_v40, %v7685_v55  ;;  %v6837_v40 = vld [vmem:[%s13904_s5 + $0x170] sm:$0xf0] }
 0x45b   :  { %v8789_v33 = vld [vmem:[%s13904_s5 + $0x184] sm:$0xf]  ;;  %v6840_v2 = vor.u32 %v8785_v27, %v6837_v40  ;;  %v8213_v52 = vld [vmem:[%s13904_s5 + $0xc30] sm:$0xf0] }
 0x45c   :  { %5460 = vmatpush.bf16.msrb.mxu1 %v8356_v6  ;;  %v6885_v6 = vld [vmem:[%s13904_s5 + $0x1d0] sm:$0xf0]  ;;  %v6856_v51 = vor.u32 %v8789_v33, %v6853_v53  ;;  %v9129_v50 = vld [vmem:[%s13904_s5 + $0xc24] sm:$0xf] }
 0x45d   :  { %5473 = vmatpush.bf16.msrb.mxu2 %v8484_v4  ;;  %5486 = vmatpush.bf16.msrb.mxu3 %v8612_v46  ;;  %v7141_v4 = vld [vmem:[%s13904_s5 + $0x3d0] sm:$0xf0]  ;;  %v11440_v46 = vpack.c.bf16 %v2176_v43, %v2176_v43  ;;  %v6888_v54 = vor.u32 %v8797_v63, %v6885_v6  ;;  %v8849_v43 = vld [vmem:[%s13904_s5 + $0x364] sm:$0xf] }
 0x45e   :  { %5603 = vmatpush.bf16.msra.mxu0 %v7720_v26  ;;  %v7144_v22 = vor.u32 %v8861_v39, %v7141_v4  ;;  %v8793_v26 = vld [vmem:[%s13904_s5 + $0x1a4] sm:$0xf]  ;;  %v7096_v63 = vor.u32 %v8849_v43, %v7093_v17  ;;  %v6949_v39 = vld [vmem:[%s13904_s5 + $0x250] sm:$0xf0] }
 0x45f   :  { %v8781_v6 = vld [vmem:[%s13904_s5 + $0x144] sm:$0xf]  ;;  %v6789_v53 = vld [vmem:[%s13904_s5 + $0x110] sm:$0xf0] }
 0x460   :  { %5461 = vmatpush.bf16.msrb.mxu1 %v8340_v11  ;;  %v6869_v11 = vld [vmem:[%s13904_s5 + $0x1b0] sm:$0xf0]  ;;  %v8845_v4 = vld [vmem:[%s13904_s5 + $0x344] sm:$0xf] }
 0x461   :  { %5474 = vmatpush.bf16.msrb.mxu2 %v8468_v24  ;;  %5487 = vmatpush.bf16.msrb.mxu3 %v8596_v23  ;;  %v7125_v24 = vld [vmem:[%s13904_s5 + $0x3b0] sm:$0xf0]  ;;  %v8296_v23 = vor.u32 %v9149_v19, %v8293_v35  ;;  %v6872_v25 = vor.u32 %v8793_v26, %v6869_v11  ;;  %v9133_v19 = vld [vmem:[%s13904_s5 + $0xc44] sm:$0xf] }
 0x462   :  { %5604 = vmatpush.bf16.msra.mxu0 %v7704_v1  ;;  %v7128_v16 = vor.u32 %v8857_v28, %v7125_v24  ;;  %v8853_v1 = vld [vmem:[%s13904_s5 + $0x384] sm:$0xf]  ;;  %v8229_v35 = vld [vmem:[%s13904_s5 + $0xc50] sm:$0xf0] }
 0x463   :  { %v8777_v26 = vld [vmem:[%s13904_s5 + $0x124] sm:$0xf]  ;;  %v6805_v11 = vld [vmem:[%s13904_s5 + $0x130] sm:$0xf0] }
 0x464   :  { %5462 = vmatpush.bf16.msrb.mxu1 %v8324_v41  ;;  %v7109_v41 = vld [vmem:[%s13904_s5 + $0x390] sm:$0xf0]  ;;  %v8841_v28 = vld [vmem:[%s13904_s5 + $0x324] sm:$0xf] }
 0x465   :  { %5475 = vmatpush.bf16.msrb.mxu2 %v8452_v14  ;;  %5488 = vmatpush.bf16.msrb.mxu3 %v8580_v32  ;;  %v8261_v14 = vld [vmem:[%s13904_s5 + $0xc90] sm:$0xf0]  ;;  %v6984_v32 = vor.u32 %v8821_v8, %v6981_v61  ;;  %v7112_v49 = vor.u32 %v8853_v1, %v7109_v41  ;;  %v8805_v8 = vld [vmem:[%s13904_s5 + $0x204] sm:$0xf] }
 0x466   :  { %5605 = vmatpush.bf16.msra.mxu0 %v7688_v38  ;;  %v8264_v55 = vor.u32 %v9141_v60, %v8261_v14  ;;  %v7077_v38 = vld [vmem:[%s13904_s5 + $0x350] sm:$0xf0]  ;;  %v8837_v1 = vld [vmem:[%s13904_s5 + $0x304] sm:$0xf] }
 0x467   :  { %5463 = vmatmul.bf16.vlgmr.msrb.gmra.mxu1 %v11440_v46  ;;  %v7061_v24 = vld [vmem:[%s13904_s5 + $0x330] sm:$0xf0]  ;;  %v8961_v60 = vld [vmem:[%s13904_s5 + $0x6e4] sm:$0xf] }
 0x468   :  { %5507 = vmatpush.bf16.msra.mxu1 %v6904_v44  ;;  %5476 = vmatmul.bf16.vlgmr.msrb.gmra.mxu2 %v11442_v57  ;;  %v8817_v44 = vld [vmem:[%s13904_s5 + $0x264] sm:$0xf]  ;;  %v7064_v33 = vor.u32 %v8841_v28, %v7061_v24  ;;  %v6917_v61 = vld [vmem:[%s13904_s5 + $0x210] sm:$0xf0] }
 0x469   :  { %5520 = vmatpush.bf16.msra.mxu2 %v7032_v30  ;;  %5533 = vmatpush.bf16.msra.mxu3 %v7160_v34  ;;  %v6965_v30 = vld [vmem:[%s13904_s5 + $0x270] sm:$0xf0]  ;;  %v8993_v27 = vld [vmem:[%s13904_s5 + $0x7e4] sm:$0xf] }
 0x46a   :  { %5489 = vmatmul.bf16.vlgmr.msrb.gmra.mxu3 %v11444_v13  ;;  %5650 = vmatpush.bf16.msrb.mxu0 %v8312_v21  ;;  %v8245_v34 = vld [vmem:[%s13904_s5 + $0xc70] sm:$0xf0]  ;;  %v6968_v5 = vor.u32 %v8817_v44, %v6965_v30  ;;  %v6920_v44 = vor.u32 %v8805_v8, %v6917_v61  ;;  %v9125_v43 = vld [vmem:[%s13904_s5 + $0xc04] sm:$0xf] }
 0x46b   :  { %5606 = vmatmul.bf16.vlgmr.msra.gmra.mxu0 %v11029_v56  ;;  %v8248_v21 = vor.u32 %v9137_v10, %v8245_v34  ;;  %v7045_v41 = vld [vmem:[%s13904_s5 + $0x310] sm:$0xf0]  ;;  %v6779_v10 = vld [vmem:[%s13904_s5 + $0xe8] sm:$0xf]  ;;  %v8772_v34 = vld [vmem:[%s13904_s5 + $0xf4] sm:$0xf0] }
 0x46c   :  { %5508 = vmatpush.bf16.msra.mxu1 %v6888_v54  ;;  %v6824_v54 = vor.u32 %v8781_v6, %v6821_v18  ;;  %v7541_v14 = vld [vmem:[%s13904_s5 + $0x6f0] sm:$0xf0]  ;;  %v7048_v30 = vor.u32 %v8837_v1, %v7045_v41  ;;  %v8957_v18 = vld [vmem:[%s13904_s5 + $0x6c4] sm:$0xf] }
 0x46d   :  { %5521 = vmatpush.bf16.msra.mxu2 %v7016_v48  ;;  %5534 = vmatpush.bf16.msra.mxu3 %v7144_v22  ;;  %v6952_v48 = vor.u32 %v8813_v3, %v6949_v39  ;;  %v7080_v22 = vor.u32 %v8845_v4, %v7077_v38  ;;  %v7669_v40 = vld [vmem:[%s13904_s5 + $0x7f0] sm:$0xf0]  ;;  %v8989_v39 = vld [vmem:[%s13904_s5 + $0x7c4] sm:$0xf] }
 0x46e   :  { %5651 = vmatpush.bf16.msrb.mxu0 %v8296_v23  ;;  %v8232_v23 = vor.u32 %v9133_v19, %v8229_v35  ;;  %v7397_v6 = vld [vmem:[%s13904_s5 + $0x5d0] sm:$0xf0]  ;;  %v6763_v19 = vld [vmem:[%s13904_s5 + $0xc8] sm:$0xf]  ;;  %v8768_v35 = vld [vmem:[%s13904_s5 + $0xd4] sm:$0xf0] }
 0x46f   :  { %v7525_v3 = vld [vmem:[%s13904_s5 + $0x6d0] sm:$0xf0]  ;;  %v8985_v24 = vld [vmem:[%s13904_s5 + $0x7a4] sm:$0xf] }
 0x470   :  { %5509 = vmatpush.bf16.msra.mxu1 %v6872_v25  ;;  %v6808_v25 = vor.u32 %v8777_v26, %v6805_v11  ;;  %v7653_v4 = vld [vmem:[%s13904_s5 + $0x7d0] sm:$0xf0]  ;;  %v8917_v61 = vld [vmem:[%s13904_s5 + $0x584] sm:$0xf] }
 0x471   :  { %5522 = vmatpush.bf16.msra.mxu2 %v7000_v20  ;;  %5535 = vmatpush.bf16.msra.mxu3 %v7128_v16  ;;  %v8773_v20 = vld [vmem:[%s13904_s5 + $0x104] sm:$0xf]  ;;  %v6936_v16 = vor.u32 %v8809_v37, %v6933_v59  ;;  %v7656_v26 = vor.u32 %v8989_v39, %v7653_v4  ;;  %v7381_v11 = vld [vmem:[%s13904_s5 + $0x5b0] sm:$0xf0]  ;;  %v2716_v59 = vld [vmem:[%s13905_s6] sm:$0xf] }
 0x472   :  { %5652 = vmatpush.bf16.msrb.mxu0 %v8280_v58  ;;  %v8929_v58 = vld [vmem:[%s13904_s5 + $0x5e4] sm:$0xf]  ;;  %v7509_v28 = vld [vmem:[%s13904_s5 + $0x6b0] sm:$0xf0]  ;;  %v6715_v4 = vld [vmem:[%s13904_s5 + $0x68] sm:$0xf] }
 0x473   :  { %v8953_v37 = vld [vmem:[%s13904_s5 + $0x6a4] sm:$0xf]  ;;  %v7365_v1 = vld [vmem:[%s13904_s5 + $0x590] sm:$0xf0] }
 0x474   :  { %5510 = vmatpush.bf16.msra.mxu1 %v6856_v51  ;;  %v7413_v51 = vld [vmem:[%s13904_s5 + $0x5f0] sm:$0xf0]  ;;  %v8949_v41 = vld [vmem:[%s13904_s5 + $0x684] sm:$0xf] }
 0x475   :  { %5523 = vmatpush.bf16.msra.mxu2 %v6984_v32  ;;  %5536 = vmatpush.bf16.msra.mxu3 %v7112_v49  ;;  %v8216_v32 = vor.u32 %v9129_v50, %v8213_v52  ;;  %v6792_v49 = vor.u32 %v8773_v20, %v6789_v53  ;;  %v7416_v17 = vor.u32 %v8929_v58, %v7413_v51  ;;  %v2718_v52 = vperm.slane %v2716_v59, 0  ;;  %v7493_v58 = vld [vmem:[%s13904_s5 + $0x690] sm:$0xf0]  ;;  %v8981_v51 = vld [vmem:[%s13904_s5 + $0x784] sm:$0xf] }
 0x476   :  { %5653 = vmatpush.bf16.msrb.mxu0 %v8264_v55  ;;  %v7544_v55 = vor.u32 %v8961_v60, %v7541_v14  ;;  %v7512_v53 = vor.u32 %v8953_v37, %v7509_v28  ;;  %v7621_v60 = vld [vmem:[%s13904_s5 + $0x790] sm:$0xf0] }
 0x477   :  { %v7589_v37 = vld [vmem:[%s13904_s5 + $0x750] sm:$0xf0] }
 0x478   :  { %5511 = vmatpush.bf16.msra.mxu1 %v6840_v2  ;;  %v8197_v2 = vld [vmem:[%s13904_s5 + $0xc10] sm:$0xf0] }
 0x479   :  { %5524 = vmatpush.bf16.msra.mxu2 %v6968_v5  ;;  %5537 = vmatpush.bf16.msra.mxu3 %v7096_v63  ;;  %v7672_v5 = vor.u32 %v8993_v27, %v7669_v40  ;;  %v8925_v63 = vld [vmem:[%s13904_s5 + $0x5c4] sm:$0xf]  ;;  %v8200_v38 = vor.u32 %v9125_v43, %v8197_v2  ;;  %v8760_v27 = vld [vmem:[%s13904_s5 + $0x94] sm:$0xf0] }
 0x47a   :  { %5654 = vmatpush.bf16.msrb.mxu0 %v8248_v21  ;;  %v6780_v21 = vor.u32 %v8772_v34, %v6779_v10  ;;  %v8913_v43 = vld [vmem:[%s13904_s5 + $0x564] sm:$0xf]  ;;  %v7477_v10 = vld [vmem:[%s13904_s5 + $0x670] sm:$0xf0] }
 0x47b   :  { %v8977_v34 = vld [vmem:[%s13904_s5 + $0x764] sm:$0xf] }
 0x47c   :  { %5512 = vmatpush.bf16.msra.mxu1 %v6824_v54  ;;  %v7400_v54 = vor.u32 %v8925_v63, %v7397_v6 }
 0x47d   :  { %5525 = vmatpush.bf16.msra.mxu2 %v6952_v48  ;;  %5538 = vmatpush.bf16.msra.mxu3 %v7080_v22  ;;  %v8921_v48 = vld [vmem:[%s13904_s5 + $0x5a4] sm:$0xf]  ;;  %v7528_v22 = vor.u32 %v8957_v18, %v7525_v3 }
 0x47e   :  { %5655 = vmatpush.bf16.msrb.mxu0 %v8232_v23  ;;  %v7637_v23 = vld [vmem:[%s13904_s5 + $0x7b0] sm:$0xf0]  ;;  %v7384_v50 = vor.u32 %v8921_v48, %v7381_v11  ;;  %v8973_v11 = vld [vmem:[%s13904_s5 + $0x744] sm:$0xf] }
 0x47f   :  { %v7640_v8 = vor.u32 %v8985_v24, %v7637_v23  ;;  %v7333_v48 = vld [vmem:[%s13904_s5 + $0x550] sm:$0xf0]  ;;  %v6699_v24 = vld [vmem:[%s13904_s5 + $0x48] sm:$0xf]  ;;  %v8752_v23 = vld [vmem:[%s13904_s5 + $0x54] sm:$0xf0] }
 0x480   :  { %5513 = vmatpush.bf16.msra.mxu1 %v6808_v25  ;;  %v6764_v25 = vor.u32 %v8768_v35, %v6763_v19  ;;  %v8909_v35 = vld [vmem:[%s13904_s5 + $0x544] sm:$0xf] }
 0x481   :  { %5526 = vmatpush.bf16.msra.mxu2 %v6936_v16  ;;  %5539 = vmatpush.bf16.msra.mxu3 %v7064_v33  ;;  %v6747_v16 = vld [vmem:[%s13904_s5 + $0xa8] sm:$0xf]  ;;  %v8764_v33 = vld [vmem:[%s13904_s5 + $0xb4] sm:$0xf0]  ;;  %v7336_v28 = vor.u32 %v8909_v35, %v7333_v48 }
 0x482   :  { %5656 = vmatpush.bf16.msrb.mxu0 %v8216_v32  ;;  %v6748_v14 = vor.u32 %v8764_v33, %v6747_v16  ;;  %v7368_v32 = vor.u32 %v8917_v61, %v7365_v1  ;;  %v8937_v16 = vld [vmem:[%s13904_s5 + $0x624] sm:$0xf]  ;;  %v7573_v61 = vld [vmem:[%s13904_s5 + $0x730] sm:$0xf0]  ;;  %v8744_v35 = vld [vmem:[%s13904_s5 + $0x14] sm:$0xf0] }
 0x483   :  { %v7291_v48 = vld [vmem:[%s13904_s5 + $0x4e8] sm:$0xf] }
 0x484   :  { %5514 = vmatpush.bf16.msra.mxu1 %v6792_v49  ;;  %v5295_v20 = vpop.f32.mrf.mxu1  ;;  %v6731_v49 = vld [vmem:[%s13904_s5 + $0x88] sm:$0xf] }
 0x485   :  { %5527 = vmatpush.bf16.msra.mxu2 %v6920_v44  ;;  %5540 = vmatpush.bf16.msra.mxu3 %v7048_v30  ;;  %v5296_v40 = vadd.f32 %v5295_v20, %v2718_v52  ;;  %v7496_v44 = vor.u32 %v8949_v41, %v7493_v58  ;;  %v7624_v30 = vor.u32 %v8981_v51, %v7621_v60  ;;  %v8905_v52 = vld [vmem:[%s13904_s5 + $0x524] sm:$0xf]  ;;  %v7317_v20 = vld [vmem:[%s13904_s5 + $0x530] sm:$0xf0]  ;;  %v6683_v60 = vld [vmem:[%s13904_s5 + $0x28] sm:$0xf] }
 0x486   :  { %5657 = vmatpush.bf16.msrb.mxu0 %v8200_v38  ;;  %v6732_v18 = vor.u32 %v8760_v27, %v6731_v49  ;;  %v8756_v38 = vld [vmem:[%s13904_s5 + $0x74] sm:$0xf0]  ;;  %v6700_v41 = vor.u32 %v8752_v23, %v6699_v24  ;;  %v7320_v58 = vor.u32 %v8905_v52, %v7317_v20  ;;  %v9085_v24 = vld [vmem:[%s13904_s5 + $0xac4] sm:$0xf]  ;;  %v8165_v52 = vld [vmem:[%s13904_s5 + $0xbd0] sm:$0xf0] }
 0x487   :  { %5515 = vmatmul.bf16.vlgmr.msra.gmra.mxu1 %v10828_v7  ;;  %v6716_v59 = vor.u32 %v8756_v38, %v6715_v4  ;;  %v6667_v38 = vld [vmem:[%s13904_s5 + $0x8] sm:$0xf] }
 0x488   :  { %5559 = vmatpush.bf16.msrb.mxu1 %v7416_v17  ;;  %5528 = vmatmul.bf16.vlgmr.msra.gmra.mxu2 %v10830_v9  ;;  %v7349_v17 = vld [vmem:[%s13904_s5 + $0x570] sm:$0xf0] }
 0x489   :  { %5572 = vmatpush.bf16.msrb.mxu2 %v7544_v55  ;;  %5585 = vmatpush.bf16.msrb.mxu3 %v7672_v5  ;;  %v8945_v55 = vld [vmem:[%s13904_s5 + $0x664] sm:$0xf]  ;;  %v7605_v5 = vld [vmem:[%s13904_s5 + $0x770] sm:$0xf0]  ;;  %v7352_v3 = vor.u32 %v8913_v43, %v7349_v17 }
 0x48a   :  { %5541 = vmatmul.bf16.vlgmr.msra.gmra.mxu3 %v10924_v15  ;;  %5702 = vmatpush.bf16.msra.mxu0 %v6780_v21  ;;  %v5308_v2 = vpop.f32.mrf.mxu2  ;;  %v7608_v19 = vor.u32 %v8977_v34, %v7605_v5  ;;  %v7429_v43 = vld [vmem:[%s13904_s5 + $0x610] sm:$0xf0]  ;;  %v8965_v17 = vld [vmem:[%s13904_s5 + $0x704] sm:$0xf] }
 0x48b   :  { %5658 = vmatmul.bf16.vlgmr.msrb.gmra.mxu0 %v11031_v47  ;;  %v5309_v63 = vadd.f32 %v5308_v2, %v5296_v40  ;;  %v5321_v6 = vpop.f32.mrf.mxu3  ;;  %v9057_v2 = vld [vmem:[%s13904_s5 + $0x9e4] sm:$0xf]  ;;  %v8053_v5 = vld [vmem:[%s13904_s5 + $0xaf0] sm:$0xf0] }
 0x48c   :  { %5560 = vmatpush.bf16.msrb.mxu1 %v7400_v54  ;;  %v5297_v39 = vpop.f32.mrf.mxu1  ;;  %v7480_v54 = vor.u32 %v8945_v55, %v7477_v10  ;;  %v7557_v55 = vld [vmem:[%s13904_s5 + $0x710] sm:$0xf0]  ;;  %v9089_v34 = vld [vmem:[%s13904_s5 + $0xae4] sm:$0xf] }
 0x48d   :  { %5573 = vmatpush.bf16.msrb.mxu2 %v7528_v22  ;;  %5586 = vmatpush.bf16.msrb.mxu3 %v7656_v26  ;;  %v5322_v21 = vadd.f32 %v5321_v6, %v5309_v63  ;;  %v8941_v22 = vld [vmem:[%s13904_s5 + $0x644] sm:$0xf]  ;;  %v7461_v26 = vld [vmem:[%s13904_s5 + $0x650] sm:$0xf0]  ;;  %v7560_v4 = vor.u32 %v8965_v17, %v7557_v55 }
 0x48e   :  { %5703 = vmatpush.bf16.msra.mxu0 %v6764_v25  ;;  %v7464_v25 = vor.u32 %v8941_v22, %v7461_v26  ;;  %v7925_v10 = vld [vmem:[%s13904_s5 + $0x9f0] sm:$0xf0]  ;;  %v8900_v22 = vld [vmem:[%s13904_s5 + $0x4f4] sm:$0xf0] }
 0x490   :  { %5561 = vmatpush.bf16.msrb.mxu1 %v7384_v50  ;;  %v7592_v50 = vor.u32 %v8973_v11, %v7589_v37 }
 0x491   :  { %5574 = vmatpush.bf16.msrb.mxu2 %v7512_v53  ;;  %5587 = vmatpush.bf16.msrb.mxu3 %v7640_v8  ;;  %v7445_v53 = vld [vmem:[%s13904_s5 + $0x630] sm:$0xf0]  ;;  %v8969_v8 = vld [vmem:[%s13904_s5 + $0x724] sm:$0xf] }
 0x492   :  { %5704 = vmatpush.bf16.msra.mxu0 %v6748_v14  ;;  %v5310_v33 = vpop.f32.mrf.mxu2  ;;  %v8748_v14 = vld [vmem:[%s13904_s5 + $0x34] sm:$0xf0]  ;;  %v7448_v49 = vor.u32 %v8937_v16, %v7445_v53  ;;  %v7576_v27 = vor.u32 %v8969_v8, %v7573_v61  ;;  %v6668_v16 = vor.u32 %v8744_v35, %v6667_v38  ;;  %v7275_v8 = vld [vmem:[%s13904_s5 + $0x4c8] sm:$0xf] }
 0x493   :  { %v5323_v1 = vpop.f32.mrf.mxu3  ;;  %v6684_v63 = vor.u32 %v8748_v14, %v6683_v60  ;;  %v7292_v33 = vor.u32 %v8900_v22, %v7291_v48  ;;  %v8896_v61 = vld [vmem:[%s13904_s5 + $0x4d4] sm:$0xf0]  ;;  %v9081_v60 = vld [vmem:[%s13904_s5 + $0xaa4] sm:$0xf]  ;;  %v8021_v14 = vld [vmem:[%s13904_s5 + $0xab0] sm:$0xf0] }
 0x494   :  { %5562 = vmatpush.bf16.msrb.mxu1 %v7368_v32  ;;  %v5334_v51 = vpop.f32.mrf.mxu1  ;;  %v8901_v32 = vld [vmem:[%s13904_s5 + $0x504] sm:$0xf]  ;;  %v8024_v17 = vor.u32 %v9081_v60, %v8021_v14  ;;  %v8101_v60 = vld [vmem:[%s13904_s5 + $0xb50] sm:$0xf0] }
 0x495   :  { %5575 = vmatpush.bf16.msrb.mxu2 %v7496_v44  ;;  %5588 = vmatpush.bf16.msrb.mxu3 %v7624_v30  ;;  %v5335_v40 = vadd.f32 %v5334_v51, %v5322_v21  ;;  %v7301_v44 = vld [vmem:[%s13904_s5 + $0x510] sm:$0xf0]  ;;  %v8933_v30 = vld [vmem:[%s13904_s5 + $0x604] sm:$0xf]  ;;  %v7928_v21 = vor.u32 %v9057_v2, %v7925_v10 }
 0x496   :  { %5705 = vmatpush.bf16.msra.mxu0 %v6732_v18  ;;  %v7304_v6 = vor.u32 %v8901_v32, %v7301_v44  ;;  %v9121_v18 = vld [vmem:[%s13904_s5 + $0xbe4] sm:$0xf]  ;;  %v7432_v39 = vor.u32 %v8933_v30, %v7429_v43  ;;  %v7893_v51 = vld [vmem:[%s13904_s5 + $0x9b0] sm:$0xf0]  ;;  %v7259_v30 = vld [vmem:[%s13904_s5 + $0x4a8] sm:$0xf] }
 0x497   :  { %v9113_v32 = vld [vmem:[%s13904_s5 + $0xba4] sm:$0xf]  ;;  %v8892_v43 = vld [vmem:[%s13904_s5 + $0x4b4] sm:$0xf0] }
 0x498   :  { %5563 = vmatpush.bf16.msrb.mxu1 %v7352_v3  ;;  %v8181_v3 = vld [vmem:[%s13904_s5 + $0xbf0] sm:$0xf0]  ;;  %v9045_v10 = vld [vmem:[%s13904_s5 + $0x984] sm:$0xf] }
 0x499   :  { %5576 = vmatpush.bf16.msrb.mxu2 %v7480_v54  ;;  %5589 = vmatpush.bf16.msrb.mxu3 %v7608_v19  ;;  %v8056_v54 = vor.u32 %v9089_v34, %v8053_v5  ;;  %v8184_v26 = vor.u32 %v9121_v18, %v8181_v3  ;;  %v7877_v34 = vld [vmem:[%s13904_s5 + $0x990] sm:$0xf0]  ;;  %v9077_v5 = vld [vmem:[%s13904_s5 + $0xa84] sm:$0xf] }
 0x49a   :  { %5706 = vmatpush.bf16.msra.mxu0 %v6716_v59  ;;  %v5347_v19 = vpop.f32.mrf.mxu2  ;;  %v9053_v59 = vld [vmem:[%s13904_s5 + $0x9c4] sm:$0xf]  ;;  %v8133_v3 = vld [vmem:[%s13904_s5 + $0xb90] sm:$0xf0] }
 0x49b   :  { %v5348_v11 = vadd.f32 %v5347_v19, %v5335_v40  ;;  %v5360_v37 = vpop.f32.mrf.mxu3  ;;  %v9109_v18 = vld [vmem:[%s13904_s5 + $0xb84] sm:$0xf]  ;;  %v8888_v19 = vld [vmem:[%s13904_s5 + $0x494] sm:$0xf0] }
 0x49c   :  { %5564 = vmatpush.bf16.msrb.mxu1 %v7336_v28  ;;  %v7909_v28 = vld [vmem:[%s13904_s5 + $0x9d0] sm:$0xf0]  ;;  %v5336_v23 = vpop.f32.mrf.mxu1  ;;  %v8136_v48 = vor.u32 %v9109_v18, %v8133_v3  ;;  %v9041_v22 = vld [vmem:[%s13904_s5 + $0x964] sm:$0xf]  ;;  %v7195_v18 = vld [vmem:[%s13904_s5 + $0x428] sm:$0xf] }
 0x49d   :  { %5577 = vmatpush.bf16.msrb.mxu2 %v7464_v25  ;;  %5590 = vmatpush.bf16.msrb.mxu3 %v7592_v50  ;;  %v8037_v25 = vld [vmem:[%s13904_s5 + $0xad0] sm:$0xf0]  ;;  %v9117_v50 = vld [vmem:[%s13904_s5 + $0xbc4] sm:$0xf]  ;;  %v5361_v20 = vadd.f32 %v5360_v37, %v5348_v11  ;;  %v7912_v53 = vor.u32 %v9053_v59, %v7909_v28  ;;  %v8876_v3 = vld [vmem:[%s13904_s5 + $0x434] sm:$0xf0] }
 0x49e   :  { %5707 = vmatpush.bf16.msra.mxu0 %v6700_v41  ;;  %v8040_v1 = vor.u32 %v9085_v24, %v8037_v25  ;;  %v8168_v41 = vor.u32 %v9117_v50, %v8165_v52  ;;  %v9073_v11 = vld [vmem:[%s13904_s5 + $0xa64] sm:$0xf]  ;;  %v7989_v37 = vld [vmem:[%s13904_s5 + $0xa70] sm:$0xf0]  ;;  %v7227_v25 = vld [vmem:[%s13904_s5 + $0x468] sm:$0xf] }
 0x49f   :  { %v9105_v59 = vld [vmem:[%s13904_s5 + $0xb64] sm:$0xf]  ;;  %v8117_v28 = vld [vmem:[%s13904_s5 + $0xb70] sm:$0xf0]  ;;  %v8884_v50 = vld [vmem:[%s13904_s5 + $0x474] sm:$0xf0]  ;;  %v7992_v52 = vor.u32 %v9073_v11, %v7989_v37 }
 0x4a0   :  { %5565 = vmatpush.bf16.msrb.mxu1 %v7320_v58  ;;  %v9049_v58 = vld [vmem:[%s13904_s5 + $0x9a4] sm:$0xf]  ;;  %v8069_v11 = vld [vmem:[%s13904_s5 + $0xb10] sm:$0xf0] }
 0x4a1   :  { %5578 = vmatpush.bf16.msrb.mxu2 %v7448_v49  ;;  %5591 = vmatpush.bf16.msrb.mxu3 %v7576_v27  ;;  %v8149_v49 = vld [vmem:[%s13904_s5 + $0xbb0] sm:$0xf0]  ;;  %v7276_v27 = vor.u32 %v8896_v61, %v7275_v8  ;;  %v7896_v40 = vor.u32 %v9049_v58, %v7893_v51  ;;  %v9069_v61 = vld [vmem:[%s13904_s5 + $0xa44] sm:$0xf] }
 0x4a2   :  { %5708 = vmatpush.bf16.msra.mxu0 %v6684_v63  ;;  %v5349_v44 = vpop.f32.mrf.mxu2  ;;  %v8152_v55 = vor.u32 %v9113_v32, %v8149_v49  ;;  %v7845_v8 = vld [vmem:[%s13904_s5 + $0x950] sm:$0xf0]  ;;  %v9101_v51 = vld [vmem:[%s13904_s5 + $0xb44] sm:$0xf]  ;;  %v7228_v32 = vor.u32 %v8884_v50, %v7227_v25 }
 0x4a3   :  { %v5362_v2 = vpop.f32.mrf.mxu3  ;;  %v7973_v58 = vld [vmem:[%s13904_s5 + $0xa50] sm:$0xf0]  ;;  %v8880_v44 = vld [vmem:[%s13904_s5 + $0x454] sm:$0xf0]  ;;  %v9185_v37 = vld [vmem:[%s13904_s5 + $0xde4] sm:$0xf] }
 0x4a4   :  { %5566 = vmatpush.bf16.msrb.mxu1 %v7304_v6  ;;  %v5373_v63 = vpop.f32.mrf.mxu1  ;;  %v8005_v6 = vld [vmem:[%s13904_s5 + $0xa90] sm:$0xf0]  ;;  %v11893_v38 = vpop.f32.mrf.mxu0  ;;  %v9065_v2 = vld [vmem:[%s13904_s5 + $0xa24] sm:$0xf] }
 0x4a5   :  { %5579 = vmatpush.bf16.msrb.mxu2 %v7432_v39  ;;  %5592 = vmatpush.bf16.msrb.mxu3 %v7560_v4  ;;  %v5374_v39 = vadd.f32 %v5373_v63, %v5361_v20  ;;  %v7260_v4 = vor.u32 %v8892_v43, %v7259_v30  ;;  %v8008_v35 = vor.u32 %v9077_v5, %v8005_v6  ;;  %v8085_v5 = vld [vmem:[%s13904_s5 + $0xb30] sm:$0xf0] }
 0x4a6   :  { %5709 = vmatpush.bf16.msra.mxu0 %v6668_v16  ;;  %v8120_v20 = vor.u32 %v9105_v59, %v8117_v28  ;;  %v7976_v30 = vor.u32 %v9069_v61, %v7973_v58  ;;  %v8104_v43 = vor.u32 %v9101_v51, %v8101_v60  ;;  %v8437_v59 = vld [vmem:[%s13904_s5 + $0xdf0] sm:$0xf0]  ;;  %v9217_v28 = vld [vmem:[%s13904_s5 + $0xee4] sm:$0xf]  ;;  %v9028_v58 = vld [vmem:[%s13904_s5 + $0x8f4] sm:$0xf0] }
 0x4a7   :  { %5567 = vmatmul.bf16.vlgmr.msrb.gmra.mxu1 %v10931_v12  ;;  %v9181_v60 = vld [vmem:[%s13904_s5 + $0xdc4] sm:$0xf] }
 0x4a8   :  { %5611 = vmatpush.bf16.msra.mxu1 %v7928_v21  ;;  %5580 = vmatmul.bf16.vlgmr.msrb.gmra.mxu2 %v11027_v36  ;;  %v7880_v21 = vor.u32 %v9045_v10, %v7877_v34  ;;  %v7957_v10 = vld [vmem:[%s13904_s5 + $0xa30] sm:$0xf0]  ;;  %v9097_v34 = vld [vmem:[%s13904_s5 + $0xb24] sm:$0xf] }
 0x4a9   :  { %5624 = vmatpush.bf16.msra.mxu2 %v8056_v54  ;;  %5637 = vmatpush.bf16.msra.mxu3 %v8184_v26  ;;  %v7243_v54 = vld [vmem:[%s13904_s5 + $0x488] sm:$0xf]  ;;  %v7861_v26 = vld [vmem:[%s13904_s5 + $0x970] sm:$0xf0] }
 0x4aa   :  { %5593 = vmatmul.bf16.vlgmr.msrb.gmra.mxu3 %v11033_v31  ;;  %5754 = vmatpush.bf16.msrb.mxu0 %v7292_v33  ;;  %v7244_v24 = vor.u32 %v8888_v19, %v7243_v54  ;;  %v7864_v23 = vor.u32 %v9041_v22, %v7861_v26  ;;  %v7941_v22 = vld [vmem:[%s13904_s5 + $0xa10] sm:$0xf0]  ;;  %v9093_v26 = vld [vmem:[%s13904_s5 + $0xb04] sm:$0xf] }
 0x4ab   :  { %5710 = vmatmul.bf16.vlgmr.msra.gmra.mxu0 %v10826_v0  ;;  %v5386_v16 = vpop.f32.mrf.mxu2 }
 0x4ac   :  { %5612 = vmatpush.bf16.msra.mxu1 %v7912_v53  ;;  %v9037_v53 = vld [vmem:[%s13904_s5 + $0x944] sm:$0xf]  ;;  %v5453_v49 = vpop.f32.mrf.mxu0 }
 0x4ad   :  { %5625 = vmatpush.bf16.msra.mxu2 %v8040_v1  ;;  %5638 = vmatpush.bf16.msra.mxu3 %v8168_v41  ;;  %v5399_v33 = vpop.f32.mrf.mxu3  ;;  %v5387_v1 = vadd.f32 %v5386_v16, %v5374_v39  ;;  %v5375_v41 = vpop.f32.mrf.mxu1  ;;  %v9029_v39 = vld [vmem:[%s13904_s5 + $0x904] sm:$0xf] }
 0x4ae   :  { %5755 = vmatpush.bf16.msrb.mxu0 %v7276_v27  ;;  %v7848_v27 = vor.u32 %v9037_v53, %v7845_v8  ;;  %v7179_v53 = vld [vmem:[%s13904_s5 + $0x408] sm:$0xf]  ;;  %v8440_v8 = vor.u32 %v9185_v37, %v8437_v59  ;;  %v9213_v49 = vld [vmem:[%s13904_s5 + $0xec4] sm:$0xf] }
 0x4af   :  { %v11943_v14 = vadd.f32 %v5399_v33, %v5387_v1  ;;  %v8072_v33 = vor.u32 %v9093_v26, %v8069_v11  ;;  %v8872_v1 = vld [vmem:[%s13904_s5 + $0x414] sm:$0xf0]  ;;  %v7803_v41 = vld [vmem:[%s13904_s5 + $0x8e8] sm:$0xf]  ;;  %v9173_v26 = vld [vmem:[%s13904_s5 + $0xd84] sm:$0xf] }
 0x4b0   :  { %5613 = vmatpush.bf16.msra.mxu1 %v7896_v40  ;;  %v7211_v40 = vld [vmem:[%s13904_s5 + $0x448] sm:$0xf]  ;;  %v8389_v11 = vld [vmem:[%s13904_s5 + $0xd90] sm:$0xf0]  ;;  %v9205_v37 = vld [vmem:[%s13904_s5 + $0xe84] sm:$0xf] }
 0x4b1   :  { %5626 = vmatpush.bf16.msra.mxu2 %v8024_v17  ;;  %5639 = vmatpush.bf16.msra.mxu3 %v8152_v55  ;;  %v9033_v17 = vld [vmem:[%s13904_s5 + $0x924] sm:$0xf]  ;;  %v7829_v55 = vld [vmem:[%s13904_s5 + $0x930] sm:$0xf0]  ;;  %v7212_v63 = vor.u32 %v8880_v44, %v7211_v40 }
 0x4b2   :  { %5756 = vmatpush.bf16.msrb.mxu0 %v7260_v4  ;;  %v7832_v6 = vor.u32 %v9033_v17, %v7829_v55  ;;  %v7960_v4 = vor.u32 %v9065_v2, %v7957_v10  ;;  %v9245_v40 = vld [vmem:[%s13904_s5 + $0xfc4] sm:$0xf]  ;;  %v8677_v44 = vld [vmem:[%s13904_s5 + $0xfd0] sm:$0xf0]  ;;  %v7787_v55 = vld [vmem:[%s13904_s5 + $0x8c8] sm:$0xf] }
 0x4b3   :  { %v5388_v54 = vpop.f32.mrf.mxu2  ;;  %v9024_v2 = vld [vmem:[%s13904_s5 + $0x8d4] sm:$0xf0] }
 0x4b4   :  { %5614 = vmatpush.bf16.msra.mxu1 %v7880_v21  ;;  %v8088_v21 = vor.u32 %v9097_v34, %v8085_v5  ;;  %v12005_v25 = vpop.f32.mrf.mxu0  ;;  %v8680_v34 = vor.u32 %v9245_v40, %v8677_v44  ;;  %v9177_v5 = vld [vmem:[%s13904_s5 + $0xda4] sm:$0xf]  ;;  %v9012_v40 = vld [vmem:[%s13904_s5 + $0x874] sm:$0xf0] }
 0x4b5   :  { %5627 = vmatpush.bf16.msra.mxu2 %v8008_v35  ;;  %5640 = vmatpush.bf16.msra.mxu3 %v8136_v48  ;;  %v5401_v19 = vpop.f32.mrf.mxu3  ;;  %v7813_v35 = vld [vmem:[%s13904_s5 + $0x910] sm:$0xf0]  ;;  %v9061_v48 = vld [vmem:[%s13904_s5 + $0xa04] sm:$0xf] }
 0x4b6   :  { %5757 = vmatpush.bf16.msrb.mxu0 %v7244_v24  ;;  %v8565_v24 = vld [vmem:[%s13904_s5 + $0xef0] sm:$0xf0]  ;;  %v7816_v50 = vor.u32 %v9029_v39, %v7813_v35  ;;  %v7944_v16 = vor.u32 %v9061_v48, %v7941_v22  ;;  %v9241_v39 = vld [vmem:[%s13904_s5 + $0xfa4] sm:$0xf]  ;;  %v7771_v19 = vld [vmem:[%s13904_s5 + $0x8a8] sm:$0xf] }
 0x4b7   :  { %v8568_v61 = vor.u32 %v9217_v28, %v8565_v24  ;;  %v9020_v35 = vld [vmem:[%s13904_s5 + $0x8b4] sm:$0xf0]  ;;  %v8517_v28 = vld [vmem:[%s13904_s5 + $0xe90] sm:$0xf0]  ;;  %v9237_v24 = vld [vmem:[%s13904_s5 + $0xf84] sm:$0xf] }
 0x4b8   :  { %5615 = vmatpush.bf16.msra.mxu1 %v7864_v23  ;;  %v7196_v23 = vor.u32 %v8876_v3, %v7195_v18  ;;  %v8533_v3 = vld [vmem:[%s13904_s5 + $0xeb0] sm:$0xf0] }
 0x4b9   :  { %5628 = vmatpush.bf16.msra.mxu2 %v7992_v52  ;;  %5641 = vmatpush.bf16.msra.mxu3 %v8120_v20  ;;  %v9249_v52 = vld [vmem:[%s13904_s5 + $0xfe4] sm:$0xf]  ;;  %v8693_v20 = vld [vmem:[%s13904_s5 + $0xff0] sm:$0xf0] }
 0x4ba   :  { %5758 = vmatpush.bf16.msrb.mxu0 %v7228_v32  ;;  %v8696_v51 = vor.u32 %v9249_v52, %v8693_v20  ;;  %v8421_v32 = vld [vmem:[%s13904_s5 + $0xdd0] sm:$0xf0]  ;;  %v7772_v52 = vor.u32 %v9020_v35, %v7771_v19  ;;  %v8392_v20 = vor.u32 %v9173_v26, %v8389_v11  ;;  %v9193_v26 = vld [vmem:[%s13904_s5 + $0xe24] sm:$0xf] }
 0x4bb   :  { %v8424_v17 = vor.u32 %v9181_v60, %v8421_v32  ;;  %v8469_v11 = vld [vmem:[%s13904_s5 + $0xe30] sm:$0xf0] }
 0x4bc   :  { %5616 = vmatpush.bf16.msra.mxu1 %v7848_v27  ;;  %v8549_v27 = vld [vmem:[%s13904_s5 + $0xed0] sm:$0xf0]  ;;  %v5505_v18 = vpop.f32.mrf.mxu0 }
 0x4bd   :  { %5629 = vmatpush.bf16.msra.mxu2 %v7976_v30  ;;  %5642 = vmatpush.bf16.msra.mxu3 %v8104_v43  ;;  %v7180_v30 = vor.u32 %v8872_v1, %v7179_v53  ;;  %v7804_v43 = vor.u32 %v9028_v58, %v7803_v41  ;;  %v8552_v10 = vor.u32 %v9213_v49, %v8549_v27  ;;  %v9201_v1 = vld [vmem:[%s13904_s5 + $0xe64] sm:$0xf]  ;;  %v8501_v41 = vld [vmem:[%s13904_s5 + $0xe70] sm:$0xf0]  ;;  %v7739_v27 = vld [vmem:[%s13904_s5 + $0x868] sm:$0xf] }
 0x4be   :  { %5759 = vmatpush.bf16.msrb.mxu0 %v7212_v63  ;;  %v8405_v63 = vld [vmem:[%s13904_s5 + $0xdb0] sm:$0xf0]  ;;  %v8520_v53 = vor.u32 %v9205_v37, %v8517_v28  ;;  %v9233_v58 = vld [vmem:[%s13904_s5 + $0xf64] sm:$0xf]  ;;  %v8504_v44 = vor.u32 %v9201_v1, %v8501_v41 }
 0x4bf   :  { %v8408_v54 = vor.u32 %v9177_v5, %v8405_v63  ;;  %v8485_v63 = vld [vmem:[%s13904_s5 + $0xe50] sm:$0xf0]  ;;  %v9225_v37 = vld [vmem:[%s13904_s5 + $0xf24] sm:$0xf] }
 0x4c0   :  { %5617 = vmatpush.bf16.msra.mxu1 %v7832_v6  ;;  %v9209_v6 = vld [vmem:[%s13904_s5 + $0xea4] sm:$0xf]  ;;  %v8613_v18 = vld [vmem:[%s13904_s5 + $0xf50] sm:$0xf0] }
 0x4c1   :  { %5630 = vmatpush.bf16.msra.mxu2 %v7960_v4  ;;  %5643 = vmatpush.bf16.msra.mxu3 %v8088_v21  ;;  %v8661_v4 = vld [vmem:[%s13904_s5 + $0xfb0] sm:$0xf0]  ;;  %v7788_v21 = vor.u32 %v9024_v2, %v7787_v55  ;;  %v8536_v48 = vor.u32 %v9209_v6, %v8533_v3  ;;  %v9165_v55 = vld [vmem:[%s13904_s5 + $0xd44] sm:$0xf] }
 0x4c2   :  { %5760 = vmatpush.bf16.msrb.mxu0 %v7196_v23  ;;  %v8664_v22 = vor.u32 %v9241_v39, %v8661_v4  ;;  %v8645_v23 = vld [vmem:[%s13904_s5 + $0xf90] sm:$0xf0]  ;;  %v9229_v6 = vld [vmem:[%s13904_s5 + $0xf44] sm:$0xf]  ;;  %v7740_v39 = vor.u32 %v9012_v40, %v7739_v27  ;;  %v8836_v27 = vld [vmem:[%s13904_s5 + $0x2f4] sm:$0xf0] }
 0x4c3   :  { %v8357_v2 = vld [vmem:[%s13904_s5 + $0xd50] sm:$0xf0]  ;;  %v8616_v35 = vor.u32 %v9229_v6, %v8613_v18  ;;  %v9221_v41 = vld [vmem:[%s13904_s5 + $0xf04] sm:$0xf]  ;;  %v9156_v6 = vld [vmem:[%s13904_s5 + $0xcf4] sm:$0xf0] }
 0x4c4   :  { %5618 = vmatpush.bf16.msra.mxu1 %v7816_v50  ;;  %v5412_v59 = vpop.f32.mrf.mxu1  ;;  %v8360_v4 = vor.u32 %v9165_v55, %v8357_v2  ;;  %v8453_v1 = vld [vmem:[%s13904_s5 + $0xe10] sm:$0xf0]  ;;  %v7691_v2 = vld [vmem:[%s13904_s5 + $0x808] sm:$0xf] }
 0x4c5   :  { %5631 = vmatpush.bf16.msra.mxu2 %v7944_v16  ;;  %5644 = vmatpush.bf16.msra.mxu3 %v8072_v33  ;;  %v5413_v50 = vadd.f32 %v5412_v59, %v11943_v14  ;;  %v7755_v16 = vld [vmem:[%s13904_s5 + $0x888] sm:$0xf]  ;;  %v9016_v33 = vld [vmem:[%s13904_s5 + $0x894] sm:$0xf0]  ;;  %v9169_v14 = vld [vmem:[%s13904_s5 + $0xd64] sm:$0xf] }
 0x4c6   :  { %5761 = vmatpush.bf16.msrb.mxu0 %v7180_v30  ;;  %v7756_v32 = vor.u32 %v9016_v33, %v7755_v16  ;;  %v8597_v59 = vld [vmem:[%s13904_s5 + $0xf30] sm:$0xf0]  ;;  %v9157_v16 = vld [vmem:[%s13904_s5 + $0xd04] sm:$0xf] }
 0x4c7   :  { %5619 = vmatmul.bf16.vlgmr.msra.gmra.mxu1 %v11235_v42  ;;  %v8600_v33 = vor.u32 %v9225_v37, %v8597_v59 }
 0x4c8   :  { %5663 = vmatpush.bf16.msrb.mxu1 %v8440_v8  ;;  %5632 = vmatmul.bf16.vlgmr.msra.gmra.mxu2 %v11237_v45  ;;  %v8648_v8 = vor.u32 %v9237_v24, %v8645_v23  ;;  %v12120_v60 = vpop.f32.mrf.mxu0 }
 0x4c9   :  { %5676 = vmatpush.bf16.msrb.mxu2 %v8568_v61  ;;  %5689 = vmatpush.bf16.msrb.mxu3 %v8696_v51  ;;  %v8373_v61 = vld [vmem:[%s13904_s5 + $0xd70] sm:$0xf0] }
 0x4ca   :  { %5645 = vmatmul.bf16.vlgmr.msra.gmra.mxu3 %v11239_v62  ;;  %5806 = vmatpush.bf16.msra.mxu0 %v7804_v43  ;;  %v8629_v51 = vld [vmem:[%s13904_s5 + $0xf70] sm:$0xf0]  ;;  %v8376_v49 = vor.u32 %v9169_v14, %v8373_v61  ;;  %v9189_v61 = vld [vmem:[%s13904_s5 + $0xe04] sm:$0xf] }
 0x4cb   :  { %5762 = vmatmul.bf16.vlgmr.msrb.gmra.mxu0 %v10926_v29  ;;  %v8632_v30 = vor.u32 %v9233_v58, %v8629_v51  ;;  %v5425_v43 = vpop.f32.mrf.mxu2  ;;  %v8325_v14 = vld [vmem:[%s13904_s5 + $0xd10] sm:$0xf0]  ;;  %v6907_v51 = vld [vmem:[%s13904_s5 + $0x1e8] sm:$0xf] }
 0x4cc   :  { %5664 = vmatpush.bf16.msrb.mxu1 %v8424_v17  ;;  %v5414_v5 = vpop.f32.mrf.mxu1  ;;  %v8581_v58 = vld [vmem:[%s13904_s5 + $0xf10] sm:$0xf0] }
 0x4cd   :  { %5677 = vmatpush.bf16.msrb.mxu2 %v8552_v10  ;;  %5690 = vmatpush.bf16.msrb.mxu3 %v8680_v34  ;;  %v5438_v17 = vpop.f32.mrf.mxu3  ;;  %v9197_v10 = vld [vmem:[%s13904_s5 + $0xe44] sm:$0xf]  ;;  %v5426_v34 = vadd.f32 %v5425_v43, %v5413_v50  ;;  %v8868_v43 = vld [vmem:[%s13904_s5 + $0x3f4] sm:$0xf0]  ;;  %v8584_v55 = vor.u32 %v9221_v41, %v8581_v58  ;;  %v6987_v58 = vld [vmem:[%s13904_s5 + $0x288] sm:$0xf] }
 0x4ce   :  { %5807 = vmatpush.bf16.msra.mxu0 %v7788_v21  ;;  %v7723_v21 = vld [vmem:[%s13904_s5 + $0x848] sm:$0xf]  ;;  %v8488_v19 = vor.u32 %v9197_v10, %v8485_v63  ;;  %v9000_v5 = vld [vmem:[%s13904_s5 + $0x814] sm:$0xf0] }
 0x4cf   :  { %v5439_v3 = vadd.f32 %v5438_v17, %v5426_v34  ;;  %v8456_v17 = vor.u32 %v9189_v61, %v8453_v1  ;;  %v8315_v63 = vld [vmem:[%s13904_s5 + $0xce8] sm:$0xf]  ;;  %v8792_v41 = vld [vmem:[%s13904_s5 + $0x194] sm:$0xf0] }
 0x4d0   :  { %5665 = vmatpush.bf16.msrb.mxu1 %v8408_v54  ;;  %v9008_v54 = vld [vmem:[%s13904_s5 + $0x854] sm:$0xf0]  ;;  %v5557_v24 = vpop.f32.mrf.mxu0  ;;  %v6859_v1 = vld [vmem:[%s13904_s5 + $0x188] sm:$0xf] }
 0x4d1   :  { %5678 = vmatpush.bf16.msrb.mxu2 %v8536_v48  ;;  %5691 = vmatpush.bf16.msrb.mxu3 %v8664_v22  ;;  %v9161_v48 = vld [vmem:[%s13904_s5 + $0xd24] sm:$0xf]  ;;  %v8341_v22 = vld [vmem:[%s13904_s5 + $0xd30] sm:$0xf0]  ;;  %v12171_v28 = vadd.f32 %v11893_v38, %v5439_v3  ;;  %v7724_v23 = vor.u32 %v9008_v54, %v7723_v21  ;;  %v8472_v38 = vor.u32 %v9193_v26, %v8469_v11  ;;  %v6891_v3 = vld [vmem:[%s13904_s5 + $0x1c8] sm:$0xf] }
 0x4d2   :  { %5808 = vmatpush.bf16.msra.mxu0 %v7772_v52  ;;  %v8344_v50 = vor.u32 %v9161_v48, %v8341_v22  ;;  %v7707_v52 = vld [vmem:[%s13904_s5 + $0x828] sm:$0xf]  ;;  %v8832_v21 = vld [vmem:[%s13904_s5 + $0x2d4] sm:$0xf0]  ;;  %v8316_v48 = vor.u32 %v9156_v6, %v8315_v63 }
 0x4d3   :  { %v7147_v54 = vld [vmem:[%s13904_s5 + $0x3c8] sm:$0xf]  ;;  %v9152_v11 = vld [vmem:[%s13904_s5 + $0xcd4] sm:$0xf0] }
 0x4d4   :  { %5666 = vmatpush.bf16.msrb.mxu1 %v8392_v20  ;;  %v9004_v20 = vld [vmem:[%s13904_s5 + $0x834] sm:$0xf0]  ;;  %v8299_v26 = vld [vmem:[%s13904_s5 + $0xcc8] sm:$0xf] }
 0x4d5   :  { %5679 = vmatpush.bf16.msrb.mxu2 %v8520_v53  ;;  %5692 = vmatpush.bf16.msrb.mxu3 %v8648_v8  ;;  %v5427_v53 = vpop.f32.mrf.mxu2  ;;  %v5440_v8 = vpop.f32.mrf.mxu3  ;;  %v7708_v40 = vor.u32 %v9004_v20, %v7707_v52  ;;  %v6875_v24 = vld [vmem:[%s13904_s5 + $0x1a8] sm:$0xf]  ;;  %v8828_v52 = vld [vmem:[%s13904_s5 + $0x2b4] sm:$0xf0] }
 0x4d6   :  { %5809 = vmatpush.bf16.msra.mxu0 %v7756_v32  ;;  %v8804_v32 = vld [vmem:[%s13904_s5 + $0x1f4] sm:$0xf0]  ;;  %v7131_v20 = vld [vmem:[%s13904_s5 + $0x3a8] sm:$0xf] }
 0x4d7   :  { %v6908_v10 = vor.u32 %v8804_v32, %v6907_v51  ;;  %v8283_v53 = vld [vmem:[%s13904_s5 + $0xca8] sm:$0xf]  ;;  %v9148_v8 = vld [vmem:[%s13904_s5 + $0xcb4] sm:$0xf0] }
 0x4d8   :  { %5667 = vmatpush.bf16.msrb.mxu1 %v8376_v49  ;;  %v7035_v49 = vld [vmem:[%s13904_s5 + $0x2e8] sm:$0xf]  ;;  %v8824_v32 = vld [vmem:[%s13904_s5 + $0x294] sm:$0xf0] }
 0x4d9   :  { %5680 = vmatpush.bf16.msrb.mxu2 %v8504_v44  ;;  %5693 = vmatpush.bf16.msrb.mxu3 %v8632_v30  ;;  %v8328_v44 = vor.u32 %v9157_v16, %v8325_v14  ;;  %v7163_v30 = vld [vmem:[%s13904_s5 + $0x3e8] sm:$0xf]  ;;  %v7036_v34 = vor.u32 %v8836_v27, %v7035_v49  ;;  %v8860_v16 = vld [vmem:[%s13904_s5 + $0x3b4] sm:$0xf0] }
 0x4da   :  { %5810 = vmatpush.bf16.msra.mxu0 %v7740_v39  ;;  %v7164_v18 = vor.u32 %v8868_v43, %v7163_v30  ;;  %v8800_v39 = vld [vmem:[%s13904_s5 + $0x1d4] sm:$0xf0]  ;;  %v7132_v61 = vor.u32 %v8860_v16, %v7131_v20  ;;  %v7115_v49 = vld [vmem:[%s13904_s5 + $0x388] sm:$0xf]  ;;  %v6860_v30 = vor.u32 %v8792_v41, %v6859_v1 }
 0x4db   :  { %v6892_v22 = vor.u32 %v8800_v39, %v6891_v3  ;;  %v8856_v27 = vld [vmem:[%s13904_s5 + $0x394] sm:$0xf0]  ;;  %v8267_v43 = vld [vmem:[%s13904_s5 + $0xc88] sm:$0xf] }
 0x4dc   :  { %5668 = vmatpush.bf16.msrb.mxu1 %v8360_v4  ;;  %v7019_v4 = vld [vmem:[%s13904_s5 + $0x2c8] sm:$0xf]  ;;  %v8852_v6 = vld [vmem:[%s13904_s5 + $0x374] sm:$0xf0] }
 0x4dd   :  { %5681 = vmatpush.bf16.msrb.mxu2 %v8488_v19  ;;  %5694 = vmatpush.bf16.msrb.mxu3 %v8616_v35  ;;  %v8864_v19 = vld [vmem:[%s13904_s5 + $0x3d4] sm:$0xf0]  ;;  %v7692_v35 = vor.u32 %v9000_v5, %v7691_v2  ;;  %v7020_v37 = vor.u32 %v8832_v21, %v7019_v4  ;;  %v7116_v2 = vor.u32 %v8856_v27, %v7115_v49  ;;  %v7099_v63 = vld [vmem:[%s13904_s5 + $0x368] sm:$0xf] }
 0x4de   :  { %5811 = vmatpush.bf16.msra.mxu0 %v7724_v23  ;;  %v7148_v59 = vor.u32 %v8864_v19, %v7147_v54  ;;  %v8796_v23 = vld [vmem:[%s13904_s5 + $0x1b4] sm:$0xf0]  ;;  %v8251_v4 = vld [vmem:[%s13904_s5 + $0xc68] sm:$0xf]  ;;  %v7100_v19 = vor.u32 %v8852_v6, %v7099_v63 }
 0x4df   :  { %v8820_v5 = vld [vmem:[%s13904_s5 + $0x274] sm:$0xf0]  ;;  %v6939_v1 = vld [vmem:[%s13904_s5 + $0x228] sm:$0xf] }
 0x4e0   :  { %5669 = vmatpush.bf16.msrb.mxu1 %v8344_v50  ;;  %v7003_v50 = vld [vmem:[%s13904_s5 + $0x2a8] sm:$0xf]  ;;  %v9140_v21 = vld [vmem:[%s13904_s5 + $0xc74] sm:$0xf0] }
 0x4e1   :  { %5682 = vmatpush.bf16.msrb.mxu2 %v8472_v38  ;;  %5695 = vmatpush.bf16.msrb.mxu3 %v8600_v33  ;;  %v8300_v38 = vor.u32 %v9152_v11, %v8299_v26  ;;  %v6876_v33 = vor.u32 %v8796_v23, %v6875_v24  ;;  %v7004_v14 = vor.u32 %v8828_v52, %v7003_v50  ;;  %v8784_v26 = vld [vmem:[%s13904_s5 + $0x154] sm:$0xf0]  ;;  %v6955_v11 = vld [vmem:[%s13904_s5 + $0x248] sm:$0xf] }
 0x4e2   :  { %5812 = vmatpush.bf16.msra.mxu0 %v7708_v40  ;;  %v8816_v24 = vld [vmem:[%s13904_s5 + $0x254] sm:$0xf0]  ;;  %v7083_v23 = vld [vmem:[%s13904_s5 + $0x348] sm:$0xf]  ;;  %v8252_v20 = vor.u32 %v9140_v21, %v8251_v4 }
 0x4e3   :  { %v8848_v50 = vld [vmem:[%s13904_s5 + $0x354] sm:$0xf0]  ;;  %v7419_v6 = vld [vmem:[%s13904_s5 + $0x5e8] sm:$0xf] }
 0x4e4   :  { %5670 = vmatpush.bf16.msrb.mxu1 %v8328_v44  ;;  %v5464_v51 = vpop.f32.mrf.mxu1  ;;  %v8284_v44 = vor.u32 %v9148_v8, %v8283_v53  ;;  %v6956_v53 = vor.u32 %v8816_v24, %v6955_v11  ;;  %v7084_v8 = vor.u32 %v8848_v50, %v7083_v23  ;;  %v8812_v41 = vld [vmem:[%s13904_s5 + $0x234] sm:$0xf0]  ;;  %v8770_v24 = vld [vmem:[%s13904_s5 + $0xec] sm:$0xf]  ;;  %v6781_v23 = vld [vmem:[%s13904_s5 + $0xf8] sm:$0xf0] }
 0x4e5   :  { %5683 = vmatpush.bf16.msrb.mxu2 %v8456_v17  ;;  %5696 = vmatpush.bf16.msrb.mxu3 %v8584_v55  ;;  %v5465_v40 = vadd.f32 %v5464_v51, %v12171_v28  ;;  %v9144_v17 = vld [vmem:[%s13904_s5 + $0xc94] sm:$0xf0]  ;;  %v6988_v55 = vor.u32 %v8824_v32, %v6987_v58  ;;  %v6843_v28 = vld [vmem:[%s13904_s5 + $0x168] sm:$0xf] }
 0x4e6   :  { %5813 = vmatpush.bf16.msra.mxu0 %v7692_v35  ;;  %v8268_v3 = vor.u32 %v9144_v17, %v8267_v43  ;;  %v7067_v58 = vld [vmem:[%s13904_s5 + $0x328] sm:$0xf]  ;;  %v8844_v51 = vld [vmem:[%s13904_s5 + $0x334] sm:$0xf0]  ;;  %v6940_v43 = vor.u32 %v8812_v41, %v6939_v1  ;;  %v8766_v41 = vld [vmem:[%s13904_s5 + $0xcc] sm:$0xf] }
 0x4e7   :  { %5671 = vmatmul.bf16.vlgmr.msrb.gmra.mxu1 %v11440_v46  ;;  %v7068_v17 = vor.u32 %v8844_v51, %v7067_v58  ;;  %v8840_v63 = vld [vmem:[%s13904_s5 + $0x314] sm:$0xf0]  ;;  %v6765_v58 = vld [vmem:[%s13904_s5 + $0xd8] sm:$0xf0] }
 0x4e8   :  { %5715 = vmatpush.bf16.msra.mxu1 %v6908_v10  ;;  %5684 = vmatmul.bf16.vlgmr.msrb.gmra.mxu2 %v11442_v57  ;;  %v8788_v10 = vld [vmem:[%s13904_s5 + $0x174] sm:$0xf0] }
 0x4e9   :  { %5728 = vmatpush.bf16.msra.mxu2 %v7036_v34  ;;  %5741 = vmatpush.bf16.msra.mxu3 %v7164_v18  ;;  %v6971_v34 = vld [vmem:[%s13904_s5 + $0x268] sm:$0xf]  ;;  %v12322_v18 = vpop.f32.mrf.mxu0  ;;  %v6844_v39 = vor.u32 %v8788_v10, %v6843_v28  ;;  %v8776_v28 = vld [vmem:[%s13904_s5 + $0x114] sm:$0xf0] }
 0x4ea   :  { %5697 = vmatmul.bf16.vlgmr.msrb.gmra.mxu3 %v11444_v13  ;;  %5858 = vmatpush.bf16.msrb.mxu0 %v8316_v48  ;;  %v6972_v54 = vor.u32 %v8820_v5, %v6971_v34  ;;  %v6923_v10 = vld [vmem:[%s13904_s5 + $0x208] sm:$0xf]  ;;  %v8808_v34 = vld [vmem:[%s13904_s5 + $0x214] sm:$0xf0] }
 0x4eb   :  { %5814 = vmatmul.bf16.vlgmr.msra.gmra.mxu0 %v11029_v56  ;;  %v5477_v35 = vpop.f32.mrf.mxu2  ;;  %v7051_v5 = vld [vmem:[%s13904_s5 + $0x308] sm:$0xf]  ;;  %v8964_v4 = vld [vmem:[%s13904_s5 + $0x6f4] sm:$0xf0] }
 0x4ec   :  { %5716 = vmatpush.bf16.msra.mxu1 %v6892_v22  ;;  %v6827_v22 = vld [vmem:[%s13904_s5 + $0x148] sm:$0xf] }
 0x4ed   :  { %5729 = vmatpush.bf16.msra.mxu2 %v7020_v37  ;;  %5742 = vmatpush.bf16.msra.mxu3 %v7148_v59  ;;  %v5490_v48 = vpop.f32.mrf.mxu3  ;;  %v5478_v37 = vadd.f32 %v5477_v35, %v5465_v40  ;;  %v5466_v59 = vpop.f32.mrf.mxu1  ;;  %v6828_v16 = vor.u32 %v8784_v26, %v6827_v22  ;;  %v8219_v40 = vld [vmem:[%s13904_s5 + $0xc28] sm:$0xf]  ;;  %v8996_v35 = vld [vmem:[%s13904_s5 + $0x7f4] sm:$0xf0]  ;;  %v7052_v22 = vor.u32 %v8840_v63, %v7051_v5 }
 0x4ee   :  { %5859 = vmatpush.bf16.msrb.mxu0 %v8300_v38  ;;  %v8235_v38 = vld [vmem:[%s13904_s5 + $0xc48] sm:$0xf]  ;;  %v9128_v59 = vld [vmem:[%s13904_s5 + $0xc14] sm:$0xf0] }
 0x4ef   :  { %v12348_v52 = vadd.f32 %v5490_v48, %v5478_v37  ;;  %v6924_v48 = vor.u32 %v8808_v34, %v6923_v10  ;;  %v8203_v26 = vld [vmem:[%s13904_s5 + $0xc08] sm:$0xf]  ;;  %v8920_v63 = vld [vmem:[%s13904_s5 + $0x594] sm:$0xf0] }
 0x4f0   :  { %5717 = vmatpush.bf16.msra.mxu1 %v6876_v33  ;;  %v9136_v33 = vld [vmem:[%s13904_s5 + $0xc54] sm:$0xf0]  ;;  %v7371_v5 = vld [vmem:[%s13904_s5 + $0x588] sm:$0xf] }
 0x4f1   :  { %5730 = vmatpush.bf16.msra.mxu2 %v7004_v14  ;;  %5743 = vmatpush.bf16.msra.mxu3 %v7132_v61  ;;  %v6811_v14 = vld [vmem:[%s13904_s5 + $0x128] sm:$0xf]  ;;  %v8780_v61 = vld [vmem:[%s13904_s5 + $0x134] sm:$0xf0]  ;;  %v5609_v32 = vpop.f32.mrf.mxu0  ;;  %v8236_v49 = vor.u32 %v9136_v33, %v8235_v38 }
 0x4f2   :  { %5860 = vmatpush.bf16.msrb.mxu0 %v8284_v44  ;;  %v6812_v27 = vor.u32 %v8780_v61, %v6811_v14  ;;  %v9132_v44 = vld [vmem:[%s13904_s5 + $0xc34] sm:$0xf0]  ;;  %v7531_v38 = vld [vmem:[%s13904_s5 + $0x6c8] sm:$0xf]  ;;  %v8204_v14 = vor.u32 %v9128_v59, %v8203_v26  ;;  %v6784_v61 = vor.u32 %v8770_v24, %v6781_v23 }
 0x4f3   :  { %v8220_v21 = vor.u32 %v9132_v44, %v8219_v40  ;;  %v8960_v33 = vld [vmem:[%s13904_s5 + $0x6d4] sm:$0xf0]  ;;  %v7515_v40 = vld [vmem:[%s13904_s5 + $0x6a8] sm:$0xf] }
 0x4f4   :  { %5718 = vmatpush.bf16.msra.mxu1 %v6860_v30  ;;  %v6795_v30 = vld [vmem:[%s13904_s5 + $0x108] sm:$0xf]  ;;  %v7532_v51 = vor.u32 %v8960_v33, %v7531_v38  ;;  %v8956_v44 = vld [vmem:[%s13904_s5 + $0x6b4] sm:$0xf0]  ;;  %v8754_v33 = vld [vmem:[%s13904_s5 + $0x6c] sm:$0xf] }
 0x4f5   :  { %5731 = vmatpush.bf16.msra.mxu2 %v6988_v55  ;;  %5744 = vmatpush.bf16.msra.mxu3 %v7116_v2  ;;  %v5479_v55 = vpop.f32.mrf.mxu2  ;;  %v5492_v2 = vpop.f32.mrf.mxu3  ;;  %v7516_v10 = vor.u32 %v8956_v44, %v7515_v40  ;;  %v7483_v59 = vld [vmem:[%s13904_s5 + $0x668] sm:$0xf]  ;;  %v8948_v24 = vld [vmem:[%s13904_s5 + $0x674] sm:$0xf0] }
 0x4f6   :  { %5861 = vmatpush.bf16.msrb.mxu0 %v8268_v3  ;;  %v8932_v3 = vld [vmem:[%s13904_s5 + $0x5f4] sm:$0xf0]  ;;  %v8762_v2 = vld [vmem:[%s13904_s5 + $0xac] sm:$0xf]  ;;  %v7611_v23 = vld [vmem:[%s13904_s5 + $0x768] sm:$0xf] }
 0x4f7   :  { %v7420_v11 = vor.u32 %v8932_v3, %v7419_v6  ;;  %v7499_v6 = vld [vmem:[%s13904_s5 + $0x688] sm:$0xf]  ;;  %v8976_v40 = vld [vmem:[%s13904_s5 + $0x754] sm:$0xf0] }
 0x4f8   :  { %5719 = vmatpush.bf16.msra.mxu1 %v6844_v39  ;;  %v7547_v39 = vld [vmem:[%s13904_s5 + $0x6e8] sm:$0xf] }
 0x4f9   :  { %5732 = vmatpush.bf16.msra.mxu2 %v6972_v54  ;;  %5745 = vmatpush.bf16.msra.mxu3 %v7100_v19  ;;  %v6796_v54 = vor.u32 %v8776_v28, %v6795_v30  ;;  %v7675_v19 = vld [vmem:[%s13904_s5 + $0x7e8] sm:$0xf]  ;;  %v7548_v37 = vor.u32 %v8964_v4, %v7547_v39  ;;  %v6749_v28 = vld [vmem:[%s13904_s5 + $0xb8] sm:$0xf0]  ;;  %v8952_v39 = vld [vmem:[%s13904_s5 + $0x694] sm:$0xf0] }
 0x4fa   :  { %5862 = vmatpush.bf16.msrb.mxu0 %v8252_v20  ;;  %v7676_v50 = vor.u32 %v8996_v35, %v7675_v19  ;;  %v7403_v20 = vld [vmem:[%s13904_s5 + $0x5c8] sm:$0xf]  ;;  %v7372_v19 = vor.u32 %v8920_v63, %v7371_v5  ;;  %v8758_v35 = vld [vmem:[%s13904_s5 + $0x8c] sm:$0xf]  ;;  %v8940_v5 = vld [vmem:[%s13904_s5 + $0x634] sm:$0xf0] }
 0x4fb   :  { %v7643_v30 = vld [vmem:[%s13904_s5 + $0x7a8] sm:$0xf] }
 0x4fc   :  { %5720 = vmatpush.bf16.msra.mxu1 %v6828_v16  ;;  %v8928_v16 = vld [vmem:[%s13904_s5 + $0x5d4] sm:$0xf0]  ;;  %v7627_v4 = vld [vmem:[%s13904_s5 + $0x788] sm:$0xf] }
 0x4fd   :  { %5733 = vmatpush.bf16.msra.mxu2 %v6956_v53  ;;  %5746 = vmatpush.bf16.msra.mxu3 %v7084_v8  ;;  %v7659_v53 = vld [vmem:[%s13904_s5 + $0x7c8] sm:$0xf]  ;;  %v8992_v8 = vld [vmem:[%s13904_s5 + $0x7d4] sm:$0xf0]  ;;  %v7404_v1 = vor.u32 %v8928_v16, %v7403_v20 }
 0x4fe   :  { %5863 = vmatpush.bf16.msrb.mxu0 %v8236_v49  ;;  %v7660_v32 = vor.u32 %v8992_v8, %v7659_v53  ;;  %v7387_v49 = vld [vmem:[%s13904_s5 + $0x5a8] sm:$0xf]  ;;  %v6717_v53 = vld [vmem:[%s13904_s5 + $0x78] sm:$0xf0]  ;;  %v7484_v8 = vor.u32 %v8948_v24, %v7483_v59  ;;  %v8904_v24 = vld [vmem:[%s13904_s5 + $0x514] sm:$0xf0] }
 0x4ff   :  { %v6720_v44 = vor.u32 %v8754_v33, %v6717_v53  ;;  %v7579_v63 = vld [vmem:[%s13904_s5 + $0x728] sm:$0xf] }
 0x500   :  { %5721 = vmatpush.bf16.msra.mxu1 %v6812_v27  ;;  %v8924_v27 = vld [vmem:[%s13904_s5 + $0x5b4] sm:$0xf0]  ;;  %v7931_v33 = vld [vmem:[%s13904_s5 + $0x9e8] sm:$0xf] }
 0x501   :  { %5734 = vmatpush.bf16.msra.mxu2 %v6940_v43  ;;  %5747 = vmatpush.bf16.msra.mxu3 %v7068_v17  ;;  %v8988_v43 = vld [vmem:[%s13904_s5 + $0x7b4] sm:$0xf0]  ;;  %v6768_v17 = vor.u32 %v8766_v41, %v6765_v58  ;;  %v7388_v55 = vor.u32 %v8924_v27, %v7387_v49  ;;  %v7339_v41 = vld [vmem:[%s13904_s5 + $0x548] sm:$0xf] }
 0x502   :  { %5864 = vmatpush.bf16.msrb.mxu0 %v8220_v21  ;;  %v7644_v34 = vor.u32 %v8988_v43, %v7643_v30  ;;  %v8984_v21 = vld [vmem:[%s13904_s5 + $0x794] sm:$0xf0]  ;;  %v7595_v27 = vld [vmem:[%s13904_s5 + $0x748] sm:$0xf]  ;;  %v8750_v43 = vld [vmem:[%s13904_s5 + $0x4c] sm:$0xf] }
 0x503   :  { %v7628_v26 = vor.u32 %v8984_v21, %v7627_v4  ;;  %v8912_v58 = vld [vmem:[%s13904_s5 + $0x554] sm:$0xf0] }
 0x504   :  { %5722 = vmatpush.bf16.msra.mxu1 %v6796_v54  ;;  %v12489_v3 = vpop.f32.mrf.mxu1  ;;  %v6752_v54 = vor.u32 %v8762_v2, %v6749_v28  ;;  %v8944_v49 = vld [vmem:[%s13904_s5 + $0x654] sm:$0xf0]  ;;  %v7340_v30 = vor.u32 %v8912_v58, %v7339_v41  ;;  %v7596_v2 = vor.u32 %v8976_v40, %v7595_v27  ;;  %v7323_v28 = vld [vmem:[%s13904_s5 + $0x528] sm:$0xf] }
 0x505   :  { %5735 = vmatpush.bf16.msra.mxu2 %v6924_v48  ;;  %5748 = vmatpush.bf16.msra.mxu3 %v7052_v22  ;;  %v6733_v48 = vld [vmem:[%s13904_s5 + $0x98] sm:$0xf0]  ;;  %v7500_v22 = vor.u32 %v8952_v39, %v7499_v6  ;;  %v8972_v6 = vld [vmem:[%s13904_s5 + $0x734] sm:$0xf0]  ;;  %v12581_v39 = vld [vmem:[%s13905_s6] sm:$0xf] }
 0x506   :  { %5865 = vmatpush.bf16.msrb.mxu0 %v8204_v14  ;;  %v6736_v16 = vor.u32 %v8758_v35, %v6733_v48  ;;  %v2719_v4 = vperm.slane %v12581_v39, 1  ;;  %v8746_v35 = vld [vmem:[%s13904_s5 + $0x2c] sm:$0xf]  ;;  %v6685_v48 = vld [vmem:[%s13904_s5 + $0x38] sm:$0xf0] }
 0x507   :  { %5723 = vmatmul.bf16.vlgmr.msra.gmra.mxu1 %v10828_v7  ;;  %v9092_v41 = vld [vmem:[%s13904_s5 + $0xaf4] sm:$0xf0]  ;;  %v6688_v58 = vor.u32 %v8746_v35, %v6685_v48  ;;  %v7277_v35 = vld [vmem:[%s13904_s5 + $0x4d8] sm:$0xf0] }
 0x508   :  { %5767 = vmatpush.bf16.msrb.mxu1 %v7420_v11  ;;  %5736 = vmatmul.bf16.vlgmr.msra.gmra.mxu2 %v10830_v9  ;;  %v7355_v11 = vld [vmem:[%s13904_s5 + $0x568] sm:$0xf]  ;;  %v12524_v20 = vpop.f32.mrf.mxu0  ;;  %v5504_v53 = vadd.f32 %v12005_v25, %v2719_v4 }
 0x509   :  { %5780 = vmatpush.bf16.msrb.mxu2 %v7548_v37  ;;  %5793 = vmatpush.bf16.msrb.mxu3 %v7676_v50  ;;  %v8916_v37 = vld [vmem:[%s13904_s5 + $0x574] sm:$0xf0]  ;;  %v8187_v25 = vld [vmem:[%s13904_s5 + $0xbe8] sm:$0xf] }
 0x50a   :  { %5749 = vmatmul.bf16.vlgmr.msra.gmra.mxu3 %v10924_v15  ;;  %5910 = vmatpush.bf16.msra.mxu0 %v6784_v61  ;;  %v8980_v50 = vld [vmem:[%s13904_s5 + $0x774] sm:$0xf0]  ;;  %v7356_v38 = vor.u32 %v8916_v37, %v7355_v11  ;;  %v7580_v11 = vor.u32 %v8972_v6, %v7579_v63 }
 0x50b   :  { %5866 = vmatmul.bf16.vlgmr.msrb.gmra.mxu0 %v11031_v47  ;;  %v7612_v14 = vor.u32 %v8980_v50, %v7611_v23  ;;  %v12532_v61 = vpop.f32.mrf.mxu2  ;;  %v7435_v23 = vld [vmem:[%s13904_s5 + $0x608] sm:$0xf]  ;;  %v8936_v50 = vld [vmem:[%s13904_s5 + $0x614] sm:$0xf0] }
 0x50c   :  { %5768 = vmatpush.bf16.msrb.mxu1 %v7404_v1  ;;  %v7436_v27 = vor.u32 %v8936_v50, %v7435_v23  ;;  %v9088_v63 = vld [vmem:[%s13904_s5 + $0xad4] sm:$0xf0] }
 0x50d   :  { %5781 = vmatpush.bf16.msrb.mxu2 %v7532_v51  ;;  %5794 = vmatpush.bf16.msrb.mxu3 %v7660_v32  ;;  %v12534_v1 = vpop.f32.mrf.mxu3  ;;  %v7467_v51 = vld [vmem:[%s13904_s5 + $0x648] sm:$0xf]  ;;  %v5518_v32 = vpop.f32.mrf.mxu1  ;;  %v9120_v6 = vld [vmem:[%s13904_s5 + $0xbd4] sm:$0xf0] }
 0x50e   :  { %5911 = vmatpush.bf16.msra.mxu0 %v6768_v17  ;;  %v6701_v17 = vld [vmem:[%s13904_s5 + $0x58] sm:$0xf0]  ;;  %v9124_v32 = vld [vmem:[%s13904_s5 + $0xbf4] sm:$0xf0] }
 0x50f   :  { %v9116_v23 = vld [vmem:[%s13904_s5 + $0xbb4] sm:$0xf0] }
 0x510   :  { %5769 = vmatpush.bf16.msrb.mxu1 %v7388_v55  ;;  %v7468_v55 = vor.u32 %v8944_v49, %v7467_v51  ;;  %v5661_v21 = vpop.f32.mrf.mxu0  ;;  %v5517_v49 = vadd.f32 %v12489_v3, %v5504_v53  ;;  %v7293_v3 = vld [vmem:[%s13904_s5 + $0x4f8] sm:$0xf0] }
 0x511   :  { %5782 = vmatpush.bf16.msrb.mxu2 %v7516_v10  ;;  %5795 = vmatpush.bf16.msrb.mxu3 %v7644_v34  ;;  %v8908_v10 = vld [vmem:[%s13904_s5 + $0x534] sm:$0xf0]  ;;  %v7451_v34 = vld [vmem:[%s13904_s5 + $0x628] sm:$0xf] }
 0x512   :  { %5912 = vmatpush.bf16.msra.mxu0 %v6752_v54  ;;  %v6704_v54 = vor.u32 %v8750_v43, %v6701_v17  ;;  %v6669_v17 = vld [vmem:[%s13904_s5 + $0x18] sm:$0xf0] }
 0x513   :  { %v5531_v37 = vpop.f32.mrf.mxu2 }
 0x514   :  { %5770 = vmatpush.bf16.msrb.mxu1 %v7372_v19  ;;  %v7324_v19 = vor.u32 %v8908_v10, %v7323_v28  ;;  %v8188_v28 = vor.u32 %v9124_v32, %v8187_v25  ;;  %v7915_v10 = vld [vmem:[%s13904_s5 + $0x9c8] sm:$0xf]  ;;  %v9052_v37 = vld [vmem:[%s13904_s5 + $0x9b4] sm:$0xf0] }
 0x515   :  { %5783 = vmatpush.bf16.msrb.mxu2 %v7500_v22  ;;  %5796 = vmatpush.bf16.msrb.mxu3 %v7628_v26  ;;  %v7307_v22 = vld [vmem:[%s13904_s5 + $0x508] sm:$0xf]  ;;  %v7452_v26 = vor.u32 %v8940_v5, %v7451_v34  ;;  %v5544_v59 = vpop.f32.mrf.mxu3  ;;  %v9056_v34 = vld [vmem:[%s13904_s5 + $0x9d4] sm:$0xf0] }
 0x516   :  { %5913 = vmatpush.bf16.msra.mxu0 %v6736_v16  ;;  %v7563_v16 = vld [vmem:[%s13904_s5 + $0x708] sm:$0xf]  ;;  %v7308_v51 = vor.u32 %v8904_v24, %v7307_v22  ;;  %v9080_v32 = vld [vmem:[%s13904_s5 + $0xa94] sm:$0xf0] }
 0x517   :  { %v8043_v5 = vld [vmem:[%s13904_s5 + $0xac8] sm:$0xf] }
 0x518   :  { %5771 = vmatpush.bf16.msrb.mxu1 %v7356_v38  ;;  %v8968_v38 = vld [vmem:[%s13904_s5 + $0x714] sm:$0xf0]  ;;  %v8044_v22 = vor.u32 %v9088_v63, %v8043_v5  ;;  %v8027_v59 = vld [vmem:[%s13904_s5 + $0xaa8] sm:$0xf] }
 0x519   :  { %5784 = vmatpush.bf16.msrb.mxu2 %v7484_v8  ;;  %5797 = vmatpush.bf16.msrb.mxu3 %v7612_v14  ;;  %v9060_v8 = vld [vmem:[%s13904_s5 + $0x9f4] sm:$0xf0]  ;;  %v8059_v14 = vld [vmem:[%s13904_s5 + $0xae8] sm:$0xf]  ;;  %v7564_v40 = vor.u32 %v8968_v38, %v7563_v16  ;;  %v8890_v38 = vld [vmem:[%s13904_s5 + $0x4ac] sm:$0xf] }
 0x51a   :  { %5914 = vmatpush.bf16.msra.mxu0 %v6720_v44  ;;  %v8742_v44 = vld [vmem:[%s13904_s5 + $0xc] sm:$0xf]  ;;  %v8060_v43 = vor.u32 %v9092_v41, %v8059_v14  ;;  %v8155_v24 = vld [vmem:[%s13904_s5 + $0xba8] sm:$0xf] }
 0x51b   :  { %v6672_v4 = vor.u32 %v8742_v44, %v6669_v17  ;;  %v7883_v41 = vld [vmem:[%s13904_s5 + $0x988] sm:$0xf] }
 0x51c   :  { %5772 = vmatpush.bf16.msrb.mxu1 %v7340_v30  ;;  %v7932_v30 = vor.u32 %v9060_v8, %v7931_v33  ;;  %v7261_v33 = vld [vmem:[%s13904_s5 + $0x4b8] sm:$0xf0]  ;;  %v8156_v8 = vor.u32 %v9116_v23, %v8155_v24  ;;  %v9104_v24 = vld [vmem:[%s13904_s5 + $0xb54] sm:$0xf0] }
 0x51d   :  { %5785 = vmatpush.bf16.msrb.mxu2 %v7468_v55  ;;  %5798 = vmatpush.bf16.msrb.mxu3 %v7596_v2  ;;  %v8898_v55 = vld [vmem:[%s13904_s5 + $0x4ec] sm:$0xf]  ;;  %v5530_v2 = vadd.f32 %v12532_v61, %v5517_v49  ;;  %v8171_v61 = vld [vmem:[%s13904_s5 + $0xbc8] sm:$0xf]  ;;  %v9112_v49 = vld [vmem:[%s13904_s5 + $0xb94] sm:$0xf0] }
 0x51e   :  { %5915 = vmatpush.bf16.msra.mxu0 %v6704_v54  ;;  %v7296_v21 = vor.u32 %v8898_v55, %v7293_v3  ;;  %v7916_v54 = vor.u32 %v9056_v34, %v7915_v10  ;;  %v7867_v55 = vld [vmem:[%s13904_s5 + $0x968] sm:$0xf]  ;;  %v9044_v3 = vld [vmem:[%s13904_s5 + $0x974] sm:$0xf0] }
 0x51f   :  { %v5543_v48 = vadd.f32 %v12534_v1, %v5530_v2  ;;  %v9084_v1 = vld [vmem:[%s13904_s5 + $0xab4] sm:$0xf0]  ;;  %v7995_v2 = vld [vmem:[%s13904_s5 + $0xa68] sm:$0xf] }
 0x520   :  { %5773 = vmatpush.bf16.msrb.mxu1 %v7324_v19  ;;  %v8894_v19 = vld [vmem:[%s13904_s5 + $0x4cc] sm:$0xf]  ;;  %v8028_v53 = vor.u32 %v9084_v1, %v8027_v59  ;;  %v8123_v10 = vld [vmem:[%s13904_s5 + $0xb68] sm:$0xf]  ;;  %v9108_v34 = vld [vmem:[%s13904_s5 + $0xb74] sm:$0xf0] }
 0x521   :  { %5786 = vmatpush.bf16.msrb.mxu2 %v7452_v26  ;;  %5799 = vmatpush.bf16.msrb.mxu3 %v7580_v11  ;;  %v8172_v26 = vor.u32 %v9120_v6, %v8171_v61  ;;  %v7899_v11 = vld [vmem:[%s13904_s5 + $0x9a8] sm:$0xf]  ;;  %v7280_v50 = vor.u32 %v8894_v19, %v7277_v35  ;;  %v5556_v14 = vadd.f32 %v12120_v60, %v5543_v48  ;;  %v8882_v6 = vld [vmem:[%s13904_s5 + $0x46c] sm:$0xf]  ;;  %v9072_v59 = vld [vmem:[%s13904_s5 + $0xa54] sm:$0xf0] }
 0x522   :  { %5916 = vmatpush.bf16.msra.mxu0 %v6688_v58  ;;  %v7900_v16 = vor.u32 %v9052_v37, %v7899_v11  ;;  %v9048_v58 = vld [vmem:[%s13904_s5 + $0x994] sm:$0xf0]  ;;  %v8139_v60 = vld [vmem:[%s13904_s5 + $0xb88] sm:$0xf]  ;;  %v7868_v61 = vor.u32 %v9044_v3, %v7867_v55 }
 0x523   :  { %v7884_v44 = vor.u32 %v9048_v58, %v7883_v41  ;;  %v8140_v17 = vor.u32 %v9112_v49, %v8139_v60  ;;  %v7851_v48 = vld [vmem:[%s13904_s5 + $0x948] sm:$0xf]  ;;  %v9036_v41 = vld [vmem:[%s13904_s5 + $0x934] sm:$0xf0] }
 0x524   :  { %5774 = vmatpush.bf16.msrb.mxu1 %v7308_v51  ;;  %v8011_v51 = vld [vmem:[%s13904_s5 + $0xa88] sm:$0xf]  ;;  %v5568_v25 = vpop.f32.mrf.mxu1  ;;  %v9032_v3 = vld [vmem:[%s13904_s5 + $0x914] sm:$0xf0] }
 0x525   :  { %5787 = vmatpush.bf16.msrb.mxu2 %v7436_v27  ;;  %5800 = vmatpush.bf16.msrb.mxu3 %v7564_v40  ;;  %v5569_v27 = vadd.f32 %v5568_v25, %v5556_v14  ;;  %v7264_v40 = vor.u32 %v8890_v38, %v7261_v33  ;;  %v8107_v1 = vld [vmem:[%s13904_s5 + $0xb48] sm:$0xf]  ;;  %v8878_v38 = vld [vmem:[%s13904_s5 + $0x44c] sm:$0xf]  ;;  %v7213_v33 = vld [vmem:[%s13904_s5 + $0x458] sm:$0xf0] }
 0x526   :  { %5917 = vmatpush.bf16.msra.mxu0 %v6672_v4  ;;  %v7229_v4 = vld [vmem:[%s13904_s5 + $0x478] sm:$0xf0]  ;;  %v7835_v14 = vld [vmem:[%s13904_s5 + $0x928] sm:$0xf] }
 0x527   :  { %5775 = vmatmul.bf16.vlgmr.msrb.gmra.mxu1 %v10931_v12  ;;  %v7963_v58 = vld [vmem:[%s13904_s5 + $0xa28] sm:$0xf] }
 0x528   :  { %5819 = vmatpush.bf16.msra.mxu1 %v7932_v30  ;;  %5788 = vmatmul.bf16.vlgmr.msrb.gmra.mxu2 %v11027_v36  ;;  %v7245_v30 = vld [vmem:[%s13904_s5 + $0x498] sm:$0xf0]  ;;  %v12737_v5 = vpop.f32.mrf.mxu0  ;;  %v8091_v25 = vld [vmem:[%s13904_s5 + $0xb28] sm:$0xf] }
 0x529   :  { %5832 = vmatpush.bf16.msra.mxu2 %v8060_v43  ;;  %5845 = vmatpush.bf16.msra.mxu3 %v8188_v28  ;;  %v8012_v43 = vor.u32 %v9080_v32, %v8011_v51  ;;  %v9076_v28 = vld [vmem:[%s13904_s5 + $0xa74] sm:$0xf0] }
 0x52a   :  { %5801 = vmatmul.bf16.vlgmr.msrb.gmra.mxu3 %v11033_v31  ;;  %5962 = vmatpush.bf16.msrb.mxu0 %v7296_v21  ;;  %v7996_v21 = vor.u32 %v9076_v28, %v7995_v2  ;;  %v9068_v51 = vld [vmem:[%s13904_s5 + $0xa34] sm:$0xf0]  ;;  %v7947_v2 = vld [vmem:[%s13904_s5 + $0xa08] sm:$0xf] }
 0x52b   :  { %5918 = vmatmul.bf16.vlgmr.msra.gmra.mxu0 %v10826_v0  ;;  %v8886_v0 = vld [vmem:[%s13904_s5 + $0x48c] sm:$0xf]  ;;  %v5581_v19 = vpop.f32.mrf.mxu2  ;;  %v9100_v32 = vld [vmem:[%s13904_s5 + $0xb34] sm:$0xf0] }
 0x52c   :  { %5820 = vmatpush.bf16.msra.mxu1 %v7916_v54  ;;  %v7248_v63 = vor.u32 %v8886_v0, %v7245_v30  ;;  %v8124_v54 = vor.u32 %v9108_v34, %v8123_v10  ;;  %v5582_v11 = vadd.f32 %v5581_v19, %v5569_v27  ;;  %v5570_v37 = vpop.f32.mrf.mxu1  ;;  %v7216_v27 = vor.u32 %v8878_v38, %v7213_v33  ;;  %v7197_v0 = vld [vmem:[%s13904_s5 + $0x438] sm:$0xf0]  ;;  %v7819_v30 = vld [vmem:[%s13904_s5 + $0x908] sm:$0xf]  ;;  %v9064_v28 = vld [vmem:[%s13904_s5 + $0xa14] sm:$0xf0] }
 0x52d   :  { %5833 = vmatpush.bf16.msra.mxu2 %v8044_v22  ;;  %5846 = vmatpush.bf16.msra.mxu3 %v8172_v26  ;;  %v5594_v35 = vpop.f32.mrf.mxu3  ;;  %v9040_v22 = vld [vmem:[%s13904_s5 + $0x954] sm:$0xf0]  ;;  %v7979_v26 = vld [vmem:[%s13904_s5 + $0xa48] sm:$0xf] }
 0x52e   :  { %5963 = vmatpush.bf16.msrb.mxu0 %v7280_v50  ;;  %v5595_v23 = vadd.f32 %v5594_v35, %v5582_v11  ;;  %v7232_v50 = vor.u32 %v8882_v6, %v7229_v4  ;;  %v8075_v10 = vld [vmem:[%s13904_s5 + $0xb08] sm:$0xf]  ;;  %v9096_v34 = vld [vmem:[%s13904_s5 + $0xb14] sm:$0xf0] }
 0x52f   :  { %v8571_v6 = vld [vmem:[%s13904_s5 + $0xee8] sm:$0xf]  ;;  %v9220_v4 = vld [vmem:[%s13904_s5 + $0xef4] sm:$0xf0] }
 0x530   :  { %5821 = vmatpush.bf16.msra.mxu1 %v7900_v16  ;;  %v7852_v16 = vor.u32 %v9040_v22, %v7851_v48  ;;  %v12788_v60 = vadd.f32 %v12322_v18, %v5595_v23  ;;  %v5713_v49 = vpop.f32.mrf.mxu0  ;;  %v7964_v18 = vor.u32 %v9068_v51, %v7963_v58  ;;  %v8699_v19 = vld [vmem:[%s13904_s5 + $0xfe8] sm:$0xf]  ;;  %v9252_v35 = vld [vmem:[%s13904_s5 + $0xff4] sm:$0xf0]  ;;  %v7948_v48 = vor.u32 %v9064_v28, %v7947_v2  ;;  %v9022_v51 = vld [vmem:[%s13904_s5 + $0x8cc] sm:$0xf] }
 0x531   :  { %5834 = vmatpush.bf16.msra.mxu2 %v8028_v53  ;;  %5847 = vmatpush.bf16.msra.mxu3 %v8156_v8  ;;  %v7980_v53 = vor.u32 %v9072_v59, %v7979_v26  ;;  %v8108_v8 = vor.u32 %v9104_v24, %v8107_v1  ;;  %v8076_v22 = vor.u32 %v9096_v34, %v8075_v10  ;;  %v8870_v26 = vld [vmem:[%s13904_s5 + $0x40c] sm:$0xf]  ;;  %v7181_v59 = vld [vmem:[%s13904_s5 + $0x418] sm:$0xf0]  ;;  %v8555_v38 = vld [vmem:[%s13904_s5 + $0xec8] sm:$0xf] }
 0x532   :  { %5964 = vmatpush.bf16.msrb.mxu0 %v7264_v40  ;;  %v7836_v40 = vor.u32 %v9036_v41, %v7835_v14  ;;  %v8572_v37 = vor.u32 %v9220_v4, %v8571_v6  ;;  %v9026_v1 = vld [vmem:[%s13904_s5 + $0x8ec] sm:$0xf]  ;;  %v7805_v24 = vld [vmem:[%s13904_s5 + $0x8f8] sm:$0xf0]  ;;  %v8700_v23 = vor.u32 %v9252_v35, %v8699_v19  ;;  %v9216_v33 = vld [vmem:[%s13904_s5 + $0xed4] sm:$0xf0]  ;;  %v7184_v14 = vor.u32 %v8870_v26, %v7181_v59 }
 0x533   :  { %v7808_v41 = vor.u32 %v9026_v1, %v7805_v24  ;;  %v8395_v10 = vld [vmem:[%s13904_s5 + $0xd88] sm:$0xf]  ;;  %v9176_v34 = vld [vmem:[%s13904_s5 + $0xd94] sm:$0xf0] }
 0x534   :  { %5822 = vmatpush.bf16.msra.mxu1 %v7884_v44  ;;  %v8874_v44 = vld [vmem:[%s13904_s5 + $0x42c] sm:$0xf]  ;;  %v9208_v6 = vld [vmem:[%s13904_s5 + $0xe94] sm:$0xf0]  ;;  %v8651_v4 = vld [vmem:[%s13904_s5 + $0xf88] sm:$0xf]  ;;  %v8396_v35 = vor.u32 %v9176_v34, %v8395_v10 }
 0x535   :  { %5835 = vmatpush.bf16.msra.mxu2 %v8012_v43  ;;  %5848 = vmatpush.bf16.msra.mxu3 %v8140_v17  ;;  %v8092_v43 = vor.u32 %v9100_v32, %v8091_v25  ;;  %v5583_v17 = vpop.f32.mrf.mxu2  ;;  %v5596_v55 = vpop.f32.mrf.mxu3  ;;  %v7789_v25 = vld [vmem:[%s13904_s5 + $0x8d8] sm:$0xf0]  ;;  %v8556_v32 = vor.u32 %v9216_v33, %v8555_v38  ;;  %v9204_v59 = vld [vmem:[%s13904_s5 + $0xe74] sm:$0xf0]  ;;  %v8635_v1 = vld [vmem:[%s13904_s5 + $0xf68] sm:$0xf] }
 0x536   :  { %5965 = vmatpush.bf16.msrb.mxu0 %v7248_v63  ;;  %v8443_v63 = vld [vmem:[%s13904_s5 + $0xde8] sm:$0xf]  ;;  %v9018_v55 = vld [vmem:[%s13904_s5 + $0x8ac] sm:$0xf]  ;;  %v9236_v24 = vld [vmem:[%s13904_s5 + $0xf74] sm:$0xf0] }
 0x537   :  { %v9010_v38 = vld [vmem:[%s13904_s5 + $0x86c] sm:$0xf]  ;;  %v7741_v33 = vld [vmem:[%s13904_s5 + $0x878] sm:$0xf0]  ;;  %v8475_v10 = vld [vmem:[%s13904_s5 + $0xe28] sm:$0xf] }
 0x538   :  { %5823 = vmatpush.bf16.msra.mxu1 %v7868_v61  ;;  %v9188_v61 = vld [vmem:[%s13904_s5 + $0xdf4] sm:$0xf0] }
 0x539   :  { %5836 = vmatpush.bf16.msra.mxu2 %v7996_v21  ;;  %5849 = vmatpush.bf16.msra.mxu3 %v8124_v54  ;;  %v7200_v21 = vor.u32 %v8874_v44, %v7197_v0  ;;  %v7820_v54 = vor.u32 %v9032_v3, %v7819_v30  ;;  %v8444_v11 = vor.u32 %v9188_v61, %v8443_v63  ;;  %v8539_v44 = vld [vmem:[%s13904_s5 + $0xea8] sm:$0xf]  ;;  %v9212_v0 = vld [vmem:[%s13904_s5 + $0xeb4] sm:$0xf0]  ;;  %v7773_v3 = vld [vmem:[%s13904_s5 + $0x8b8] sm:$0xf0] }
 0x53a   :  { %5966 = vmatpush.bf16.msrb.mxu0 %v7232_v50  ;;  %v8427_v50 = vld [vmem:[%s13904_s5 + $0xdc8] sm:$0xf]  ;;  %v8540_v2 = vor.u32 %v9212_v0, %v8539_v44  ;;  %v7776_v19 = vor.u32 %v9018_v55, %v7773_v3  ;;  %v9232_v44 = vld [vmem:[%s13904_s5 + $0xf54] sm:$0xf0] }
 0x53b   :  { %v8667_v30 = vld [vmem:[%s13904_s5 + $0xfa8] sm:$0xf]  ;;  %v9196_v34 = vld [vmem:[%s13904_s5 + $0xe34] sm:$0xf0] }
 0x53c   :  { %5824 = vmatpush.bf16.msra.mxu1 %v7852_v16  ;;  %v9184_v16 = vld [vmem:[%s13904_s5 + $0xdd4] sm:$0xf0]  ;;  %v8523_v63 = vld [vmem:[%s13904_s5 + $0xe88] sm:$0xf] }
 0x53d   :  { %5837 = vmatpush.bf16.msra.mxu2 %v7980_v53  ;;  %5850 = vmatpush.bf16.msra.mxu3 %v8108_v8  ;;  %v8683_v53 = vld [vmem:[%s13904_s5 + $0xfc8] sm:$0xf]  ;;  %v9248_v8 = vld [vmem:[%s13904_s5 + $0xfd4] sm:$0xf0]  ;;  %v8428_v58 = vor.u32 %v9184_v16, %v8427_v50 }
 0x53e   :  { %5967 = vmatpush.bf16.msrb.mxu0 %v7216_v27  ;;  %v8684_v49 = vor.u32 %v9248_v8, %v8683_v53  ;;  %v8411_v27 = vld [vmem:[%s13904_s5 + $0xda8] sm:$0xf]  ;;  %v8636_v8 = vor.u32 %v9236_v24, %v8635_v1  ;;  %v9224_v1 = vld [vmem:[%s13904_s5 + $0xf14] sm:$0xf0]  ;;  %v8802_v24 = vld [vmem:[%s13904_s5 + $0x1ec] sm:$0xf] }
 0x540   :  { %5825 = vmatpush.bf16.msra.mxu1 %v7836_v40  ;;  %v9180_v40 = vld [vmem:[%s13904_s5 + $0xdb4] sm:$0xf0] }
 0x541   :  { %5838 = vmatpush.bf16.msra.mxu2 %v7964_v18  ;;  %5851 = vmatpush.bf16.msra.mxu3 %v8092_v43  ;;  %v9244_v18 = vld [vmem:[%s13904_s5 + $0xfb4] sm:$0xf0]  ;;  %v7792_v43 = vor.u32 %v9022_v51, %v7789_v25  ;;  %v8412_v17 = vor.u32 %v9180_v40, %v8411_v27  ;;  %v8491_v25 = vld [vmem:[%s13904_s5 + $0xe48] sm:$0xf] }
 0x542   :  { %5968 = vmatpush.bf16.msrb.mxu0 %v7200_v21  ;;  %v8668_v28 = vor.u32 %v9244_v18, %v8667_v30  ;;  %v9240_v21 = vld [vmem:[%s13904_s5 + $0xf94] sm:$0xf0]  ;;  %v8619_v40 = vld [vmem:[%s13904_s5 + $0xf48] sm:$0xf]  ;;  %v7744_v30 = vor.u32 %v9010_v38, %v7741_v33  ;;  %v7037_v38 = vld [vmem:[%s13904_s5 + $0x2f8] sm:$0xf0] }
 0x543   :  { %v8652_v26 = vor.u32 %v9240_v21, %v8651_v4  ;;  %v9168_v51 = vld [vmem:[%s13904_s5 + $0xd54] sm:$0xf0]  ;;  %v8620_v3 = vor.u32 %v9232_v44, %v8619_v40  ;;  %v8317_v40 = vld [vmem:[%s13904_s5 + $0xcf8] sm:$0xf0] }
 0x544   :  { %5826 = vmatpush.bf16.msra.mxu1 %v7820_v54  ;;  %v5620_v61 = vpop.f32.mrf.mxu1  ;;  %v9200_v27 = vld [vmem:[%s13904_s5 + $0xe54] sm:$0xf0] }
 0x545   :  { %5839 = vmatpush.bf16.msra.mxu2 %v7948_v48  ;;  %5852 = vmatpush.bf16.msra.mxu3 %v8076_v22  ;;  %v5621_v54 = vadd.f32 %v5620_v61, %v12788_v60  ;;  %v7757_v48 = vld [vmem:[%s13904_s5 + $0x898] sm:$0xf0]  ;;  %v8524_v22 = vor.u32 %v9208_v6, %v8523_v63  ;;  %v8379_v60 = vld [vmem:[%s13904_s5 + $0xd68] sm:$0xf]  ;;  %v8492_v55 = vor.u32 %v9200_v27, %v8491_v25  ;;  %v9228_v61 = vld [vmem:[%s13904_s5 + $0xf34] sm:$0xf0] }
 0x546   :  { %5969 = vmatpush.bf16.msrb.mxu0 %v7184_v14  ;;  %v8603_v63 = vld [vmem:[%s13904_s5 + $0xf28] sm:$0xf]  ;;  %v9154_v27 = vld [vmem:[%s13904_s5 + $0xcec] sm:$0xf] }
 0x547   :  { %5827 = vmatmul.bf16.vlgmr.msra.gmra.mxu1 %v11235_v42 }
 0x548   :  { %5871 = vmatpush.bf16.msrb.mxu1 %v8444_v11  ;;  %5840 = vmatmul.bf16.vlgmr.msra.gmra.mxu2 %v11237_v45  ;;  %v9172_v11 = vld [vmem:[%s13904_s5 + $0xd74] sm:$0xf0] }
 0x549   :  { %5884 = vmatpush.bf16.msrb.mxu2 %v8572_v37  ;;  %5897 = vmatpush.bf16.msrb.mxu3 %v8700_v23  ;;  %v8507_v37 = vld [vmem:[%s13904_s5 + $0xe68] sm:$0xf]  ;;  %v12939_v23 = vpop.f32.mrf.mxu0  ;;  %v8380_v16 = vor.u32 %v9172_v11, %v8379_v60  ;;  %v9160_v60 = vld [vmem:[%s13904_s5 + $0xd14] sm:$0xf0] }
 0x54a   :  { %5853 = vmatmul.bf16.vlgmr.msra.gmra.mxu3 %v11239_v62  ;;  %6014 = vmatpush.bf16.msra.mxu0 %v7808_v41  ;;  %v8508_v53 = vor.u32 %v9204_v59, %v8507_v37  ;;  %v8459_v11 = vld [vmem:[%s13904_s5 + $0xe08] sm:$0xf]  ;;  %v9192_v37 = vld [vmem:[%s13904_s5 + $0xe14] sm:$0xf0] }
 0x54b   :  { %5970 = vmatmul.bf16.vlgmr.msrb.gmra.mxu0 %v10926_v29  ;;  %v9014_v29 = vld [vmem:[%s13904_s5 + $0x88c] sm:$0xf]  ;;  %v5633_v14 = vpop.f32.mrf.mxu2  ;;  %v8587_v59 = vld [vmem:[%s13904_s5 + $0xf08] sm:$0xf] }
 0x54c   :  { %5872 = vmatpush.bf16.msrb.mxu1 %v8428_v58  ;;  %v7760_v50 = vor.u32 %v9014_v29, %v7757_v48  ;;  %v8363_v58 = vld [vmem:[%s13904_s5 + $0xd48] sm:$0xf]  ;;  %v8604_v48 = vor.u32 %v9228_v61, %v8603_v63 }
 0x54d   :  { %5885 = vmatpush.bf16.msrb.mxu2 %v8556_v32  ;;  %5898 = vmatpush.bf16.msrb.mxu3 %v8684_v49  ;;  %v5646_v41 = vpop.f32.mrf.mxu3  ;;  %v5634_v32 = vadd.f32 %v5633_v14, %v5621_v54  ;;  %v5622_v49 = vpop.f32.mrf.mxu1  ;;  %v8364_v18 = vor.u32 %v9168_v51, %v8363_v58  ;;  %v8331_v29 = vld [vmem:[%s13904_s5 + $0xd08] sm:$0xf]  ;;  %v7165_v14 = vld [vmem:[%s13904_s5 + $0x3f8] sm:$0xf0]  ;;  %v8588_v58 = vor.u32 %v9224_v1, %v8587_v59  ;;  %v8998_v51 = vld [vmem:[%s13904_s5 + $0x80c] sm:$0xf] }
 0x54e   :  { %6015 = vmatpush.bf16.msra.mxu0 %v7792_v43  ;;  %v9006_v43 = vld [vmem:[%s13904_s5 + $0x84c] sm:$0xf]  ;;  %v7693_v49 = vld [vmem:[%s13904_s5 + $0x818] sm:$0xf0] }
 0x54f   :  { %v5647_v0 = vadd.f32 %v5646_v41, %v5634_v32  ;;  %v8460_v41 = vor.u32 %v9192_v37, %v8459_v11  ;;  %v8790_v37 = vld [vmem:[%s13904_s5 + $0x18c] sm:$0xf]  ;;  %v6861_v59 = vld [vmem:[%s13904_s5 + $0x198] sm:$0xf0] }
 0x550   :  { %5873 = vmatpush.bf16.msrb.mxu1 %v8412_v17  ;;  %v7725_v17 = vld [vmem:[%s13904_s5 + $0x858] sm:$0xf0]  ;;  %v8822_v1 = vld [vmem:[%s13904_s5 + $0x28c] sm:$0xf] }
 0x551   :  { %5886 = vmatpush.bf16.msrb.mxu2 %v8540_v2  ;;  %5899 = vmatpush.bf16.msrb.mxu3 %v8668_v28  ;;  %v8347_v2 = vld [vmem:[%s13904_s5 + $0xd28] sm:$0xf]  ;;  %v9164_v28 = vld [vmem:[%s13904_s5 + $0xd34] sm:$0xf0]  ;;  %v12990_v6 = vadd.f32 %v12524_v20, %v5647_v0  ;;  %v5765_v4 = vpop.f32.mrf.mxu0  ;;  %v7728_v21 = vor.u32 %v9006_v43, %v7725_v17  ;;  %v8476_v20 = vor.u32 %v9196_v34, %v8475_v10  ;;  %v8798_v0 = vld [vmem:[%s13904_s5 + $0x1cc] sm:$0xf] }
 0x552   :  { %6016 = vmatpush.bf16.msra.mxu0 %v7776_v19  ;;  %v8348_v54 = vor.u32 %v9164_v28, %v8347_v2  ;;  %v9002_v19 = vld [vmem:[%s13904_s5 + $0x82c] sm:$0xf]  ;;  %v7021_v43 = vld [vmem:[%s13904_s5 + $0x2d8] sm:$0xf0]  ;;  %v8320_v2 = vor.u32 %v9154_v27, %v8317_v40 }
 0x553   :  { %v8862_v17 = vld [vmem:[%s13904_s5 + $0x3cc] sm:$0xf]  ;;  %v8301_v34 = vld [vmem:[%s13904_s5 + $0xcd8] sm:$0xf0] }
 0x554   :  { %5874 = vmatpush.bf16.msrb.mxu1 %v8396_v35  ;;  %v7709_v35 = vld [vmem:[%s13904_s5 + $0x838] sm:$0xf0]  ;;  %v9150_v10 = vld [vmem:[%s13904_s5 + $0xccc] sm:$0xf] }
 0x555   :  { %5887 = vmatpush.bf16.msrb.mxu2 %v8524_v22  ;;  %5900 = vmatpush.bf16.msrb.mxu3 %v8652_v26  ;;  %v5635_v22 = vpop.f32.mrf.mxu2  ;;  %v5648_v26 = vpop.f32.mrf.mxu3  ;;  %v7712_v33 = vor.u32 %v9002_v19, %v7709_v35  ;;  %v8794_v4 = vld [vmem:[%s13904_s5 + $0x1ac] sm:$0xf]  ;;  %v7005_v19 = vld [vmem:[%s13904_s5 + $0x2b8] sm:$0xf0] }
 0x556   :  { %6017 = vmatpush.bf16.msra.mxu0 %v7760_v50  ;;  %v6909_v50 = vld [vmem:[%s13904_s5 + $0x1f8] sm:$0xf0]  ;;  %v8858_v35 = vld [vmem:[%s13904_s5 + $0x3ac] sm:$0xf] }
 0x557   :  { %v6912_v25 = vor.u32 %v8802_v24, %v6909_v50  ;;  %v9146_v22 = vld [vmem:[%s13904_s5 + $0xcac] sm:$0xf]  ;;  %v8285_v26 = vld [vmem:[%s13904_s5 + $0xcb8] sm:$0xf0] }
 0x558   :  { %5875 = vmatpush.bf16.msrb.mxu1 %v8380_v16  ;;  %v8834_v16 = vld [vmem:[%s13904_s5 + $0x2ec] sm:$0xf]  ;;  %v6989_v50 = vld [vmem:[%s13904_s5 + $0x298] sm:$0xf0] }
 0x559   :  { %5888 = vmatpush.bf16.msrb.mxu2 %v8508_v53  ;;  %5901 = vmatpush.bf16.msrb.mxu3 %v8636_v8  ;;  %v8332_v53 = vor.u32 %v9160_v60, %v8331_v29  ;;  %v8866_v8 = vld [vmem:[%s13904_s5 + $0x3ec] sm:$0xf]  ;;  %v7040_v32 = vor.u32 %v8834_v16, %v7037_v38  ;;  %v7133_v29 = vld [vmem:[%s13904_s5 + $0x3b8] sm:$0xf0] }
 0x55a   :  { %6018 = vmatpush.bf16.msra.mxu0 %v7744_v30  ;;  %v7168_v44 = vor.u32 %v8866_v8, %v7165_v14  ;;  %v6893_v30 = vld [vmem:[%s13904_s5 + $0x1d8] sm:$0xf0]  ;;  %v7136_v11 = vor.u32 %v8858_v35, %v7133_v29  ;;  %v8854_v16 = vld [vmem:[%s13904_s5 + $0x38c] sm:$0xf]  ;;  %v6864_v8 = vor.u32 %v8790_v37, %v6861_v59 }
 0x55b   :  { %v6896_v28 = vor.u32 %v8798_v0, %v6893_v30  ;;  %v7117_v38 = vld [vmem:[%s13904_s5 + $0x398] sm:$0xf0]  ;;  %v9138_v30 = vld [vmem:[%s13904_s5 + $0xc6c] sm:$0xf] }
 0x55c   :  { %5876 = vmatpush.bf16.msrb.mxu1 %v8364_v18  ;;  %v8830_v18 = vld [vmem:[%s13904_s5 + $0x2cc] sm:$0xf]  ;;  %v8269_v14 = vld [vmem:[%s13904_s5 + $0xc98] sm:$0xf0] }
 0x55d   :  { %5889 = vmatpush.bf16.msrb.mxu2 %v8492_v55  ;;  %5902 = vmatpush.bf16.msrb.mxu3 %v8620_v3  ;;  %v7149_v55 = vld [vmem:[%s13904_s5 + $0x3d8] sm:$0xf0]  ;;  %v7696_v3 = vor.u32 %v8998_v51, %v7693_v49  ;;  %v7024_v63 = vor.u32 %v8830_v18, %v7021_v43  ;;  %v8850_v49 = vld [vmem:[%s13904_s5 + $0x36c] sm:$0xf] }
 0x55e   :  { %6019 = vmatpush.bf16.msra.mxu0 %v7728_v21  ;;  %v7152_v61 = vor.u32 %v8862_v17, %v7149_v55  ;;  %v6877_v21 = vld [vmem:[%s13904_s5 + $0x1b8] sm:$0xf0]  ;;  %v9134_v29 = vld [vmem:[%s13904_s5 + $0xc4c] sm:$0xf] }
 0x55f   :  { %v6845_v51 = vld [vmem:[%s13904_s5 + $0x178] sm:$0xf0]  ;;  %v8842_v59 = vld [vmem:[%s13904_s5 + $0x32c] sm:$0xf] }
 0x560   :  { %5877 = vmatpush.bf16.msrb.mxu1 %v8348_v54  ;;  %v8826_v54 = vld [vmem:[%s13904_s5 + $0x2ac] sm:$0xf]  ;;  %v7101_v27 = vld [vmem:[%s13904_s5 + $0x378] sm:$0xf0] }
 0x561   :  { %5890 = vmatpush.bf16.msrb.mxu2 %v8476_v20  ;;  %5903 = vmatpush.bf16.msrb.mxu3 %v8604_v48  ;;  %v8304_v20 = vor.u32 %v9150_v10, %v8301_v34  ;;  %v6880_v48 = vor.u32 %v8794_v4, %v6877_v21  ;;  %v7008_v60 = vor.u32 %v8826_v54, %v7005_v19  ;;  %v8253_v18 = vld [vmem:[%s13904_s5 + $0xc78] sm:$0xf0]  ;;  %v8814_v10 = vld [vmem:[%s13904_s5 + $0x24c] sm:$0xf] }
 0x562   :  { %6020 = vmatpush.bf16.msra.mxu0 %v7712_v33  ;;  %v7104_v17 = vor.u32 %v8850_v49, %v7101_v27  ;;  %v8846_v4 = vld [vmem:[%s13904_s5 + $0x34c] sm:$0xf]  ;;  %v7085_v21 = vld [vmem:[%s13904_s5 + $0x358] sm:$0xf0]  ;;  %v8256_v19 = vor.u32 %v9138_v30, %v8253_v18 }
 0x563   :  { %v6941_v37 = vld [vmem:[%s13904_s5 + $0x238] sm:$0xf0]  ;;  %v8930_v49 = vld [vmem:[%s13904_s5 + $0x5ec] sm:$0xf] }
 0x564   :  { %5878 = vmatpush.bf16.msrb.mxu1 %v8332_v53  ;;  %v5672_v24 = vpop.f32.mrf.mxu1  ;;  %v8288_v53 = vor.u32 %v9146_v22, %v8285_v26  ;;  %v7088_v22 = vor.u32 %v8846_v4, %v7085_v21  ;;  %v8778_v26 = vld [vmem:[%s13904_s5 + $0x12c] sm:$0xf]  ;;  %v7421_v27 = vld [vmem:[%s13904_s5 + $0x5f8] sm:$0xf0] }
 0x565   :  { %5891 = vmatpush.bf16.msrb.mxu2 %v8460_v41  ;;  %5904 = vmatpush.bf16.msrb.mxu3 %v8588_v58  ;;  %v5673_v33 = vadd.f32 %v5672_v24, %v12990_v6  ;;  %v6992_v41 = vor.u32 %v8822_v1, %v6989_v50  ;;  %v7120_v58 = vor.u32 %v8854_v16, %v7117_v38  ;;  %v8786_v6 = vld [vmem:[%s13904_s5 + $0x16c] sm:$0xf]  ;;  %v7069_v1 = vld [vmem:[%s13904_s5 + $0x338] sm:$0xf0] }
 0x566   :  { %6021 = vmatpush.bf16.msra.mxu0 %v7696_v3  ;;  %v6848_v0 = vor.u32 %v8786_v6, %v6845_v51  ;;  %v9130_v38 = vld [vmem:[%s13904_s5 + $0xc2c] sm:$0xf]  ;;  %v6925_v51 = vld [vmem:[%s13904_s5 + $0x218] sm:$0xf0] }
 0x567   :  { %5879 = vmatmul.bf16.vlgmr.msrb.gmra.mxu1 %v11440_v46  ;;  %v8806_v6 = vld [vmem:[%s13904_s5 + $0x20c] sm:$0xf]  ;;  %v7405_v4 = vld [vmem:[%s13904_s5 + $0x5d8] sm:$0xf0] }
 0x568   :  { %5923 = vmatpush.bf16.msra.mxu1 %v6912_v25  ;;  %5892 = vmatmul.bf16.vlgmr.msrb.gmra.mxu2 %v11442_v57  ;;  %v8818_v25 = vld [vmem:[%s13904_s5 + $0x26c] sm:$0xf]  ;;  %v13141_v40 = vpop.f32.mrf.mxu0 }
 0x569   :  { %5936 = vmatpush.bf16.msra.mxu2 %v7040_v32  ;;  %5949 = vmatpush.bf16.msra.mxu3 %v7168_v44  ;;  %v6973_v32 = vld [vmem:[%s13904_s5 + $0x278] sm:$0xf0]  ;;  %v8958_v21 = vld [vmem:[%s13904_s5 + $0x6cc] sm:$0xf] }
 0x56a   :  { %5905 = vmatmul.bf16.vlgmr.msrb.gmra.mxu3 %v11444_v13  ;;  %6066 = vmatpush.bf16.msrb.mxu0 %v8320_v2  ;;  %v6976_v43 = vor.u32 %v8818_v25, %v6973_v32  ;;  %v8782_v2 = vld [vmem:[%s13904_s5 + $0x14c] sm:$0xf]  ;;  %v7053_v32 = vld [vmem:[%s13904_s5 + $0x318] sm:$0xf0] }
 0x56b   :  { %6022 = vmatmul.bf16.vlgmr.msra.gmra.mxu0 %v11029_v56  ;;  %v9142_v56 = vld [vmem:[%s13904_s5 + $0xc8c] sm:$0xf]  ;;  %v5685_v55 = vpop.f32.mrf.mxu2 }
 0x56c   :  { %5924 = vmatpush.bf16.msra.mxu1 %v6896_v28  ;;  %v8272_v44 = vor.u32 %v9142_v56, %v8269_v14  ;;  %v6829_v28 = vld [vmem:[%s13904_s5 + $0x158] sm:$0xf0]  ;;  %v5686_v34 = vadd.f32 %v5685_v55, %v5673_v33  ;;  %v7072_v56 = vor.u32 %v8842_v59, %v7069_v1  ;;  %v8838_v25 = vld [vmem:[%s13904_s5 + $0x30c] sm:$0xf]  ;;  %v6928_v55 = vor.u32 %v8806_v6, %v6925_v51  ;;  %v6134_v6 = vld [vmem:[%s13906_s7 + $0x60] sm:$0xff] }
 0x56d   :  { %5937 = vmatpush.bf16.msra.mxu2 %v7024_v63  ;;  %5950 = vmatpush.bf16.msra.mxu3 %v7152_v61  ;;  %v5698_v3 = vpop.f32.mrf.mxu3  ;;  %v5674_v63 = vpop.f32.mrf.mxu1  ;;  %v6957_v61 = vld [vmem:[%s13904_s5 + $0x258] sm:$0xf0]  ;;  %v6832_v35 = vor.u32 %v8782_v2, %v6829_v28  ;;  %v7424_v2 = vor.u32 %v8930_v49, %v7421_v27  ;;  %v8986_v1 = vld [vmem:[%s13904_s5 + $0x7ac] sm:$0xf] }
 0x56e   :  { %6067 = vmatpush.bf16.msrb.mxu0 %v8304_v20  ;;  %v13167_v54 = vadd.f32 %v5698_v3, %v5686_v34  ;;  %v8237_v20 = vld [vmem:[%s13904_s5 + $0xc58] sm:$0xf0]  ;;  %v7056_v3 = vor.u32 %v8838_v25, %v7053_v32  ;;  %v8914_v32 = vld [vmem:[%s13904_s5 + $0x56c] sm:$0xf] }
 0x56f   :  { %v8240_v50 = vor.u32 %v9134_v29, %v8237_v20  ;;  %v8221_v33 = vld [vmem:[%s13904_s5 + $0xc38] sm:$0xf0] }
 0x570   :  { %5925 = vmatpush.bf16.msra.mxu1 %v6880_v48  ;;  %v6960_v48 = vor.u32 %v8814_v10, %v6957_v61  ;;  %v5817_v24 = vpop.f32.mrf.mxu0  ;;  %v8224_v30 = vor.u32 %v9130_v38, %v8221_v33  ;;  %v9126_v10 = vld [vmem:[%s13904_s5 + $0xc0c] sm:$0xf]  ;;  %v8205_v34 = vld [vmem:[%s13904_s5 + $0xc18] sm:$0xf0] }
 0x571   :  { %5938 = vmatpush.bf16.msra.mxu2 %v7008_v60  ;;  %5951 = vmatpush.bf16.msra.mxu3 %v7136_v11  ;;  %v6813_v60 = vld [vmem:[%s13904_s5 + $0x138] sm:$0xf0]  ;;  %v8810_v11 = vld [vmem:[%s13904_s5 + $0x22c] sm:$0xf]  ;;  %v8208_v20 = vor.u32 %v9126_v10, %v8205_v34 }
 0x572   :  { %6068 = vmatpush.bf16.msrb.mxu0 %v8288_v53  ;;  %v6816_v16 = vor.u32 %v8778_v26, %v6813_v60  ;;  %v8774_v53 = vld [vmem:[%s13904_s5 + $0x10c] sm:$0xf]  ;;  %v7661_v29 = vld [vmem:[%s13904_s5 + $0x7d8] sm:$0xf0] }
 0x573   :  { %v5687_v14 = vpop.f32.mrf.mxu2  ;;  %v8926_v61 = vld [vmem:[%s13904_s5 + $0x5cc] sm:$0xf]  ;;  %v6137_v26 = vld [vmem:[%s13906_s7 + $0x78] sm:$0xff] }
 0x574   :  { %5926 = vmatpush.bf16.msra.mxu1 %v6864_v8  ;;  %v6944_v8 = vor.u32 %v8810_v11, %v6941_v37  ;;  %v8922_v37 = vld [vmem:[%s13904_s5 + $0x5ac] sm:$0xf]  ;;  %v7389_v59 = vld [vmem:[%s13904_s5 + $0x5b8] sm:$0xf0] }
 0x575   :  { %5939 = vmatpush.bf16.msra.mxu2 %v6992_v41  ;;  %5952 = vmatpush.bf16.msra.mxu3 %v7120_v58  ;;  %v5700_v41 = vpop.f32.mrf.mxu3  ;;  %v6797_v58 = vld [vmem:[%s13904_s5 + $0x118] sm:$0xf0]  ;;  %v8918_v38 = vld [vmem:[%s13904_s5 + $0x58c] sm:$0xf] }
 0x576   :  { %6069 = vmatpush.bf16.msrb.mxu0 %v8272_v44  ;;  %v8962_v44 = vld [vmem:[%s13904_s5 + $0x6ec] sm:$0xf]  ;;  %v6800_v18 = vor.u32 %v8774_v53, %v6797_v58  ;;  %v7645_v24 = vld [vmem:[%s13904_s5 + $0x7b8] sm:$0xf0] }
 0x577   :  { %v7373_v33 = vld [vmem:[%s13904_s5 + $0x598] sm:$0xf0]  ;;  %v6135_v53 = vld [vmem:[%s13906_s7 + $0x68] sm:$0xff] }
 0x578   :  { %5927 = vmatpush.bf16.msra.mxu1 %v6848_v0  ;;  %v7549_v0 = vld [vmem:[%s13904_s5 + $0x6f8] sm:$0xf0]  ;;  %v7376_v51 = vor.u32 %v8918_v38, %v7373_v33  ;;  %v8910_v34 = vld [vmem:[%s13904_s5 + $0x54c] sm:$0xf]  ;;  %v6128_v38 = vld [vmem:[%s13906_s7 + $0x30] sm:$0xff] }
 0x579   :  { %5940 = vmatpush.bf16.msra.mxu2 %v6976_v43  ;;  %5953 = vmatpush.bf16.msra.mxu3 %v7104_v17  ;;  %v8994_v43 = vld [vmem:[%s13904_s5 + $0x7ec] sm:$0xf]  ;;  %v7677_v17 = vld [vmem:[%s13904_s5 + $0x7f8] sm:$0xf0]  ;;  %v7552_v28 = vor.u32 %v8962_v44, %v7549_v0 }
 0x57a   :  { %6070 = vmatpush.bf16.msrb.mxu0 %v8256_v19  ;;  %v7680_v63 = vor.u32 %v8994_v43, %v7677_v17  ;;  %v7533_v19 = vld [vmem:[%s13904_s5 + $0x6d8] sm:$0xf0]  ;;  %v8946_v0 = vld [vmem:[%s13904_s5 + $0x66c] sm:$0xf] }
 0x57b   :  { %v7536_v60 = vor.u32 %v8958_v21, %v7533_v19  ;;  %v7501_v14 = vld [vmem:[%s13904_s5 + $0x698] sm:$0xf0]  ;;  %v8978_v43 = vld [vmem:[%s13904_s5 + $0x76c] sm:$0xf] }
 0x57c   :  { %5928 = vmatpush.bf16.msra.mxu1 %v6832_v35  ;;  %v8990_v35 = vld [vmem:[%s13904_s5 + $0x7cc] sm:$0xf]  ;;  %v7629_v58 = vld [vmem:[%s13904_s5 + $0x798] sm:$0xf0] }
 0x57d   :  { %5941 = vmatpush.bf16.msra.mxu2 %v6960_v48  ;;  %5954 = vmatpush.bf16.msra.mxu3 %v7088_v22  ;;  %v7408_v48 = vor.u32 %v8926_v61, %v7405_v4  ;;  %v2720_v22 = vperm.slane %v12581_v39, 2  ;;  %v7664_v11 = vor.u32 %v8990_v35, %v7661_v29  ;;  %v7517_v39 = vld [vmem:[%s13904_s5 + $0x6b8] sm:$0xf0]  ;;  %v6131_v61 = vld [vmem:[%s13906_s7 + $0x48] sm:$0xff] }
 0x57e   :  { %6071 = vmatpush.bf16.msrb.mxu0 %v8240_v50  ;;  %v7357_v49 = vld [vmem:[%s13904_s5 + $0x578] sm:$0xf0]  ;;  %v8942_v35 = vld [vmem:[%s13904_s5 + $0x64c] sm:$0xf] }
 0x57f   :  { %v5712_v50 = vadd.f32 %v12737_v5, %v2720_v22  ;;  %v8950_v5 = vld [vmem:[%s13904_s5 + $0x68c] sm:$0xf]  ;;  %v6133_v27 = vld [vmem:[%s13906_s7 + $0x58] sm:$0xff] }
 0x580   :  { %5929 = vmatpush.bf16.msra.mxu1 %v6816_v16  ;;  %v7504_v25 = vor.u32 %v8950_v5, %v7501_v14  ;;  %v7613_v17 = vld [vmem:[%s13904_s5 + $0x778] sm:$0xf0]  ;;  %v8902_v5 = vld [vmem:[%s13904_s5 + $0x50c] sm:$0xf] }
 0x581   :  { %5942 = vmatpush.bf16.msra.mxu2 %v6944_v8  ;;  %5955 = vmatpush.bf16.msra.mxu3 %v7072_v56  ;;  %v7648_v8 = vor.u32 %v8986_v1, %v7645_v24  ;;  %v7616_v4 = vor.u32 %v8978_v43, %v7613_v17  ;;  %v7469_v29 = vld [vmem:[%s13904_s5 + $0x658] sm:$0xf0]  ;;  %v8938_v1 = vld [vmem:[%s13904_s5 + $0x62c] sm:$0xf] }
 0x582   :  { %6072 = vmatpush.bf16.msrb.mxu0 %v8224_v30  ;;  %v7485_v30 = vld [vmem:[%s13904_s5 + $0x678] sm:$0xf0] }
 0x583   :  { %v7453_v24 = vld [vmem:[%s13904_s5 + $0x638] sm:$0xf0] }
 0x584   :  { %5930 = vmatpush.bf16.msra.mxu1 %v6800_v18  ;;  %v5724_v56 = vpop.f32.mrf.mxu1  ;;  %v7309_v14 = vld [vmem:[%s13904_s5 + $0x518] sm:$0xf0] }
 0x585   :  { %5943 = vmatpush.bf16.msra.mxu2 %v6928_v55  ;;  %5956 = vmatpush.bf16.msra.mxu3 %v7056_v3  ;;  %v5725_v41 = vadd.f32 %v5724_v56, %v5712_v50  ;;  %v6132_v55 = vld [vmem:[%s13906_s7 + $0x50] sm:$0xff]  ;;  %v7360_v3 = vor.u32 %v8914_v32, %v7357_v49  ;;  %v8970_v50 = vld [vmem:[%s13904_s5 + $0x72c] sm:$0xf]  ;;  %v7933_v49 = vld [vmem:[%s13904_s5 + $0x9f8] sm:$0xf0] }
 0x586   :  { %6073 = vmatpush.bf16.msrb.mxu0 %v8208_v20  ;;  %v8974_v20 = vld [vmem:[%s13904_s5 + $0x74c] sm:$0xf]  ;;  %v8189_v43 = vld [vmem:[%s13904_s5 + $0xbf8] sm:$0xf0] }
 0x587   :  { %5931 = vmatmul.bf16.vlgmr.msra.gmra.mxu1 %v10828_v7  ;;  %v8954_v7 = vld [vmem:[%s13904_s5 + $0x6ac] sm:$0xf] }
 0x588   :  { %5975 = vmatpush.bf16.msrb.mxu1 %v7424_v2  ;;  %5944 = vmatmul.bf16.vlgmr.msra.gmra.mxu2 %v10830_v9  ;;  %v6136_v9 = vld [vmem:[%s13906_s7 + $0x70] sm:$0xff]  ;;  %v7520_v16 = vor.u32 %v8954_v7, %v7517_v39  ;;  %v13328_v18 = vpop.f32.mrf.mxu0  ;;  %v7488_v2 = vor.u32 %v8946_v0, %v7485_v30  ;;  %v6129_v7 = vld [vmem:[%s13906_s7 + $0x38] sm:$0xff]  ;;  %v9058_v32 = vld [vmem:[%s13904_s5 + $0x9ec] sm:$0xf] }
 0x589   :  { %5988 = vmatpush.bf16.msrb.mxu2 %v7552_v28  ;;  %6001 = vmatpush.bf16.msrb.mxu3 %v7680_v63  ;;  %v7341_v63 = vld [vmem:[%s13904_s5 + $0x558] sm:$0xf0]  ;;  %v9122_v30 = vld [vmem:[%s13904_s5 + $0xbec] sm:$0xf] }
 0x58a   :  { %5957 = vmatmul.bf16.vlgmr.msra.gmra.mxu3 %v10924_v15  ;;  %6190 = vmatpush.msra.mxu0 %v6137_v26  ;;  %v7392_v15 = vor.u32 %v8922_v37, %v7389_v59  ;;  %v6130_v26 = vld [vmem:[%s13906_s7 + $0x40] sm:$0xff]  ;;  %v8906_v37 = vld [vmem:[%s13904_s5 + $0x52c] sm:$0xf]  ;;  %v7325_v59 = vld [vmem:[%s13904_s5 + $0x538] sm:$0xf0] }
 0x58b   :  { %6074 = vmatmul.bf16.vlgmr.msrb.gmra.mxu0 %v11031_v47  ;;  %v8982_v47 = vld [vmem:[%s13904_s5 + $0x78c] sm:$0xf]  ;;  %v5737_v28 = vpop.f32.mrf.mxu2  ;;  %v7328_v33 = vor.u32 %v8906_v37, %v7325_v59  ;;  %v8061_v0 = vld [vmem:[%s13904_s5 + $0xaf8] sm:$0xf0] }
 0x58c   :  { %5976 = vmatpush.bf16.msrb.mxu1 %v7408_v48  ;;  %6191 = vmatpush.msra.mxu0 %v6136_v9  ;;  %v7632_v44 = vor.u32 %v8982_v47, %v7629_v58  ;;  %v5738_v21 = vadd.f32 %v5737_v28, %v5725_v41  ;;  %v5726_v19 = vpop.f32.mrf.mxu1  ;;  %v7597_v48 = vld [vmem:[%s13904_s5 + $0x758] sm:$0xf0]  ;;  %v8934_v41 = vld [vmem:[%s13904_s5 + $0x60c] sm:$0xf]  ;;  %v6126_v58 = vld [vmem:[%s13906_s7 + $0x20] sm:$0xff] }
 0x58d   :  { %5989 = vmatpush.bf16.msrb.mxu2 %v7536_v60  ;;  %6002 = vmatpush.bf16.msrb.mxu3 %v7664_v11  ;;  %v5750_v10 = vpop.f32.mrf.mxu3  ;;  %v7344_v60 = vor.u32 %v8910_v34, %v7341_v63  ;;  %v7472_v11 = vor.u32 %v8942_v35, %v7469_v29  ;;  %v7600_v39 = vor.u32 %v8974_v20, %v7597_v48  ;;  %v9054_v34 = vld [vmem:[%s13904_s5 + $0x9cc] sm:$0xf]  ;;  %v7917_v63 = vld [vmem:[%s13904_s5 + $0x9d8] sm:$0xf0]  ;;  %v6124_v35 = vld [vmem:[%s13906_s7 + $0x10] sm:$0xff] }
 0x58e   :  { %6192 = vmatpush.msra.mxu0 %v6135_v53  ;;  %v5751_v22 = vadd.f32 %v5750_v10, %v5738_v21  ;;  %v7456_v53 = vor.u32 %v8938_v1, %v7453_v24  ;;  %v8192_v10 = vor.u32 %v9122_v30, %v8189_v43  ;;  %v9118_v21 = vld [vmem:[%s13904_s5 + $0xbcc] sm:$0xf]  ;;  %v8173_v19 = vld [vmem:[%s13904_s5 + $0xbd8] sm:$0xf0]  ;;  %v7920_v20 = vor.u32 %v9054_v34, %v7917_v63 }
 0x58f   :  { %v6123_v29 = vld [vmem:[%s13906_s7 + $0x8] sm:$0xff]  ;;  %v8029_v37 = vld [vmem:[%s13904_s5 + $0xab8] sm:$0xf0] }
 0x590   :  { %5977 = vmatpush.bf16.msrb.mxu1 %v7392_v15  ;;  %6193 = vmatpush.msra.mxu0 %v6134_v6  ;;  %v13379_v9 = vadd.f32 %v12939_v23, %v5751_v22  ;;  %v5869_v15 = vpop.f32.mrf.mxu0  ;;  %v6127_v23 = vld [vmem:[%s13906_s7 + $0x28] sm:$0xff]  ;;  %v7437_v6 = vld [vmem:[%s13904_s5 + $0x618] sm:$0xf0]  ;;  %v8176_v22 = vor.u32 %v9118_v21, %v8173_v19 }
 0x591   :  { %5990 = vmatpush.bf16.msrb.mxu2 %v7520_v16  ;;  %6003 = vmatpush.bf16.msrb.mxu3 %v7648_v8  ;;  %v7581_v16 = vld [vmem:[%s13904_s5 + $0x738] sm:$0xf0]  ;;  %v7440_v17 = vor.u32 %v8934_v41, %v7437_v6  ;;  %v9114_v59 = vld [vmem:[%s13904_s5 + $0xbac] sm:$0xf] }
 0x592   :  { %6194 = vmatpush.msra.mxu0 %v6133_v27  ;;  %v7584_v47 = vor.u32 %v8970_v50, %v7581_v16  ;;  %v9090_v27 = vld [vmem:[%s13904_s5 + $0xaec] sm:$0xf]  ;;  %v8013_v16 = vld [vmem:[%s13904_s5 + $0xa98] sm:$0xf0] }
 0x593   :  { %v5739_v8 = vpop.f32.mrf.mxu2  ;;  %v8064_v28 = vor.u32 %v9090_v27, %v8061_v0  ;;  %v9046_v50 = vld [vmem:[%s13904_s5 + $0x98c] sm:$0xf]  ;;  %v7997_v41 = vld [vmem:[%s13904_s5 + $0xa78] sm:$0xf0] }
 0x594   :  { %5978 = vmatpush.bf16.msrb.mxu1 %v7376_v51  ;;  %6195 = vmatpush.msra.mxu0 %v6132_v55  ;;  %v8966_v51 = vld [vmem:[%s13904_s5 + $0x70c] sm:$0xf]  ;;  %v6125_v55 = vld [vmem:[%s13906_s7 + $0x18] sm:$0xff] }
 0x595   :  { %5991 = vmatpush.bf16.msrb.mxu2 %v7504_v25  ;;  %6004 = vmatpush.bf16.msrb.mxu3 %v7632_v44  ;;  %v5752_v56 = vpop.f32.mrf.mxu3  ;;  %v7565_v25 = vld [vmem:[%s13904_s5 + $0x718] sm:$0xf0]  ;;  %v7312_v44 = vor.u32 %v8902_v5, %v7309_v14  ;;  %v9074_v14 = vld [vmem:[%s13904_s5 + $0xa6c] sm:$0xf] }
 0x596   :  { %6196 = vmatpush.msra.mxu0 %v6131_v61  ;;  %v9086_v61 = vld [vmem:[%s13904_s5 + $0xacc] sm:$0xf]  ;;  %v7869_v5 = vld [vmem:[%s13904_s5 + $0x978] sm:$0xf0] }
 0x597   :  { %v9042_v56 = vld [vmem:[%s13904_s5 + $0x96c] sm:$0xf]  ;;  %v7853_v30 = vld [vmem:[%s13904_s5 + $0x958] sm:$0xf0] }
 0x598   :  { %5979 = vmatpush.bf16.msrb.mxu1 %v7360_v3  ;;  %6197 = vmatpush.msra.mxu0 %v6130_v26  ;;  %v7568_v3 = vor.u32 %v8966_v51, %v7565_v25  ;;  %v9050_v26 = vld [vmem:[%s13904_s5 + $0x9ac] sm:$0xf]  ;;  %v7872_v25 = vor.u32 %v9042_v56, %v7869_v5  ;;  %v7965_v19 = vld [vmem:[%s13904_s5 + $0xa38] sm:$0xf0] }
 0x599   :  { %5992 = vmatpush.bf16.msrb.mxu2 %v7488_v2  ;;  %6005 = vmatpush.bf16.msrb.mxu3 %v7616_v4  ;;  %v7936_v2 = vor.u32 %v9058_v32, %v7933_v49  ;;  %v8045_v4 = vld [vmem:[%s13904_s5 + $0xad8] sm:$0xf0]  ;;  %v8000_v32 = vor.u32 %v9074_v14, %v7997_v41  ;;  %v9038_v0 = vld [vmem:[%s13904_s5 + $0x94c] sm:$0xf] }
 0x59a   :  { %6198 = vmatpush.msra.mxu0 %v6129_v7  ;;  %v8048_v48 = vor.u32 %v9086_v61, %v8045_v4  ;;  %v8157_v7 = vld [vmem:[%s13904_s5 + $0xbb8] sm:$0xf0]  ;;  %v9034_v61 = vld [vmem:[%s13904_s5 + $0x92c] sm:$0xf] }
 0x59b   :  { %v8160_v15 = vor.u32 %v9114_v59, %v8157_v7  ;;  %v7837_v4 = vld [vmem:[%s13904_s5 + $0x938] sm:$0xf0]  ;;  %v9066_v21 = vld [vmem:[%s13904_s5 + $0xa2c] sm:$0xf] }
 0x59c   :  { %5980 = vmatpush.bf16.msrb.mxu1 %v7344_v60  ;;  %6199 = vmatpush.msra.mxu0 %v6128_v38  ;;  %v7901_v60 = vld [vmem:[%s13904_s5 + $0x9b8] sm:$0xf0]  ;;  %v9110_v38 = vld [vmem:[%s13904_s5 + $0xb8c] sm:$0xf] }
 0x59d   :  { %5993 = vmatpush.bf16.msrb.mxu2 %v7472_v11  ;;  %6006 = vmatpush.bf16.msrb.mxu3 %v7600_v39  ;;  %v9082_v11 = vld [vmem:[%s13904_s5 + $0xaac] sm:$0xf]  ;;  %v6118_v39 = vmax.f32 %v12348_v52, 0.0  ;;  %v7904_v1 = vor.u32 %v9050_v26, %v7901_v60  ;;  %v7968_v60 = vor.u32 %v9066_v21, %v7965_v19  ;;  %v7821_v7 = vld [vmem:[%s13904_s5 + $0x918] sm:$0xf0] }
 0x59e   :  { %6200 = vmatpush.msra.mxu0 %v6127_v23  ;;  %v8032_v24 = vor.u32 %v9082_v11, %v8029_v37  ;;  %v8141_v23 = vld [vmem:[%s13904_s5 + $0xb98] sm:$0xf0]  ;;  %v9030_v26 = vld [vmem:[%s13904_s5 + $0x90c] sm:$0xf] }
 0x59f   :  { %v8144_v8 = vor.u32 %v9110_v38, %v8141_v23  ;;  %v8429_v5 = vld [vmem:[%s13904_s5 + $0xdd8] sm:$0xf0]  ;;  %v9214_v14 = vld [vmem:[%s13904_s5 + $0xecc] sm:$0xf] }
 0x5a0   :  { %5981 = vmatpush.bf16.msrb.mxu1 %v7328_v33  ;;  %6201 = vmatpush.msra.mxu0 %v6126_v58  ;;  %v8125_v58 = vld [vmem:[%s13904_s5 + $0xb78] sm:$0xf0]  ;;  %v9202_v19 = vld [vmem:[%s13904_s5 + $0xe6c] sm:$0xf] }
 0x5a1   :  { %5994 = vmatpush.bf16.msrb.mxu2 %v7456_v53  ;;  %6007 = vmatpush.bf16.msrb.mxu3 %v7584_v47  ;;  %v9106_v47 = vld [vmem:[%s13904_s5 + $0xb6c] sm:$0xf]  ;;  %v8557_v41 = vld [vmem:[%s13904_s5 + $0xed8] sm:$0xf0] }
 0x5a2   :  { %6202 = vmatpush.msra.mxu0 %v6125_v55  ;;  %v8128_v49 = vor.u32 %v9106_v47, %v8125_v58  ;;  %v7981_v55 = vld [vmem:[%s13904_s5 + $0xa58] sm:$0xf0]  ;;  %v9246_v47 = vld [vmem:[%s13904_s5 + $0xfcc] sm:$0xf] }
 0x5a3   :  { %v8685_v58 = vld [vmem:[%s13904_s5 + $0xfd8] sm:$0xf0] }
 0x5a4   :  { %5982 = vmatpush.bf16.msrb.mxu1 %v7312_v44  ;;  %6203 = vmatpush.msra.mxu0 %v6124_v35  ;;  %v5776_v52 = vpop.f32.mrf.mxu1  ;;  %v9098_v35 = vld [vmem:[%s13904_s5 + $0xb2c] sm:$0xf]  ;;  %v8381_v21 = vld [vmem:[%s13904_s5 + $0xd78] sm:$0xf0] }
 0x5a5   :  { %5995 = vmatpush.bf16.msrb.mxu2 %v7440_v17  ;;  %6008 = vmatpush.bf16.msrb.mxu3 %v7568_v3  ;;  %v5777_v51 = vadd.f32 %v5776_v52, %v13379_v9  ;;  %v9070_v9 = vld [vmem:[%s13904_s5 + $0xa4c] sm:$0xf] }
 0x5a6   :  { %6204 = vmatpush.msra.mxu0 %v6123_v29  ;;  %v9102_v3 = vld [vmem:[%s13904_s5 + $0xb4c] sm:$0xf]  ;;  %v7984_v34 = vor.u32 %v9070_v9, %v7981_v55  ;;  %v8093_v29 = vld [vmem:[%s13904_s5 + $0xb38] sm:$0xf0] }
 0x5a7   :  { %5983 = vmatmul.bf16.vlgmr.msrb.gmra.mxu1 %v10931_v12  ;;  %v6122_v12 = vld [vmem:[%s13906_s7] sm:$0xff]  ;;  %v8096_v11 = vor.u32 %v9098_v35, %v8093_v29  ;;  %v9250_v52 = vld [vmem:[%s13904_s5 + $0xfec] sm:$0xf]  ;;  %v8509_v35 = vld [vmem:[%s13904_s5 + $0xe78] sm:$0xf0] }
 0x5a8   :  { %6027 = vmatpush.bf16.msra.mxu1 %v7936_v2  ;;  %5996 = vmatmul.bf16.vlgmr.msrb.gmra.mxu2 %v11027_v36  ;;  %v7885_v36 = vld [vmem:[%s13904_s5 + $0x998] sm:$0xf0]  ;;  %v13520_v6 = vpop.f32.mrf.mxu0  ;;  %v9206_v55 = vld [vmem:[%s13904_s5 + $0xe8c] sm:$0xf] }
 0x5a9   :  { %6040 = vmatpush.bf16.msra.mxu2 %v8064_v28  ;;  %6053 = vmatpush.bf16.msra.mxu3 %v8192_v10  ;;  %v7888_v33 = vor.u32 %v9046_v50, %v7885_v36  ;;  %v8109_v2 = vld [vmem:[%s13904_s5 + $0xb58] sm:$0xf0]  ;;  %v7856_v10 = vor.u32 %v9038_v0, %v7853_v30  ;;  %v9218_v50 = vld [vmem:[%s13904_s5 + $0xeec] sm:$0xf] }
 0x5aa   :  { %6009 = vmatmul.bf16.vlgmr.msrb.gmra.mxu3 %v11033_v31  ;;  %v9078_v31 = vld [vmem:[%s13904_s5 + $0xa8c] sm:$0xf]  ;;  %6205 = vmatpush.msra.mxu0 %v6122_v12  ;;  %v8112_v63 = vor.u32 %v9102_v3, %v8109_v2  ;;  %v7949_v12 = vld [vmem:[%s13904_s5 + $0xa18] sm:$0xf0] }
 0x5ab   :  { %6206 = vmatmul.f32.vlgmr.msra.gmra.mxu0 %v6118_v39  ;;  %v8016_v53 = vor.u32 %v9078_v31, %v8013_v16  ;;  %v5789_v27 = vpop.f32.mrf.mxu2  ;;  %v9094_v39 = vld [vmem:[%s13904_s5 + $0xb0c] sm:$0xf]  ;;  %v8573_v36 = vld [vmem:[%s13904_s5 + $0xef8] sm:$0xf0]  ;;  %v7824_v31 = vor.u32 %v9030_v26, %v7821_v7 }
 0x5ac   :  { %6028 = vmatpush.bf16.msra.mxu1 %v7920_v20  ;;  %v5790_v43 = vadd.f32 %v5789_v27, %v5777_v51  ;;  %v5778_v17 = vpop.f32.mrf.mxu1  ;;  %v8701_v16 = vld [vmem:[%s13904_s5 + $0xff8] sm:$0xf0]  ;;  %v9234_v29 = vld [vmem:[%s13904_s5 + $0xf6c] sm:$0xf] }
 0x5ad   :  { %6041 = vmatpush.bf16.msra.mxu2 %v8048_v48  ;;  %6054 = vmatpush.bf16.msra.mxu3 %v8176_v22  ;;  %v5802_v44 = vpop.f32.mrf.mxu3  ;;  %v7840_v22 = vor.u32 %v9034_v61, %v7837_v4  ;;  %v8704_v56 = vor.u32 %v9250_v52, %v8701_v16  ;;  %v8413_v27 = vld [vmem:[%s13904_s5 + $0xdb8] sm:$0xf0]  ;;  %v9174_v17 = vld [vmem:[%s13904_s5 + $0xd8c] sm:$0xf] }
 0x5ae   :  { %v5803_v28 = vadd.f32 %v5802_v44, %v5790_v43  ;;  %v9210_v44 = vld [vmem:[%s13904_s5 + $0xeac] sm:$0xf]  ;;  %v8541_v0 = vld [vmem:[%s13904_s5 + $0xeb8] sm:$0xf0] }
 0x5af   :  { %v8669_v30 = vld [vmem:[%s13904_s5 + $0xfb8] sm:$0xf0]  ;;  %v8544_v43 = vor.u32 %v9210_v44, %v8541_v0  ;;  %v9170_v61 = vld [vmem:[%s13904_s5 + $0xd6c] sm:$0xf] }
 0x5b0   :  { %6029 = vmatpush.bf16.msra.mxu1 %v7904_v1  ;;  %v13560_v20 = vadd.f32 %v13141_v40, %v5803_v28  ;;  %v5921_v48 = vpop.f32.mrf.mxu0  ;;  %v9062_v40 = vld [vmem:[%s13904_s5 + $0xa0c] sm:$0xf]  ;;  %v8077_v1 = vld [vmem:[%s13904_s5 + $0xb18] sm:$0xf0] }
 0x5b1   :  { %6042 = vmatpush.bf16.msra.mxu2 %v8032_v24  ;;  %6055 = vmatpush.bf16.msra.mxu3 %v8160_v15  ;;  %v9186_v24 = vld [vmem:[%s13904_s5 + $0xdec] sm:$0xf]  ;;  %v8445_v15 = vld [vmem:[%s13904_s5 + $0xdf8] sm:$0xf0]  ;;  %v7952_v38 = vor.u32 %v9062_v40, %v7949_v12  ;;  %v8080_v23 = vor.u32 %v9094_v39, %v8077_v1 }
 0x5b2   :  { %v8525_v3 = vld [vmem:[%s13904_s5 + $0xe98] sm:$0xf0]  ;;  %v9238_v28 = vld [vmem:[%s13904_s5 + $0xf8c] sm:$0xf] }
 0x5b3   :  { %v5791_v37 = vpop.f32.mrf.mxu2  ;;  %v8637_v48 = vld [vmem:[%s13904_s5 + $0xf78] sm:$0xf0]  ;;  %v9162_v16 = vld [vmem:[%s13904_s5 + $0xd2c] sm:$0xf] }
 0x5b4   :  { %6030 = vmatpush.bf16.msra.mxu1 %v7888_v33  ;;  %v8448_v33 = vor.u32 %v9186_v24, %v8445_v15  ;;  %v9166_v37 = vld [vmem:[%s13904_s5 + $0xd4c] sm:$0xf]  ;;  %v8365_v12 = vld [vmem:[%s13904_s5 + $0xd58] sm:$0xf0] }
 0x5b5   :  { %6043 = vmatpush.bf16.msra.mxu2 %v8016_v53  ;;  %6056 = vmatpush.bf16.msra.mxu3 %v8144_v8  ;;  %v5804_v59 = vpop.f32.mrf.mxu3  ;;  %v8576_v53 = vor.u32 %v9218_v50, %v8573_v36  ;;  %v9182_v8 = vld [vmem:[%s13904_s5 + $0xdcc] sm:$0xf]  ;;  %v8493_v39 = vld [vmem:[%s13904_s5 + $0xe58] sm:$0xf0] }
 0x5b6   :  { %v8432_v51 = vor.u32 %v9182_v8, %v8429_v5  ;;  %v8640_v59 = vor.u32 %v9234_v29, %v8637_v48  ;;  %v9230_v15 = vld [vmem:[%s13904_s5 + $0xf4c] sm:$0xf]  ;;  %v8621_v50 = vld [vmem:[%s13904_s5 + $0xf58] sm:$0xf0] }
 0x5b7   :  { %v9226_v8 = vld [vmem:[%s13904_s5 + $0xf2c] sm:$0xf]  ;;  %v8589_v0 = vld [vmem:[%s13904_s5 + $0xf18] sm:$0xf0] }
 0x5b8   :  { %6031 = vmatpush.bf16.msra.mxu1 %v7872_v25  ;;  %v8560_v25 = vor.u32 %v9214_v14, %v8557_v41  ;;  %v9222_v44 = vld [vmem:[%s13904_s5 + $0xf0c] sm:$0xf] }
 0x5b9   :  { %6044 = vmatpush.bf16.msra.mxu2 %v8000_v32  ;;  %6057 = vmatpush.bf16.msra.mxu3 %v8128_v49  ;;  %v9178_v32 = vld [vmem:[%s13904_s5 + $0xdac] sm:$0xf]  ;;  %v8688_v49 = vor.u32 %v9246_v47, %v8685_v58 }
 0x5ba   :  { %v8416_v9 = vor.u32 %v9178_v32, %v8413_v27  ;;  %v9158_v58 = vld [vmem:[%s13904_s5 + $0xd0c] sm:$0xf]  ;;  %v8461_v27 = vld [vmem:[%s13904_s5 + $0xe18] sm:$0xf0] }
 0x5bc   :  { %6032 = vmatpush.bf16.msra.mxu1 %v7856_v10  ;;  %v8653_v10 = vld [vmem:[%s13904_s5 + $0xf98] sm:$0xf0] }
 0x5bd   :  { %6045 = vmatpush.bf16.msra.mxu2 %v7984_v34  ;;  %6058 = vmatpush.bf16.msra.mxu3 %v8112_v63  ;;  %v8528_v63 = vor.u32 %v9206_v55, %v8525_v3  ;;  %v8656_v4 = vor.u32 %v9238_v28, %v8653_v10  ;;  %v6151_v55 = vld [vmem:[%s13906_s7 + $0xe8] sm:$0xff]  ;;  %v6148_v10 = vld [vmem:[%s13906_s7 + $0xd0] sm:$0xff] }
 0x5be   :  { %v6167_v3 = vld [vmem:[%s13906_s7 + $0x168] sm:$0xff] }
 0x5c0   :  { %6033 = vmatpush.bf16.msra.mxu1 %v7840_v22 }
 0x5c1   :  { %6046 = vmatpush.bf16.msra.mxu2 %v7968_v60  ;;  %6059 = vmatpush.bf16.msra.mxu3 %v8096_v11  ;;  %v8384_v60 = vor.u32 %v9170_v61, %v8381_v21  ;;  %v8512_v11 = vor.u32 %v9202_v19, %v8509_v35  ;;  %v6163_v61 = vld [vmem:[%s13906_s7 + $0x148] sm:$0xff]  ;;  %v6146_v21 = vld [vmem:[%s13906_s7 + $0xc0] sm:$0xff]  ;;  %v6145_v35 = vld [vmem:[%s13906_s7 + $0xb8] sm:$0xff] }
 0x5c2   :  { %v6162_v19 = vld [vmem:[%s13906_s7 + $0x140] sm:$0xff] }
 0x5c4   :  { %6034 = vmatpush.bf16.msra.mxu1 %v7824_v31  ;;  %v5828_v2 = vpop.f32.mrf.mxu1  ;;  %v8368_v31 = vor.u32 %v9166_v37, %v8365_v12  ;;  %v6160_v37 = vld [vmem:[%s13906_s7 + $0x130] sm:$0xff]  ;;  %v6142_v12 = vld [vmem:[%s13906_s7 + $0xa0] sm:$0xff] }
 0x5c5   :  { %6047 = vmatpush.bf16.msra.mxu2 %v7952_v38  ;;  %6060 = vmatpush.bf16.msra.mxu3 %v8080_v23  ;;  %v5829_v26 = vadd.f32 %v5828_v2, %v13560_v20  ;;  %v9198_v20 = vld [vmem:[%s13904_s5 + $0xe4c] sm:$0xf]  ;;  %v8624_v38 = vor.u32 %v9230_v15, %v8621_v50  ;;  %v8349_v23 = vld [vmem:[%s13904_s5 + $0xd38] sm:$0xf0]  ;;  %v6150_v2 = vld [vmem:[%s13906_s7 + $0xe0] sm:$0xff] }
 0x5c6   :  { %v8496_v52 = vor.u32 %v9198_v20, %v8493_v39  ;;  %v8352_v41 = vor.u32 %v9162_v16, %v8349_v23  ;;  %v6158_v39 = vld [vmem:[%s13906_s7 + $0x120] sm:$0xff]  ;;  %v6139_v16 = vld [vmem:[%s13906_s7 + $0x88] sm:$0xff] }
 0x5c7   :  { %6035 = vmatmul.bf16.vlgmr.msra.gmra.mxu1 %v11235_v42  ;;  %v9242_v42 = vld [vmem:[%s13904_s5 + $0xfac] sm:$0xf] }
 0x5c8   :  { %6079 = vmatpush.bf16.msrb.mxu1 %v8448_v33  ;;  %6048 = vmatmul.bf16.vlgmr.msra.gmra.mxu2 %v11237_v45  ;;  %v8672_v45 = vor.u32 %v9242_v42, %v8669_v30  ;;  %v13673_v22 = vpop.f32.mrf.mxu0  ;;  %v9194_v33 = vld [vmem:[%s13904_s5 + $0xe2c] sm:$0xf] }
 0x5c9   :  { %6092 = vmatpush.bf16.msrb.mxu2 %v8576_v53  ;;  %6105 = vmatpush.bf16.msrb.mxu3 %v8704_v56  ;;  %v8477_v53 = vld [vmem:[%s13904_s5 + $0xe38] sm:$0xf0]  ;;  %v6155_v23 = vld [vmem:[%s13906_s7 + $0x108] sm:$0xff] }
 0x5ca   :  { %6061 = vmatmul.bf16.vlgmr.msra.gmra.mxu3 %v11239_v62  ;;  %v8397_v62 = vld [vmem:[%s13904_s5 + $0xd98] sm:$0xf0]  ;;  %v8480_v47 = vor.u32 %v9194_v33, %v8477_v53  ;;  %v6138_v33 = vld [vmem:[%s13906_s7 + $0x80] sm:$0xff] }
 0x5cb   :  { %v8400_v34 = vor.u32 %v9174_v17, %v8397_v62  ;;  %v5841_v7 = vpop.f32.mrf.mxu2  ;;  %v8605_v56 = vld [vmem:[%s13904_s5 + $0xf38] sm:$0xf0]  ;;  %v6168_v62 = vld [vmem:[%s13906_s7 + $0x170] sm:$0xff]  ;;  %v6154_v53 = vld [vmem:[%s13906_s7 + $0x100] sm:$0xff] }
 0x5cc   :  { %6080 = vmatpush.bf16.msrb.mxu1 %v8432_v51  ;;  %v5842_v1 = vadd.f32 %v5841_v7, %v5829_v26  ;;  %v5830_v24 = vpop.f32.mrf.mxu1  ;;  %v8608_v51 = vor.u32 %v9226_v8, %v8605_v56  ;;  %v6169_v17 = vld [vmem:[%s13906_s7 + $0x178] sm:$0xff]  ;;  %v6159_v7 = vld [vmem:[%s13906_s7 + $0x128] sm:$0xff]  ;;  %v6119_v8 = vmax.f32 %v13167_v54, 0.0 }
 0x5cd   :  { %6093 = vmatpush.bf16.msrb.mxu2 %v8560_v25  ;;  %6106 = vmatpush.bf16.msrb.mxu3 %v8688_v49  ;;  %v5854_v40 = vpop.f32.mrf.mxu3  ;;  %v8333_v49 = vld [vmem:[%s13904_s5 + $0xd18] sm:$0xf0] }
 0x5ce   :  { %v5855_v36 = vadd.f32 %v5854_v40, %v5842_v1  ;;  %v8336_v42 = vor.u32 %v9158_v58, %v8333_v49  ;;  %v6161_v26 = vld [vmem:[%s13906_s7 + $0x138] sm:$0xff] }
 0x5cf   :  { %v6141_v1 = vld [vmem:[%s13906_s7 + $0x98] sm:$0xff] }
 0x5d0   :  { %6081 = vmatpush.bf16.msrb.mxu1 %v8416_v9  ;;  %v13713_v5 = vadd.f32 %v13328_v18, %v5855_v36  ;;  %v5973_v14 = vpop.f32.mrf.mxu0  ;;  %v9190_v18 = vld [vmem:[%s13904_s5 + $0xe0c] sm:$0xf]  ;;  %v8592_v9 = vor.u32 %v9222_v44, %v8589_v0  ;;  %v6157_v36 = vld [vmem:[%s13906_s7 + $0x118] sm:$0xff] }
 0x5d1   :  { %6094 = vmatpush.bf16.msrb.mxu2 %v8544_v43  ;;  %6107 = vmatpush.bf16.msrb.mxu3 %v8672_v45  ;;  %v8464_v30 = vor.u32 %v9190_v18, %v8461_v27  ;;  %v6153_v43 = vld [vmem:[%s13906_s7 + $0xf8] sm:$0xff]  ;;  %v6152_v45 = vld [vmem:[%s13906_s7 + $0xf0] sm:$0xff] }
 0x5d3   :  { %v5843_v25 = vpop.f32.mrf.mxu2 }
 0x5d4   :  { %6082 = vmatpush.bf16.msrb.mxu1 %v8400_v34  ;;  %v6164_v34 = vld [vmem:[%s13906_s7 + $0x150] sm:$0xff] }
 0x5d5   :  { %6095 = vmatpush.bf16.msrb.mxu2 %v8528_v63  ;;  %6108 = vmatpush.bf16.msrb.mxu3 %v8656_v4  ;;  %v5856_v32 = vpop.f32.mrf.mxu3  ;;  %v6147_v63 = vld [vmem:[%s13906_s7 + $0xc8] sm:$0xff] }
 0x5d8   :  { %6083 = vmatpush.bf16.msrb.mxu1 %v8384_v60 }
 0x5d9   :  { %6096 = vmatpush.bf16.msrb.mxu2 %v8512_v11  ;;  %6109 = vmatpush.bf16.msrb.mxu3 %v8640_v59  ;;  %v6144_v11 = vld [vmem:[%s13906_s7 + $0xb0] sm:$0xff]  ;;  %v6143_v59 = vld [vmem:[%s13906_s7 + $0xa8] sm:$0xff] }
 0x5dc   :  { %6084 = vmatpush.bf16.msrb.mxu1 %v8368_v31  ;;  %v6140_v31 = vld [vmem:[%s13906_s7 + $0x90] sm:$0xff] }
 0x5dd   :  { %6097 = vmatpush.bf16.msrb.mxu2 %v8496_v52  ;;  %6110 = vmatpush.bf16.msrb.mxu3 %v8624_v38  ;;  %v6156_v52 = vld [vmem:[%s13906_s7 + $0x110] sm:$0xff] }
 0x5e0   :  { %6085 = vmatpush.bf16.msrb.mxu1 %v8352_v41 }
 0x5e1   :  { %6098 = vmatpush.bf16.msrb.mxu2 %v8480_v47  ;;  %6111 = vmatpush.bf16.msrb.mxu3 %v8608_v51 }
 0x5e4   :  { %6086 = vmatpush.bf16.msrb.mxu1 %v8336_v42  ;;  %v5880_v28 = vpop.f32.mrf.mxu1 }
 0x5e5   :  { %6099 = vmatpush.bf16.msrb.mxu2 %v8464_v30  ;;  %6112 = vmatpush.bf16.msrb.mxu3 %v8592_v9  ;;  %v5881_v20 = vadd.f32 %v5880_v28, %v13713_v5  ;;  %v9264_v5 = vld [vmem:[%s13905_s6] sm:$0xf] }
 0x5e6   :  { %v2721_v14 = vperm.slane %v9264_v5, 3 }
 0x5e7   :  { %6087 = vmatmul.bf16.vlgmr.msrb.gmra.mxu1 %v11440_v46  ;;  %v6166_v46 = vld [vmem:[%s13906_s7 + $0x160] sm:$0xff] }
 0x5e8   :  { %6210 = vmatpush.msra.mxu1 %v6153_v43  ;;  %6100 = vmatmul.bf16.vlgmr.msrb.gmra.mxu2 %v11442_v57  ;;  %v6149_v57 = vld [vmem:[%s13906_s7 + $0xd8] sm:$0xff]  ;;  %v13778_v4 = vpop.f32.mrf.mxu0  ;;  %v5920_v41 = vadd.f32 %v13520_v6, %v2721_v14 }
 0x5e9   :  { %6230 = vmatpush.msra.mxu2 %v6169_v17  ;;  %6113 = vmatmul.bf16.vlgmr.msrb.gmra.mxu3 %v11444_v13  ;;  %v6165_v13 = vld [vmem:[%s13906_s7 + $0x158] sm:$0xff] }
 0x5ea   :  { %6211 = vmatpush.msra.mxu1 %v6152_v45  ;;  %v6185_v6 = vld [vmem:[%s13906_s7 + $0x1f8] sm:$0xff]  ;;  %v6184_v45 = vld [vmem:[%s13906_s7 + $0x1f0] sm:$0xff] }
 0x5eb   :  { %6231 = vmatpush.msra.mxu2 %v6168_v62  ;;  %v5893_v29 = vpop.f32.mrf.mxu2  ;;  %6250 = vmatpush.msra.mxu3 %v6185_v6 }
 0x5ec   :  { %6212 = vmatpush.msra.mxu1 %v6151_v55  ;;  %v5882_v60 = vpop.f32.mrf.mxu1  ;;  %v5894_v50 = vadd.f32 %v5893_v29, %v5881_v20  ;;  %v6173_v29 = vld [vmem:[%s13906_s7 + $0x198] sm:$0xff] }
 0x5ed   :  { %6232 = vmatpush.msra.mxu2 %v6167_v3  ;;  %v5906_v48 = vpop.f32.mrf.mxu3  ;;  %6251 = vmatpush.msra.mxu3 %v6184_v45 }
 0x5ee   :  { %6213 = vmatpush.msra.mxu1 %v6150_v2  ;;  %v5907_v38 = vadd.f32 %v5906_v48, %v5894_v50  ;;  %v6183_v2 = vld [vmem:[%s13906_s7 + $0x1e8] sm:$0xff] }
 0x5ef   :  { %6233 = vmatpush.msra.mxu2 %v6166_v46  ;;  %v6182_v46 = vld [vmem:[%s13906_s7 + $0x1e0] sm:$0xff]  ;;  %6252 = vmatpush.msra.mxu3 %v6183_v2 }
 0x5f0   :  { %6214 = vmatpush.msra.mxu1 %v6149_v57  ;;  %v6025_v40 = vpop.f32.mrf.mxu0  ;;  %v6120_v56 = vmax.f32 %v5907_v38, 0.0  ;;  %v6181_v57 = vld [vmem:[%s13906_s7 + $0x1d8] sm:$0xff] }
 0x5f1   :  { %6234 = vmatpush.msra.mxu2 %v6165_v13  ;;  %6253 = vmatpush.msra.mxu3 %v6182_v46  ;;  %v6170_v40 = vld [vmem:[%s13906_s7 + $0x180] sm:$0xff] }
 0x5f2   :  { %6215 = vmatpush.msra.mxu1 %v6148_v10  ;;  %v6180_v10 = vld [vmem:[%s13906_s7 + $0x1d0] sm:$0xff] }
 0x5f3   :  { %6235 = vmatpush.msra.mxu2 %v6164_v34  ;;  %v5895_v24 = vpop.f32.mrf.mxu2  ;;  %6254 = vmatpush.msra.mxu3 %v6181_v57  ;;  %v6179_v34 = vld [vmem:[%s13906_s7 + $0x1c8] sm:$0xff] }
 0x5f4   :  { %6216 = vmatpush.msra.mxu1 %v6147_v63  ;;  %v6178_v63 = vld [vmem:[%s13906_s7 + $0x1c0] sm:$0xff] }
 0x5f5   :  { %6236 = vmatpush.msra.mxu2 %v6163_v61  ;;  %v5908_v15 = vpop.f32.mrf.mxu3  ;;  %6255 = vmatpush.msra.mxu3 %v6180_v10  ;;  %v6177_v61 = vld [vmem:[%s13906_s7 + $0x1b8] sm:$0xff] }
 0x5f6   :  { %6217 = vmatpush.msra.mxu1 %v6146_v21  ;;  %v6175_v21 = vld [vmem:[%s13906_s7 + $0x1a8] sm:$0xff] }
 0x5f7   :  { %6237 = vmatpush.msra.mxu2 %v6162_v19  ;;  %6256 = vmatpush.msra.mxu3 %v6179_v34 }
 0x5f8   :  { %6218 = vmatpush.msra.mxu1 %v6145_v35  ;;  %v6174_v35 = vld [vmem:[%s13906_s7 + $0x1a0] sm:$0xff] }
 0x5f9   :  { %6238 = vmatpush.msra.mxu2 %v6161_v26  ;;  %6257 = vmatpush.msra.mxu3 %v6178_v63 }
 0x5fa   :  { %6219 = vmatpush.msra.mxu1 %v6144_v11  ;;  %v6172_v11 = vld [vmem:[%s13906_s7 + $0x190] sm:$0xff] }
 0x5fb   :  { %6239 = vmatpush.msra.mxu2 %v6160_v37  ;;  %6258 = vmatpush.msra.mxu3 %v6177_v61 }
 0x5fc   :  { %6220 = vmatpush.msra.mxu1 %v6143_v59 }
 0x5fd   :  { %6240 = vmatpush.msra.mxu2 %v6159_v7  ;;  %v6171_v7 = vld [vmem:[%s13906_s7 + $0x188] sm:$0xff] }
 0x5fe   :  { %6221 = vmatpush.msra.mxu1 %v6142_v12 }
 0x5ff   :  { %6241 = vmatpush.msra.mxu2 %v6158_v39 }
 0x600   :  { %6222 = vmatpush.msra.mxu1 %v6141_v1 }
 0x601   :  { %6242 = vmatpush.msra.mxu2 %v6157_v36 }
 0x602   :  { %6223 = vmatpush.msra.mxu1 %v6140_v31 }
 0x603   :  { %6243 = vmatpush.msra.mxu2 %v6156_v52 }
 0x604   :  { %6224 = vmatpush.msra.mxu1 %v6139_v16  ;;  %v5932_v47 = vpop.f32.mrf.mxu1 }
 0x605   :  { %6244 = vmatpush.msra.mxu2 %v6155_v23  ;;  %v5933_v58 = vadd.f32 %v5932_v47, %v5920_v41 }
 0x606   :  { %6225 = vmatpush.msra.mxu1 %v6138_v33 }
 0x607   :  { %6245 = vmatpush.msra.mxu2 %v6154_v53  ;;  %6226 = vmatmul.f32.vlgmr.msra.gmra.mxu1 %v6119_v8  ;;  %v9257_v53 = vld [vmem:[%s13907_s8] ss:$0 sm:$0xff] }
 0x608   :  { %6246 = vmatmul.f32.vlgmr.msra.gmra.mxu2 %v6120_v56  ;;  %v6075_v51 = vpop.f32.mrf.mxu0 }
 0x60b   :  { %v5945_v25 = vpop.f32.mrf.mxu2 }
 0x60c   :  { %v5946_v49 = vadd.f32 %v5945_v25, %v5933_v58  ;;  %v5934_v54 = vpop.f32.mrf.mxu1 }
 0x60d   :  { %v5958_v32 = vpop.f32.mrf.mxu3 }
 0x60e   :  { %v5959_v18 = vadd.f32 %v5958_v32, %v5946_v49 }
 0x610   :  { %v5972_v27 = vadd.f32 %v13673_v22, %v5959_v18  ;;  %v6077_v44 = vpop.f32.mrf.mxu0 }
 0x613   :  { %v5947_v0 = vpop.f32.mrf.mxu2 }
 0x615   :  { %v5960_v42 = vpop.f32.mrf.mxu3 }
 0x624   :  { %v5984_v30 = vpop.f32.mrf.mxu1 }
 0x625   :  { %v5985_v9 = vadd.f32 %v5984_v30, %v5972_v27 }
 0x628   :  { %v6207_v8 = vpop.f32.mrf.mxu0 }
 0x629   :  { %v6208_v5 = vadd.f32 %v9257_v53, %v6207_v8 }
 0x62b   :  { %v5997_v43 = vpop.f32.mrf.mxu2 }
 0x62c   :  { %v5998_v62 = vadd.f32 %v5997_v43, %v5985_v9  ;;  %v5986_v55 = vpop.f32.mrf.mxu1 }
 0x62d   :  { %v6010_v17 = vpop.f32.mrf.mxu3 }
 0x62e   :  { %v6011_v3 = vadd.f32 %v6010_v17, %v5998_v62 }
 0x630   :  { %v6024_v22 = vadd.f32 %v13778_v4, %v6011_v3  ;;  %v6176_v4 = vld [vmem:[%s13906_s7 + $0x1b0] sm:$0xff]  ;;  %s9292_s7 = smov [#allocation6]  }
 0x631   :  { %6259 = vmatpush.msra.mxu3 %v6176_v4  ;;  %s6301_s8 = sshll.u32 %s9292_s7, 4  ;;  %s6302_s8 = int_to_ptr.vmem [resolvable:$true] %s6301_s8 }
 0x633   :  { %v5999_v13 = vpop.f32.mrf.mxu2  ;;  %6260 = vmatpush.msra.mxu3 %v6175_v21 }
 0x635   :  { %v6012_v28 = vpop.f32.mrf.mxu3  ;;  %6261 = vmatpush.msra.mxu3 %v6174_v35 }
 0x637   :  { %6262 = vmatpush.msra.mxu3 %v6173_v29 }
 0x639   :  { %6263 = vmatpush.msra.mxu3 %v6172_v11 }
 0x63b   :  { %6264 = vmatpush.msra.mxu3 %v6171_v7 }
 0x63d   :  { %6265 = vmatpush.msra.mxu3 %v6170_v40 }
 0x644   :  { %v6036_v19 = vpop.f32.mrf.mxu1 }
 0x645   :  { %v6037_v48 = vadd.f32 %v6036_v19, %v6024_v22 }
 0x64b   :  { %v6049_v26 = vpop.f32.mrf.mxu2 }
 0x64c   :  { %v6050_v37 = vadd.f32 %v6049_v26, %v6037_v48  ;;  %v6038_v59 = vpop.f32.mrf.mxu1 }
 0x64d   :  { %v6062_v60 = vpop.f32.mrf.mxu3 }
 0x64e   :  { %v6063_v12 = vadd.f32 %v6062_v60, %v6050_v37 }
 0x650   :  { %v6076_v20 = vadd.f32 %v6075_v51, %v6063_v12 }
 0x653   :  { %v6051_v39 = vpop.f32.mrf.mxu2 }
 0x655   :  { %v6064_v1 = vpop.f32.mrf.mxu3 }
 0x664   :  { %v6088_v24 = vpop.f32.mrf.mxu1 }
 0x665   :  { %v6089_v15 = vadd.f32 %v6088_v24, %v6076_v20 }
 0x66b   :  { %v6101_v50 = vpop.f32.mrf.mxu2 }
 0x66c   :  { %v6102_v36 = vadd.f32 %v6101_v50, %v6089_v15  ;;  %v6114_v31 = vpop.f32.mrf.mxu3  ;;  %v6090_v52 = vpop.f32.mrf.mxu1 }
 0x66e   :  { %v6115_v16 = vadd.f32 %v6114_v31, %v6102_v36 }
 0x670   :  { %v6121_v38 = vmax.f32 %v6115_v16, 0.0 }
 0x672   :  { %6266 = vmatmul.f32.vlgmr.msra.gmra.mxu3 %v6121_v38 }
 0x673   :  { %v6103_v23 = vpop.f32.mrf.mxu2 }
 0x674   :  { %v6116_v33 = vpop.f32.mrf.mxu3 }
 0x684   :  { %v6227_v56 = vpop.f32.mrf.mxu1 }
 0x685   :  { %v6228_v41 = vadd.f32 %v6227_v56, %v6208_v5 }
 0x68b   :  { %v6247_v14 = vpop.f32.mrf.mxu2 }
 0x68c   :  { %v6248_v47 = vadd.f32 %v6247_v14, %v6228_v41 }
 0x6f5   :  { %v6267_v58 = vpop.f32.mrf.mxu3 }
 0x6f6   :  { %v6268_v51 = vadd.f32 %v6267_v58, %v6248_v47 }
 0x6f8   :  { %v6271_v25 = vsel %vm6270_vm5, %v6268_v51, -inf }
 0x6f9   :  { %6272 = vmax.xlane.f32.xlu0 %v6271_v25 }
 0x76c   :  { %v6273_v32 = vpop.xlane.xlu0 %6272 }
 0x76d   :  { %v6274_v49 = vsub.f32 %v6268_v51, %v6273_v32 }
 0x76f   :  { %v6275_v54 = vmul.f32 1.442695, %v6274_v49 }
 0x771   :  { %9258 = vpow2.f32 %v6275_v54 }
 0x777   :  { %v9259_v18 = vpop.eup %9258 }
 0x778   :  { %v6277_v27 = vsel %vm6270_vm5, %v9259_v18, 0.0 }
 0x779   :  { %6278 = vadd.xlane.f32.xlu0 %v6277_v27 }
 0x7ec   :  { %v6279_v44 = vpop.xlane.xlu0 %6278 }
 0x7ed   :  { %9260 = vrcp.f32 %v6279_v44  ;;  %v6291_v9 = vand.u32 2147483648, %v6279_v44  ;;  %v6289_v17 = vand.u32 2147483647, %v6279_v44  ;;  %vm6285_vm7 = vweird.f32 %v6279_v44 }
 0x7ef   :  { %v6292_v45 = vor.u32 1.1754944e-38, %v6291_v9  ;;  %vm6290_vm9 = vcmp.eq.f32.partialorder %v6289_v17, 8.507059e+37 }
 0x7f3   :  { %v9261_v0 = vpop.eup %9260 }
 0x7f4   :  { %v6281_v42 = vmul.f32 %v9261_v0, %v6279_v44  ;;  %vm6286_vm6 = vweird.f32 %v9261_v0 }
 0x7f5   :  { %vm6287_vm8 = vmor %vm6285_vm7, %vm6286_vm6 }
 0x7f6   :  { %v6282_v30 = vsub.f32 1.0, %v6281_v42 }
 0x7f8   :  { %v6283_v43 = vmul.f32 %v9261_v0, %v6282_v30 }
 0x7fa   :  { %v6284_v6 = vadd.f32 %v9261_v0, %v6283_v43 }
 0x7fc   :  { %v6288_v62 = vsel %vm6287_vm8, %v9261_v0, %v6284_v6 }
 0x7fd   :  { %v6293_v55 = vsel %vm6290_vm9, %v6292_v45, %v6288_v62 }
 0x7fe   :  { %v6294_v3 = vmul.f32 %v9259_v18, %v6293_v55 }
 0x800   :  { %6295 = vst.msk [vmem:[#allocation6] sm:$0x3] %vm6270_vm5, %v6294_v3 }
 0x801   :  { %6306 = dma.vmem_to_hbm [thread:$0]  %s6302_s8, 32, %s6304_s0, [#allocation7]  }
 0x802   :  { %9289 = dma.done.wait [#allocation7], 32  }
 0x803   :  { %9290 = vsyncadd [#allocation7], 4294967264 }
 0x804   :  { %6311 = vsyncpa [#allocation7], 1 }

</bundles_post_ra>
